<compile_context>
chip_gen: v5e
topology: v5e:2x2
jax: 0.10.0
libtpu: 0.0.40
codegen_flags: <defaults>
</compile_context>

<pallas_src>
import functools

import jax
import jax.numpy as jnp
import numpy as np
from jax import lax
from jax.experimental import pallas as pl
from jax.experimental.pallas import tpu as pltpu

_BN_EPS = 1e-5
_LANE = 128                 # channel (lane) padding target
_ACT_DTYPE = jnp.bfloat16   # activation storage dtype (f32 MXU accumulation)
_CHUNK_ROWS = 512           # row-chunk target for in-kernel convs


def _round_up(x: int, m: int) -> int:
    return (x + m - 1) // m * m


def _row_chunks(n: int, target: int = _CHUNK_ROWS):
    """Static (start, size) row chunks covering [0, n)."""
    if n <= target:
        return ((0, n),)
    nchunks = -(-n // target)
    base = -(-n // nchunks)
    chunks, s = [], 0
    while s < n:
        sz = min(base, n - s)
        chunks.append((s, sz))
        s += sz
    return tuple(chunks)


def _vmem_capacity_bytes() -> int:
    try:
        cap = getattr(pltpu.get_tpu_info(), "vmem_capacity_bytes", None)
        if cap:
            return int(cap)
    except Exception:
        pass
    return 64 * 1024 * 1024     # conservative default (v7x per-TensorCore VMEM)


# --------------------------- fused per-layer kernel ---------------------------

def _make_layer_kernel(nrows, guard, wp, hw, wo, ho, tb, num_blocks, cout):
    """Kernel for one ResDownSampleLayer on one batch slab.

    Flat row layout: [guard zeros | tb * Hp * Wp padded pixels | guard zeros].
    A conv tap at (dy, dx) is the constant row offset (dy - 1) * wp + (dx - 1).
    Frame rows are kept at exactly zero via the interior mask; guard rows are zeroed
    here, so every interior pixel sees correct zero padding.
    """
    down_offs = tuple((by - 1) * wp + (bx - 1) for by in range(2) for bx in range(2))
    res_offs = tuple((dy - 1) * wp + (dx - 1) for dy in range(3) for dx in range(3))
    chunks = _row_chunks(nrows)

    def kernel(x_ref, mask_ref, wd_ref, bd_ref, w1_ref, b1_ref, w2_ref, b2_ref,
               out_ref, act_ref, y_ref):
        # Guard rows must be zero: taps of border pixels read them.
        zg = jnp.zeros((guard, cout), _ACT_DTYPE)
        act_ref[pl.ds(0, guard), :] = zg
        act_ref[pl.ds(guard + nrows, guard), :] = zg
        y_ref[pl.ds(0, guard), :] = zg
        y_ref[pl.ds(guard + nrows, guard), :] = zg

        def conv_pass(src_ref, dst_ref, offs, tap_w, bias, skip_ref=None, use_mask=True):
            # One full conv over the slab, chunked over rows so the per-tap f32
            # accumulation chain stays small per chunk (less spill / vst pressure).
            for cs, cr in chunks:
                row0 = guard + cs
                acc = None
                for t, off in enumerate(offs):
                    a = src_ref[pl.ds(row0 + off, cr), :]             # bf16 (cr, Cin)
                    d = jnp.dot(a, tap_w(t), preferred_element_type=jnp.float32)
                    acc = d if acc is None else acc + d               # f32 (cr, Cout)
                acc = acc + bias
                if skip_ref is not None:
                    acc = acc + skip_ref[pl.ds(row0, cr), :].astype(jnp.float32)
                val = jnp.maximum(acc, 0.0)
                if use_mask:
                    val = val * mask_ref[pl.ds(row0, cr), :]          # zero frame rows
                dst_ref[pl.ds(row0, cr), :] = val.astype(_ACT_DTYPE)  # single bf16 cast

        # Downsample conv (2x2 taps over the space-to-depth input) + folded-BN bias + ReLU.
        conv_pass(x_ref, act_ref, down_offs, lambda t: wd_ref[t], bd_ref[...])

        # Residual blocks: conv-BN-ReLU -> conv-BN (+skip) -> ReLU, all in VMEM.
        for i in range(num_blocks):
            conv_pass(act_ref, y_ref, res_offs,
                      lambda t, i=i: w1_ref[i * 9 + t], b1_ref[i])
            last = i == num_blocks - 1
            conv_pass(y_ref, act_ref, res_offs,
                      lambda t, i=i: w2_ref[i * 9 + t], b2_ref[i],
                      skip_ref=act_ref,
                      use_mask=not last)   # last block's frame rows are never read again

        # Compact, lane-dense writeback: interior pixels only (no frame / guard rows).
        for b in range(tb):
            for y in range(ho):
                src = guard + b * hw + (y + 1) * wp + 1
                dst = (b * ho + y) * wo
                out_ref[pl.ds(dst, wo), :] = act_ref[pl.ds(src, wo), :]

    return kernel


# ------------------------------ layer wrapper ---------------------------------

def _res_down_sample_layer(x, layer):
    """x: (B, H, W, Cin) NHWC -> (B, ceil(H/2), ceil(W/2), Cout_padded) bf16."""
    x = x.astype(_ACT_DTYPE)
    B, H, W, Cin = x.shape
    # Odd spatial: appending a zero row/col matches the pad-1 stride-2 3x3 conv.
    if H % 2:
        x = jnp.pad(x, ((0, 0), (0, 1), (0, 0), (0, 0)))
    if W % 2:
        x = jnp.pad(x, ((0, 0), (0, 0), (0, 1), (0, 0)))
    B, H, W, Cin = x.shape
    Ho, Wo = H // 2, W // 2
    Hp, Wp = Ho + 2, Wo + 2
    hw = Hp * Wp
    guard = _round_up(Wp + 1, 8)

    cin2 = 4 * Cin
    cout = layer["bd"].shape[-1]              # lane-padded Cout
    nb = layer["b1"].shape[0]

    # --- VMEM-budgeted slab sizing (whole images per grid step) -------------------
    cap = _vmem_capacity_bytes()
    vmem_limit = int(min(cap * 3 // 4, 100 * 1024 * 1024))
    act_b = 2                                  # bf16
    # Grid-invariant VMEM: weights / biases (double-buffered by the pipeline).
    fixed = 2 * ((layer["wd"].size + layer["w1"].size + layer["w2"].size) * 2
                 + (layer["bd"].size + layer["b1"].size + layer["b2"].size) * 4)
    # Per-image VMEM: input slab (2x buffered) + act & y scratch + compact out (2x) + mask.
    per_img = hw * (2 * cin2 * act_b + 2 * cout * act_b + 2 * 4) \
        + Ho * Wo * 2 * cout * act_b
    guard_ovh = 2 * guard * (2 * cin2 * act_b + 2 * cout * act_b + 2 * 4)
    budget = int(vmem_limit * 0.8) - fixed - guard_ovh
    tb_mem = max(1, budget // per_img)
    # Keep >= min(B, 3) grid steps: lets the BlockSpec pipeline hide the next slab's DMA
    # and gives v7x's two TensorCores parallel work.
    tb = max(1, min(B, tb_mem, B // min(B, 3)))
    while B % tb:
        tb -= 1
    nslabs = B // tb
    nrows = tb * hw
    slab = guard + nrows + guard

    # --- host-side layout: space-to-depth(2) + 1-pixel zero frame + guard rows ----
    # (bf16, so this XLA pass moves half the bytes it used to.)
    x2 = x.reshape(B, Ho, 2, Wo, 2, Cin).transpose(0, 1, 3, 2, 4, 5)
    x2 = x2.reshape(B, Ho, Wo, cin2)
    x2 = jnp.pad(x2, ((0, 0), (1, 1), (1, 1), (0, 0)))
    x2 = x2.reshape(nslabs, nrows, cin2)
    x2 = jnp.pad(x2, ((0, 0), (guard, guard), (0, 0)))

    # Static interior mask (1 = real output pixel, 0 = frame row).
    pos = np.arange(hw)
    yy, xx = pos // Wp, pos % Wp
    interior = ((yy >= 1) & (yy <= Ho) & (xx >= 1) & (xx <= Wo)).astype(np.float32)
    m = np.zeros((slab, 1), np.float32)
    m[guard:guard + nrows, 0] = np.tile(interior, tb)
    mask = jnp.asarray(m)

    out_rows = tb * Ho * Wo
    kernel = _make_layer_kernel(nrows, guard, Wp, hw, Wo, Ho, tb, nb, cout)

    out = pl.pallas_call(
        kernel,
        out_shape=jax.ShapeDtypeStruct((nslabs, out_rows, cout), _ACT_DTYPE),
        grid_spec=pltpu.PrefetchScalarGridSpec(
            num_scalar_prefetch=0,
            grid=(nslabs,),
            in_specs=[
                pl.BlockSpec((None, slab, cin2), lambda i: (i, 0, 0)),       # x slab
                pl.BlockSpec((slab, 1), lambda i: (0, 0)),                   # mask
                pl.BlockSpec((4, cin2, cout), lambda i: (0, 0, 0)),          # down weight
                pl.BlockSpec((1, cout), lambda i: (0, 0)),                   # down bias
                pl.BlockSpec((nb * 9, cout, cout), lambda i: (0, 0, 0)),     # block conv1 w
                pl.BlockSpec((nb, 1, cout), lambda i: (0, 0, 0)),            # block conv1 b
                pl.BlockSpec((nb * 9, cout, cout), lambda i: (0, 0, 0)),     # block conv2 w
                pl.BlockSpec((nb, 1, cout), lambda i: (0, 0, 0)),            # block conv2 b
            ],
            out_specs=pl.BlockSpec((None, out_rows, cout), lambda i: (i, 0, 0)),
            scratch_shapes=[pltpu.VMEM((slab, cout), _ACT_DTYPE),            # activation
                            pltpu.VMEM((slab, cout), _ACT_DTYPE)],           # block temp
        ),
        compiler_params=pltpu.CompilerParams(
            dimension_semantics=("parallel",),     # v7x: shard slabs over both TCs
            vmem_limit_bytes=vmem_limit,
        ),
    )(x2, mask, layer["wd"], layer["bd"], layer["w1"], layer["b1"],
      layer["w2"], layer["b2"])

    return out.reshape(B, Ho, Wo, cout)


# ------------------------- parameter initialization --------------------------

def _conv_w(key, cin, cout):
    fan_in = cin * 9
    return jax.random.normal(key, (3, 3, cin, cout), jnp.float32) / np.sqrt(fan_in)


def _bn_fold(key, c):
    # Eval-mode BN with init running stats: mean = 0, var = 1.
    kg, kb = jax.random.split(key)
    gamma = jax.random.uniform(kg, (c,), jnp.float32, 0.5, 1.5)
    beta = 0.1 * jax.random.normal(kb, (c,), jnp.float32)
    scale = gamma / jnp.sqrt(1.0 + _BN_EPS)
    bias = beta                              # beta - running_mean * scale, mean == 0
    return scale, bias


def _pad_to(a, shape):
    return jnp.pad(a, [(0, s - d) for d, s in zip(a.shape, shape)])


def _down_weight_s2d(w):
    """(3,3,Cin,Cout) -> (4, 4*Cin, Cout): taps of the equivalent 2x2 stride-1 conv over
    the space-to-depth(2) input (tap order (by,bx); channel order (sy,sx,cin))."""
    cin, cout = w.shape[2], w.shape[3]
    taps = []
    for by in range(2):
        for bx in range(2):
            parts = []
            for sy in range(2):
                for sx in range(2):
                    dy, dx = 2 * by + sy - 1, 2 * bx + sx - 1
                    if 0 <= dy <= 2 and 0 <= dx <= 2:
                        parts.append(w[dy, dx])
                    else:
                        parts.append(jnp.zeros((cin, cout), w.dtype))
            taps.append(jnp.concatenate(parts, axis=0))
    return jnp.stack(taps, axis=0)


def init_down_sample_res_net(key, observation_shape, start_channels,
                             channels_scale=2.0, num_blocks=1):
    C, H, W = observation_shape
    assert H == W and H % 2 == 0
    assert num_blocks >= 1

    # Layer plan mirrors DownSampleResNet.__init__ exactly.
    layer_io = []
    current_channels = start_channels
    current_size = H // 2
    layer_io.append((C, current_channels))
    while current_size >= 3:
        new_channels = int(current_channels * channels_scale)
        current_size //= 2
        layer_io.append((current_channels, new_channels))
        current_channels = new_channels

    params, ref_params = [], []
    prev_cout_pad = C                         # first layer's input keeps raw obs channels
    for cin, cout in layer_io:
        cin_pad = prev_cout_pad
        cout_pad = _round_up(cout, _LANE)     # lane-dense stores / MXU N dim
        key, k_dw, k_dn = jax.random.split(key, 3)
        s, b = _bn_fold(k_dn, cout)
        wd = _conv_w(k_dw, cin, cout) * s[None, None, None, :]    # BN folded into weights
        layer = {
            "wd": _down_weight_s2d(_pad_to(wd, (3, 3, cin_pad, cout_pad))
                                   ).astype(jnp.bfloat16),         # (4, 4*Cin_p, Cout_p)
            "bd": _pad_to(b.reshape(1, cout), (1, cout_pad)),       # (1, Cout_p) f32
        }
        ref = {"wd": wd, "bd": b, "w1": [], "b1": [], "w2": [], "b2": []}
        w1s, b1s, w2s, b2s = [], [], [], []
        for _ in range(num_blocks):
            key, k1, k1n, k2, k2n = jax.random.split(key, 5)
            s1, bb1 = _bn_fold(k1n, cout)
            s2, bb2 = _bn_fold(k2n, cout)
            w1 = _conv_w(k1, cout, cout) * s1[None, None, None, :]
            w2 = _conv_w(k2, cout, cout) * s2[None, None, None, :]
            ref["w1"].append(w1); ref["b1"].append(bb1)
            ref["w2"].append(w2); ref["b2"].append(bb2)
            w1s.append(_pad_to(w1, (3, 3, cout_pad, cout_pad)).reshape(9, cout_pad, cout_pad))
            w2s.append(_pad_to(w2, (3, 3, cout_pad, cout_pad)).reshape(9, cout_pad, cout_pad))
            b1s.append(_pad_to(bb1.reshape(1, cout), (1, cout_pad)))
            b2s.append(_pad_to(bb2.reshape(1, cout), (1, cout_pad)))
        layer["w1"] = jnp.concatenate(w1s, axis=0).astype(jnp.bfloat16)   # (nb*9, Cp, Cp)
        layer["w2"] = jnp.concatenate(w2s, axis=0).astype(jnp.bfloat16)
        layer["b1"] = jnp.stack(b1s, axis=0)                              # (nb, 1, Cp)
        layer["b2"] = jnp.stack(b2s, axis=0)
        params.append(layer)
        ref_params.append(ref)
        prev_cout_pad = cout_pad

    return params, ref_params, current_channels, current_size


# --------------------------------- forward ------------------------------------

def down_sample_res_net_forward(x_nchw, params, out_features=None):
    """(B, C_in, H, W) -> (B, C_out, H_out, W_out) float32 (as the PyTorch module)."""
    x = jnp.transpose(x_nchw, (0, 2, 3, 1))             # NCHW -> NHWC
    for layer in params:
        x = _res_down_sample_layer(x, layer)
    if out_features is not None and out_features != x.shape[-1]:
        x = x[..., :out_features]                        # drop channel (lane) padding
    return jnp.transpose(x, (0, 3, 1, 2)).astype(jnp.float32)   # NHWC -> NCHW


# ------------------------------ pure-JAX reference -----------------------------

def _ref_conv(x, w, stride):
    return lax.conv_general_dilated(
        x, w, (stride, stride), ((1, 1), (1, 1)),
        dimension_numbers=("NHWC", "HWIO", "NHWC"))


def _ref_forward(x_nchw, ref_params):
    """f32 lax.conv reference with the same folded-BN parameters (no padding)."""
    x = jnp.transpose(x_nchw, (0, 2, 3, 1)).astype(jnp.float32)
    for lyr in ref_params:
        x = jnp.maximum(_ref_conv(x, lyr["wd"], 2) + lyr["bd"], 0.0)
        for w1, b1, w2, b2 in zip(lyr["w1"], lyr["b1"], lyr["w2"], lyr["b2"]):
            h = jnp.maximum(_ref_conv(x, w1, 1) + b1, 0.0)
            x = jnp.maximum(_ref_conv(h, w2, 1) + b2 + x, 0.0)
    return jnp.transpose(x, (0, 3, 1, 2))


# ----------------------------------- main --------------------------------------

if __name__ == "__main__":
    key = jax.random.PRNGKey(0)
    k_param, k_x = jax.random.split(key)

    observation_shape = (4, 16, 16)   # (C, H, W)
    batch = 2
    start_channels = 8

    params, ref_params, out_features, out_size = init_down_sample_res_net(
        k_param, observation_shape, start_channels,
        channels_scale=2.0, num_blocks=1)

    x = jax.random.normal(k_x, (batch,) + observation_shape, jnp.float32)

    fwd = jax.jit(functools.partial(down_sample_res_net_forward,
                                    out_features=out_features))
    out = jax.block_until_ready(fwd(x, params))

    expected_shape = (batch, out_features, out_size, out_size)
    assert out.shape == expected_shape, (out.shape, expected_shape)
    assert out.dtype == jnp.float32
    assert bool(jnp.all(jnp.isfinite(out)))

    # bf16 activations / weights inside the kernel -> loose tolerance vs f32 reference.
    ref = np.asarray(_ref_forward(x, ref_params))
    np.testing.assert_allclose(np.asarray(out), ref, rtol=1e-1, atol=1e-1)

    print("KERNEL_OK")
</pallas_src>

<mosaic_0001>
module attributes {stable_mosaic.version = 11 : i64} {
  func.func @kernel(%arg0: i32, %arg1: memref<1x132x16xbf16, #tpu.memory_space<vmem>>, %arg2: memref<132x1xf32, #tpu.memory_space<vmem>>, %arg3: memref<4x16x128xbf16, #tpu.memory_space<vmem>>, %arg4: memref<1x128xf32, #tpu.memory_space<vmem>>, %arg5: memref<9x128x128xbf16, #tpu.memory_space<vmem>>, %arg6: memref<1x1x128xf32, #tpu.memory_space<vmem>>, %arg7: memref<9x128x128xbf16, #tpu.memory_space<vmem>>, %arg8: memref<1x1x128xf32, #tpu.memory_space<vmem>>, %arg9: memref<1x64x128xbf16, #tpu.memory_space<vmem>>, %arg10: memref<132x128xbf16, #tpu.memory_space<vmem>>, %arg11: memref<132x128xbf16, #tpu.memory_space<vmem>>) attributes {dimension_semantics = [#tpu.dimension_semantics<parallel>], iteration_bounds = array<i64: 2>, scalar_prefetch = 0 : i64, scratch_operands = 2 : i64, tpu.core_type = #tpu.core_type<tc>, window_params = [{transform_indices = @transform_0, window_bounds = array<i64: 1, 132, 16>}, {pipeline_mode = #tpu.pipeline_mode<synchronous>, transform_indices = @transform_1, window_bounds = array<i64: 132, 1>}, {pipeline_mode = #tpu.pipeline_mode<synchronous>, transform_indices = @transform_2, window_bounds = array<i64: 4, 16, 128>}, {pipeline_mode = #tpu.pipeline_mode<synchronous>, transform_indices = @transform_3, window_bounds = array<i64: 1, 128>}, {pipeline_mode = #tpu.pipeline_mode<synchronous>, transform_indices = @transform_4, window_bounds = array<i64: 9, 128, 128>}, {pipeline_mode = #tpu.pipeline_mode<synchronous>, transform_indices = @transform_5, window_bounds = array<i64: 1, 1, 128>}, {pipeline_mode = #tpu.pipeline_mode<synchronous>, transform_indices = @transform_6, window_bounds = array<i64: 9, 128, 128>}, {pipeline_mode = #tpu.pipeline_mode<synchronous>, transform_indices = @transform_7, window_bounds = array<i64: 1, 1, 128>}, {transform_indices = @transform_8, window_bounds = array<i64: 1, 64, 128>}]} {
    %cst = arith.constant 0.000000e+00 : bf16
    %0 = vector.broadcast %cst : bf16 to vector<16x128xbf16>
    %c0 = arith.constant 0 : index
    %c0_0 = arith.constant 0 : index
    %1 = vector.load %arg10[%c0, %c0_0] : memref<132x128xbf16, #tpu.memory_space<vmem>>, vector<16x128xbf16>
    tpu.vector_store %arg10[%c0, %c0_0], %0 {strides = array<i32>} : memref<132x128xbf16, #tpu.memory_space<vmem>>, vector<16x128xbf16>,
    %c116 = arith.constant 116 : index
    %c0_1 = arith.constant 0 : index
    %2 = vector.load %arg10[%c116, %c0_1] : memref<132x128xbf16, #tpu.memory_space<vmem>>, vector<16x128xbf16>
    tpu.vector_store %arg10[%c116, %c0_1], %0 {strides = array<i32>} : memref<132x128xbf16, #tpu.memory_space<vmem>>, vector<16x128xbf16>,
    %c0_2 = arith.constant 0 : index
    %c0_3 = arith.constant 0 : index
    %3 = vector.load %arg11[%c0_2, %c0_3] : memref<132x128xbf16, #tpu.memory_space<vmem>>, vector<16x128xbf16>
    tpu.vector_store %arg11[%c0_2, %c0_3], %0 {strides = array<i32>} : memref<132x128xbf16, #tpu.memory_space<vmem>>, vector<16x128xbf16>,
    %c116_4 = arith.constant 116 : index
    %c0_5 = arith.constant 0 : index
    %4 = vector.load %arg11[%c116_4, %c0_5] : memref<132x128xbf16, #tpu.memory_space<vmem>>, vector<16x128xbf16>
    tpu.vector_store %arg11[%c116_4, %c0_5], %0 {strides = array<i32>} : memref<132x128xbf16, #tpu.memory_space<vmem>>, vector<16x128xbf16>,
    %c0_6 = arith.constant 0 : index
    %c0_7 = arith.constant 0 : index
    %5 = vector.load %arg4[%c0_6, %c0_7] : memref<1x128xf32, #tpu.memory_space<vmem>>, vector<1x128xf32>
    %c0_8 = arith.constant 0 : index
    %c5 = arith.constant 5 : index
    %c0_9 = arith.constant 0 : index
    %6 = vector.load %arg1[%c0_8, %c5, %c0_9] : memref<1x132x16xbf16, #tpu.memory_space<vmem>>, vector<1x100x16xbf16>
    %7 = vector.shape_cast %6 : vector<1x100x16xbf16> to vector<100x16xbf16>
    %c0_10 = arith.constant 0 : index
    %c0_11 = arith.constant 0 : index
    %c0_12 = arith.constant 0 : index
    %8 = vector.load %arg3[%c0_10, %c0_11, %c0_12] : memref<4x16x128xbf16, #tpu.memory_space<vmem>>, vector<1x16x128xbf16>
    %9 = vector.shape_cast %8 : vector<1x16x128xbf16> to vector<16x128xbf16>
    %cst_13 = arith.constant dense<0.000000e+00> : vector<100x128xf32>
    %10 = tpu.matmul %7, %9, %cst_13 {dimension_numbers = #tpu.dot_dimension_numbers<[1], [0], [0], [1], [0, 0, 1, 1], [], []>} : vector<100x16xbf16>, vector<16x128xbf16>, vector<100x128xf32> -> vector<100x128xf32>
    %c0_14 = arith.constant 0 : index
    %c6 = arith.constant 6 : index
    %c0_15 = arith.constant 0 : index
    %11 = vector.load %arg1[%c0_14, %c6, %c0_15] : memref<1x132x16xbf16, #tpu.memory_space<vmem>>, vector<1x100x16xbf16>
    %12 = vector.shape_cast %11 : vector<1x100x16xbf16> to vector<100x16xbf16>
    %c1 = arith.constant 1 : index
    %c0_16 = arith.constant 0 : index
    %c0_17 = arith.constant 0 : index
    %13 = vector.load %arg3[%c1, %c0_16, %c0_17] : memref<4x16x128xbf16, #tpu.memory_space<vmem>>, vector<1x16x128xbf16>
    %14 = vector.shape_cast %13 : vector<1x16x128xbf16> to vector<16x128xbf16>
    %cst_18 = arith.constant dense<0.000000e+00> : vector<100x128xf32>
    %15 = tpu.matmul %12, %14, %cst_18 {dimension_numbers = #tpu.dot_dimension_numbers<[1], [0], [0], [1], [0, 0, 1, 1], [], []>} : vector<100x16xbf16>, vector<16x128xbf16>, vector<100x128xf32> -> vector<100x128xf32>
    %16 = arith.addf %10, %15 : vector<100x128xf32>
    %c0_19 = arith.constant 0 : index
    %c15 = arith.constant 15 : index
    %c0_20 = arith.constant 0 : index
    %17 = vector.load %arg1[%c0_19, %c15, %c0_20] : memref<1x132x16xbf16, #tpu.memory_space<vmem>>, vector<1x100x16xbf16>
    %18 = vector.shape_cast %17 : vector<1x100x16xbf16> to vector<100x16xbf16>
    %c2 = arith.constant 2 : index
    %c0_21 = arith.constant 0 : index
    %c0_22 = arith.constant 0 : index
    %19 = vector.load %arg3[%c2, %c0_21, %c0_22] : memref<4x16x128xbf16, #tpu.memory_space<vmem>>, vector<1x16x128xbf16>
    %20 = vector.shape_cast %19 : vector<1x16x128xbf16> to vector<16x128xbf16>
    %cst_23 = arith.constant dense<0.000000e+00> : vector<100x128xf32>
    %21 = tpu.matmul %18, %20, %cst_23 {dimension_numbers = #tpu.dot_dimension_numbers<[1], [0], [0], [1], [0, 0, 1, 1], [], []>} : vector<100x16xbf16>, vector<16x128xbf16>, vector<100x128xf32> -> vector<100x128xf32>
    %22 = arith.addf %16, %21 : vector<100x128xf32>
    %c0_24 = arith.constant 0 : index
    %c16 = arith.constant 16 : index
    %c0_25 = arith.constant 0 : index
    %23 = vector.load %arg1[%c0_24, %c16, %c0_25] : memref<1x132x16xbf16, #tpu.memory_space<vmem>>, vector<1x100x16xbf16>
    %24 = vector.shape_cast %23 : vector<1x100x16xbf16> to vector<100x16xbf16>
    %c3 = arith.constant 3 : index
    %c0_26 = arith.constant 0 : index
    %c0_27 = arith.constant 0 : index
    %25 = vector.load %arg3[%c3, %c0_26, %c0_27] : memref<4x16x128xbf16, #tpu.memory_space<vmem>>, vector<1x16x128xbf16>
    %26 = vector.shape_cast %25 : vector<1x16x128xbf16> to vector<16x128xbf16>
    %cst_28 = arith.constant dense<0.000000e+00> : vector<100x128xf32>
    %27 = tpu.matmul %24, %26, %cst_28 {dimension_numbers = #tpu.dot_dimension_numbers<[1], [0], [0], [1], [0, 0, 1, 1], [], []>} : vector<100x16xbf16>, vector<16x128xbf16>, vector<100x128xf32> -> vector<100x128xf32>
    %28 = arith.addf %22, %27 : vector<100x128xf32>
    %29 = vector.broadcast %5 : vector<1x128xf32> to vector<100x128xf32>
    %30 = arith.addf %28, %29 : vector<100x128xf32>
    %cst_29 = arith.constant 0.000000e+00 : f32
    %31 = vector.broadcast %cst_29 : f32 to vector<100x128xf32>
    %32 = arith.maximumf %30, %31 : vector<100x128xf32>
    %c16_30 = arith.constant 16 : index
    %c0_31 = arith.constant 0 : index
    %33 = vector.load %arg2[%c16_30, %c0_31] : memref<132x1xf32, #tpu.memory_space<vmem>>, vector<100x1xf32>
    %34 = vector.broadcast %33 : vector<100x1xf32> to vector<100x128xf32>
    %35 = arith.mulf %32, %34 : vector<100x128xf32>
    %36 = arith.truncf %35 : vector<100x128xf32> to vector<100x128xbf16>
    %c16_32 = arith.constant 16 : index
    %c0_33 = arith.constant 0 : index
    %37 = vector.load %arg10[%c16_32, %c0_33] : memref<132x128xbf16, #tpu.memory_space<vmem>>, vector<100x128xbf16>
    tpu.vector_store %arg10[%c16_32, %c0_33], %36 {strides = array<i32>} : memref<132x128xbf16, #tpu.memory_space<vmem>>, vector<100x128xbf16>,
    %c0_34 = arith.constant 0 : index
    %c0_35 = arith.constant 0 : index
    %c0_36 = arith.constant 0 : index
    %38 = vector.load %arg6[%c0_34, %c0_35, %c0_36] : memref<1x1x128xf32, #tpu.memory_space<vmem>>, vector<1x1x128xf32>
    %39 = vector.shape_cast %38 : vector<1x1x128xf32> to vector<1x128xf32>
    %c5_37 = arith.constant 5 : index
    %c0_38 = arith.constant 0 : index
    %40 = vector.load %arg10[%c5_37, %c0_38] : memref<132x128xbf16, #tpu.memory_space<vmem>>, vector<100x128xbf16>
    %c0_39 = arith.constant 0 : index
    %c0_40 = arith.constant 0 : index
    %c0_41 = arith.constant 0 : index
    %41 = vector.load %arg5[%c0_39, %c0_40, %c0_41] : memref<9x128x128xbf16, #tpu.memory_space<vmem>>, vector<1x128x128xbf16>
    %42 = vector.shape_cast %41 : vector<1x128x128xbf16> to vector<128x128xbf16>
    %cst_42 = arith.constant dense<0.000000e+00> : vector<100x128xf32>
    %43 = tpu.matmul %40, %42, %cst_42 {dimension_numbers = #tpu.dot_dimension_numbers<[1], [0], [0], [1], [0, 0, 1, 1], [], []>} : vector<100x128xbf16>, vector<128x128xbf16>, vector<100x128xf32> -> vector<100x128xf32>
    %c6_43 = arith.constant 6 : index
    %c0_44 = arith.constant 0 : index
    %44 = vector.load %arg10[%c6_43, %c0_44] : memref<132x128xbf16, #tpu.memory_space<vmem>>, vector<100x128xbf16>
    %c1_45 = arith.constant 1 : index
    %c0_46 = arith.constant 0 : index
    %c0_47 = arith.constant 0 : index
    %45 = vector.load %arg5[%c1_45, %c0_46, %c0_47] : memref<9x128x128xbf16, #tpu.memory_space<vmem>>, vector<1x128x128xbf16>
    %46 = vector.shape_cast %45 : vector<1x128x128xbf16> to vector<128x128xbf16>
    %cst_48 = arith.constant dense<0.000000e+00> : vector<100x128xf32>
    %47 = tpu.matmul %44, %46, %cst_48 {dimension_numbers = #tpu.dot_dimension_numbers<[1], [0], [0], [1], [0, 0, 1, 1], [], []>} : vector<100x128xbf16>, vector<128x128xbf16>, vector<100x128xf32> -> vector<100x128xf32>
    %48 = arith.addf %43, %47 : vector<100x128xf32>
    %c7 = arith.constant 7 : index
    %c0_49 = arith.constant 0 : index
    %49 = vector.load %arg10[%c7, %c0_49] : memref<132x128xbf16, #tpu.memory_space<vmem>>, vector<100x128xbf16>
    %c2_50 = arith.constant 2 : index
    %c0_51 = arith.constant 0 : index
    %c0_52 = arith.constant 0 : index
    %50 = vector.load %arg5[%c2_50, %c0_51, %c0_52] : memref<9x128x128xbf16, #tpu.memory_space<vmem>>, vector<1x128x128xbf16>
    %51 = vector.shape_cast %50 : vector<1x128x128xbf16> to vector<128x128xbf16>
    %cst_53 = arith.constant dense<0.000000e+00> : vector<100x128xf32>
    %52 = tpu.matmul %49, %51, %cst_53 {dimension_numbers = #tpu.dot_dimension_numbers<[1], [0], [0], [1], [0, 0, 1, 1], [], []>} : vector<100x128xbf16>, vector<128x128xbf16>, vector<100x128xf32> -> vector<100x128xf32>
    %53 = arith.addf %48, %52 : vector<100x128xf32>
    %c15_54 = arith.constant 15 : index
    %c0_55 = arith.constant 0 : index
    %54 = vector.load %arg10[%c15_54, %c0_55] : memref<132x128xbf16, #tpu.memory_space<vmem>>, vector<100x128xbf16>
    %c3_56 = arith.constant 3 : index
    %c0_57 = arith.constant 0 : index
    %c0_58 = arith.constant 0 : index
    %55 = vector.load %arg5[%c3_56, %c0_57, %c0_58] : memref<9x128x128xbf16, #tpu.memory_space<vmem>>, vector<1x128x128xbf16>
    %56 = vector.shape_cast %55 : vector<1x128x128xbf16> to vector<128x128xbf16>
    %cst_59 = arith.constant dense<0.000000e+00> : vector<100x128xf32>
    %57 = tpu.matmul %54, %56, %cst_59 {dimension_numbers = #tpu.dot_dimension_numbers<[1], [0], [0], [1], [0, 0, 1, 1], [], []>} : vector<100x128xbf16>, vector<128x128xbf16>, vector<100x128xf32> -> vector<100x128xf32>
    %58 = arith.addf %53, %57 : vector<100x128xf32>
    %c16_60 = arith.constant 16 : index
    %c0_61 = arith.constant 0 : index
    %59 = vector.load %arg10[%c16_60, %c0_61] : memref<132x128xbf16, #tpu.memory_space<vmem>>, vector<100x128xbf16>
    %c4 = arith.constant 4 : index
    %c0_62 = arith.constant 0 : index
    %c0_63 = arith.constant 0 : index
    %60 = vector.load %arg5[%c4, %c0_62, %c0_63] : memref<9x128x128xbf16, #tpu.memory_space<vmem>>, vector<1x128x128xbf16>
    %61 = vector.shape_cast %60 : vector<1x128x128xbf16> to vector<128x128xbf16>
    %cst_64 = arith.constant dense<0.000000e+00> : vector<100x128xf32>
    %62 = tpu.matmul %59, %61, %cst_64 {dimension_numbers = #tpu.dot_dimension_numbers<[1], [0], [0], [1], [0, 0, 1, 1], [], []>} : vector<100x128xbf16>, vector<128x128xbf16>, vector<100x128xf32> -> vector<100x128xf32>
    %63 = arith.addf %58, %62 : vector<100x128xf32>
    %c17 = arith.constant 17 : index
    %c0_65 = arith.constant 0 : index
    %64 = vector.load %arg10[%c17, %c0_65] : memref<132x128xbf16, #tpu.memory_space<vmem>>, vector<100x128xbf16>
    %c5_66 = arith.constant 5 : index
    %c0_67 = arith.constant 0 : index
    %c0_68 = arith.constant 0 : index
    %65 = vector.load %arg5[%c5_66, %c0_67, %c0_68] : memref<9x128x128xbf16, #tpu.memory_space<vmem>>, vector<1x128x128xbf16>
    %66 = vector.shape_cast %65 : vector<1x128x128xbf16> to vector<128x128xbf16>
    %cst_69 = arith.constant dense<0.000000e+00> : vector<100x128xf32>
    %67 = tpu.matmul %64, %66, %cst_69 {dimension_numbers = #tpu.dot_dimension_numbers<[1], [0], [0], [1], [0, 0, 1, 1], [], []>} : vector<100x128xbf16>, vector<128x128xbf16>, vector<100x128xf32> -> vector<100x128xf32>
    %68 = arith.addf %63, %67 : vector<100x128xf32>
    %c25 = arith.constant 25 : index
    %c0_70 = arith.constant 0 : index
    %69 = vector.load %arg10[%c25, %c0_70] : memref<132x128xbf16, #tpu.memory_space<vmem>>, vector<100x128xbf16>
    %c6_71 = arith.constant 6 : index
    %c0_72 = arith.constant 0 : index
    %c0_73 = arith.constant 0 : index
    %70 = vector.load %arg5[%c6_71, %c0_72, %c0_73] : memref<9x128x128xbf16, #tpu.memory_space<vmem>>, vector<1x128x128xbf16>
    %71 = vector.shape_cast %70 : vector<1x128x128xbf16> to vector<128x128xbf16>
    %cst_74 = arith.constant dense<0.000000e+00> : vector<100x128xf32>
    %72 = tpu.matmul %69, %71, %cst_74 {dimension_numbers = #tpu.dot_dimension_numbers<[1], [0], [0], [1], [0, 0, 1, 1], [], []>} : vector<100x128xbf16>, vector<128x128xbf16>, vector<100x128xf32> -> vector<100x128xf32>
    %73 = arith.addf %68, %72 : vector<100x128xf32>
    %c26 = arith.constant 26 : index
    %c0_75 = arith.constant 0 : index
    %74 = vector.load %arg10[%c26, %c0_75] : memref<132x128xbf16, #tpu.memory_space<vmem>>, vector<100x128xbf16>
    %c7_76 = arith.constant 7 : index
    %c0_77 = arith.constant 0 : index
    %c0_78 = arith.constant 0 : index
    %75 = vector.load %arg5[%c7_76, %c0_77, %c0_78] : memref<9x128x128xbf16, #tpu.memory_space<vmem>>, vector<1x128x128xbf16>
    %76 = vector.shape_cast %75 : vector<1x128x128xbf16> to vector<128x128xbf16>
    %cst_79 = arith.constant dense<0.000000e+00> : vector<100x128xf32>
    %77 = tpu.matmul %74, %76, %cst_79 {dimension_numbers = #tpu.dot_dimension_numbers<[1], [0], [0], [1], [0, 0, 1, 1], [], []>} : vector<100x128xbf16>, vector<128x128xbf16>, vector<100x128xf32> -> vector<100x128xf32>
    %78 = arith.addf %73, %77 : vector<100x128xf32>
    %c27 = arith.constant 27 : index
    %c0_80 = arith.constant 0 : index
    %79 = vector.load %arg10[%c27, %c0_80] : memref<132x128xbf16, #tpu.memory_space<vmem>>, vector<100x128xbf16>
    %c8 = arith.constant 8 : index
    %c0_81 = arith.constant 0 : index
    %c0_82 = arith.constant 0 : index
    %80 = vector.load %arg5[%c8, %c0_81, %c0_82] : memref<9x128x128xbf16, #tpu.memory_space<vmem>>, vector<1x128x128xbf16>
    %81 = vector.shape_cast %80 : vector<1x128x128xbf16> to vector<128x128xbf16>
    %cst_83 = arith.constant dense<0.000000e+00> : vector<100x128xf32>
    %82 = tpu.matmul %79, %81, %cst_83 {dimension_numbers = #tpu.dot_dimension_numbers<[1], [0], [0], [1], [0, 0, 1, 1], [], []>} : vector<100x128xbf16>, vector<128x128xbf16>, vector<100x128xf32> -> vector<100x128xf32>
    %83 = arith.addf %78, %82 : vector<100x128xf32>
    %84 = vector.broadcast %39 : vector<1x128xf32> to vector<100x128xf32>
    %85 = arith.addf %83, %84 : vector<100x128xf32>
    %cst_84 = arith.constant 0.000000e+00 : f32
    %86 = vector.broadcast %cst_84 : f32 to vector<100x128xf32>
    %87 = arith.maximumf %85, %86 : vector<100x128xf32>
    %c16_85 = arith.constant 16 : index
    %c0_86 = arith.constant 0 : index
    %88 = vector.load %arg2[%c16_85, %c0_86] : memref<132x1xf32, #tpu.memory_space<vmem>>, vector<100x1xf32>
    %89 = vector.broadcast %88 : vector<100x1xf32> to vector<100x128xf32>
    %90 = arith.mulf %87, %89 : vector<100x128xf32>
    %91 = arith.truncf %90 : vector<100x128xf32> to vector<100x128xbf16>
    %c16_87 = arith.constant 16 : index
    %c0_88 = arith.constant 0 : index
    %92 = vector.load %arg11[%c16_87, %c0_88] : memref<132x128xbf16, #tpu.memory_space<vmem>>, vector<100x128xbf16>
    tpu.vector_store %arg11[%c16_87, %c0_88], %91 {strides = array<i32>} : memref<132x128xbf16, #tpu.memory_space<vmem>>, vector<100x128xbf16>,
    %c0_89 = arith.constant 0 : index
    %c0_90 = arith.constant 0 : index
    %c0_91 = arith.constant 0 : index
    %93 = vector.load %arg8[%c0_89, %c0_90, %c0_91] : memref<1x1x128xf32, #tpu.memory_space<vmem>>, vector<1x1x128xf32>
    %94 = vector.shape_cast %93 : vector<1x1x128xf32> to vector<1x128xf32>
    %c5_92 = arith.constant 5 : index
    %c0_93 = arith.constant 0 : index
    %95 = vector.load %arg11[%c5_92, %c0_93] : memref<132x128xbf16, #tpu.memory_space<vmem>>, vector<100x128xbf16>
    %c0_94 = arith.constant 0 : index
    %c0_95 = arith.constant 0 : index
    %c0_96 = arith.constant 0 : index
    %96 = vector.load %arg7[%c0_94, %c0_95, %c0_96] : memref<9x128x128xbf16, #tpu.memory_space<vmem>>, vector<1x128x128xbf16>
    %97 = vector.shape_cast %96 : vector<1x128x128xbf16> to vector<128x128xbf16>
    %cst_97 = arith.constant dense<0.000000e+00> : vector<100x128xf32>
    %98 = tpu.matmul %95, %97, %cst_97 {dimension_numbers = #tpu.dot_dimension_numbers<[1], [0], [0], [1], [0, 0, 1, 1], [], []>} : vector<100x128xbf16>, vector<128x128xbf16>, vector<100x128xf32> -> vector<100x128xf32>
    %c6_98 = arith.constant 6 : index
    %c0_99 = arith.constant 0 : index
    %99 = vector.load %arg11[%c6_98, %c0_99] : memref<132x128xbf16, #tpu.memory_space<vmem>>, vector<100x128xbf16>
    %c1_100 = arith.constant 1 : index
    %c0_101 = arith.constant 0 : index
    %c0_102 = arith.constant 0 : index
    %100 = vector.load %arg7[%c1_100, %c0_101, %c0_102] : memref<9x128x128xbf16, #tpu.memory_space<vmem>>, vector<1x128x128xbf16>
    %101 = vector.shape_cast %100 : vector<1x128x128xbf16> to vector<128x128xbf16>
    %cst_103 = arith.constant dense<0.000000e+00> : vector<100x128xf32>
    %102 = tpu.matmul %99, %101, %cst_103 {dimension_numbers = #tpu.dot_dimension_numbers<[1], [0], [0], [1], [0, 0, 1, 1], [], []>} : vector<100x128xbf16>, vector<128x128xbf16>, vector<100x128xf32> -> vector<100x128xf32>
    %103 = arith.addf %98, %102 : vector<100x128xf32>
    %c7_104 = arith.constant 7 : index
    %c0_105 = arith.constant 0 : index
    %104 = vector.load %arg11[%c7_104, %c0_105] : memref<132x128xbf16, #tpu.memory_space<vmem>>, vector<100x128xbf16>
    %c2_106 = arith.constant 2 : index
    %c0_107 = arith.constant 0 : index
    %c0_108 = arith.constant 0 : index
    %105 = vector.load %arg7[%c2_106, %c0_107, %c0_108] : memref<9x128x128xbf16, #tpu.memory_space<vmem>>, vector<1x128x128xbf16>
    %106 = vector.shape_cast %105 : vector<1x128x128xbf16> to vector<128x128xbf16>
    %cst_109 = arith.constant dense<0.000000e+00> : vector<100x128xf32>
    %107 = tpu.matmul %104, %106, %cst_109 {dimension_numbers = #tpu.dot_dimension_numbers<[1], [0], [0], [1], [0, 0, 1, 1], [], []>} : vector<100x128xbf16>, vector<128x128xbf16>, vector<100x128xf32> -> vector<100x128xf32>
    %108 = arith.addf %103, %107 : vector<100x128xf32>
    %c15_110 = arith.constant 15 : index
    %c0_111 = arith.constant 0 : index
    %109 = vector.load %arg11[%c15_110, %c0_111] : memref<132x128xbf16, #tpu.memory_space<vmem>>, vector<100x128xbf16>
    %c3_112 = arith.constant 3 : index
    %c0_113 = arith.constant 0 : index
    %c0_114 = arith.constant 0 : index
    %110 = vector.load %arg7[%c3_112, %c0_113, %c0_114] : memref<9x128x128xbf16, #tpu.memory_space<vmem>>, vector<1x128x128xbf16>
    %111 = vector.shape_cast %110 : vector<1x128x128xbf16> to vector<128x128xbf16>
    %cst_115 = arith.constant dense<0.000000e+00> : vector<100x128xf32>
    %112 = tpu.matmul %109, %111, %cst_115 {dimension_numbers = #tpu.dot_dimension_numbers<[1], [0], [0], [1], [0, 0, 1, 1], [], []>} : vector<100x128xbf16>, vector<128x128xbf16>, vector<100x128xf32> -> vector<100x128xf32>
    %113 = arith.addf %108, %112 : vector<100x128xf32>
    %c16_116 = arith.constant 16 : index
    %c0_117 = arith.constant 0 : index
    %114 = vector.load %arg11[%c16_116, %c0_117] : memref<132x128xbf16, #tpu.memory_space<vmem>>, vector<100x128xbf16>
    %c4_118 = arith.constant 4 : index
    %c0_119 = arith.constant 0 : index
    %c0_120 = arith.constant 0 : index
    %115 = vector.load %arg7[%c4_118, %c0_119, %c0_120] : memref<9x128x128xbf16, #tpu.memory_space<vmem>>, vector<1x128x128xbf16>
    %116 = vector.shape_cast %115 : vector<1x128x128xbf16> to vector<128x128xbf16>
    %cst_121 = arith.constant dense<0.000000e+00> : vector<100x128xf32>
    %117 = tpu.matmul %114, %116, %cst_121 {dimension_numbers = #tpu.dot_dimension_numbers<[1], [0], [0], [1], [0, 0, 1, 1], [], []>} : vector<100x128xbf16>, vector<128x128xbf16>, vector<100x128xf32> -> vector<100x128xf32>
    %118 = arith.addf %113, %117 : vector<100x128xf32>
    %c17_122 = arith.constant 17 : index
    %c0_123 = arith.constant 0 : index
    %119 = vector.load %arg11[%c17_122, %c0_123] : memref<132x128xbf16, #tpu.memory_space<vmem>>, vector<100x128xbf16>
    %c5_124 = arith.constant 5 : index
    %c0_125 = arith.constant 0 : index
    %c0_126 = arith.constant 0 : index
    %120 = vector.load %arg7[%c5_124, %c0_125, %c0_126] : memref<9x128x128xbf16, #tpu.memory_space<vmem>>, vector<1x128x128xbf16>
    %121 = vector.shape_cast %120 : vector<1x128x128xbf16> to vector<128x128xbf16>
    %cst_127 = arith.constant dense<0.000000e+00> : vector<100x128xf32>
    %122 = tpu.matmul %119, %121, %cst_127 {dimension_numbers = #tpu.dot_dimension_numbers<[1], [0], [0], [1], [0, 0, 1, 1], [], []>} : vector<100x128xbf16>, vector<128x128xbf16>, vector<100x128xf32> -> vector<100x128xf32>
    %123 = arith.addf %118, %122 : vector<100x128xf32>
    %c25_128 = arith.constant 25 : index
    %c0_129 = arith.constant 0 : index
    %124 = vector.load %arg11[%c25_128, %c0_129] : memref<132x128xbf16, #tpu.memory_space<vmem>>, vector<100x128xbf16>
    %c6_130 = arith.constant 6 : index
    %c0_131 = arith.constant 0 : index
    %c0_132 = arith.constant 0 : index
    %125 = vector.load %arg7[%c6_130, %c0_131, %c0_132] : memref<9x128x128xbf16, #tpu.memory_space<vmem>>, vector<1x128x128xbf16>
    %126 = vector.shape_cast %125 : vector<1x128x128xbf16> to vector<128x128xbf16>
    %cst_133 = arith.constant dense<0.000000e+00> : vector<100x128xf32>
    %127 = tpu.matmul %124, %126, %cst_133 {dimension_numbers = #tpu.dot_dimension_numbers<[1], [0], [0], [1], [0, 0, 1, 1], [], []>} : vector<100x128xbf16>, vector<128x128xbf16>, vector<100x128xf32> -> vector<100x128xf32>
    %128 = arith.addf %123, %127 : vector<100x128xf32>
    %c26_134 = arith.constant 26 : index
    %c0_135 = arith.constant 0 : index
    %129 = vector.load %arg11[%c26_134, %c0_135] : memref<132x128xbf16, #tpu.memory_space<vmem>>, vector<100x128xbf16>
    %c7_136 = arith.constant 7 : index
    %c0_137 = arith.constant 0 : index
    %c0_138 = arith.constant 0 : index
    %130 = vector.load %arg7[%c7_136, %c0_137, %c0_138] : memref<9x128x128xbf16, #tpu.memory_space<vmem>>, vector<1x128x128xbf16>
    %131 = vector.shape_cast %130 : vector<1x128x128xbf16> to vector<128x128xbf16>
    %cst_139 = arith.constant dense<0.000000e+00> : vector<100x128xf32>
    %132 = tpu.matmul %129, %131, %cst_139 {dimension_numbers = #tpu.dot_dimension_numbers<[1], [0], [0], [1], [0, 0, 1, 1], [], []>} : vector<100x128xbf16>, vector<128x128xbf16>, vector<100x128xf32> -> vector<100x128xf32>
    %133 = arith.addf %128, %132 : vector<100x128xf32>
    %c27_140 = arith.constant 27 : index
    %c0_141 = arith.constant 0 : index
    %134 = vector.load %arg11[%c27_140, %c0_141] : memref<132x128xbf16, #tpu.memory_space<vmem>>, vector<100x128xbf16>
    %c8_142 = arith.constant 8 : index
    %c0_143 = arith.constant 0 : index
    %c0_144 = arith.constant 0 : index
    %135 = vector.load %arg7[%c8_142, %c0_143, %c0_144] : memref<9x128x128xbf16, #tpu.memory_space<vmem>>, vector<1x128x128xbf16>
    %136 = vector.shape_cast %135 : vector<1x128x128xbf16> to vector<128x128xbf16>
    %cst_145 = arith.constant dense<0.000000e+00> : vector<100x128xf32>
    %137 = tpu.matmul %134, %136, %cst_145 {dimension_numbers = #tpu.dot_dimension_numbers<[1], [0], [0], [1], [0, 0, 1, 1], [], []>} : vector<100x128xbf16>, vector<128x128xbf16>, vector<100x128xf32> -> vector<100x128xf32>
    %138 = arith.addf %133, %137 : vector<100x128xf32>
    %139 = vector.broadcast %94 : vector<1x128xf32> to vector<100x128xf32>
    %140 = arith.addf %138, %139 : vector<100x128xf32>
    %c16_146 = arith.constant 16 : index
    %c0_147 = arith.constant 0 : index
    %141 = vector.load %arg10[%c16_146, %c0_147] : memref<132x128xbf16, #tpu.memory_space<vmem>>, vector<100x128xbf16>
    %142 = arith.extf %141 : vector<100x128xbf16> to vector<100x128xf32>
    %143 = arith.addf %140, %142 : vector<100x128xf32>
    %cst_148 = arith.constant 0.000000e+00 : f32
    %144 = vector.broadcast %cst_148 : f32 to vector<100x128xf32>
    %145 = arith.maximumf %143, %144 : vector<100x128xf32>
    %146 = arith.truncf %145 : vector<100x128xf32> to vector<100x128xbf16>
    %c16_149 = arith.constant 16 : index
    %c0_150 = arith.constant 0 : index
    %147 = vector.load %arg10[%c16_149, %c0_150] : memref<132x128xbf16, #tpu.memory_space<vmem>>, vector<100x128xbf16>
    tpu.vector_store %arg10[%c16_149, %c0_150], %146 {strides = array<i32>} : memref<132x128xbf16, #tpu.memory_space<vmem>>, vector<100x128xbf16>,
    %c27_151 = arith.constant 27 : index
    %c0_152 = arith.constant 0 : index
    %148 = vector.load %arg10[%c27_151, %c0_152] : memref<132x128xbf16, #tpu.memory_space<vmem>>, vector<8x128xbf16>
    %c0_153 = arith.constant 0 : index
    %c0_154 = arith.constant 0 : index
    %c0_155 = arith.constant 0 : index
    %149 = vector.load %arg9[%c0_153, %c0_154, %c0_155] : memref<1x64x128xbf16, #tpu.memory_space<vmem>>, vector<1x8x128xbf16>
    %150 = vector.shape_cast %149 : vector<1x8x128xbf16> to vector<8x128xbf16>
    %151 = vector.shape_cast %148 : vector<8x128xbf16> to vector<1x8x128xbf16>
    tpu.vector_store %arg9[%c0_153, %c0_154, %c0_155], %151 {strides = array<i32>} : memref<1x64x128xbf16, #tpu.memory_space<vmem>>, vector<1x8x128xbf16>,
    %c37 = arith.constant 37 : index
    %c0_156 = arith.constant 0 : index
    %152 = vector.load %arg10[%c37, %c0_156] : memref<132x128xbf16, #tpu.memory_space<vmem>>, vector<8x128xbf16>
    %c0_157 = arith.constant 0 : index
    %c8_158 = arith.constant 8 : index
    %c0_159 = arith.constant 0 : index
    %153 = vector.load %arg9[%c0_157, %c8_158, %c0_159] : memref<1x64x128xbf16, #tpu.memory_space<vmem>>, vector<1x8x128xbf16>
    %154 = vector.shape_cast %153 : vector<1x8x128xbf16> to vector<8x128xbf16>
    %155 = vector.shape_cast %152 : vector<8x128xbf16> to vector<1x8x128xbf16>
    tpu.vector_store %arg9[%c0_157, %c8_158, %c0_159], %155 {strides = array<i32>} : memref<1x64x128xbf16, #tpu.memory_space<vmem>>, vector<1x8x128xbf16>,
    %c47 = arith.constant 47 : index
    %c0_160 = arith.constant 0 : index
    %156 = vector.load %arg10[%c47, %c0_160] : memref<132x128xbf16, #tpu.memory_space<vmem>>, vector<8x128xbf16>
    %c0_161 = arith.constant 0 : index
    %c16_162 = arith.constant 16 : index
    %c0_163 = arith.constant 0 : index
    %157 = vector.load %arg9[%c0_161, %c16_162, %c0_163] : memref<1x64x128xbf16, #tpu.memory_space<vmem>>, vector<1x8x128xbf16>
    %158 = vector.shape_cast %157 : vector<1x8x128xbf16> to vector<8x128xbf16>
    %159 = vector.shape_cast %156 : vector<8x128xbf16> to vector<1x8x128xbf16>
    tpu.vector_store %arg9[%c0_161, %c16_162, %c0_163], %159 {strides = array<i32>} : memref<1x64x128xbf16, #tpu.memory_space<vmem>>, vector<1x8x128xbf16>,
    %c57 = arith.constant 57 : index
    %c0_164 = arith.constant 0 : index
    %160 = vector.load %arg10[%c57, %c0_164] : memref<132x128xbf16, #tpu.memory_space<vmem>>, vector<8x128xbf16>
    %c0_165 = arith.constant 0 : index
    %c24 = arith.constant 24 : index
    %c0_166 = arith.constant 0 : index
    %161 = vector.load %arg9[%c0_165, %c24, %c0_166] : memref<1x64x128xbf16, #tpu.memory_space<vmem>>, vector<1x8x128xbf16>
    %162 = vector.shape_cast %161 : vector<1x8x128xbf16> to vector<8x128xbf16>
    %163 = vector.shape_cast %160 : vector<8x128xbf16> to vector<1x8x128xbf16>
    tpu.vector_store %arg9[%c0_165, %c24, %c0_166], %163 {strides = array<i32>} : memref<1x64x128xbf16, #tpu.memory_space<vmem>>, vector<1x8x128xbf16>,
    %c67 = arith.constant 67 : index
    %c0_167 = arith.constant 0 : index
    %164 = vector.load %arg10[%c67, %c0_167] : memref<132x128xbf16, #tpu.memory_space<vmem>>, vector<8x128xbf16>
    %c0_168 = arith.constant 0 : index
    %c32 = arith.constant 32 : index
    %c0_169 = arith.constant 0 : index
    %165 = vector.load %arg9[%c0_168, %c32, %c0_169] : memref<1x64x128xbf16, #tpu.memory_space<vmem>>, vector<1x8x128xbf16>
    %166 = vector.shape_cast %165 : vector<1x8x128xbf16> to vector<8x128xbf16>
    %167 = vector.shape_cast %164 : vector<8x128xbf16> to vector<1x8x128xbf16>
    tpu.vector_store %arg9[%c0_168, %c32, %c0_169], %167 {strides = array<i32>} : memref<1x64x128xbf16, #tpu.memory_space<vmem>>, vector<1x8x128xbf16>,
    %c77 = arith.constant 77 : index
    %c0_170 = arith.constant 0 : index
    %168 = vector.load %arg10[%c77, %c0_170] : memref<132x128xbf16, #tpu.memory_space<vmem>>, vector<8x128xbf16>
    %c0_171 = arith.constant 0 : index
    %c40 = arith.constant 40 : index
    %c0_172 = arith.constant 0 : index
    %169 = vector.load %arg9[%c0_171, %c40, %c0_172] : memref<1x64x128xbf16, #tpu.memory_space<vmem>>, vector<1x8x128xbf16>
    %170 = vector.shape_cast %169 : vector<1x8x128xbf16> to vector<8x128xbf16>
    %171 = vector.shape_cast %168 : vector<8x128xbf16> to vector<1x8x128xbf16>
    tpu.vector_store %arg9[%c0_171, %c40, %c0_172], %171 {strides = array<i32>} : memref<1x64x128xbf16, #tpu.memory_space<vmem>>, vector<1x8x128xbf16>,
    %c87 = arith.constant 87 : index
    %c0_173 = arith.constant 0 : index
    %172 = vector.load %arg10[%c87, %c0_173] : memref<132x128xbf16, #tpu.memory_space<vmem>>, vector<8x128xbf16>
    %c0_174 = arith.constant 0 : index
    %c48 = arith.constant 48 : index
    %c0_175 = arith.constant 0 : index
    %173 = vector.load %arg9[%c0_174, %c48, %c0_175] : memref<1x64x128xbf16, #tpu.memory_space<vmem>>, vector<1x8x128xbf16>
    %174 = vector.shape_cast %173 : vector<1x8x128xbf16> to vector<8x128xbf16>
    %175 = vector.shape_cast %172 : vector<8x128xbf16> to vector<1x8x128xbf16>
    tpu.vector_store %arg9[%c0_174, %c48, %c0_175], %175 {strides = array<i32>} : memref<1x64x128xbf16, #tpu.memory_space<vmem>>, vector<1x8x128xbf16>,
    %c97 = arith.constant 97 : index
    %c0_176 = arith.constant 0 : index
    %176 = vector.load %arg10[%c97, %c0_176] : memref<132x128xbf16, #tpu.memory_space<vmem>>, vector<8x128xbf16>
    %c0_177 = arith.constant 0 : index
    %c56 = arith.constant 56 : index
    %c0_178 = arith.constant 0 : index
    %177 = vector.load %arg9[%c0_177, %c56, %c0_178] : memref<1x64x128xbf16, #tpu.memory_space<vmem>>, vector<1x8x128xbf16>
    %178 = vector.shape_cast %177 : vector<1x8x128xbf16> to vector<8x128xbf16>
    %179 = vector.shape_cast %176 : vector<8x128xbf16> to vector<1x8x128xbf16>
    tpu.vector_store %arg9[%c0_177, %c56, %c0_178], %179 {strides = array<i32>} : memref<1x64x128xbf16, #tpu.memory_space<vmem>>, vector<1x8x128xbf16>,
    return
  }
  func.func @transform_0(%arg0: i32) -> (i32, i32, i32) {
    %c0_i32 = arith.constant 0 : i32
    %c0_i32_0 = arith.constant 0 : i32
    %c0_i32_1 = arith.constant 0 : i32
    return %arg0, %c0_i32, %c0_i32_0 : i32, i32, i32
  }
  func.func @transform_1(%arg0: i32) -> (i32, i32) {
    %c0_i32 = arith.constant 0 : i32
    %c0_i32_0 = arith.constant 0 : i32
    %c0_i32_1 = arith.constant 0 : i32
    return %c0_i32, %c0_i32_0 : i32, i32
  }
  func.func @transform_2(%arg0: i32) -> (i32, i32, i32) {
    %c0_i32 = arith.constant 0 : i32
    %c0_i32_0 = arith.constant 0 : i32
    %c0_i32_1 = arith.constant 0 : i32
    %c0_i32_2 = arith.constant 0 : i32
    return %c0_i32, %c0_i32_0, %c0_i32_1 : i32, i32, i32
  }
  func.func @transform_3(%arg0: i32) -> (i32, i32) {
    %c0_i32 = arith.constant 0 : i32
    %c0_i32_0 = arith.constant 0 : i32
    %c0_i32_1 = arith.constant 0 : i32
    return %c0_i32, %c0_i32_0 : i32, i32
  }
  func.func @transform_4(%arg0: i32) -> (i32, i32, i32) {
    %c0_i32 = arith.constant 0 : i32
    %c0_i32_0 = arith.constant 0 : i32
    %c0_i32_1 = arith.constant 0 : i32
    %c0_i32_2 = arith.constant 0 : i32
    return %c0_i32, %c0_i32_0, %c0_i32_1 : i32, i32, i32
  }
  func.func @transform_5(%arg0: i32) -> (i32, i32, i32) {
    %c0_i32 = arith.constant 0 : i32
    %c0_i32_0 = arith.constant 0 : i32
    %c0_i32_1 = arith.constant 0 : i32
    %c0_i32_2 = arith.constant 0 : i32
    return %c0_i32, %c0_i32_0, %c0_i32_1 : i32, i32, i32
  }
  func.func @transform_6(%arg0: i32) -> (i32, i32, i32) {
    %c0_i32 = arith.constant 0 : i32
    %c0_i32_0 = arith.constant 0 : i32
    %c0_i32_1 = arith.constant 0 : i32
    %c0_i32_2 = arith.constant 0 : i32
    return %c0_i32, %c0_i32_0, %c0_i32_1 : i32, i32, i32
  }
  func.func @transform_7(%arg0: i32) -> (i32, i32, i32) {
    %c0_i32 = arith.constant 0 : i32
    %c0_i32_0 = arith.constant 0 : i32
    %c0_i32_1 = arith.constant 0 : i32
    %c0_i32_2 = arith.constant 0 : i32
    return %c0_i32, %c0_i32_0, %c0_i32_1 : i32, i32, i32
  }
  func.func @transform_8(%arg0: i32) -> (i32, i32, i32) {
    %c0_i32 = arith.constant 0 : i32
    %c0_i32_0 = arith.constant 0 : i32
    %c0_i32_1 = arith.constant 0 : i32
    return %arg0, %c0_i32, %c0_i32_0 : i32, i32, i32
  }
}

module attributes {stable_mosaic.version = 11 : i64} {
  func.func @kernel(%arg0: i32, %arg1: memref<1x52x512xbf16, #tpu.memory_space<vmem>>, %arg2: memref<52x1xf32, #tpu.memory_space<vmem>>, %arg3: memref<4x512x128xbf16, #tpu.memory_space<vmem>>, %arg4: memref<1x128xf32, #tpu.memory_space<vmem>>, %arg5: memref<9x128x128xbf16, #tpu.memory_space<vmem>>, %arg6: memref<1x1x128xf32, #tpu.memory_space<vmem>>, %arg7: memref<9x128x128xbf16, #tpu.memory_space<vmem>>, %arg8: memref<1x1x128xf32, #tpu.memory_space<vmem>>, %arg9: memref<1x16x128xbf16, #tpu.memory_space<vmem>>, %arg10: memref<52x128xbf16, #tpu.memory_space<vmem>>, %arg11: memref<52x128xbf16, #tpu.memory_space<vmem>>) attributes {dimension_semantics = [#tpu.dimension_semantics<parallel>], iteration_bounds = array<i64: 2>, scalar_prefetch = 0 : i64, scratch_operands = 2 : i64, tpu.core_type = #tpu.core_type<tc>, window_params = [{transform_indices = @transform_0, window_bounds = array<i64: 1, 52, 512>}, {pipeline_mode = #tpu.pipeline_mode<synchronous>, transform_indices = @transform_1, window_bounds = array<i64: 52, 1>}, {pipeline_mode = #tpu.pipeline_mode<synchronous>, transform_indices = @transform_2, window_bounds = array<i64: 4, 512, 128>}, {pipeline_mode = #tpu.pipeline_mode<synchronous>, transform_indices = @transform_3, window_bounds = array<i64: 1, 128>}, {pipeline_mode = #tpu.pipeline_mode<synchronous>, transform_indices = @transform_4, window_bounds = array<i64: 9, 128, 128>}, {pipeline_mode = #tpu.pipeline_mode<synchronous>, transform_indices = @transform_5, window_bounds = array<i64: 1, 1, 128>}, {pipeline_mode = #tpu.pipeline_mode<synchronous>, transform_indices = @transform_6, window_bounds = array<i64: 9, 128, 128>}, {pipeline_mode = #tpu.pipeline_mode<synchronous>, transform_indices = @transform_7, window_bounds = array<i64: 1, 1, 128>}, {transform_indices = @transform_8, window_bounds = array<i64: 1, 16, 128>}]} {
    %cst = arith.constant 0.000000e+00 : bf16
    %0 = vector.broadcast %cst : bf16 to vector<8x128xbf16>
    %c0 = arith.constant 0 : index
    %c0_0 = arith.constant 0 : index
    %1 = vector.load %arg10[%c0, %c0_0] : memref<52x128xbf16, #tpu.memory_space<vmem>>, vector<8x128xbf16>
    tpu.vector_store %arg10[%c0, %c0_0], %0 {strides = array<i32>} : memref<52x128xbf16, #tpu.memory_space<vmem>>, vector<8x128xbf16>,
    %c44 = arith.constant 44 : index
    %c0_1 = arith.constant 0 : index
    %2 = vector.load %arg10[%c44, %c0_1] : memref<52x128xbf16, #tpu.memory_space<vmem>>, vector<8x128xbf16>
    tpu.vector_store %arg10[%c44, %c0_1], %0 {strides = array<i32>} : memref<52x128xbf16, #tpu.memory_space<vmem>>, vector<8x128xbf16>,
    %c0_2 = arith.constant 0 : index
    %c0_3 = arith.constant 0 : index
    %3 = vector.load %arg11[%c0_2, %c0_3] : memref<52x128xbf16, #tpu.memory_space<vmem>>, vector<8x128xbf16>
    tpu.vector_store %arg11[%c0_2, %c0_3], %0 {strides = array<i32>} : memref<52x128xbf16, #tpu.memory_space<vmem>>, vector<8x128xbf16>,
    %c44_4 = arith.constant 44 : index
    %c0_5 = arith.constant 0 : index
    %4 = vector.load %arg11[%c44_4, %c0_5] : memref<52x128xbf16, #tpu.memory_space<vmem>>, vector<8x128xbf16>
    tpu.vector_store %arg11[%c44_4, %c0_5], %0 {strides = array<i32>} : memref<52x128xbf16, #tpu.memory_space<vmem>>, vector<8x128xbf16>,
    %c0_6 = arith.constant 0 : index
    %c0_7 = arith.constant 0 : index
    %5 = vector.load %arg4[%c0_6, %c0_7] : memref<1x128xf32, #tpu.memory_space<vmem>>, vector<1x128xf32>
    %c0_8 = arith.constant 0 : index
    %c1 = arith.constant 1 : index
    %c0_9 = arith.constant 0 : index
    %6 = vector.load %arg1[%c0_8, %c1, %c0_9] : memref<1x52x512xbf16, #tpu.memory_space<vmem>>, vector<1x36x512xbf16>
    %7 = vector.shape_cast %6 : vector<1x36x512xbf16> to vector<36x512xbf16>
    %c0_10 = arith.constant 0 : index
    %c0_11 = arith.constant 0 : index
    %c0_12 = arith.constant 0 : index
    %8 = vector.load %arg3[%c0_10, %c0_11, %c0_12] : memref<4x512x128xbf16, #tpu.memory_space<vmem>>, vector<1x512x128xbf16>
    %9 = vector.shape_cast %8 : vector<1x512x128xbf16> to vector<512x128xbf16>
    %cst_13 = arith.constant dense<0.000000e+00> : vector<36x128xf32>
    %10 = tpu.matmul %7, %9, %cst_13 {dimension_numbers = #tpu.dot_dimension_numbers<[1], [0], [0], [1], [0, 0, 1, 1], [], []>} : vector<36x512xbf16>, vector<512x128xbf16>, vector<36x128xf32> -> vector<36x128xf32>
    %c0_14 = arith.constant 0 : index
    %c2 = arith.constant 2 : index
    %c0_15 = arith.constant 0 : index
    %11 = vector.load %arg1[%c0_14, %c2, %c0_15] : memref<1x52x512xbf16, #tpu.memory_space<vmem>>, vector<1x36x512xbf16>
    %12 = vector.shape_cast %11 : vector<1x36x512xbf16> to vector<36x512xbf16>
    %c1_16 = arith.constant 1 : index
    %c0_17 = arith.constant 0 : index
    %c0_18 = arith.constant 0 : index
    %13 = vector.load %arg3[%c1_16, %c0_17, %c0_18] : memref<4x512x128xbf16, #tpu.memory_space<vmem>>, vector<1x512x128xbf16>
    %14 = vector.shape_cast %13 : vector<1x512x128xbf16> to vector<512x128xbf16>
    %cst_19 = arith.constant dense<0.000000e+00> : vector<36x128xf32>
    %15 = tpu.matmul %12, %14, %cst_19 {dimension_numbers = #tpu.dot_dimension_numbers<[1], [0], [0], [1], [0, 0, 1, 1], [], []>} : vector<36x512xbf16>, vector<512x128xbf16>, vector<36x128xf32> -> vector<36x128xf32>
    %16 = arith.addf %10, %15 : vector<36x128xf32>
    %c0_20 = arith.constant 0 : index
    %c7 = arith.constant 7 : index
    %c0_21 = arith.constant 0 : index
    %17 = vector.load %arg1[%c0_20, %c7, %c0_21] : memref<1x52x512xbf16, #tpu.memory_space<vmem>>, vector<1x36x512xbf16>
    %18 = vector.shape_cast %17 : vector<1x36x512xbf16> to vector<36x512xbf16>
    %c2_22 = arith.constant 2 : index
    %c0_23 = arith.constant 0 : index
    %c0_24 = arith.constant 0 : index
    %19 = vector.load %arg3[%c2_22, %c0_23, %c0_24] : memref<4x512x128xbf16, #tpu.memory_space<vmem>>, vector<1x512x128xbf16>
    %20 = vector.shape_cast %19 : vector<1x512x128xbf16> to vector<512x128xbf16>
    %cst_25 = arith.constant dense<0.000000e+00> : vector<36x128xf32>
    %21 = tpu.matmul %18, %20, %cst_25 {dimension_numbers = #tpu.dot_dimension_numbers<[1], [0], [0], [1], [0, 0, 1, 1], [], []>} : vector<36x512xbf16>, vector<512x128xbf16>, vector<36x128xf32> -> vector<36x128xf32>
    %22 = arith.addf %16, %21 : vector<36x128xf32>
    %c0_26 = arith.constant 0 : index
    %c8 = arith.constant 8 : index
    %c0_27 = arith.constant 0 : index
    %23 = vector.load %arg1[%c0_26, %c8, %c0_27] : memref<1x52x512xbf16, #tpu.memory_space<vmem>>, vector<1x36x512xbf16>
    %24 = vector.shape_cast %23 : vector<1x36x512xbf16> to vector<36x512xbf16>
    %c3 = arith.constant 3 : index
    %c0_28 = arith.constant 0 : index
    %c0_29 = arith.constant 0 : index
    %25 = vector.load %arg3[%c3, %c0_28, %c0_29] : memref<4x512x128xbf16, #tpu.memory_space<vmem>>, vector<1x512x128xbf16>
    %26 = vector.shape_cast %25 : vector<1x512x128xbf16> to vector<512x128xbf16>
    %cst_30 = arith.constant dense<0.000000e+00> : vector<36x128xf32>
    %27 = tpu.matmul %24, %26, %cst_30 {dimension_numbers = #tpu.dot_dimension_numbers<[1], [0], [0], [1], [0, 0, 1, 1], [], []>} : vector<36x512xbf16>, vector<512x128xbf16>, vector<36x128xf32> -> vector<36x128xf32>
    %28 = arith.addf %22, %27 : vector<36x128xf32>
    %29 = vector.broadcast %5 : vector<1x128xf32> to vector<36x128xf32>
    %30 = arith.addf %28, %29 : vector<36x128xf32>
    %cst_31 = arith.constant 0.000000e+00 : f32
    %31 = vector.broadcast %cst_31 : f32 to vector<36x128xf32>
    %32 = arith.maximumf %30, %31 : vector<36x128xf32>
    %c8_32 = arith.constant 8 : index
    %c0_33 = arith.constant 0 : index
    %33 = vector.load %arg2[%c8_32, %c0_33] : memref<52x1xf32, #tpu.memory_space<vmem>>, vector<36x1xf32>
    %34 = vector.broadcast %33 : vector<36x1xf32> to vector<36x128xf32>
    %35 = arith.mulf %32, %34 : vector<36x128xf32>
    %36 = arith.truncf %35 : vector<36x128xf32> to vector<36x128xbf16>
    %c8_34 = arith.constant 8 : index
    %c0_35 = arith.constant 0 : index
    %37 = vector.load %arg10[%c8_34, %c0_35] : memref<52x128xbf16, #tpu.memory_space<vmem>>, vector<36x128xbf16>
    tpu.vector_store %arg10[%c8_34, %c0_35], %36 {strides = array<i32>} : memref<52x128xbf16, #tpu.memory_space<vmem>>, vector<36x128xbf16>,
    %c0_36 = arith.constant 0 : index
    %c0_37 = arith.constant 0 : index
    %c0_38 = arith.constant 0 : index
    %38 = vector.load %arg6[%c0_36, %c0_37, %c0_38] : memref<1x1x128xf32, #tpu.memory_space<vmem>>, vector<1x1x128xf32>
    %39 = vector.shape_cast %38 : vector<1x1x128xf32> to vector<1x128xf32>
    %c1_39 = arith.constant 1 : index
    %c0_40 = arith.constant 0 : index
    %40 = vector.load %arg10[%c1_39, %c0_40] : memref<52x128xbf16, #tpu.memory_space<vmem>>, vector<36x128xbf16>
    %c0_41 = arith.constant 0 : index
    %c0_42 = arith.constant 0 : index
    %c0_43 = arith.constant 0 : index
    %41 = vector.load %arg5[%c0_41, %c0_42, %c0_43] : memref<9x128x128xbf16, #tpu.memory_space<vmem>>, vector<1x128x128xbf16>
    %42 = vector.shape_cast %41 : vector<1x128x128xbf16> to vector<128x128xbf16>
    %cst_44 = arith.constant dense<0.000000e+00> : vector<36x128xf32>
    %43 = tpu.matmul %40, %42, %cst_44 {dimension_numbers = #tpu.dot_dimension_numbers<[1], [0], [0], [1], [0, 0, 1, 1], [], []>} : vector<36x128xbf16>, vector<128x128xbf16>, vector<36x128xf32> -> vector<36x128xf32>
    %c2_45 = arith.constant 2 : index
    %c0_46 = arith.constant 0 : index
    %44 = vector.load %arg10[%c2_45, %c0_46] : memref<52x128xbf16, #tpu.memory_space<vmem>>, vector<36x128xbf16>
    %c1_47 = arith.constant 1 : index
    %c0_48 = arith.constant 0 : index
    %c0_49 = arith.constant 0 : index
    %45 = vector.load %arg5[%c1_47, %c0_48, %c0_49] : memref<9x128x128xbf16, #tpu.memory_space<vmem>>, vector<1x128x128xbf16>
    %46 = vector.shape_cast %45 : vector<1x128x128xbf16> to vector<128x128xbf16>
    %cst_50 = arith.constant dense<0.000000e+00> : vector<36x128xf32>
    %47 = tpu.matmul %44, %46, %cst_50 {dimension_numbers = #tpu.dot_dimension_numbers<[1], [0], [0], [1], [0, 0, 1, 1], [], []>} : vector<36x128xbf16>, vector<128x128xbf16>, vector<36x128xf32> -> vector<36x128xf32>
    %48 = arith.addf %43, %47 : vector<36x128xf32>
    %c3_51 = arith.constant 3 : index
    %c0_52 = arith.constant 0 : index
    %49 = vector.load %arg10[%c3_51, %c0_52] : memref<52x128xbf16, #tpu.memory_space<vmem>>, vector<36x128xbf16>
    %c2_53 = arith.constant 2 : index
    %c0_54 = arith.constant 0 : index
    %c0_55 = arith.constant 0 : index
    %50 = vector.load %arg5[%c2_53, %c0_54, %c0_55] : memref<9x128x128xbf16, #tpu.memory_space<vmem>>, vector<1x128x128xbf16>
    %51 = vector.shape_cast %50 : vector<1x128x128xbf16> to vector<128x128xbf16>
    %cst_56 = arith.constant dense<0.000000e+00> : vector<36x128xf32>
    %52 = tpu.matmul %49, %51, %cst_56 {dimension_numbers = #tpu.dot_dimension_numbers<[1], [0], [0], [1], [0, 0, 1, 1], [], []>} : vector<36x128xbf16>, vector<128x128xbf16>, vector<36x128xf32> -> vector<36x128xf32>
    %53 = arith.addf %48, %52 : vector<36x128xf32>
    %c7_57 = arith.constant 7 : index
    %c0_58 = arith.constant 0 : index
    %54 = vector.load %arg10[%c7_57, %c0_58] : memref<52x128xbf16, #tpu.memory_space<vmem>>, vector<36x128xbf16>
    %c3_59 = arith.constant 3 : index
    %c0_60 = arith.constant 0 : index
    %c0_61 = arith.constant 0 : index
    %55 = vector.load %arg5[%c3_59, %c0_60, %c0_61] : memref<9x128x128xbf16, #tpu.memory_space<vmem>>, vector<1x128x128xbf16>
    %56 = vector.shape_cast %55 : vector<1x128x128xbf16> to vector<128x128xbf16>
    %cst_62 = arith.constant dense<0.000000e+00> : vector<36x128xf32>
    %57 = tpu.matmul %54, %56, %cst_62 {dimension_numbers = #tpu.dot_dimension_numbers<[1], [0], [0], [1], [0, 0, 1, 1], [], []>} : vector<36x128xbf16>, vector<128x128xbf16>, vector<36x128xf32> -> vector<36x128xf32>
    %58 = arith.addf %53, %57 : vector<36x128xf32>
    %c8_63 = arith.constant 8 : index
    %c0_64 = arith.constant 0 : index
    %59 = vector.load %arg10[%c8_63, %c0_64] : memref<52x128xbf16, #tpu.memory_space<vmem>>, vector<36x128xbf16>
    %c4 = arith.constant 4 : index
    %c0_65 = arith.constant 0 : index
    %c0_66 = arith.constant 0 : index
    %60 = vector.load %arg5[%c4, %c0_65, %c0_66] : memref<9x128x128xbf16, #tpu.memory_space<vmem>>, vector<1x128x128xbf16>
    %61 = vector.shape_cast %60 : vector<1x128x128xbf16> to vector<128x128xbf16>
    %cst_67 = arith.constant dense<0.000000e+00> : vector<36x128xf32>
    %62 = tpu.matmul %59, %61, %cst_67 {dimension_numbers = #tpu.dot_dimension_numbers<[1], [0], [0], [1], [0, 0, 1, 1], [], []>} : vector<36x128xbf16>, vector<128x128xbf16>, vector<36x128xf32> -> vector<36x128xf32>
    %63 = arith.addf %58, %62 : vector<36x128xf32>
    %c9 = arith.constant 9 : index
    %c0_68 = arith.constant 0 : index
    %64 = vector.load %arg10[%c9, %c0_68] : memref<52x128xbf16, #tpu.memory_space<vmem>>, vector<36x128xbf16>
    %c5 = arith.constant 5 : index
    %c0_69 = arith.constant 0 : index
    %c0_70 = arith.constant 0 : index
    %65 = vector.load %arg5[%c5, %c0_69, %c0_70] : memref<9x128x128xbf16, #tpu.memory_space<vmem>>, vector<1x128x128xbf16>
    %66 = vector.shape_cast %65 : vector<1x128x128xbf16> to vector<128x128xbf16>
    %cst_71 = arith.constant dense<0.000000e+00> : vector<36x128xf32>
    %67 = tpu.matmul %64, %66, %cst_71 {dimension_numbers = #tpu.dot_dimension_numbers<[1], [0], [0], [1], [0, 0, 1, 1], [], []>} : vector<36x128xbf16>, vector<128x128xbf16>, vector<36x128xf32> -> vector<36x128xf32>
    %68 = arith.addf %63, %67 : vector<36x128xf32>
    %c13 = arith.constant 13 : index
    %c0_72 = arith.constant 0 : index
    %69 = vector.load %arg10[%c13, %c0_72] : memref<52x128xbf16, #tpu.memory_space<vmem>>, vector<36x128xbf16>
    %c6 = arith.constant 6 : index
    %c0_73 = arith.constant 0 : index
    %c0_74 = arith.constant 0 : index
    %70 = vector.load %arg5[%c6, %c0_73, %c0_74] : memref<9x128x128xbf16, #tpu.memory_space<vmem>>, vector<1x128x128xbf16>
    %71 = vector.shape_cast %70 : vector<1x128x128xbf16> to vector<128x128xbf16>
    %cst_75 = arith.constant dense<0.000000e+00> : vector<36x128xf32>
    %72 = tpu.matmul %69, %71, %cst_75 {dimension_numbers = #tpu.dot_dimension_numbers<[1], [0], [0], [1], [0, 0, 1, 1], [], []>} : vector<36x128xbf16>, vector<128x128xbf16>, vector<36x128xf32> -> vector<36x128xf32>
    %73 = arith.addf %68, %72 : vector<36x128xf32>
    %c14 = arith.constant 14 : index
    %c0_76 = arith.constant 0 : index
    %74 = vector.load %arg10[%c14, %c0_76] : memref<52x128xbf16, #tpu.memory_space<vmem>>, vector<36x128xbf16>
    %c7_77 = arith.constant 7 : index
    %c0_78 = arith.constant 0 : index
    %c0_79 = arith.constant 0 : index
    %75 = vector.load %arg5[%c7_77, %c0_78, %c0_79] : memref<9x128x128xbf16, #tpu.memory_space<vmem>>, vector<1x128x128xbf16>
    %76 = vector.shape_cast %75 : vector<1x128x128xbf16> to vector<128x128xbf16>
    %cst_80 = arith.constant dense<0.000000e+00> : vector<36x128xf32>
    %77 = tpu.matmul %74, %76, %cst_80 {dimension_numbers = #tpu.dot_dimension_numbers<[1], [0], [0], [1], [0, 0, 1, 1], [], []>} : vector<36x128xbf16>, vector<128x128xbf16>, vector<36x128xf32> -> vector<36x128xf32>
    %78 = arith.addf %73, %77 : vector<36x128xf32>
    %c15 = arith.constant 15 : index
    %c0_81 = arith.constant 0 : index
    %79 = vector.load %arg10[%c15, %c0_81] : memref<52x128xbf16, #tpu.memory_space<vmem>>, vector<36x128xbf16>
    %c8_82 = arith.constant 8 : index
    %c0_83 = arith.constant 0 : index
    %c0_84 = arith.constant 0 : index
    %80 = vector.load %arg5[%c8_82, %c0_83, %c0_84] : memref<9x128x128xbf16, #tpu.memory_space<vmem>>, vector<1x128x128xbf16>
    %81 = vector.shape_cast %80 : vector<1x128x128xbf16> to vector<128x128xbf16>
    %cst_85 = arith.constant dense<0.000000e+00> : vector<36x128xf32>
    %82 = tpu.matmul %79, %81, %cst_85 {dimension_numbers = #tpu.dot_dimension_numbers<[1], [0], [0], [1], [0, 0, 1, 1], [], []>} : vector<36x128xbf16>, vector<128x128xbf16>, vector<36x128xf32> -> vector<36x128xf32>
    %83 = arith.addf %78, %82 : vector<36x128xf32>
    %84 = vector.broadcast %39 : vector<1x128xf32> to vector<36x128xf32>
    %85 = arith.addf %83, %84 : vector<36x128xf32>
    %cst_86 = arith.constant 0.000000e+00 : f32
    %86 = vector.broadcast %cst_86 : f32 to vector<36x128xf32>
    %87 = arith.maximumf %85, %86 : vector<36x128xf32>
    %c8_87 = arith.constant 8 : index
    %c0_88 = arith.constant 0 : index
    %88 = vector.load %arg2[%c8_87, %c0_88] : memref<52x1xf32, #tpu.memory_space<vmem>>, vector<36x1xf32>
    %89 = vector.broadcast %88 : vector<36x1xf32> to vector<36x128xf32>
    %90 = arith.mulf %87, %89 : vector<36x128xf32>
    %91 = arith.truncf %90 : vector<36x128xf32> to vector<36x128xbf16>
    %c8_89 = arith.constant 8 : index
    %c0_90 = arith.constant 0 : index
    %92 = vector.load %arg11[%c8_89, %c0_90] : memref<52x128xbf16, #tpu.memory_space<vmem>>, vector<36x128xbf16>
    tpu.vector_store %arg11[%c8_89, %c0_90], %91 {strides = array<i32>} : memref<52x128xbf16, #tpu.memory_space<vmem>>, vector<36x128xbf16>,
    %c0_91 = arith.constant 0 : index
    %c0_92 = arith.constant 0 : index
    %c0_93 = arith.constant 0 : index
    %93 = vector.load %arg8[%c0_91, %c0_92, %c0_93] : memref<1x1x128xf32, #tpu.memory_space<vmem>>, vector<1x1x128xf32>
    %94 = vector.shape_cast %93 : vector<1x1x128xf32> to vector<1x128xf32>
    %c1_94 = arith.constant 1 : index
    %c0_95 = arith.constant 0 : index
    %95 = vector.load %arg11[%c1_94, %c0_95] : memref<52x128xbf16, #tpu.memory_space<vmem>>, vector<36x128xbf16>
    %c0_96 = arith.constant 0 : index
    %c0_97 = arith.constant 0 : index
    %c0_98 = arith.constant 0 : index
    %96 = vector.load %arg7[%c0_96, %c0_97, %c0_98] : memref<9x128x128xbf16, #tpu.memory_space<vmem>>, vector<1x128x128xbf16>
    %97 = vector.shape_cast %96 : vector<1x128x128xbf16> to vector<128x128xbf16>
    %cst_99 = arith.constant dense<0.000000e+00> : vector<36x128xf32>
    %98 = tpu.matmul %95, %97, %cst_99 {dimension_numbers = #tpu.dot_dimension_numbers<[1], [0], [0], [1], [0, 0, 1, 1], [], []>} : vector<36x128xbf16>, vector<128x128xbf16>, vector<36x128xf32> -> vector<36x128xf32>
    %c2_100 = arith.constant 2 : index
    %c0_101 = arith.constant 0 : index
    %99 = vector.load %arg11[%c2_100, %c0_101] : memref<52x128xbf16, #tpu.memory_space<vmem>>, vector<36x128xbf16>
    %c1_102 = arith.constant 1 : index
    %c0_103 = arith.constant 0 : index
    %c0_104 = arith.constant 0 : index
    %100 = vector.load %arg7[%c1_102, %c0_103, %c0_104] : memref<9x128x128xbf16, #tpu.memory_space<vmem>>, vector<1x128x128xbf16>
    %101 = vector.shape_cast %100 : vector<1x128x128xbf16> to vector<128x128xbf16>
    %cst_105 = arith.constant dense<0.000000e+00> : vector<36x128xf32>
    %102 = tpu.matmul %99, %101, %cst_105 {dimension_numbers = #tpu.dot_dimension_numbers<[1], [0], [0], [1], [0, 0, 1, 1], [], []>} : vector<36x128xbf16>, vector<128x128xbf16>, vector<36x128xf32> -> vector<36x128xf32>
    %103 = arith.addf %98, %102 : vector<36x128xf32>
    %c3_106 = arith.constant 3 : index
    %c0_107 = arith.constant 0 : index
    %104 = vector.load %arg11[%c3_106, %c0_107] : memref<52x128xbf16, #tpu.memory_space<vmem>>, vector<36x128xbf16>
    %c2_108 = arith.constant 2 : index
    %c0_109 = arith.constant 0 : index
    %c0_110 = arith.constant 0 : index
    %105 = vector.load %arg7[%c2_108, %c0_109, %c0_110] : memref<9x128x128xbf16, #tpu.memory_space<vmem>>, vector<1x128x128xbf16>
    %106 = vector.shape_cast %105 : vector<1x128x128xbf16> to vector<128x128xbf16>
    %cst_111 = arith.constant dense<0.000000e+00> : vector<36x128xf32>
    %107 = tpu.matmul %104, %106, %cst_111 {dimension_numbers = #tpu.dot_dimension_numbers<[1], [0], [0], [1], [0, 0, 1, 1], [], []>} : vector<36x128xbf16>, vector<128x128xbf16>, vector<36x128xf32> -> vector<36x128xf32>
    %108 = arith.addf %103, %107 : vector<36x128xf32>
    %c7_112 = arith.constant 7 : index
    %c0_113 = arith.constant 0 : index
    %109 = vector.load %arg11[%c7_112, %c0_113] : memref<52x128xbf16, #tpu.memory_space<vmem>>, vector<36x128xbf16>
    %c3_114 = arith.constant 3 : index
    %c0_115 = arith.constant 0 : index
    %c0_116 = arith.constant 0 : index
    %110 = vector.load %arg7[%c3_114, %c0_115, %c0_116] : memref<9x128x128xbf16, #tpu.memory_space<vmem>>, vector<1x128x128xbf16>
    %111 = vector.shape_cast %110 : vector<1x128x128xbf16> to vector<128x128xbf16>
    %cst_117 = arith.constant dense<0.000000e+00> : vector<36x128xf32>
    %112 = tpu.matmul %109, %111, %cst_117 {dimension_numbers = #tpu.dot_dimension_numbers<[1], [0], [0], [1], [0, 0, 1, 1], [], []>} : vector<36x128xbf16>, vector<128x128xbf16>, vector<36x128xf32> -> vector<36x128xf32>
    %113 = arith.addf %108, %112 : vector<36x128xf32>
    %c8_118 = arith.constant 8 : index
    %c0_119 = arith.constant 0 : index
    %114 = vector.load %arg11[%c8_118, %c0_119] : memref<52x128xbf16, #tpu.memory_space<vmem>>, vector<36x128xbf16>
    %c4_120 = arith.constant 4 : index
    %c0_121 = arith.constant 0 : index
    %c0_122 = arith.constant 0 : index
    %115 = vector.load %arg7[%c4_120, %c0_121, %c0_122] : memref<9x128x128xbf16, #tpu.memory_space<vmem>>, vector<1x128x128xbf16>
    %116 = vector.shape_cast %115 : vector<1x128x128xbf16> to vector<128x128xbf16>
    %cst_123 = arith.constant dense<0.000000e+00> : vector<36x128xf32>
    %117 = tpu.matmul %114, %116, %cst_123 {dimension_numbers = #tpu.dot_dimension_numbers<[1], [0], [0], [1], [0, 0, 1, 1], [], []>} : vector<36x128xbf16>, vector<128x128xbf16>, vector<36x128xf32> -> vector<36x128xf32>
    %118 = arith.addf %113, %117 : vector<36x128xf32>
    %c9_124 = arith.constant 9 : index
    %c0_125 = arith.constant 0 : index
    %119 = vector.load %arg11[%c9_124, %c0_125] : memref<52x128xbf16, #tpu.memory_space<vmem>>, vector<36x128xbf16>
    %c5_126 = arith.constant 5 : index
    %c0_127 = arith.constant 0 : index
    %c0_128 = arith.constant 0 : index
    %120 = vector.load %arg7[%c5_126, %c0_127, %c0_128] : memref<9x128x128xbf16, #tpu.memory_space<vmem>>, vector<1x128x128xbf16>
    %121 = vector.shape_cast %120 : vector<1x128x128xbf16> to vector<128x128xbf16>
    %cst_129 = arith.constant dense<0.000000e+00> : vector<36x128xf32>
    %122 = tpu.matmul %119, %121, %cst_129 {dimension_numbers = #tpu.dot_dimension_numbers<[1], [0], [0], [1], [0, 0, 1, 1], [], []>} : vector<36x128xbf16>, vector<128x128xbf16>, vector<36x128xf32> -> vector<36x128xf32>
    %123 = arith.addf %118, %122 : vector<36x128xf32>
    %c13_130 = arith.constant 13 : index
    %c0_131 = arith.constant 0 : index
    %124 = vector.load %arg11[%c13_130, %c0_131] : memref<52x128xbf16, #tpu.memory_space<vmem>>, vector<36x128xbf16>
    %c6_132 = arith.constant 6 : index
    %c0_133 = arith.constant 0 : index
    %c0_134 = arith.constant 0 : index
    %125 = vector.load %arg7[%c6_132, %c0_133, %c0_134] : memref<9x128x128xbf16, #tpu.memory_space<vmem>>, vector<1x128x128xbf16>
    %126 = vector.shape_cast %125 : vector<1x128x128xbf16> to vector<128x128xbf16>
    %cst_135 = arith.constant dense<0.000000e+00> : vector<36x128xf32>
    %127 = tpu.matmul %124, %126, %cst_135 {dimension_numbers = #tpu.dot_dimension_numbers<[1], [0], [0], [1], [0, 0, 1, 1], [], []>} : vector<36x128xbf16>, vector<128x128xbf16>, vector<36x128xf32> -> vector<36x128xf32>
    %128 = arith.addf %123, %127 : vector<36x128xf32>
    %c14_136 = arith.constant 14 : index
    %c0_137 = arith.constant 0 : index
    %129 = vector.load %arg11[%c14_136, %c0_137] : memref<52x128xbf16, #tpu.memory_space<vmem>>, vector<36x128xbf16>
    %c7_138 = arith.constant 7 : index
    %c0_139 = arith.constant 0 : index
    %c0_140 = arith.constant 0 : index
    %130 = vector.load %arg7[%c7_138, %c0_139, %c0_140] : memref<9x128x128xbf16, #tpu.memory_space<vmem>>, vector<1x128x128xbf16>
    %131 = vector.shape_cast %130 : vector<1x128x128xbf16> to vector<128x128xbf16>
    %cst_141 = arith.constant dense<0.000000e+00> : vector<36x128xf32>
    %132 = tpu.matmul %129, %131, %cst_141 {dimension_numbers = #tpu.dot_dimension_numbers<[1], [0], [0], [1], [0, 0, 1, 1], [], []>} : vector<36x128xbf16>, vector<128x128xbf16>, vector<36x128xf32> -> vector<36x128xf32>
    %133 = arith.addf %128, %132 : vector<36x128xf32>
    %c15_142 = arith.constant 15 : index
    %c0_143 = arith.constant 0 : index
    %134 = vector.load %arg11[%c15_142, %c0_143] : memref<52x128xbf16, #tpu.memory_space<vmem>>, vector<36x128xbf16>
    %c8_144 = arith.constant 8 : index
    %c0_145 = arith.constant 0 : index
    %c0_146 = arith.constant 0 : index
    %135 = vector.load %arg7[%c8_144, %c0_145, %c0_146] : memref<9x128x128xbf16, #tpu.memory_space<vmem>>, vector<1x128x128xbf16>
    %136 = vector.shape_cast %135 : vector<1x128x128xbf16> to vector<128x128xbf16>
    %cst_147 = arith.constant dense<0.000000e+00> : vector<36x128xf32>
    %137 = tpu.matmul %134, %136, %cst_147 {dimension_numbers = #tpu.dot_dimension_numbers<[1], [0], [0], [1], [0, 0, 1, 1], [], []>} : vector<36x128xbf16>, vector<128x128xbf16>, vector<36x128xf32> -> vector<36x128xf32>
    %138 = arith.addf %133, %137 : vector<36x128xf32>
    %139 = vector.broadcast %94 : vector<1x128xf32> to vector<36x128xf32>
    %140 = arith.addf %138, %139 : vector<36x128xf32>
    %c8_148 = arith.constant 8 : index
    %c0_149 = arith.constant 0 : index
    %141 = vector.load %arg10[%c8_148, %c0_149] : memref<52x128xbf16, #tpu.memory_space<vmem>>, vector<36x128xbf16>
    %142 = arith.extf %141 : vector<36x128xbf16> to vector<36x128xf32>
    %143 = arith.addf %140, %142 : vector<36x128xf32>
    %cst_150 = arith.constant 0.000000e+00 : f32
    %144 = vector.broadcast %cst_150 : f32 to vector<36x128xf32>
    %145 = arith.maximumf %143, %144 : vector<36x128xf32>
    %146 = arith.truncf %145 : vector<36x128xf32> to vector<36x128xbf16>
    %c8_151 = arith.constant 8 : index
    %c0_152 = arith.constant 0 : index
    %147 = vector.load %arg10[%c8_151, %c0_152] : memref<52x128xbf16, #tpu.memory_space<vmem>>, vector<36x128xbf16>
    tpu.vector_store %arg10[%c8_151, %c0_152], %146 {strides = array<i32>} : memref<52x128xbf16, #tpu.memory_space<vmem>>, vector<36x128xbf16>,
    %c15_153 = arith.constant 15 : index
    %c0_154 = arith.constant 0 : index
    %148 = vector.load %arg10[%c15_153, %c0_154] : memref<52x128xbf16, #tpu.memory_space<vmem>>, vector<4x128xbf16>
    %c0_155 = arith.constant 0 : index
    %c0_156 = arith.constant 0 : index
    %c0_157 = arith.constant 0 : index
    %149 = vector.load %arg9[%c0_155, %c0_156, %c0_157] : memref<1x16x128xbf16, #tpu.memory_space<vmem>>, vector<1x4x128xbf16>
    %150 = vector.shape_cast %149 : vector<1x4x128xbf16> to vector<4x128xbf16>
    %151 = vector.shape_cast %148 : vector<4x128xbf16> to vector<1x4x128xbf16>
    tpu.vector_store %arg9[%c0_155, %c0_156, %c0_157], %151 {strides = array<i32>} : memref<1x16x128xbf16, #tpu.memory_space<vmem>>, vector<1x4x128xbf16>,
    %c21 = arith.constant 21 : index
    %c0_158 = arith.constant 0 : index
    %152 = vector.load %arg10[%c21, %c0_158] : memref<52x128xbf16, #tpu.memory_space<vmem>>, vector<4x128xbf16>
    %c0_159 = arith.constant 0 : index
    %c4_160 = arith.constant 4 : index
    %c0_161 = arith.constant 0 : index
    %153 = vector.load %arg9[%c0_159, %c4_160, %c0_161] : memref<1x16x128xbf16, #tpu.memory_space<vmem>>, vector<1x4x128xbf16>
    %154 = vector.shape_cast %153 : vector<1x4x128xbf16> to vector<4x128xbf16>
    %155 = vector.shape_cast %152 : vector<4x128xbf16> to vector<1x4x128xbf16>
    tpu.vector_store %arg9[%c0_159, %c4_160, %c0_161], %155 {strides = array<i32>} : memref<1x16x128xbf16, #tpu.memory_space<vmem>>, vector<1x4x128xbf16>,
    %c27 = arith.constant 27 : index
    %c0_162 = arith.constant 0 : index
    %156 = vector.load %arg10[%c27, %c0_162] : memref<52x128xbf16, #tpu.memory_space<vmem>>, vector<4x128xbf16>
    %c0_163 = arith.constant 0 : index
    %c8_164 = arith.constant 8 : index
    %c0_165 = arith.constant 0 : index
    %157 = vector.load %arg9[%c0_163, %c8_164, %c0_165] : memref<1x16x128xbf16, #tpu.memory_space<vmem>>, vector<1x4x128xbf16>
    %158 = vector.shape_cast %157 : vector<1x4x128xbf16> to vector<4x128xbf16>
    %159 = vector.shape_cast %156 : vector<4x128xbf16> to vector<1x4x128xbf16>
    tpu.vector_store %arg9[%c0_163, %c8_164, %c0_165], %159 {strides = array<i32>} : memref<1x16x128xbf16, #tpu.memory_space<vmem>>, vector<1x4x128xbf16>,
    %c33 = arith.constant 33 : index
    %c0_166 = arith.constant 0 : index
    %160 = vector.load %arg10[%c33, %c0_166] : memref<52x128xbf16, #tpu.memory_space<vmem>>, vector<4x128xbf16>
    %c0_167 = arith.constant 0 : index
    %c12 = arith.constant 12 : index
    %c0_168 = arith.constant 0 : index
    %161 = vector.load %arg9[%c0_167, %c12, %c0_168] : memref<1x16x128xbf16, #tpu.memory_space<vmem>>, vector<1x4x128xbf16>
    %162 = vector.shape_cast %161 : vector<1x4x128xbf16> to vector<4x128xbf16>
    %163 = vector.shape_cast %160 : vector<4x128xbf16> to vector<1x4x128xbf16>
    tpu.vector_store %arg9[%c0_167, %c12, %c0_168], %163 {strides = array<i32>} : memref<1x16x128xbf16, #tpu.memory_space<vmem>>, vector<1x4x128xbf16>,
    return
  }
  func.func @transform_0(%arg0: i32) -> (i32, i32, i32) {
    %c0_i32 = arith.constant 0 : i32
    %c0_i32_0 = arith.constant 0 : i32
    %c0_i32_1 = arith.constant 0 : i32
    return %arg0, %c0_i32, %c0_i32_0 : i32, i32, i32
  }
  func.func @transform_1(%arg0: i32) -> (i32, i32) {
    %c0_i32 = arith.constant 0 : i32
    %c0_i32_0 = arith.constant 0 : i32
    %c0_i32_1 = arith.constant 0 : i32
    return %c0_i32, %c0_i32_0 : i32, i32
  }
  func.func @transform_2(%arg0: i32) -> (i32, i32, i32) {
    %c0_i32 = arith.constant 0 : i32
    %c0_i32_0 = arith.constant 0 : i32
    %c0_i32_1 = arith.constant 0 : i32
    %c0_i32_2 = arith.constant 0 : i32
    return %c0_i32, %c0_i32_0, %c0_i32_1 : i32, i32, i32
  }
  func.func @transform_3(%arg0: i32) -> (i32, i32) {
    %c0_i32 = arith.constant 0 : i32
    %c0_i32_0 = arith.constant 0 : i32
    %c0_i32_1 = arith.constant 0 : i32
    return %c0_i32, %c0_i32_0 : i32, i32
  }
  func.func @transform_4(%arg0: i32) -> (i32, i32, i32) {
    %c0_i32 = arith.constant 0 : i32
    %c0_i32_0 = arith.constant 0 : i32
    %c0_i32_1 = arith.constant 0 : i32
    %c0_i32_2 = arith.constant 0 : i32
    return %c0_i32, %c0_i32_0, %c0_i32_1 : i32, i32, i32
  }
  func.func @transform_5(%arg0: i32) -> (i32, i32, i32) {
    %c0_i32 = arith.constant 0 : i32
    %c0_i32_0 = arith.constant 0 : i32
    %c0_i32_1 = arith.constant 0 : i32
    %c0_i32_2 = arith.constant 0 : i32
    return %c0_i32, %c0_i32_0, %c0_i32_1 : i32, i32, i32
  }
  func.func @transform_6(%arg0: i32) -> (i32, i32, i32) {
    %c0_i32 = arith.constant 0 : i32
    %c0_i32_0 = arith.constant 0 : i32
    %c0_i32_1 = arith.constant 0 : i32
    %c0_i32_2 = arith.constant 0 : i32
    return %c0_i32, %c0_i32_0, %c0_i32_1 : i32, i32, i32
  }
  func.func @transform_7(%arg0: i32) -> (i32, i32, i32) {
    %c0_i32 = arith.constant 0 : i32
    %c0_i32_0 = arith.constant 0 : i32
    %c0_i32_1 = arith.constant 0 : i32
    %c0_i32_2 = arith.constant 0 : i32
    return %c0_i32, %c0_i32_0, %c0_i32_1 : i32, i32, i32
  }
  func.func @transform_8(%arg0: i32) -> (i32, i32, i32) {
    %c0_i32 = arith.constant 0 : i32
    %c0_i32_0 = arith.constant 0 : i32
    %c0_i32_1 = arith.constant 0 : i32
    return %arg0, %c0_i32, %c0_i32_0 : i32, i32, i32
  }
}

module attributes {stable_mosaic.version = 11 : i64} {
  func.func @kernel(%arg0: i32, %arg1: memref<1x32x512xbf16, #tpu.memory_space<vmem>>, %arg2: memref<32x1xf32, #tpu.memory_space<vmem>>, %arg3: memref<4x512x128xbf16, #tpu.memory_space<vmem>>, %arg4: memref<1x128xf32, #tpu.memory_space<vmem>>, %arg5: memref<9x128x128xbf16, #tpu.memory_space<vmem>>, %arg6: memref<1x1x128xf32, #tpu.memory_space<vmem>>, %arg7: memref<9x128x128xbf16, #tpu.memory_space<vmem>>, %arg8: memref<1x1x128xf32, #tpu.memory_space<vmem>>, %arg9: memref<1x4x128xbf16, #tpu.memory_space<vmem>>, %arg10: memref<32x128xbf16, #tpu.memory_space<vmem>>, %arg11: memref<32x128xbf16, #tpu.memory_space<vmem>>) attributes {dimension_semantics = [#tpu.dimension_semantics<parallel>], iteration_bounds = array<i64: 2>, scalar_prefetch = 0 : i64, scratch_operands = 2 : i64, tpu.core_type = #tpu.core_type<tc>, window_params = [{transform_indices = @transform_0, window_bounds = array<i64: 1, 32, 512>}, {pipeline_mode = #tpu.pipeline_mode<synchronous>, transform_indices = @transform_1, window_bounds = array<i64: 32, 1>}, {pipeline_mode = #tpu.pipeline_mode<synchronous>, transform_indices = @transform_2, window_bounds = array<i64: 4, 512, 128>}, {pipeline_mode = #tpu.pipeline_mode<synchronous>, transform_indices = @transform_3, window_bounds = array<i64: 1, 128>}, {pipeline_mode = #tpu.pipeline_mode<synchronous>, transform_indices = @transform_4, window_bounds = array<i64: 9, 128, 128>}, {pipeline_mode = #tpu.pipeline_mode<synchronous>, transform_indices = @transform_5, window_bounds = array<i64: 1, 1, 128>}, {pipeline_mode = #tpu.pipeline_mode<synchronous>, transform_indices = @transform_6, window_bounds = array<i64: 9, 128, 128>}, {pipeline_mode = #tpu.pipeline_mode<synchronous>, transform_indices = @transform_7, window_bounds = array<i64: 1, 1, 128>}, {transform_indices = @transform_8, window_bounds = array<i64: 1, 4, 128>}]} {
    %cst = arith.constant 0.000000e+00 : bf16
    %0 = vector.broadcast %cst : bf16 to vector<8x128xbf16>
    %c0 = arith.constant 0 : index
    %c0_0 = arith.constant 0 : index
    %1 = vector.load %arg10[%c0, %c0_0] : memref<32x128xbf16, #tpu.memory_space<vmem>>, vector<8x128xbf16>
    tpu.vector_store %arg10[%c0, %c0_0], %0 {strides = array<i32>} : memref<32x128xbf16, #tpu.memory_space<vmem>>, vector<8x128xbf16>,
    %c24 = arith.constant 24 : index
    %c0_1 = arith.constant 0 : index
    %2 = vector.load %arg10[%c24, %c0_1] : memref<32x128xbf16, #tpu.memory_space<vmem>>, vector<8x128xbf16>
    tpu.vector_store %arg10[%c24, %c0_1], %0 {strides = array<i32>} : memref<32x128xbf16, #tpu.memory_space<vmem>>, vector<8x128xbf16>,
    %c0_2 = arith.constant 0 : index
    %c0_3 = arith.constant 0 : index
    %3 = vector.load %arg11[%c0_2, %c0_3] : memref<32x128xbf16, #tpu.memory_space<vmem>>, vector<8x128xbf16>
    tpu.vector_store %arg11[%c0_2, %c0_3], %0 {strides = array<i32>} : memref<32x128xbf16, #tpu.memory_space<vmem>>, vector<8x128xbf16>,
    %c24_4 = arith.constant 24 : index
    %c0_5 = arith.constant 0 : index
    %4 = vector.load %arg11[%c24_4, %c0_5] : memref<32x128xbf16, #tpu.memory_space<vmem>>, vector<8x128xbf16>
    tpu.vector_store %arg11[%c24_4, %c0_5], %0 {strides = array<i32>} : memref<32x128xbf16, #tpu.memory_space<vmem>>, vector<8x128xbf16>,
    %c0_6 = arith.constant 0 : index
    %c0_7 = arith.constant 0 : index
    %5 = vector.load %arg4[%c0_6, %c0_7] : memref<1x128xf32, #tpu.memory_space<vmem>>, vector<1x128xf32>
    %c0_8 = arith.constant 0 : index
    %c3 = arith.constant 3 : index
    %c0_9 = arith.constant 0 : index
    %6 = vector.load %arg1[%c0_8, %c3, %c0_9] : memref<1x32x512xbf16, #tpu.memory_space<vmem>>, vector<1x16x512xbf16>
    %7 = vector.shape_cast %6 : vector<1x16x512xbf16> to vector<16x512xbf16>
    %c0_10 = arith.constant 0 : index
    %c0_11 = arith.constant 0 : index
    %c0_12 = arith.constant 0 : index
    %8 = vector.load %arg3[%c0_10, %c0_11, %c0_12] : memref<4x512x128xbf16, #tpu.memory_space<vmem>>, vector<1x512x128xbf16>
    %9 = vector.shape_cast %8 : vector<1x512x128xbf16> to vector<512x128xbf16>
    %cst_13 = arith.constant dense<0.000000e+00> : vector<16x128xf32>
    %10 = tpu.matmul %7, %9, %cst_13 {dimension_numbers = #tpu.dot_dimension_numbers<[1], [0], [0], [1], [0, 0, 1, 1], [], []>} : vector<16x512xbf16>, vector<512x128xbf16>, vector<16x128xf32> -> vector<16x128xf32>
    %c0_14 = arith.constant 0 : index
    %c4 = arith.constant 4 : index
    %c0_15 = arith.constant 0 : index
    %11 = vector.load %arg1[%c0_14, %c4, %c0_15] : memref<1x32x512xbf16, #tpu.memory_space<vmem>>, vector<1x16x512xbf16>
    %12 = vector.shape_cast %11 : vector<1x16x512xbf16> to vector<16x512xbf16>
    %c1 = arith.constant 1 : index
    %c0_16 = arith.constant 0 : index
    %c0_17 = arith.constant 0 : index
    %13 = vector.load %arg3[%c1, %c0_16, %c0_17] : memref<4x512x128xbf16, #tpu.memory_space<vmem>>, vector<1x512x128xbf16>
    %14 = vector.shape_cast %13 : vector<1x512x128xbf16> to vector<512x128xbf16>
    %cst_18 = arith.constant dense<0.000000e+00> : vector<16x128xf32>
    %15 = tpu.matmul %12, %14, %cst_18 {dimension_numbers = #tpu.dot_dimension_numbers<[1], [0], [0], [1], [0, 0, 1, 1], [], []>} : vector<16x512xbf16>, vector<512x128xbf16>, vector<16x128xf32> -> vector<16x128xf32>
    %16 = arith.addf %10, %15 : vector<16x128xf32>
    %c0_19 = arith.constant 0 : index
    %c7 = arith.constant 7 : index
    %c0_20 = arith.constant 0 : index
    %17 = vector.load %arg1[%c0_19, %c7, %c0_20] : memref<1x32x512xbf16, #tpu.memory_space<vmem>>, vector<1x16x512xbf16>
    %18 = vector.shape_cast %17 : vector<1x16x512xbf16> to vector<16x512xbf16>
    %c2 = arith.constant 2 : index
    %c0_21 = arith.constant 0 : index
    %c0_22 = arith.constant 0 : index
    %19 = vector.load %arg3[%c2, %c0_21, %c0_22] : memref<4x512x128xbf16, #tpu.memory_space<vmem>>, vector<1x512x128xbf16>
    %20 = vector.shape_cast %19 : vector<1x512x128xbf16> to vector<512x128xbf16>
    %cst_23 = arith.constant dense<0.000000e+00> : vector<16x128xf32>
    %21 = tpu.matmul %18, %20, %cst_23 {dimension_numbers = #tpu.dot_dimension_numbers<[1], [0], [0], [1], [0, 0, 1, 1], [], []>} : vector<16x512xbf16>, vector<512x128xbf16>, vector<16x128xf32> -> vector<16x128xf32>
    %22 = arith.addf %16, %21 : vector<16x128xf32>
    %c0_24 = arith.constant 0 : index
    %c8 = arith.constant 8 : index
    %c0_25 = arith.constant 0 : index
    %23 = vector.load %arg1[%c0_24, %c8, %c0_25] : memref<1x32x512xbf16, #tpu.memory_space<vmem>>, vector<1x16x512xbf16>
    %24 = vector.shape_cast %23 : vector<1x16x512xbf16> to vector<16x512xbf16>
    %c3_26 = arith.constant 3 : index
    %c0_27 = arith.constant 0 : index
    %c0_28 = arith.constant 0 : index
    %25 = vector.load %arg3[%c3_26, %c0_27, %c0_28] : memref<4x512x128xbf16, #tpu.memory_space<vmem>>, vector<1x512x128xbf16>
    %26 = vector.shape_cast %25 : vector<1x512x128xbf16> to vector<512x128xbf16>
    %cst_29 = arith.constant dense<0.000000e+00> : vector<16x128xf32>
    %27 = tpu.matmul %24, %26, %cst_29 {dimension_numbers = #tpu.dot_dimension_numbers<[1], [0], [0], [1], [0, 0, 1, 1], [], []>} : vector<16x512xbf16>, vector<512x128xbf16>, vector<16x128xf32> -> vector<16x128xf32>
    %28 = arith.addf %22, %27 : vector<16x128xf32>
    %29 = vector.broadcast %5 : vector<1x128xf32> to vector<16x128xf32>
    %30 = arith.addf %28, %29 : vector<16x128xf32>
    %cst_30 = arith.constant 0.000000e+00 : f32
    %31 = vector.broadcast %cst_30 : f32 to vector<16x128xf32>
    %32 = arith.maximumf %30, %31 : vector<16x128xf32>
    %c8_31 = arith.constant 8 : index
    %c0_32 = arith.constant 0 : index
    %33 = vector.load %arg2[%c8_31, %c0_32] : memref<32x1xf32, #tpu.memory_space<vmem>>, vector<16x1xf32>
    %34 = vector.broadcast %33 : vector<16x1xf32> to vector<16x128xf32>
    %35 = arith.mulf %32, %34 : vector<16x128xf32>
    %36 = arith.truncf %35 : vector<16x128xf32> to vector<16x128xbf16>
    %c8_33 = arith.constant 8 : index
    %c0_34 = arith.constant 0 : index
    %37 = vector.load %arg10[%c8_33, %c0_34] : memref<32x128xbf16, #tpu.memory_space<vmem>>, vector<16x128xbf16>
    tpu.vector_store %arg10[%c8_33, %c0_34], %36 {strides = array<i32>} : memref<32x128xbf16, #tpu.memory_space<vmem>>, vector<16x128xbf16>,
    %c0_35 = arith.constant 0 : index
    %c0_36 = arith.constant 0 : index
    %c0_37 = arith.constant 0 : index
    %38 = vector.load %arg6[%c0_35, %c0_36, %c0_37] : memref<1x1x128xf32, #tpu.memory_space<vmem>>, vector<1x1x128xf32>
    %39 = vector.shape_cast %38 : vector<1x1x128xf32> to vector<1x128xf32>
    %c3_38 = arith.constant 3 : index
    %c0_39 = arith.constant 0 : index
    %40 = vector.load %arg10[%c3_38, %c0_39] : memref<32x128xbf16, #tpu.memory_space<vmem>>, vector<16x128xbf16>
    %c0_40 = arith.constant 0 : index
    %c0_41 = arith.constant 0 : index
    %c0_42 = arith.constant 0 : index
    %41 = vector.load %arg5[%c0_40, %c0_41, %c0_42] : memref<9x128x128xbf16, #tpu.memory_space<vmem>>, vector<1x128x128xbf16>
    %42 = vector.shape_cast %41 : vector<1x128x128xbf16> to vector<128x128xbf16>
    %cst_43 = arith.constant dense<0.000000e+00> : vector<16x128xf32>
    %43 = tpu.matmul %40, %42, %cst_43 {dimension_numbers = #tpu.dot_dimension_numbers<[1], [0], [0], [1], [0, 0, 1, 1], [], []>} : vector<16x128xbf16>, vector<128x128xbf16>, vector<16x128xf32> -> vector<16x128xf32>
    %c4_44 = arith.constant 4 : index
    %c0_45 = arith.constant 0 : index
    %44 = vector.load %arg10[%c4_44, %c0_45] : memref<32x128xbf16, #tpu.memory_space<vmem>>, vector<16x128xbf16>
    %c1_46 = arith.constant 1 : index
    %c0_47 = arith.constant 0 : index
    %c0_48 = arith.constant 0 : index
    %45 = vector.load %arg5[%c1_46, %c0_47, %c0_48] : memref<9x128x128xbf16, #tpu.memory_space<vmem>>, vector<1x128x128xbf16>
    %46 = vector.shape_cast %45 : vector<1x128x128xbf16> to vector<128x128xbf16>
    %cst_49 = arith.constant dense<0.000000e+00> : vector<16x128xf32>
    %47 = tpu.matmul %44, %46, %cst_49 {dimension_numbers = #tpu.dot_dimension_numbers<[1], [0], [0], [1], [0, 0, 1, 1], [], []>} : vector<16x128xbf16>, vector<128x128xbf16>, vector<16x128xf32> -> vector<16x128xf32>
    %48 = arith.addf %43, %47 : vector<16x128xf32>
    %c5 = arith.constant 5 : index
    %c0_50 = arith.constant 0 : index
    %49 = vector.load %arg10[%c5, %c0_50] : memref<32x128xbf16, #tpu.memory_space<vmem>>, vector<16x128xbf16>
    %c2_51 = arith.constant 2 : index
    %c0_52 = arith.constant 0 : index
    %c0_53 = arith.constant 0 : index
    %50 = vector.load %arg5[%c2_51, %c0_52, %c0_53] : memref<9x128x128xbf16, #tpu.memory_space<vmem>>, vector<1x128x128xbf16>
    %51 = vector.shape_cast %50 : vector<1x128x128xbf16> to vector<128x128xbf16>
    %cst_54 = arith.constant dense<0.000000e+00> : vector<16x128xf32>
    %52 = tpu.matmul %49, %51, %cst_54 {dimension_numbers = #tpu.dot_dimension_numbers<[1], [0], [0], [1], [0, 0, 1, 1], [], []>} : vector<16x128xbf16>, vector<128x128xbf16>, vector<16x128xf32> -> vector<16x128xf32>
    %53 = arith.addf %48, %52 : vector<16x128xf32>
    %c7_55 = arith.constant 7 : index
    %c0_56 = arith.constant 0 : index
    %54 = vector.load %arg10[%c7_55, %c0_56] : memref<32x128xbf16, #tpu.memory_space<vmem>>, vector<16x128xbf16>
    %c3_57 = arith.constant 3 : index
    %c0_58 = arith.constant 0 : index
    %c0_59 = arith.constant 0 : index
    %55 = vector.load %arg5[%c3_57, %c0_58, %c0_59] : memref<9x128x128xbf16, #tpu.memory_space<vmem>>, vector<1x128x128xbf16>
    %56 = vector.shape_cast %55 : vector<1x128x128xbf16> to vector<128x128xbf16>
    %cst_60 = arith.constant dense<0.000000e+00> : vector<16x128xf32>
    %57 = tpu.matmul %54, %56, %cst_60 {dimension_numbers = #tpu.dot_dimension_numbers<[1], [0], [0], [1], [0, 0, 1, 1], [], []>} : vector<16x128xbf16>, vector<128x128xbf16>, vector<16x128xf32> -> vector<16x128xf32>
    %58 = arith.addf %53, %57 : vector<16x128xf32>
    %c8_61 = arith.constant 8 : index
    %c0_62 = arith.constant 0 : index
    %59 = vector.load %arg10[%c8_61, %c0_62] : memref<32x128xbf16, #tpu.memory_space<vmem>>, vector<16x128xbf16>
    %c4_63 = arith.constant 4 : index
    %c0_64 = arith.constant 0 : index
    %c0_65 = arith.constant 0 : index
    %60 = vector.load %arg5[%c4_63, %c0_64, %c0_65] : memref<9x128x128xbf16, #tpu.memory_space<vmem>>, vector<1x128x128xbf16>
    %61 = vector.shape_cast %60 : vector<1x128x128xbf16> to vector<128x128xbf16>
    %cst_66 = arith.constant dense<0.000000e+00> : vector<16x128xf32>
    %62 = tpu.matmul %59, %61, %cst_66 {dimension_numbers = #tpu.dot_dimension_numbers<[1], [0], [0], [1], [0, 0, 1, 1], [], []>} : vector<16x128xbf16>, vector<128x128xbf16>, vector<16x128xf32> -> vector<16x128xf32>
    %63 = arith.addf %58, %62 : vector<16x128xf32>
    %c9 = arith.constant 9 : index
    %c0_67 = arith.constant 0 : index
    %64 = vector.load %arg10[%c9, %c0_67] : memref<32x128xbf16, #tpu.memory_space<vmem>>, vector<16x128xbf16>
    %c5_68 = arith.constant 5 : index
    %c0_69 = arith.constant 0 : index
    %c0_70 = arith.constant 0 : index
    %65 = vector.load %arg5[%c5_68, %c0_69, %c0_70] : memref<9x128x128xbf16, #tpu.memory_space<vmem>>, vector<1x128x128xbf16>
    %66 = vector.shape_cast %65 : vector<1x128x128xbf16> to vector<128x128xbf16>
    %cst_71 = arith.constant dense<0.000000e+00> : vector<16x128xf32>
    %67 = tpu.matmul %64, %66, %cst_71 {dimension_numbers = #tpu.dot_dimension_numbers<[1], [0], [0], [1], [0, 0, 1, 1], [], []>} : vector<16x128xbf16>, vector<128x128xbf16>, vector<16x128xf32> -> vector<16x128xf32>
    %68 = arith.addf %63, %67 : vector<16x128xf32>
    %c11 = arith.constant 11 : index
    %c0_72 = arith.constant 0 : index
    %69 = vector.load %arg10[%c11, %c0_72] : memref<32x128xbf16, #tpu.memory_space<vmem>>, vector<16x128xbf16>
    %c6 = arith.constant 6 : index
    %c0_73 = arith.constant 0 : index
    %c0_74 = arith.constant 0 : index
    %70 = vector.load %arg5[%c6, %c0_73, %c0_74] : memref<9x128x128xbf16, #tpu.memory_space<vmem>>, vector<1x128x128xbf16>
    %71 = vector.shape_cast %70 : vector<1x128x128xbf16> to vector<128x128xbf16>
    %cst_75 = arith.constant dense<0.000000e+00> : vector<16x128xf32>
    %72 = tpu.matmul %69, %71, %cst_75 {dimension_numbers = #tpu.dot_dimension_numbers<[1], [0], [0], [1], [0, 0, 1, 1], [], []>} : vector<16x128xbf16>, vector<128x128xbf16>, vector<16x128xf32> -> vector<16x128xf32>
    %73 = arith.addf %68, %72 : vector<16x128xf32>
    %c12 = arith.constant 12 : index
    %c0_76 = arith.constant 0 : index
    %74 = vector.load %arg10[%c12, %c0_76] : memref<32x128xbf16, #tpu.memory_space<vmem>>, vector<16x128xbf16>
    %c7_77 = arith.constant 7 : index
    %c0_78 = arith.constant 0 : index
    %c0_79 = arith.constant 0 : index
    %75 = vector.load %arg5[%c7_77, %c0_78, %c0_79] : memref<9x128x128xbf16, #tpu.memory_space<vmem>>, vector<1x128x128xbf16>
    %76 = vector.shape_cast %75 : vector<1x128x128xbf16> to vector<128x128xbf16>
    %cst_80 = arith.constant dense<0.000000e+00> : vector<16x128xf32>
    %77 = tpu.matmul %74, %76, %cst_80 {dimension_numbers = #tpu.dot_dimension_numbers<[1], [0], [0], [1], [0, 0, 1, 1], [], []>} : vector<16x128xbf16>, vector<128x128xbf16>, vector<16x128xf32> -> vector<16x128xf32>
    %78 = arith.addf %73, %77 : vector<16x128xf32>
    %c13 = arith.constant 13 : index
    %c0_81 = arith.constant 0 : index
    %79 = vector.load %arg10[%c13, %c0_81] : memref<32x128xbf16, #tpu.memory_space<vmem>>, vector<16x128xbf16>
    %c8_82 = arith.constant 8 : index
    %c0_83 = arith.constant 0 : index
    %c0_84 = arith.constant 0 : index
    %80 = vector.load %arg5[%c8_82, %c0_83, %c0_84] : memref<9x128x128xbf16, #tpu.memory_space<vmem>>, vector<1x128x128xbf16>
    %81 = vector.shape_cast %80 : vector<1x128x128xbf16> to vector<128x128xbf16>
    %cst_85 = arith.constant dense<0.000000e+00> : vector<16x128xf32>
    %82 = tpu.matmul %79, %81, %cst_85 {dimension_numbers = #tpu.dot_dimension_numbers<[1], [0], [0], [1], [0, 0, 1, 1], [], []>} : vector<16x128xbf16>, vector<128x128xbf16>, vector<16x128xf32> -> vector<16x128xf32>
    %83 = arith.addf %78, %82 : vector<16x128xf32>
    %84 = vector.broadcast %39 : vector<1x128xf32> to vector<16x128xf32>
    %85 = arith.addf %83, %84 : vector<16x128xf32>
    %cst_86 = arith.constant 0.000000e+00 : f32
    %86 = vector.broadcast %cst_86 : f32 to vector<16x128xf32>
    %87 = arith.maximumf %85, %86 : vector<16x128xf32>
    %c8_87 = arith.constant 8 : index
    %c0_88 = arith.constant 0 : index
    %88 = vector.load %arg2[%c8_87, %c0_88] : memref<32x1xf32, #tpu.memory_space<vmem>>, vector<16x1xf32>
    %89 = vector.broadcast %88 : vector<16x1xf32> to vector<16x128xf32>
    %90 = arith.mulf %87, %89 : vector<16x128xf32>
    %91 = arith.truncf %90 : vector<16x128xf32> to vector<16x128xbf16>
    %c8_89 = arith.constant 8 : index
    %c0_90 = arith.constant 0 : index
    %92 = vector.load %arg11[%c8_89, %c0_90] : memref<32x128xbf16, #tpu.memory_space<vmem>>, vector<16x128xbf16>
    tpu.vector_store %arg11[%c8_89, %c0_90], %91 {strides = array<i32>} : memref<32x128xbf16, #tpu.memory_space<vmem>>, vector<16x128xbf16>,
    %c0_91 = arith.constant 0 : index
    %c0_92 = arith.constant 0 : index
    %c0_93 = arith.constant 0 : index
    %93 = vector.load %arg8[%c0_91, %c0_92, %c0_93] : memref<1x1x128xf32, #tpu.memory_space<vmem>>, vector<1x1x128xf32>
    %94 = vector.shape_cast %93 : vector<1x1x128xf32> to vector<1x128xf32>
    %c3_94 = arith.constant 3 : index
    %c0_95 = arith.constant 0 : index
    %95 = vector.load %arg11[%c3_94, %c0_95] : memref<32x128xbf16, #tpu.memory_space<vmem>>, vector<16x128xbf16>
    %c0_96 = arith.constant 0 : index
    %c0_97 = arith.constant 0 : index
    %c0_98 = arith.constant 0 : index
    %96 = vector.load %arg7[%c0_96, %c0_97, %c0_98] : memref<9x128x128xbf16, #tpu.memory_space<vmem>>, vector<1x128x128xbf16>
    %97 = vector.shape_cast %96 : vector<1x128x128xbf16> to vector<128x128xbf16>
    %cst_99 = arith.constant dense<0.000000e+00> : vector<16x128xf32>
    %98 = tpu.matmul %95, %97, %cst_99 {dimension_numbers = #tpu.dot_dimension_numbers<[1], [0], [0], [1], [0, 0, 1, 1], [], []>} : vector<16x128xbf16>, vector<128x128xbf16>, vector<16x128xf32> -> vector<16x128xf32>
    %c4_100 = arith.constant 4 : index
    %c0_101 = arith.constant 0 : index
    %99 = vector.load %arg11[%c4_100, %c0_101] : memref<32x128xbf16, #tpu.memory_space<vmem>>, vector<16x128xbf16>
    %c1_102 = arith.constant 1 : index
    %c0_103 = arith.constant 0 : index
    %c0_104 = arith.constant 0 : index
    %100 = vector.load %arg7[%c1_102, %c0_103, %c0_104] : memref<9x128x128xbf16, #tpu.memory_space<vmem>>, vector<1x128x128xbf16>
    %101 = vector.shape_cast %100 : vector<1x128x128xbf16> to vector<128x128xbf16>
    %cst_105 = arith.constant dense<0.000000e+00> : vector<16x128xf32>
    %102 = tpu.matmul %99, %101, %cst_105 {dimension_numbers = #tpu.dot_dimension_numbers<[1], [0], [0], [1], [0, 0, 1, 1], [], []>} : vector<16x128xbf16>, vector<128x128xbf16>, vector<16x128xf32> -> vector<16x128xf32>
    %103 = arith.addf %98, %102 : vector<16x128xf32>
    %c5_106 = arith.constant 5 : index
    %c0_107 = arith.constant 0 : index
    %104 = vector.load %arg11[%c5_106, %c0_107] : memref<32x128xbf16, #tpu.memory_space<vmem>>, vector<16x128xbf16>
    %c2_108 = arith.constant 2 : index
    %c0_109 = arith.constant 0 : index
    %c0_110 = arith.constant 0 : index
    %105 = vector.load %arg7[%c2_108, %c0_109, %c0_110] : memref<9x128x128xbf16, #tpu.memory_space<vmem>>, vector<1x128x128xbf16>
    %106 = vector.shape_cast %105 : vector<1x128x128xbf16> to vector<128x128xbf16>
    %cst_111 = arith.constant dense<0.000000e+00> : vector<16x128xf32>
    %107 = tpu.matmul %104, %106, %cst_111 {dimension_numbers = #tpu.dot_dimension_numbers<[1], [0], [0], [1], [0, 0, 1, 1], [], []>} : vector<16x128xbf16>, vector<128x128xbf16>, vector<16x128xf32> -> vector<16x128xf32>
    %108 = arith.addf %103, %107 : vector<16x128xf32>
    %c7_112 = arith.constant 7 : index
    %c0_113 = arith.constant 0 : index
    %109 = vector.load %arg11[%c7_112, %c0_113] : memref<32x128xbf16, #tpu.memory_space<vmem>>, vector<16x128xbf16>
    %c3_114 = arith.constant 3 : index
    %c0_115 = arith.constant 0 : index
    %c0_116 = arith.constant 0 : index
    %110 = vector.load %arg7[%c3_114, %c0_115, %c0_116] : memref<9x128x128xbf16, #tpu.memory_space<vmem>>, vector<1x128x128xbf16>
    %111 = vector.shape_cast %110 : vector<1x128x128xbf16> to vector<128x128xbf16>
    %cst_117 = arith.constant dense<0.000000e+00> : vector<16x128xf32>
    %112 = tpu.matmul %109, %111, %cst_117 {dimension_numbers = #tpu.dot_dimension_numbers<[1], [0], [0], [1], [0, 0, 1, 1], [], []>} : vector<16x128xbf16>, vector<128x128xbf16>, vector<16x128xf32> -> vector<16x128xf32>
    %113 = arith.addf %108, %112 : vector<16x128xf32>
    %c8_118 = arith.constant 8 : index
    %c0_119 = arith.constant 0 : index
    %114 = vector.load %arg11[%c8_118, %c0_119] : memref<32x128xbf16, #tpu.memory_space<vmem>>, vector<16x128xbf16>
    %c4_120 = arith.constant 4 : index
    %c0_121 = arith.constant 0 : index
    %c0_122 = arith.constant 0 : index
    %115 = vector.load %arg7[%c4_120, %c0_121, %c0_122] : memref<9x128x128xbf16, #tpu.memory_space<vmem>>, vector<1x128x128xbf16>
    %116 = vector.shape_cast %115 : vector<1x128x128xbf16> to vector<128x128xbf16>
    %cst_123 = arith.constant dense<0.000000e+00> : vector<16x128xf32>
    %117 = tpu.matmul %114, %116, %cst_123 {dimension_numbers = #tpu.dot_dimension_numbers<[1], [0], [0], [1], [0, 0, 1, 1], [], []>} : vector<16x128xbf16>, vector<128x128xbf16>, vector<16x128xf32> -> vector<16x128xf32>
    %118 = arith.addf %113, %117 : vector<16x128xf32>
    %c9_124 = arith.constant 9 : index
    %c0_125 = arith.constant 0 : index
    %119 = vector.load %arg11[%c9_124, %c0_125] : memref<32x128xbf16, #tpu.memory_space<vmem>>, vector<16x128xbf16>
    %c5_126 = arith.constant 5 : index
    %c0_127 = arith.constant 0 : index
    %c0_128 = arith.constant 0 : index
    %120 = vector.load %arg7[%c5_126, %c0_127, %c0_128] : memref<9x128x128xbf16, #tpu.memory_space<vmem>>, vector<1x128x128xbf16>
    %121 = vector.shape_cast %120 : vector<1x128x128xbf16> to vector<128x128xbf16>
    %cst_129 = arith.constant dense<0.000000e+00> : vector<16x128xf32>
    %122 = tpu.matmul %119, %121, %cst_129 {dimension_numbers = #tpu.dot_dimension_numbers<[1], [0], [0], [1], [0, 0, 1, 1], [], []>} : vector<16x128xbf16>, vector<128x128xbf16>, vector<16x128xf32> -> vector<16x128xf32>
    %123 = arith.addf %118, %122 : vector<16x128xf32>
    %c11_130 = arith.constant 11 : index
    %c0_131 = arith.constant 0 : index
    %124 = vector.load %arg11[%c11_130, %c0_131] : memref<32x128xbf16, #tpu.memory_space<vmem>>, vector<16x128xbf16>
    %c6_132 = arith.constant 6 : index
    %c0_133 = arith.constant 0 : index
    %c0_134 = arith.constant 0 : index
    %125 = vector.load %arg7[%c6_132, %c0_133, %c0_134] : memref<9x128x128xbf16, #tpu.memory_space<vmem>>, vector<1x128x128xbf16>
    %126 = vector.shape_cast %125 : vector<1x128x128xbf16> to vector<128x128xbf16>
    %cst_135 = arith.constant dense<0.000000e+00> : vector<16x128xf32>
    %127 = tpu.matmul %124, %126, %cst_135 {dimension_numbers = #tpu.dot_dimension_numbers<[1], [0], [0], [1], [0, 0, 1, 1], [], []>} : vector<16x128xbf16>, vector<128x128xbf16>, vector<16x128xf32> -> vector<16x128xf32>
    %128 = arith.addf %123, %127 : vector<16x128xf32>
    %c12_136 = arith.constant 12 : index
    %c0_137 = arith.constant 0 : index
    %129 = vector.load %arg11[%c12_136, %c0_137] : memref<32x128xbf16, #tpu.memory_space<vmem>>, vector<16x128xbf16>
    %c7_138 = arith.constant 7 : index
    %c0_139 = arith.constant 0 : index
    %c0_140 = arith.constant 0 : index
    %130 = vector.load %arg7[%c7_138, %c0_139, %c0_140] : memref<9x128x128xbf16, #tpu.memory_space<vmem>>, vector<1x128x128xbf16>
    %131 = vector.shape_cast %130 : vector<1x128x128xbf16> to vector<128x128xbf16>
    %cst_141 = arith.constant dense<0.000000e+00> : vector<16x128xf32>
    %132 = tpu.matmul %129, %131, %cst_141 {dimension_numbers = #tpu.dot_dimension_numbers<[1], [0], [0], [1], [0, 0, 1, 1], [], []>} : vector<16x128xbf16>, vector<128x128xbf16>, vector<16x128xf32> -> vector<16x128xf32>
    %133 = arith.addf %128, %132 : vector<16x128xf32>
    %c13_142 = arith.constant 13 : index
    %c0_143 = arith.constant 0 : index
    %134 = vector.load %arg11[%c13_142, %c0_143] : memref<32x128xbf16, #tpu.memory_space<vmem>>, vector<16x128xbf16>
    %c8_144 = arith.constant 8 : index
    %c0_145 = arith.constant 0 : index
    %c0_146 = arith.constant 0 : index
    %135 = vector.load %arg7[%c8_144, %c0_145, %c0_146] : memref<9x128x128xbf16, #tpu.memory_space<vmem>>, vector<1x128x128xbf16>
    %136 = vector.shape_cast %135 : vector<1x128x128xbf16> to vector<128x128xbf16>
    %cst_147 = arith.constant dense<0.000000e+00> : vector<16x128xf32>
    %137 = tpu.matmul %134, %136, %cst_147 {dimension_numbers = #tpu.dot_dimension_numbers<[1], [0], [0], [1], [0, 0, 1, 1], [], []>} : vector<16x128xbf16>, vector<128x128xbf16>, vector<16x128xf32> -> vector<16x128xf32>
    %138 = arith.addf %133, %137 : vector<16x128xf32>
    %139 = vector.broadcast %94 : vector<1x128xf32> to vector<16x128xf32>
    %140 = arith.addf %138, %139 : vector<16x128xf32>
    %c8_148 = arith.constant 8 : index
    %c0_149 = arith.constant 0 : index
    %141 = vector.load %arg10[%c8_148, %c0_149] : memref<32x128xbf16, #tpu.memory_space<vmem>>, vector<16x128xbf16>
    %142 = arith.extf %141 : vector<16x128xbf16> to vector<16x128xf32>
    %143 = arith.addf %140, %142 : vector<16x128xf32>
    %cst_150 = arith.constant 0.000000e+00 : f32
    %144 = vector.broadcast %cst_150 : f32 to vector<16x128xf32>
    %145 = arith.maximumf %143, %144 : vector<16x128xf32>
    %146 = arith.truncf %145 : vector<16x128xf32> to vector<16x128xbf16>
    %c8_151 = arith.constant 8 : index
    %c0_152 = arith.constant 0 : index
    %147 = vector.load %arg10[%c8_151, %c0_152] : memref<32x128xbf16, #tpu.memory_space<vmem>>, vector<16x128xbf16>
    tpu.vector_store %arg10[%c8_151, %c0_152], %146 {strides = array<i32>} : memref<32x128xbf16, #tpu.memory_space<vmem>>, vector<16x128xbf16>,
    %c13_153 = arith.constant 13 : index
    %c0_154 = arith.constant 0 : index
    %148 = vector.load %arg10[%c13_153, %c0_154] : memref<32x128xbf16, #tpu.memory_space<vmem>>, vector<2x128xbf16>
    %c0_155 = arith.constant 0 : index
    %c0_156 = arith.constant 0 : index
    %c0_157 = arith.constant 0 : index
    %149 = vector.load %arg9[%c0_155, %c0_156, %c0_157] : memref<1x4x128xbf16, #tpu.memory_space<vmem>>, vector<1x2x128xbf16>
    %150 = vector.shape_cast %149 : vector<1x2x128xbf16> to vector<2x128xbf16>
    %151 = vector.shape_cast %148 : vector<2x128xbf16> to vector<1x2x128xbf16>
    tpu.vector_store %arg9[%c0_155, %c0_156, %c0_157], %151 {strides = array<i32>} : memref<1x4x128xbf16, #tpu.memory_space<vmem>>, vector<1x2x128xbf16>,
    %c17 = arith.constant 17 : index
    %c0_158 = arith.constant 0 : index
    %152 = vector.load %arg10[%c17, %c0_158] : memref<32x128xbf16, #tpu.memory_space<vmem>>, vector<2x128xbf16>
    %c0_159 = arith.constant 0 : index
    %c2_160 = arith.constant 2 : index
    %c0_161 = arith.constant 0 : index
    %153 = vector.load %arg9[%c0_159, %c2_160, %c0_161] : memref<1x4x128xbf16, #tpu.memory_space<vmem>>, vector<1x2x128xbf16>
    %154 = vector.shape_cast %153 : vector<1x2x128xbf16> to vector<2x128xbf16>
    %155 = vector.shape_cast %152 : vector<2x128xbf16> to vector<1x2x128xbf16>
    tpu.vector_store %arg9[%c0_159, %c2_160, %c0_161], %155 {strides = array<i32>} : memref<1x4x128xbf16, #tpu.memory_space<vmem>>, vector<1x2x128xbf16>,
    return
  }
  func.func @transform_0(%arg0: i32) -> (i32, i32, i32) {
    %c0_i32 = arith.constant 0 : i32
    %c0_i32_0 = arith.constant 0 : i32
    %c0_i32_1 = arith.constant 0 : i32
    return %arg0, %c0_i32, %c0_i32_0 : i32, i32, i32
  }
  func.func @transform_1(%arg0: i32) -> (i32, i32) {
    %c0_i32 = arith.constant 0 : i32
    %c0_i32_0 = arith.constant 0 : i32
    %c0_i32_1 = arith.constant 0 : i32
    return %c0_i32, %c0_i32_0 : i32, i32
  }
  func.func @transform_2(%arg0: i32) -> (i32, i32, i32) {
    %c0_i32 = arith.constant 0 : i32
    %c0_i32_0 = arith.constant 0 : i32
    %c0_i32_1 = arith.constant 0 : i32
    %c0_i32_2 = arith.constant 0 : i32
    return %c0_i32, %c0_i32_0, %c0_i32_1 : i32, i32, i32
  }
  func.func @transform_3(%arg0: i32) -> (i32, i32) {
    %c0_i32 = arith.constant 0 : i32
    %c0_i32_0 = arith.constant 0 : i32
    %c0_i32_1 = arith.constant 0 : i32
    return %c0_i32, %c0_i32_0 : i32, i32
  }
  func.func @transform_4(%arg0: i32) -> (i32, i32, i32) {
    %c0_i32 = arith.constant 0 : i32
    %c0_i32_0 = arith.constant 0 : i32
    %c0_i32_1 = arith.constant 0 : i32
    %c0_i32_2 = arith.constant 0 : i32
    return %c0_i32, %c0_i32_0, %c0_i32_1 : i32, i32, i32
  }
  func.func @transform_5(%arg0: i32) -> (i32, i32, i32) {
    %c0_i32 = arith.constant 0 : i32
    %c0_i32_0 = arith.constant 0 : i32
    %c0_i32_1 = arith.constant 0 : i32
    %c0_i32_2 = arith.constant 0 : i32
    return %c0_i32, %c0_i32_0, %c0_i32_1 : i32, i32, i32
  }
  func.func @transform_6(%arg0: i32) -> (i32, i32, i32) {
    %c0_i32 = arith.constant 0 : i32
    %c0_i32_0 = arith.constant 0 : i32
    %c0_i32_1 = arith.constant 0 : i32
    %c0_i32_2 = arith.constant 0 : i32
    return %c0_i32, %c0_i32_0, %c0_i32_1 : i32, i32, i32
  }
  func.func @transform_7(%arg0: i32) -> (i32, i32, i32) {
    %c0_i32 = arith.constant 0 : i32
    %c0_i32_0 = arith.constant 0 : i32
    %c0_i32_1 = arith.constant 0 : i32
    %c0_i32_2 = arith.constant 0 : i32
    return %c0_i32, %c0_i32_0, %c0_i32_1 : i32, i32, i32
  }
  func.func @transform_8(%arg0: i32) -> (i32, i32, i32) {
    %c0_i32 = arith.constant 0 : i32
    %c0_i32_0 = arith.constant 0 : i32
    %c0_i32_1 = arith.constant 0 : i32
    return %arg0, %c0_i32, %c0_i32_0 : i32, i32, i32
  }
}

</mosaic_0001>

<bundles_post_ra>
// kernel: down_sample_res_net_forward.3
= control target key start
LH: loop header
LB: loop body
LE: loop exit
PB: predicated region body
PF: predicated region fallthrough
CT: control target
= control target key end

     0   :  { %13 = vsyncpa [#allocation5], 0  ;;  %s6435_s27 = smov 0   ;;  %s8008_s0 = inlined_call_operand.vmem [shape: bf16[2,132,16], index: 0, kind: input, shape index: {}]   ;;  %s8009_s1 = inlined_call_operand.vmem [shape: f32[132,1], index: 1, kind: input, shape index: {}]   ;;  %s8010_s2 = inlined_call_operand.hbm [shape: bf16[4,16,128], index: 2, kind: input, shape index: {}]   ;;  %s8011_s3 = inlined_call_operand.vmem [shape: f32[1,128], index: 3, kind: input, shape index: {}]   ;;  %s8012_s4 = inlined_call_operand.vmem [shape: bf16[9,128,128], index: 4, kind: input, shape index: {}]   ;;  %s8013_s5 = inlined_call_operand.vmem [shape: f32[1,1,128], index: 5, kind: input, shape index: {}]   ;;  %s8014_s6 = inlined_call_operand.vmem [shape: bf16[9,128,128], index: 6, kind: input, shape index: {}]   ;;  %s8015_s7 = inlined_call_operand.vmem [shape: f32[1,1,128], index: 7, kind: input, shape index: {}]   ;;  %s8016_s8 = inlined_call_operand.vmem [shape: bf16[2,64,128], index: 8, kind: output, shape index: {}]  }
   0x1 LB: > { %s237_s30 = sshll.u32 %s8010_s2, 4  ;;  %s4790_s9 = sadd.s32 4294967295, %s6384_s27   ;;  %s6384_s27 = sphi %s6435_s27, %s19_s27   ;;  %s238_s30 = int_to_ptr.hbm [resolvable:$true] %s237_s30 }
   0x2   : > { %p4792_p0 = scmp.ge.s32.totalorder %s6384_s27, 1  ;;  %p223_p1 = scmp.lt.s32.totalorder %s6384_s27, 3 }
   0x3   : > { %p6318_p2 = scmp.eq.s32.totalorder %s4790_s9, 0  ;;  %s6386_s10 = smov [#allocation4]  }
   0x4   : > { %p224_p3 = pnand %p4792_p0, %p223_p1  ;;  %s239_s11 = sshll.u32 %s6386_s10, 4  ;;  %s240_s11 = int_to_ptr.vmem [resolvable:$true] %s239_s11 }
   0x5   : > { %s6387_s12 = smov 64   ;;  %s6388_s13 = smov 4  }
   0x6   : > { %p6314_p4 = pneg %p224_p3  ;;  %278 = sbr.rel (%p224_p3) target bundleno = 1090 (0x442), region = 52 }
   0x8   : > { %p6315_p5 = pnand %p6318_p2, %p6314_p4 }
   0xa   : > { %6317 = dma.hbm_to_vmem [thread:$0]  (!%p6315_p5), %s238_s30, 512, %s240_s11, [#allocation5], %s6387_s12, %s6387_s12, %s6388_s13  }
   0xb   : > { %6373 = dma.done.wait (%p6318_p2), [#allocation5], 512  }
   0xc   : > { %6375 = vsyncadd (%p6318_p2), [#allocation5], 4294966784  ;;  %p313_p6 = scmp.lt.s32.totalorder %s4790_s9, 1  ;;  %v6389_v0 = vmov 0   ;;  %v5792_v1 = vld [vmem:[#allocation4 + $0x8] sm:$0xff]  ;;  %vm390_vm0 = vcmask 1044480  }
   0xd   : > { %6332 = vset.pattern.permute.xlu0 %v6389_v0  ;;  %6333 = vset.pattern.permute.xlu1 %v6389_v0  ;;  %324 = vst [vmem:[#allocation2] sm:$0xf] %v6389_v0  ;;  %vm410_vm1 = vcmask 130048   ;;  %v5791_v4 = vld [vmem:[#allocation4] sm:$0xff]  ;;  %v5793_v5 = vld [vmem:[#allocation4 + $0x10] sm:$0xff]  ;;  %v5794_v6 = vld [vmem:[#allocation4 + $0x18] sm:$0xff] }
   0xe   : > { %s8026_s9 = smov (!%p313_p6, %s4790_s9), 1  ;;  %6334 = vset.pattern.permute.xlu2 %v6389_v0  ;;  %325 = vst [vmem:[#allocation2 + $0x4] sm:$0xf] %v6389_v0  ;;  %6274 = vmatpush.bf16.msra.mxu2 %v5792_v1  ;;  %v6469_v13 = vld [vmem:[%s8009_s1 + $0x10] sm:$0xff]  ;;  %v6481_v21 = vld [vmem:[%s8009_s1 + $0x20] sm:$0xff]  ;;  %v6493_v26 = vld [vmem:[%s8009_s1 + $0x18] sm:$0xff] }
   0xf   : > { %s6309_s14 = smul.u32 68, %s8026_s9  ;;  %326 = vst [vmem:[#allocation2 + $0x38] sm:$0xc] %v6389_v0  ;;  %439 = vmatpush.bf16.msra.mxu0 %v5792_v1  ;;  %6275 = vmatpush.bf16.msra.mxu3 %v5791_v4  ;;  %vm478_vm2 = vsmask.f32 5376  ;;  %v6501_v29 = vld [vmem:[%s8009_s1 + $0x28] sm:$0xff] }
  0x10   : > { %327 = vst [vmem:[#allocation2 + $0x3c] sm:$0xf] %v6389_v0  ;;  %946 = vperm.xlu0 %6332, %v6469_v13   ;;  %575 = vmatpush.bf16.msra.mxu1 %v5791_v4  ;;  %v6513_v47 = vld [vmem:[%s8009_s1 + $0x40] sm:$0xff]  ;;  %v6519_v53 = vld [vmem:[%s8009_s1 + $0x48] sm:$0xff]  ;;  %v6532_v61 = vld [vmem:[%s8009_s1 + $0x58] sm:$0xff]  ;;  %vm2387_vm6 = vcmask 1046528  }
  0x11   : > { %s6452_s17 = scalar_lea.vmem %s8008_s0, %s6309_s14  ;;  %329 = vst [vmem:[#allocation3] sm:$0xf] %v6389_v0  ;;  %956 = vperm.xlu1 %6333, %v6481_v21   ;;  %v6539_v63 = vld [vmem:[%s8009_s1 + $0x60] sm:$0xff]  ;;  %vm663_vm3 = vsmask.f32 4352  ;;  %s5784_s21 = sshll.u32 %s8026_s9, 5 }
  0x12   : > { %v6455_v2 = vld [vmem:[%s6452_s17 + $0x20] sm:$0xff]  ;;  %v6458_v3 = vld [vmem:[%s6452_s17 + $0x28] sm:$0xff]  ;;  %330 = vst [vmem:[#allocation3 + $0x4] sm:$0xf] %v6389_v0  ;;  %760 = vmatpush.bf16.msrb.mxu2 %v5793_v5  ;;  %v4822_v17 = vld [vmem:[%s6452_s17 + $0x30] sm:$0xf]  ;;  %s7951_s23 = scalar_lea.vmem %s8016_s8, %s5784_s21 }
  0x13   : > { %v398_v7 = vrot.slane %v6455_v2, 3  ;;  %v400_v8 = vrot.slane %v6458_v3, 3  ;;  %v515_v9 = vshrl.u32 %v6455_v2, 16  ;;  %v518_v10 = vshll.u32 %v6455_v2, 16  ;;  %331 = vst [vmem:[#allocation3 + $0x38] sm:$0xc] %v6389_v0  ;;  %853 = vmatpush.bf16.msrb.mxu3 %v5794_v6 }
  0x14   : > { %v524_v11 = vshrl.u32 %v6458_v3, 16  ;;  %v527_v12 = vshll.u32 %v6458_v3, 16  ;;  %332 = vst [vmem:[#allocation3 + $0x3c] sm:$0xf] %v6389_v0  ;;  %v5790_v18 = vld [vmem:[%s6452_s17 + $0x30] sm:$0x10] }
  0x15   : > { %v401_v14 = vsel %vm390_vm0, %v398_v7, %v400_v8  ;;  %v517_v15 = vrot.slane %v515_v9, 2  ;;  %v520_v16 = vrot.slane %v518_v10, 3  ;;  %v6485_v23 = vor.u32 %v5790_v18, %v4822_v17  ;;  %v336_v30 = vld [vmem:[%s6452_s17 + $0x4] sm:$0xf]  ;;  %v5785_v31 = vld [vmem:[%s6452_s17 + $0x8] sm:$0xff]  ;;  %v5786_v62 = vld [vmem:[%s6452_s17 + $0x10] sm:$0xff] }
  0x16   : > { %4832 = vmatmul.msk.bf16.vlgmr.msra.gmra.mxu2 %vm410_vm1, %v401_v14  ;;  %v526_v19 = vrot.slane %v524_v11, 2  ;;  %v529_v20 = vrot.slane %v527_v12, 3  ;;  %v351_v32 = vld [vmem:[%s6452_s17] sm:$0x8]  ;;  %v370_v33 = vunpack.c.l.b16 %v336_v30  ;;  %v488_v40 = vshrl.u32 %v5785_v31, 16  ;;  %v6279_v12 = vld [vmem:[%s6452_s17 + $0xc] sm:$0xff]  }
  0x17   : > { %v6483_v22 = vor.u32 %v520_v16, %v517_v15  ;;  %v533_v27 = vshrl.u32 %v6485_v23, 16  ;;  %v536_v28 = vshll.u32 %v6485_v23, 16  ;;  %v335_v34 = vld [vmem:[%s6452_s17] sm:$0xc]  ;;  %v402_v35 = vrot.slane %v6485_v23, 3 }
  0x18   : > { %v530_v24 = vor.u32 %v529_v20, %v526_v19  ;;  %951 = vperm.xlu0 %6332, %v6493_v26   ;;  %v369_v36 = vunpack.c.l.b16 %v351_v32  ;;  %v476_v37 = vunpack.c.l.b16 %v335_v34  ;;  %v491_v41 = vshll.u32 %v5785_v31, 16  ;;  %v6189_v6 = vld [vmem:[%s6452_s17 + $0x4] sm:$0x8]  ;;  %v943_v9 = vld [vmem:[%s8009_s1 + $0x70] sm:$0xf] }
  0x19   : > { %v535_v38 = vrot.slane %v533_v27, 2  ;;  %v538_v39 = vrot.slane %v536_v28, 3  ;;  %961 = vperm.xlu1 %6333, %v6501_v29   ;;  %v392_v43 = vrot.slane %v5785_v31, 3  ;;  %v490_v45 = vrot.slane %v488_v40, 2  ;;  %v935_v27 = vld [vmem:[%s8009_s1 + $0x30] sm:$0xff]  ;;  %v5787_v28 = vld [vmem:[%s6452_s17 + $0x18] sm:$0xff] }
  0x1a   : > { %v531_v25 = vsel %vm478_vm2, %v6483_v22, %v530_v24  ;;  %v383_v42 = vpack.c.b16 %v370_v33, %v369_v36  ;;  %v477_v44 = vpack.c.b16 %v370_v33, %v476_v37  ;;  %v493_v46 = vrot.slane %v491_v41, 3  ;;  %966 = vperm.xlu2 %6334, %v935_v27   ;;  %v2716_v36 = vld [vmem:[%s8009_s1 + $0x38] sm:$0xff] }
  0x1b   : > { %4843 = vmatmul.msk.bf16.vlgmr.msra.gmra.mxu3 %vm410_vm1, %v531_v25  ;;  %v403_v51 = vsel %vm390_vm0, %v400_v8, %v402_v35  ;;  %v539_v52 = vor.u32 %v538_v39, %v535_v38  ;;  %v497_v0 = vshrl.u32 %v5786_v62, 16  ;;  %v500_v1 = vshll.u32 %v5786_v62, 16  ;;  %v6277_v8 = vld [vmem:[%s6452_s17 + $0x4] sm:$0xf0]   ;;  %v6281_v39 = vld [vmem:[%s6452_s17 + $0x14] sm:$0xff]  }
  0x1c   : > { %v391_v48 = vrot.slane %v383_v42, 3  ;;  %v480_v49 = vshrl.u32 %v477_v44, 16  ;;  %v483_v50 = vshll.u32 %v477_v44, 16  ;;  %v494_v57 = vor.u32 %v493_v46, %v490_v45  ;;  %v6145_v42 = vld [vmem:[%s6452_s17 + $0x8] sm:$0xff]  }
  0x1d   : > { %v540_v59 = vsel %vm478_vm2, %v530_v24, %v539_v52  ;;  %v394_v3 = vrot.slane %v5786_v62, 3  ;;  %v499_v4 = vrot.slane %v497_v0, 2  ;;  %v502_v5 = vrot.slane %v500_v1, 3 }
  0x1e   : > { %v393_v54 = vsel %vm390_vm0, %v391_v48, %v392_v43  ;;  %v482_v55 = vrot.slane %v480_v49, 2  ;;  %v485_v56 = vrot.slane %v483_v50, 3  ;;  %v6190_v14 = vor.u32 %v6277_v8, %v6189_v6  ;;  %v6283_v50 = vld [vmem:[%s6452_s17 + $0x1c] sm:$0xff]  }
  0x1f   : > { %4828 = vmatmul.msk.bf16.vlgmr.msra.gmra.mxu0 %vm410_vm1, %v393_v54  ;;  %v395_v10 = vsel %vm390_vm0, %v392_v43, %v394_v3  ;;  %v503_v11 = vor.u32 %v502_v5, %v499_v4  ;;  %v673_v18 = vshrl.u32 %v6279_v12, 16  ;;  %v676_v19 = vshll.u32 %v6279_v12, 16  ;;  %v2719_v43 = vld [vmem:[%s8009_s1 + $0x50] sm:$0xff]  ;;  %v6148_v6 = vld [vmem:[%s6452_s17 + $0x20] sm:$0xff]  }
  0x20   : > { %976 = vperm.xlu0 %6332, %v6513_v47   ;;  %v486_v58 = vor.u32 %v485_v56, %v482_v55  ;;  %v665_v16 = vshrl.u32 %v6190_v14, 16  ;;  %v668_v17 = vshll.u32 %v6190_v14, 16  ;;  %v396_v30 = vrot.slane %v5787_v28, 3  ;;  %v6146_v54 = vld [vmem:[%s6452_s17 + $0x10] sm:$0xff]  }
  0x21   : > { %981 = vperm.xlu1 %6333, %v6519_v53   ;;  %v504_v15 = vsel %vm478_vm2, %v494_v57, %v503_v11  ;;  %v675_v24 = vrot.slane %v673_v18, 3  ;;  %v678_v25 = vrot.slane %v676_v19, 4  ;;  %v506_v31 = vshrl.u32 %v5787_v28, 16  ;;  %v6149_v18 = vld [vmem:[%s6452_s17 + $0x28] sm:$0xff]  }
  0x22   : > { %v495_v60 = vsel %vm478_vm2, %v486_v58, %v494_v57  ;;  %v667_v20 = vrot.slane %v665_v16, 3  ;;  %v670_v23 = vrot.slane %v668_v17, 4  ;;  %v397_v37 = vsel %vm390_vm0, %v394_v3, %v396_v30  ;;  %971 = vperm.xlu2 %6334, %v2716_v36   ;;  %v6286_v3 = vld [vmem:[%s6452_s17 + $0x2c] sm:$0xff]  }
  0x23   : > { %4839 = vmatmul.msk.bf16.vlgmr.msra.gmra.mxu1 %vm410_vm1, %v495_v60  ;;  %v679_v33 = vor.u32 %v678_v25, %v675_v24  ;;  %v508_v34 = vrot.slane %v506_v31, 2  ;;  %v682_v40 = vshrl.u32 %v6281_v39, 16  ;;  %v685_v41 = vshll.u32 %v6281_v39, 16  ;;  %v5815_v24 = vld [vmem:[%s8012_s4 + $0x78] sm:$0xff] }
  0x24   : > { %v671_v32 = vor.u32 %v670_v23, %v667_v20  ;;  %v399_v48 = vsel %vm390_vm0, %v396_v30, %v398_v7  ;;  %v691_v2 = vshrl.u32 %v6283_v50, 16  ;;  %v694_v7 = vshll.u32 %v6283_v50, 16  ;;  %1200 = vmatpush.bf16.msrb.mxu0 %v5815_v24  ;;  %v5823_v39 = vld [vmem:[%s8012_s4 + $0xb8] sm:$0xff]  ;;  %v5820_v50 = vld [vmem:[%s8012_s4 + $0xa0] sm:$0xff]  ;;  %v5826_v24 = vld [vmem:[%s8012_s4 + $0xd0] sm:$0xff] }
  0x25   : > { %v684_v44 = vrot.slane %v682_v40, 3  ;;  %v687_v45 = vrot.slane %v685_v41, 4  ;;  %v709_v4 = vshrl.u32 %v6286_v3, 16  ;;  %v712_v5 = vshll.u32 %v6286_v3, 16  ;;  %1519 = vmatpush.bf16.msra.mxu2 %v5823_v39  ;;  %v5806_v40 = vld [vmem:[%s8012_s4 + $0x30] sm:$0xff]  ;;  %v5825_v39 = vld [vmem:[%s8012_s4 + $0xc8] sm:$0xff] }
  0x26   : > { %4833 = vmatmul.msk.bf16.gmra.mxu2 %vm410_vm1, %v403_v51  ;;  %v2723_v51 = vld [vmem:[%s8009_s1 + $0x70] sm:$0xf]  ;;  %v693_v55 = vrot.slane %v691_v2, 3  ;;  %v696_v56 = vrot.slane %v694_v7, 4  ;;  %v5803_v7 = vld [vmem:[%s8012_s4 + $0x18] sm:$0xff] }
  0x27   : > { %v688_v46 = vor.u32 %v687_v45, %v684_v44  ;;  %v711_v8 = vrot.slane %v709_v4, 3  ;;  %v5822_v41 = vld [vmem:[%s8012_s4 + $0xb0] sm:$0xff]  ;;  %v5805_v44 = vld [vmem:[%s8012_s4 + $0x28] sm:$0xff]  ;;  %vm2533_vm4 = vsmask.f32 6400 }
  0x28   : > { %991 = vperm.xlu0 %6332, %v6532_v61   ;;  %v697_v57 = vor.u32 %v696_v56, %v693_v55  ;;  %v5821_v45 = vld [vmem:[%s8012_s4 + $0xa8] sm:$0xff]  ;;  %v5810_v2 = vld [vmem:[%s8012_s4 + $0x50] sm:$0xff]  ;;  %v5831_v56 = vld [vmem:[%s8012_s4 + $0xf8] sm:$0xff]  ;;  %vm1970_vm5 = vsmask.f32 7424 }
  0x29   : > { %996 = vperm.xlu1 %6333, %v6539_v63   ;;  %v689_v49 = vsel %vm663_vm3, %v679_v33, %v688_v46  ;;  %1520 = vmatpush.bf16.msra.mxu2 %v5822_v41  ;;  %vm4555_vm7 = vsmask.f32 2304  ;;  %vm4556_vm8 = vsmask.f32 6416  ;;  %vm4580_vm9 = vsmask.f32 1280 }
  0x2a   : > { %986 = vperm.xlu2 %6334, %v2719_v43   ;;  %v698_v58 = vsel %vm663_vm3, %v688_v46, %v697_v57  ;;  %1758 = vmatpush.bf16.msra.mxu3 %v5831_v56  ;;  %vm4581_vm10 = vsmask.f32 5392  ;;  %vm7944_vm11 = vmor %vm4555_vm7, %vm4556_vm8  ;;  %vm4605_vm13 = vsmask.f32 256  ;;  %vm4606_vm14 = vsmask.f32 4368 }
  0x2b   : > { %4844 = vmatmul.msk.bf16.gmra.mxu3 %vm410_vm1, %v540_v59  ;;  %v6285_v59 = vld [vmem:[%s6452_s17 + $0x24] sm:$0xff]   ;;  %vm7955_vm12 = vmor %vm4580_vm9, %vm4581_vm10 }
  0x2c   : > { %v703_v60 = vshll.u32 %v6285_v59, 16  ;;  %vm7969_vm15 = vmor %vm4605_vm13, %vm4606_vm14 }
  0x2d   : > { %1521 = vmatpush.bf16.msra.mxu2 %v5821_v45 }
  0x2e   : > { %v705_v0 = vrot.slane %v703_v60, 4  ;;  %v5818_v60 = vld [vmem:[%s8012_s4 + $0x90] sm:$0xff] }
  0x2f   : > { %4829 = vmatmul.msk.bf16.gmra.mxu0 %vm410_vm1, %v395_v10  ;;  %v6150_v10 = vld [vmem:[%s6452_s17 + $0x30] sm:$0xff]  }
  0x30   : > { %1006 = vperm.xlu0 %6332, %v943_v9   ;;  %v714_v9 = vrot.slane %v712_v5, 4  ;;  %v5829_v5 = vld [vmem:[%s8012_s4 + $0xe8] sm:$0xff] }
  0x31   : > { %2726 = vperm.xlu1 %6333, %v6469_v13   ;;  %v509_v13 = vshll.u32 %v5787_v28, 16  ;;  %1522 = vmatpush.bf16.msra.mxu2 %v5820_v50  ;;  %v5824_v50 = vld [vmem:[%s8012_s4 + $0xc0] sm:$0xff] }
  0x32   : > { %v715_v12 = vor.u32 %v714_v9, %v711_v8  ;;  %v5816_v8 = vld [vmem:[%s8012_s4 + $0x80] sm:$0xff] }
  0x33   : > { %4840 = vmatmul.msk.bf16.gmra.mxu1 %vm410_vm1, %v504_v15  ;;  %v5828_v9 = vld [vmem:[%s8012_s4 + $0xe0] sm:$0xff] }
  0x36   : > { %4834 = vmatmul.msk.bf16.gmra.mxu2 %vm410_vm1, %v402_v35  ;;  %v511_v35 = vrot.slane %v509_v13, 3  ;;  %v5813_v13 = vld [vmem:[%s8012_s4 + $0x68] sm:$0xff] }
  0x38   : > { %2736 = vperm.xlu0 %6332, %v6481_v21   ;;  %v512_v38 = vor.u32 %v511_v35, %v508_v34  ;;  %v680_v21 = vsel %vm663_vm3, %v671_v32, %v679_v33  ;;  %v5812_v34 = vld [vmem:[%s8012_s4 + $0x60] sm:$0xff] }
  0x39   : > { %2741 = vperm.xlu1 %6333, %v6501_v29  }
  0x3a   : > { %v513_v29 = vsel %vm478_vm2, %v503_v11, %v512_v38  ;;  %v624_v11 = vld [vmem:[%s6452_s17 + $0x38] sm:$0x3] }
  0x3b   : > { %4845 = vmatmul.msk.bf16.gmra.mxu3 %vm410_vm1, %v539_v52  ;;  %v522_v52 = vsel %vm478_vm2, %v512_v38, %v6483_v22  ;;  %v700_v22 = vshrl.u32 %v6285_v59, 16  ;;  %v655_v14 = vunpack.c.l.b16 %v624_v11  ;;  %v5809_v59 = vld [vmem:[%s8012_s4 + $0x48] sm:$0xff] }
  0x3d   : > { %v702_v62 = vrot.slane %v700_v22, 3  ;;  %v818_v35 = vpack.c.b16 %v655_v14, %v655_v14  ;;  %v5802_v22 = vld [vmem:[%s8012_s4 + $0x10] sm:$0xff] }
  0x3f   : > { %4830 = vmatmul.msk.bf16.gmra.mxu0 %vm410_vm1, %v397_v37 }
  0x40   : > { %2751 = vperm.xlu0 %6332, %v2716_v36  }
  0x41   : > { %2756 = vperm.xlu1 %6333, %v6513_v47   ;;  %v2722_v47 = vld [vmem:[%s8009_s1 + $0x68] sm:$0xff] }
  0x42   : > { %1001 = vperm.xlu2 %6334, %v2722_v47  }
  0x43   : > { %4841 = vmatmul.msk.bf16.gmra.mxu1 %vm410_vm1, %v513_v29 }
  0x46   : > { %4850 = vmatmul.msk.bf16.vlgmr.msrb.gmra.mxu2 %vm410_vm1, %v680_v21  ;;  %v5807_v21 = vld [vmem:[%s8012_s4 + $0x38] sm:$0xff] }
  0x47   : > { %1363 = vmatpush.bf16.msrb.mxu1 %v5807_v21 }
  0x48   : > { %2766 = vperm.xlu0 %6332, %v2719_v43  }
  0x49   : > { %2771 = vperm.xlu1 %6333, %v6532_v61   ;;  %v6147_v61 = vld [vmem:[%s6452_s17 + $0x18] sm:$0xff]  }
  0x4a   : > { %2731 = vperm.xlu2 %6334, %v6493_v26   ;;  %v706_v26 = vor.u32 %v705_v0, %v702_v62  ;;  %v5808_v0 = vld [vmem:[%s8012_s4 + $0x40] sm:$0xff] }
  0x4b   : > { %4861 = vmatmul.msk.bf16.vlgmr.msrb.gmra.mxu3 %vm410_vm1, %v6145_v42  ;;  %v5811_v42 = vld [vmem:[%s8012_s4 + $0x58] sm:$0xff]  ;;  %1364 = vmatpush.bf16.msrb.mxu1 %v5806_v40  ;;  %v1079_v40 = vld [vmem:[#allocation2] sm:$0x8] }
  0x4c   : > { %v707_v1 = vsel %vm663_vm3, %v697_v57, %v706_v26  ;;  %v716_v15 = vsel %vm663_vm3, %v706_v26, %v715_v12  ;;  %v5801_v26 = vld [vmem:[%s8012_s4 + $0x8] sm:$0xff] }
  0x4f   : > { %4831 = vmatmul.msk.bf16.gmra.mxu0 %vm410_vm1, %v399_v48  ;;  %1365 = vmatpush.bf16.msrb.mxu1 %v5805_v44 }
  0x50   : > { %2781 = vperm.xlu0 %6332, %v2722_v47  }
  0x51   : > { %2786 = vperm.xlu1 %6333, %v2723_v51  }
  0x52   : > { %2746 = vperm.xlu2 %6334, %v935_v27   ;;  %v5814_v27 = vld [vmem:[%s8012_s4 + $0x70] sm:$0xff] }
  0x53   : > { %4842 = vmatmul.msk.bf16.gmra.mxu1 %vm410_vm1, %v522_v52  ;;  %1201 = vmatpush.bf16.msrb.mxu0 %v5814_v27 }
  0x56   : > { %4851 = vmatmul.msk.bf16.gmra.mxu2 %vm410_vm1, %v689_v49  ;;  %v5804_v49 = vld [vmem:[%s8012_s4 + $0x20] sm:$0xff] }
  0x57   : > { %1202 = vmatpush.bf16.msrb.mxu0 %v5813_v13  ;;  %1366 = vmatpush.bf16.msrb.mxu1 %v5804_v49  ;;  %v1050_v13 = vld [vmem:[#allocation2 + $0x4] sm:$0xf]  ;;  %v1111_v49 = vunpack.c.l.b16 %v1079_v40 }
  0x5a   : > { %2761 = vperm.xlu2 %6334, %v6519_v53   ;;  %v5982_v53 = vunpack.c.h.b16 %v6150_v10 }
  0x5b   : > { %4862 = vmatmul.msk.bf16.gmra.mxu3 %vm410_vm1, %v6146_v54  ;;  %1203 = vmatpush.bf16.msrb.mxu0 %v5812_v34  ;;  %v5819_v54 = vld [vmem:[%s8012_s4 + $0x98] sm:$0xff]  ;;  %v1049_v34 = vld [vmem:[#allocation2] sm:$0xc] }
  0x5c   : > { %v662_v16 = vpack.c.b16 %v655_v14, %v5982_v53  ;;  %1367 = vmatpush.bf16.msrb.mxu1 %v5803_v7  ;;  %1523 = vmatpush.bf16.msra.mxu2 %v5819_v54  ;;  %v1244_v44 = vunpack.c.l.b16 %v1049_v34 }
  0x5e   : > { %v721_v17 = vshll.u32 %v662_v16, 16 }
  0x5f   : > { %1204 = vmatpush.bf16.msrb.mxu0 %v5811_v42  ;;  %v1112_v42 = vunpack.c.l.b16 %v1050_v13 }
  0x60   : > { %v723_v20 = vrot.slane %v721_v17, 4  ;;  %1368 = vmatpush.bf16.msrb.mxu1 %v5802_v22  ;;  %1524 = vmatpush.bf16.msra.mxu2 %v5818_v60 }
  0x61   : > { %v1245_v7 = vpack.c.b16 %v1112_v42, %v1244_v44 }
  0x62   : > { %2776 = vperm.xlu2 %6334, %v6539_v63   ;;  %v718_v63 = vshrl.u32 %v662_v16, 16 }
  0x63   : > { %1205 = vmatpush.bf16.msrb.mxu0 %v5810_v2  ;;  %v1247_v60 = vshrl.u32 %v1245_v7, 16 }
  0x64   : > { %v720_v19 = vrot.slane %v718_v63, 3  ;;  %1369 = vmatpush.bf16.msrb.mxu1 %v5801_v26  ;;  %v5827_v63 = vld [vmem:[%s8012_s4 + $0xd8] sm:$0xff] }
  0x66   : > { %4852 = vmatmul.msk.bf16.gmra.mxu2 %vm410_vm1, %v698_v58  ;;  %v724_v23 = vor.u32 %v723_v20, %v720_v19 }
  0x67   : > { %1206 = vmatpush.bf16.msrb.mxu0 %v5809_v59 }
  0x68   : > { %v725_v25 = vsel %vm663_vm3, %v715_v12, %v724_v23 }
  0x6b   : > { %4863 = vmatmul.msk.bf16.gmra.mxu3 %vm410_vm1, %v6147_v61  ;;  %v5830_v61 = vld [vmem:[%s8012_s4 + $0xf0] sm:$0xff]  ;;  %1207 = vmatpush.bf16.msrb.mxu0 %v5808_v0 }
  0x6c   : > { %1759 = vmatpush.bf16.msra.mxu3 %v5830_v61  ;;  %v1250_v61 = vshll.u32 %v1245_v7, 16 }
  0x70   : > { %1760 = vmatpush.bf16.msra.mxu3 %v5829_v5 }
  0x74   : > { %1761 = vmatpush.bf16.msra.mxu3 %v5828_v9  ;;  %v1252_v9 = vrot.slane %v1250_v61, 3  ;;  %v967_v7 = vpop.permute.xlu2 %966 }
  0x76   : > { %4853 = vmatmul.msk.bf16.gmra.mxu2 %vm410_vm1, %v707_v1  ;;  %v5817_v1 = vld [vmem:[%s8012_s4 + $0x88] sm:$0xff] }
  0x77   : > { %1525 = vmatpush.bf16.msra.mxu2 %v5817_v1 }
  0x78   : > { %1762 = vmatpush.bf16.msra.mxu3 %v5827_v63 }
  0x7b   : > { %4864 = vmatmul.msk.bf16.gmra.mxu3 %vm410_vm1, %v6148_v6  ;;  %v5800_v6 = vld [vmem:[%s8012_s4] sm:$0xff]  ;;  %1526 = vmatpush.bf16.msra.mxu2 %v5816_v8  ;;  %v1249_v8 = vrot.slane %v1247_v60, 2 }
  0x7c   : > { %1370 = vmatpush.bf16.msrb.mxu1 %v5800_v6  ;;  %1763 = vmatpush.bf16.msra.mxu3 %v5826_v24 }
  0x80   : > { %1764 = vmatpush.bf16.msra.mxu3 %v5825_v39 }
  0x82   : > { %v947_v17 = vpop.permute.xlu0 %946 }
  0x84   : > { %1765 = vmatpush.bf16.msra.mxu3 %v5824_v50 }
  0x86   : > { %4854 = vmatmul.msk.bf16.gmra.mxu2 %vm410_vm1, %v716_v15  ;;  %v6722_v15 = vld [vmem:[%s8011_s3] ss:$0 sm:$0xff] }
  0x8a   : > { %v952_v45 = vpop.permute.xlu0 %951 }
  0x8b   : > { %4865 = vmatmul.msk.bf16.gmra.mxu3 %vm410_vm1, %v6149_v18 }
  0x96   : > { %4855 = vmatmul.msk.bf16.gmra.mxu2 %vm410_vm1, %v725_v25 }
  0x99   : > { %v461_v28 = vpop.f32.mrf.mxu2 }
  0x9b   : > { %4866 = vmatmul.msk.bf16.gmra.mxu3 %vm410_vm1, %v6150_v10 }
  0x9c   : > { %v441_v47 = vpop.f32.mrf.mxu0 }
  0x9e   : > { %v597_v30 = vpop.f32.mrf.mxu3 }
  0x9f   : > { %v6625_v31 = vadd.f32 %v597_v30, %v461_v28 }
  0xa0   : > { %v577_v48 = vpop.f32.mrf.mxu1 }
  0xa1   : > { %v6630_v32 = vpop.f32.mrf.mxu2  ;;  %v578_v3 = vadd.f32 %v577_v48, %v441_v47 }
  0xa4   : > { %v443_v57 = vpop.f32.mrf.mxu0 }
  0xa6   : > { %v6632_v33 = vpop.f32.mrf.mxu3  ;;  %4856 = vmatmul.msk.bf16.gmra.mxu2 %vm410_vm1, %v724_v23  ;;  %v5839_v23 = vld [vmem:[%s8012_s4 + $0x138] sm:$0xff] }
  0xa7   : > { %1893 = vmatpush.bf16.msra.mxu0 %v5839_v23 }
  0xa8   : > { %v579_v58 = vpop.f32.mrf.mxu1 }
  0xa9   : > { %v466_v36 = vpop.f32.mrf.mxu2  ;;  %v580_v18 = vadd.f32 %v579_v58, %v443_v57  ;;  %v1125_v57 = vpack.c.b16 %v1112_v42, %v1111_v49  ;;  %v957_v58 = vpop.permute.xlu1 %956  ;;  %v6218_v42 = vld [vmem:[#allocation2 + $0x4] sm:$0x8] }
  0xab   : > { %4867 = vmatmul.msk.bf16.gmra.mxu3 %vm410_vm1, %v818_v35  ;;  %v1428_v26 = vshrl.u32 %v1125_v57, 16  ;;  %v1431_v1 = vshll.u32 %v1125_v57, 16  ;;  %vm4626_vm1 = vsmask.f32 7440 }
  0xac   : > { %v446_v11 = vpop.f32.mrf.mxu0 }
  0xad   : > { %v1433_v63 = vrot.slane %v1431_v1, 4 }
  0xae   : > { %v602_v37 = vpop.f32.mrf.mxu3 }
  0xaf   : > { %v6639_v38 = vadd.f32 %v602_v37, %v466_v36 }
  0xb0   : > { %v582_v53 = vpop.f32.mrf.mxu1 }
  0xb1   : > { %v6647_v29 = vpop.f32.mrf.mxu2  ;;  %v583_v36 = vadd.f32 %v582_v53, %v446_v11  ;;  %v1132_v11 = vrot.slane %v1125_v57, 3 }
  0xb4   : > { %v448_v28 = vpop.f32.mrf.mxu0 }
  0xb6   : > { %v6658_v43 = vpop.f32.mrf.mxu3 }
  0xb8   : > { %v584_v30 = vpop.f32.mrf.mxu1 }
  0xb9   : > { %v471_v46 = vpop.f32.mrf.mxu2  ;;  %v585_v22 = vadd.f32 %v584_v30, %v448_v28 }
  0xbc   : > { %v451_v56 = vpop.f32.mrf.mxu0 }
  0xbe   : > { %v607_v51 = vpop.f32.mrf.mxu3 }
  0xbf   : > { %v6672_v52 = vadd.f32 %v607_v51, %v471_v46 }
  0xc0   : > { %v587_v59 = vpop.f32.mrf.mxu1 }
  0xc1   : > { %v473_v55 = vpop.f32.mrf.mxu2  ;;  %v588_v5 = vadd.f32 %v587_v59, %v451_v56 }
  0xc4   : > { %v453_v24 = vpop.f32.mrf.mxu0 }
  0xc6   : > { %v609_v62 = vpop.f32.mrf.mxu3 }
  0xc8   : > { %v589_v28 = vpop.f32.mrf.mxu1 }
  0xc9   : > { %v762_v4 = vpop.f32.mrf.mxu2 }
  0xca   : > { %v796_v10 = vadd.f32 %v762_v4, %v578_v3  ;;  %v5838_v3 = vld [vmem:[%s8012_s4 + $0x130] sm:$0xff] }
  0xcb   : > { %1894 = vmatpush.bf16.msra.mxu0 %v5838_v3 }
  0xcc   : > { %v456_v57 = vpop.f32.mrf.mxu0 }
  0xce   : > { %v855_v12 = vpop.f32.mrf.mxu3 }
  0xcf   : > { %v889_v14 = vadd.f32 %v855_v12, %v796_v10 }
  0xd0   : > { %v592_v60 = vpop.f32.mrf.mxu1 }
  0xd1   : > { %v764_v16 = vpop.f32.mrf.mxu2  ;;  %v905_v19 = vadd.f32 %v6722_v15, %v889_v14 }
  0xd2   : > { %v797_v20 = vadd.f32 %v764_v16, %v580_v18  ;;  %v1430_v16 = vrot.slane %v1428_v26, 3 }
  0xd3   : > { %v918_v35 = vmax.f32 %v905_v19, 0.0 }
  0xd5   : > { %v1009_v46 = vmul.f32 %v947_v17, %v918_v35 }
  0xd6   : > { %v857_v25 = vpop.f32.mrf.mxu3 }
  0xd7   : > { %v890_v27 = vadd.f32 %v857_v25, %v797_v20  ;;  %v1253_v25 = vor.u32 %v1252_v9, %v1249_v8 }
  0xd9   : > { %v906_v37 = vadd.f32 %v6722_v15, %v890_v27  ;;  %v767_v21 = vpop.f32.mrf.mxu2  ;;  %v962_v27 = vpop.permute.xlu1 %961 }
  0xda   : > { %v798_v48 = vadd.f32 %v767_v21, %v583_v36  ;;  %v1434_v21 = vor.u32 %v1433_v63, %v1430_v16  ;;  %v972_v63 = vpop.permute.xlu2 %971 }
  0xdb   : > { %v919_v41 = vmax.f32 %v906_v37, 0.0 }
  0xdd   : > { %v1010_v47 = vmul.f32 %v952_v45, %v919_v41 }
  0xde   : > { %v860_v51 = vpop.f32.mrf.mxu3 }
  0xdf   : > { %v5986_v2 = vpack.c.bf16 %v1010_v47, %v1009_v46  ;;  %v891_v54 = vadd.f32 %v860_v51, %v798_v48 }
  0xe1   : > { %6151 = vst [vmem:[#allocation2 + $0x8] sm:$0xff] %v5986_v2   ;;  %v769_v55 = vpop.f32.mrf.mxu2  ;;  %v907_v62 = vadd.f32 %v6722_v15, %v891_v54  ;;  %v5837_v2 = vld [vmem:[%s8012_s4 + $0x128] sm:$0xff] }
  0xe2   : > { %v799_v0 = vadd.f32 %v769_v55, %v585_v22  ;;  %v590_v55 = vadd.f32 %v589_v28, %v453_v24  ;;  %1895 = vmatpush.bf16.msra.mxu0 %v5837_v2 }
  0xe3   : > { %v920_v12 = vmax.f32 %v907_v62, 0.0  ;;  %v593_v62 = vadd.f32 %v592_v60, %v456_v57 }
  0xe5   : > { %v1011_v36 = vmul.f32 %v957_v58, %v920_v12 }
  0xe6   : > { %v862_v4 = vpop.f32.mrf.mxu3 }
  0xe7   : > { %v892_v6 = vadd.f32 %v862_v4, %v799_v0 }
  0xe8   : > { %v6745_v10 = vld [vmem:[#allocation2 + $0x8] sm:$0xff] }
  0xe9   : > { %v908_v53 = vadd.f32 %v6722_v15, %v892_v6  ;;  %v772_v14 = vpop.f32.mrf.mxu2  ;;  %v1133_v17 = vrot.slane %v6745_v10, 3  ;;  %v1255_v18 = vshrl.u32 %v6745_v10, 16  ;;  %v1258_v19 = vshll.u32 %v6745_v10, 16  ;;  %v6288_v44 = vld [vmem:[#allocation2 + $0x4] sm:$0xf0]  }
  0xea   : > { %v800_v23 = vadd.f32 %v772_v14, %v588_v5  ;;  %v6219_v51 = vor.u32 %v6288_v44, %v6218_v42  ;;  %v594_v42 = vpop.f32.mrf.mxu1 }
  0xeb   : > { %v921_v20 = vmax.f32 %v908_v53, 0.0  ;;  %v1134_v30 = vsel %vm390_vm0, %v1132_v11, %v1133_v17  ;;  %v1257_v13 = vrot.slane %v1255_v18, 2  ;;  %v1260_v34 = vrot.slane %v1258_v19, 3 }
  0xec   : > { %v1435_v35 = vrot.slane %v1255_v18, 3  ;;  %1208 = vmatmul.bf16.vlgmr.msrb.gmra.mxu0 %v1134_v30  ;;  %v1436_v39 = vrot.slane %v1258_v19, 4  ;;  %v1642_v58 = vshrl.u32 %v6219_v51, 16  ;;  %v1645_v59 = vshll.u32 %v6219_v51, 16  ;;  %v5836_v51 = vld [vmem:[%s8012_s4 + $0x120] sm:$0xff] }
  0xed   : > { %v1012_v37 = vmul.f32 %v962_v27, %v921_v20  ;;  %v6752_v41 = vor.u32 %v1260_v34, %v1257_v13  ;;  %1896 = vmatpush.bf16.msra.mxu0 %v5836_v51 }
  0xee   : > { %v865_v40 = vpop.f32.mrf.mxu3  ;;  %v6756_v47 = vor.u32 %v1436_v39, %v1435_v35  ;;  %v1644_v5 = vrot.slane %v1642_v58, 3  ;;  %v1647_v6 = vrot.slane %v1645_v59, 4  ;;  %v977_v59 = vpop.permute.xlu0 %976 }
  0xef   : > { %v6754_v45 = vpack.c.bf16 %v1012_v37, %v1011_v36  ;;  %v893_v46 = vadd.f32 %v865_v40, %v800_v23  ;;  %v1262_v48 = vsel %vm478_vm2, %v1253_v25, %v6752_v41  ;;  %v458_v40 = vpop.f32.mrf.mxu0 }
  0xf0   : > { %1371 = vmatmul.bf16.vlgmr.msrb.gmra.mxu1 %v1262_v48  ;;  %v1438_v50 = vsel %vm663_vm3, %v1434_v21, %v6756_v47  ;;  %v1648_v34 = vor.u32 %v1647_v6, %v1644_v5 }
  0xf1   : > { %6152 = vst [vmem:[#allocation2 + $0x10] sm:$0xff] %v6754_v45   ;;  %v774_v49 = vpop.f32.mrf.mxu2  ;;  %v909_v54 = vadd.f32 %v6722_v15, %v893_v46  ;;  %1527 = vmatmul.bf16.vlgmr.msra.gmra.mxu2 %v1438_v50  ;;  %v6377_v46 = vld [vmem:[#allocation2 + $0xc] sm:$0xe] }
  0xf2   : > { %v801_v56 = vadd.f32 %v774_v49, %v590_v55 }
  0xf3   : > { %v922_v22 = vmax.f32 %v909_v54, 0.0 }
  0xf5   : > { %v1013_v8 = vmul.f32 %v967_v7, %v922_v22 }
  0xf6   : > { %v867_v61 = vpop.f32.mrf.mxu3 }
  0xf7   : > { %v894_v0 = vadd.f32 %v867_v61, %v801_v56 }
  0xf8   : > { %v6767_v26 = vld [vmem:[#allocation2 + $0x10] sm:$0xff] }
  0xf9   : > { %v6290_v1 = vld [vmem:[#allocation2 + $0xc] sm:$0xff]   ;;  %v910_v3 = vadd.f32 %v6722_v15, %v894_v0  ;;  %v777_v4 = vpop.f32.mrf.mxu2  ;;  %v1135_v9 = vrot.slane %v6767_v26, 3  ;;  %v1264_v10 = vshrl.u32 %v6767_v26, 16  ;;  %v1267_v11 = vshll.u32 %v6767_v26, 16 }
  0xfa   : > { %v802_v53 = vadd.f32 %v777_v4, %v593_v62  ;;  %v1650_v14 = vshrl.u32 %v6290_v1, 16  ;;  %v1653_v16 = vshll.u32 %v6290_v1, 16  ;;  %v6778_v35 = vld [vmem:[#allocation2 + $0xc] sm:$0xff]  }
  0xfb   : > { %v923_v12 = vmax.f32 %v910_v3, 0.0  ;;  %v1136_v18 = vsel %vm390_vm0, %v1133_v17, %v1135_v9  ;;  %v1266_v19 = vrot.slane %v1264_v10, 2  ;;  %v1269_v20 = vrot.slane %v1267_v11, 3  ;;  %v6376_v36 = vld [vmem:[#allocation2 + $0xc] sm:$0xf0] }
  0xfc   : > { %v1439_v23 = vrot.slane %v1264_v10, 3  ;;  %1213 = vmatmul.bf16.gmra.mxu0 %v1136_v18  ;;  %v1440_v25 = vrot.slane %v1267_v11, 4  ;;  %v1652_v27 = vrot.slane %v1650_v14, 3  ;;  %v1655_v28 = vrot.slane %v1653_v16, 4 }
  0xfd   : > { %v1014_v24 = vmul.f32 %v972_v63, %v923_v12  ;;  %v6776_v13 = vor.u32 %v1269_v20, %v1266_v19  ;;  %v6799_v54 = vor.u32 %v6377_v46, %v6376_v36  ;;  %v982_v12 = vpop.permute.xlu1 %981  ;;  %v5835_v46 = vld [vmem:[%s8012_s4 + $0x118] sm:$0xff] }
  0xfe   : > { %v870_v30 = vpop.f32.mrf.mxu3  ;;  %v6782_v39 = vor.u32 %v1440_v25, %v1439_v23  ;;  %v6784_v17 = vor.u32 %v1655_v28, %v1652_v27  ;;  %1897 = vmatpush.bf16.msra.mxu0 %v5835_v46 }
  0xff   : > { %v6780_v37 = vpack.c.bf16 %v1014_v24, %v1013_v8  ;;  %v895_v21 = vadd.f32 %v870_v30, %v802_v53  ;;  %v1271_v44 = vsel %vm478_vm2, %v6752_v41, %v6776_v13  ;;  %v595_v41 = vadd.f32 %v594_v42, %v458_v40 }
 0x100   : > { %1376 = vmatmul.bf16.gmra.mxu1 %v1271_v44  ;;  %v1442_v49 = vsel %vm663_vm3, %v6756_v47, %v6782_v39  ;;  %v1657_v50 = vsel %vm663_vm3, %v1648_v34, %v6784_v17  ;;  %v2535_v61 = vshrl.u32 %v6799_v54, 16  ;;  %v2538_v62 = vshll.u32 %v6799_v54, 16 }
 0x101   : > { %6153 = vst [vmem:[#allocation2 + $0x18] sm:$0xff] %v6780_v37   ;;  %v779_v48 = vpop.f32.mrf.mxu2  ;;  %v911_v2 = vadd.f32 %v6722_v15, %v895_v21  ;;  %1532 = vmatmul.bf16.gmra.mxu2 %v1442_v49  ;;  %1766 = vmatmul.bf16.vlgmr.msra.gmra.mxu3 %v1657_v50 }
 0x102   : > { %v803_v7 = vadd.f32 %v779_v48, %v595_v41  ;;  %v2537_v36 = vrot.slane %v2535_v61, 1  ;;  %v2540_v21 = vrot.slane %v2538_v62, 2 }
 0x103   : > { %v924_v55 = vmax.f32 %v911_v2, 0.0 }
 0x105   : > { %v1015_v0 = vmul.f32 %v977_v59, %v924_v55 }
 0x106   : > { %v872_v56 = vpop.f32.mrf.mxu3 }
 0x107   : > { %v896_v57 = vadd.f32 %v872_v56, %v803_v7 }
 0x108   : > { %v6801_v47 = vld [vmem:[#allocation2 + $0x18] sm:$0xff] }
 0x109   : > { %v6292_v58 = vld [vmem:[#allocation2 + $0x14] sm:$0xff]   ;;  %v912_v22 = vadd.f32 %v6722_v15, %v896_v57  ;;  %v782_v60 = vpop.f32.mrf.mxu2  ;;  %v1137_v1 = vrot.slane %v6801_v47, 3  ;;  %v1273_v3 = vshrl.u32 %v6801_v47, 16  ;;  %v1276_v4 = vshll.u32 %v6801_v47, 16 }
 0x10a   : > { %v6809_v5 = vld [vmem:[#allocation2 + $0x14] sm:$0xff]  ;;  %v804_v8 = vadd.f32 %v782_v60, %v6625_v31  ;;  %v1659_v10 = vshrl.u32 %v6292_v58, 16  ;;  %v1662_v11 = vshll.u32 %v6292_v58, 16  ;;  %v987_v58 = vpop.permute.xlu2 %986 }
 0x10b   : > { %v925_v6 = vmax.f32 %v912_v22, 0.0  ;;  %v1138_v53 = vsel %vm390_vm0, %v1135_v9, %v1137_v1  ;;  %v1275_v14 = vrot.slane %v1273_v3, 2  ;;  %v1278_v16 = vrot.slane %v1276_v4, 3 }
 0x10c   : > { %v1443_v63 = vrot.slane %v1273_v3, 3  ;;  %1218 = vmatmul.bf16.gmra.mxu0 %v1138_v53  ;;  %v1444_v19 = vrot.slane %v1276_v4, 4  ;;  %v1661_v20 = vrot.slane %v1659_v10, 3  ;;  %v1664_v23 = vrot.slane %v1662_v11, 4  ;;  %v992_v10 = vpop.permute.xlu0 %991 }
 0x10d   : > { %v1016_v18 = vmul.f32 %v982_v12, %v925_v6  ;;  %v6817_v25 = vor.u32 %v1278_v16, %v1275_v14  ;;  %v2208_v31 = vshll.u32 %v6809_v5, 16  ;;  %v2212_v27 = vshrl.u32 %v6809_v5, 16 }
 0x10e   : > { %v875_v24 = vpop.f32.mrf.mxu3  ;;  %v6823_v30 = vor.u32 %v1444_v19, %v1443_v63  ;;  %v6825_v9 = vor.u32 %v1664_v23, %v1661_v20 }
 0x10f   : > { %v6821_v28 = vpack.c.bf16 %v1016_v18, %v1015_v0  ;;  %v897_v26 = vadd.f32 %v875_v24, %v804_v8  ;;  %v1280_v34 = vsel %vm478_vm2, %v6776_v13, %v6817_v25  ;;  %v2542_v13 = vrot.slane %v2212_v27, 1 }
 0x110   : > { %1381 = vmatmul.bf16.gmra.mxu1 %v1280_v34  ;;  %v1446_v42 = vsel %vm663_vm3, %v6782_v39, %v6823_v30  ;;  %v1666_v44 = vsel %vm663_vm3, %v6784_v17, %v6825_v9  ;;  %v2543_v49 = vrot.slane %v2208_v31, 2  ;;  %v600_v39 = vadd.f32 %v6632_v33, %v6630_v32  ;;  %v5834_v33 = vld [vmem:[%s8012_s4 + $0x110] sm:$0xff] }
 0x111   : > { %6154 = vst [vmem:[#allocation2 + $0x20] sm:$0xff] %v6821_v28   ;;  %v784_v40 = vpop.f32.mrf.mxu2  ;;  %v913_v48 = vadd.f32 %v6722_v15, %v897_v26  ;;  %1537 = vmatmul.bf16.gmra.mxu2 %v1446_v42  ;;  %1771 = vmatmul.bf16.gmra.mxu3 %v1666_v44  ;;  %v2541_v17 = vor.u32 %v2540_v21, %v2537_v36 }
 0x112   : > { %v6847_v50 = vor.u32 %v2543_v49, %v2542_v13  ;;  %v805_v51 = vadd.f32 %v784_v40, %v600_v39  ;;  %1898 = vmatpush.bf16.msra.mxu0 %v5834_v33  ;;  %v605_v13 = vadd.f32 %v6658_v43, %v6647_v29  ;;  %v5833_v39 = vld [vmem:[%s8012_s4 + $0x108] sm:$0xff]  ;;  %v5846_v29 = vld [vmem:[%s8012_s4 + $0x170] sm:$0xff] }
 0x113   : > { %v926_v2 = vmax.f32 %v913_v48, 0.0  ;;  %v5859_v43 = vld [vmem:[%s8012_s4 + $0x1b0] sm:$0xff] }
 0x114   : > { %v6851_v7 = vsel %vm2533_vm4, %v2541_v17, %v6847_v50 }
 0x115   : > { %v1017_v22 = vmul.f32 %v987_v58, %v926_v2  ;;  %v997_v58 = vpop.permute.xlu1 %996 }
 0x116   : > { %v877_v41 = vpop.f32.mrf.mxu3  ;;  %1899 = vmatpush.bf16.msra.mxu0 %v5833_v39 }
 0x117   : > { %v898_v55 = vadd.f32 %v877_v41, %v805_v51 }
 0x118   : > { %v6853_v56 = vld [vmem:[#allocation2 + $0x20] sm:$0xff] }
 0x119   : > { %v6294_v57 = vld [vmem:[#allocation2 + $0x1c] sm:$0xff]   ;;  %v914_v59 = vadd.f32 %v6722_v15, %v898_v55  ;;  %v787_v32 = vpop.f32.mrf.mxu2  ;;  %v1139_v60 = vrot.slane %v6853_v56, 3  ;;  %v1282_v61 = vshrl.u32 %v6853_v56, 16  ;;  %v1285_v62 = vshll.u32 %v6853_v56, 16 }
 0x11a   : > { %v6862_v0 = vld [vmem:[#allocation2 + $0x1c] sm:$0xff]  ;;  %v806_v4 = vadd.f32 %v787_v32, %v6639_v38  ;;  %v1668_v6 = vshrl.u32 %v6294_v57, 16  ;;  %v1671_v8 = vshll.u32 %v6294_v57, 16 }
 0x11b   : > { %v927_v3 = vmax.f32 %v914_v59, 0.0  ;;  %v1140_v11 = vsel %vm390_vm0, %v1137_v1, %v1139_v60  ;;  %v1284_v12 = vrot.slane %v1282_v61, 2  ;;  %v1287_v53 = vrot.slane %v1285_v62, 3 }
 0x11c   : > { %v1447_v14 = vrot.slane %v1282_v61, 3  ;;  %1223 = vmatmul.bf16.gmra.mxu0 %v1140_v11  ;;  %v1448_v63 = vrot.slane %v1285_v62, 4  ;;  %v1670_v18 = vrot.slane %v1668_v6, 3  ;;  %v1673_v19 = vrot.slane %v1671_v8, 4 }
 0x11d   : > { %v1018_v16 = vmul.f32 %v992_v10, %v927_v3  ;;  %v6870_v38 = vor.u32 %v1287_v53, %v1284_v12  ;;  %v2216_v23 = vshll.u32 %v6862_v0, 16  ;;  %v2220_v24 = vshrl.u32 %v6862_v0, 16  ;;  %v5858_v3 = vld [vmem:[%s8012_s4 + $0x1a8] sm:$0xff]  ;;  %v1002_v12 = vpop.permute.xlu2 %1001 }
 0x11e   : > { %v880_v20 = vpop.f32.mrf.mxu3  ;;  %v6876_v34 = vor.u32 %v1448_v63, %v1447_v14  ;;  %v6878_v1 = vor.u32 %v1673_v19, %v1670_v18 }
 0x11f   : > { %v6874_v26 = vpack.c.bf16 %v1018_v16, %v1017_v22  ;;  %v899_v47 = vadd.f32 %v880_v20, %v806_v4  ;;  %v1289_v36 = vsel %vm478_vm2, %v6817_v25, %v6870_v38  ;;  %v2546_v46 = vrot.slane %v2220_v24, 1 }
 0x120   : > { %1386 = vmatmul.bf16.gmra.mxu1 %v1289_v36  ;;  %v1450_v40 = vsel %vm663_vm3, %v6823_v30, %v6876_v34  ;;  %v1675_v42 = vsel %vm663_vm3, %v6825_v9, %v6878_v1  ;;  %v2547_v25 = vrot.slane %v2216_v23, 2  ;;  %v5847_v30 = vld [vmem:[%s8012_s4 + $0x178] sm:$0xff] }
 0x121   : > { %6155 = vst [vmem:[#allocation2 + $0x28] sm:$0xff] %v6874_v26   ;;  %v789_v21 = vpop.f32.mrf.mxu2  ;;  %v915_v44 = vadd.f32 %v6722_v15, %v899_v47  ;;  %1542 = vmatmul.bf16.gmra.mxu2 %v1450_v40  ;;  %1776 = vmatmul.bf16.gmra.mxu3 %v1675_v42  ;;  %v5860_v9 = vld [vmem:[%s8012_s4 + $0x1b8] sm:$0xff] }
 0x122   : > { %v6903_v48 = vor.u32 %v2547_v25, %v2546_v46  ;;  %v807_v49 = vadd.f32 %v789_v21, %v605_v13  ;;  %2081 = vmatpush.bf16.msra.mxu1 %v5847_v30  ;;  %2310 = vmatpush.bf16.msrb.mxu2 %v5860_v9  ;;  %v5844_v25 = vld [vmem:[%s8012_s4 + $0x160] sm:$0xff] }
 0x123   : > { %v928_v17 = vmax.f32 %v915_v44, 0.0  ;;  %v5857_v13 = vld [vmem:[%s8012_s4 + $0x1a0] sm:$0xff] }
 0x124   : > { %v6917_v2 = vsel %vm2533_vm4, %v6847_v50, %v6903_v48  ;;  %v5845_v50 = vld [vmem:[%s8012_s4 + $0x168] sm:$0xff] }
 0x125   : > { %v1019_v33 = vmul.f32 %v997_v58, %v928_v17 }
 0x126   : > { %v882_v51 = vpop.f32.mrf.mxu3  ;;  %2082 = vmatpush.bf16.msra.mxu1 %v5846_v29  ;;  %2311 = vmatpush.bf16.msrb.mxu2 %v5859_v43  ;;  %v5843_v29 = vld [vmem:[%s8012_s4 + $0x158] sm:$0xff] }
 0x127   : > { %v900_v41 = vadd.f32 %v882_v51, %v807_v49  ;;  %v5868_v49 = vld [vmem:[%s8012_s4 + $0x1f8] sm:$0xff] }
 0x128   : > { %v6919_v55 = vld [vmem:[#allocation2 + $0x28] sm:$0xff]  ;;  %2456 = vmatpush.bf16.msrb.mxu3 %v5868_v49  ;;  %v5856_v43 = vld [vmem:[%s8012_s4 + $0x198] sm:$0xff] }
 0x129   : > { %v6296_v57 = vld [vmem:[#allocation2 + $0x24] sm:$0xff]   ;;  %v916_v59 = vadd.f32 %v6722_v15, %v900_v41  ;;  %v792_v32 = vpop.f32.mrf.mxu2  ;;  %v1141_v22 = vrot.slane %v6919_v55, 3  ;;  %v1291_v61 = vshrl.u32 %v6919_v55, 16  ;;  %v1294_v62 = vshll.u32 %v6919_v55, 16 }
 0x12a   : > { %v6931_v4 = vld [vmem:[#allocation2 + $0x24] sm:$0xff]  ;;  %v808_v8 = vadd.f32 %v792_v32, %v6672_v52  ;;  %v1677_v10 = vshrl.u32 %v6296_v57, 16  ;;  %v1680_v11 = vshll.u32 %v6296_v57, 16  ;;  %2083 = vmatpush.bf16.msra.mxu1 %v5845_v50  ;;  %2312 = vmatpush.bf16.msrb.mxu2 %v5858_v3  ;;  %v5867_v57 = vld [vmem:[%s8012_s4 + $0x1f0] sm:$0xff] }
 0x12b   : > { %v929_v6 = vmax.f32 %v916_v59, 0.0  ;;  %v1142_v53 = vsel %vm390_vm0, %v1139_v60, %v1141_v22  ;;  %v1293_v14 = vrot.slane %v1291_v61, 2  ;;  %v1296_v16 = vrot.slane %v1294_v62, 3  ;;  %v5840_v55 = vld [vmem:[%s8012_s4 + $0x140] sm:$0xff] }
 0x12c   : > { %v1451_v63 = vrot.slane %v1291_v61, 3  ;;  %1228 = vmatmul.bf16.gmra.mxu0 %v1142_v53  ;;  %v1452_v19 = vrot.slane %v1294_v62, 4  ;;  %v1679_v20 = vrot.slane %v1677_v10, 3  ;;  %v1682_v47 = vrot.slane %v1680_v11, 4  ;;  %v5855_v61 = vld [vmem:[%s8012_s4 + $0x190] sm:$0xff]  ;;  %v5866_v62 = vld [vmem:[%s8012_s4 + $0x1e8] sm:$0xff]  ;;  %2457 = vmatpush.bf16.msrb.mxu3 %v5867_v57 }
 0x12d   : > { %v1020_v18 = vmul.f32 %v1002_v12, %v929_v6  ;;  %v6939_v21 = vor.u32 %v1296_v16, %v1293_v14  ;;  %v2224_v52 = vshll.u32 %v6931_v4, 16  ;;  %v2228_v40 = vshrl.u32 %v6931_v4, 16 }
 0x12e   : > { %v885_v36 = vpop.f32.mrf.mxu3  ;;  %v6945_v42 = vor.u32 %v1452_v19, %v1451_v63  ;;  %v6947_v44 = vor.u32 %v1682_v47, %v1679_v20  ;;  %2084 = vmatpush.bf16.msra.mxu1 %v5844_v25  ;;  %2313 = vmatpush.bf16.msrb.mxu2 %v5857_v13  ;;  %v5854_v19 = vld [vmem:[%s8012_s4 + $0x188] sm:$0xff] }
 0x12f   : > { %v6943_v56 = vpack.c.bf16 %v1020_v18, %v1019_v33  ;;  %v901_v60 = vadd.f32 %v885_v36, %v808_v8  ;;  %v1298_v46 = vsel %vm478_vm2, %v6870_v38, %v6939_v21  ;;  %v2550_v17 = vrot.slane %v2228_v40, 1  ;;  %v5842_v33 = vld [vmem:[%s8012_s4 + $0x150] sm:$0xff] }
 0x130   : > { %1391 = vmatmul.bf16.gmra.mxu1 %v1298_v46  ;;  %v1454_v9 = vsel %vm663_vm3, %v6876_v34, %v6945_v42  ;;  %v1684_v38 = vsel %vm663_vm3, %v6878_v1, %v6947_v44  ;;  %v2551_v34 = vrot.slane %v2224_v52, 2  ;;  %v1007_v1 = vpop.permute.xlu0 %1006  ;;  %2458 = vmatpush.bf16.msrb.mxu3 %v5866_v62 }
 0x131   : > { %6156 = vst [vmem:[#allocation2 + $0x30] sm:$0xff] %v6943_v56   ;;  %v917_v30 = vadd.f32 %v6722_v15, %v901_v60  ;;  %v794_v39 = vpop.f32.mrf.mxu2  ;;  %1547 = vmatmul.bf16.gmra.mxu2 %v1454_v9  ;;  %1781 = vmatmul.bf16.gmra.mxu3 %v1684_v38  ;;  %v5832_v15 = vld [vmem:[%s8012_s4 + $0x100] sm:$0xff]  ;;  %v6036_v57 = vunpack.c.h.b16 %v6943_v56 }
 0x132   : > { %1900 = vmatpush.bf16.msra.mxu0 %v5832_v15  ;;  %v6985_v58 = vor.u32 %v2551_v34, %v2550_v17  ;;  %2085 = vmatpush.bf16.msra.mxu1 %v5843_v29  ;;  %v5865_v60 = vld [vmem:[%s8012_s4 + $0x1e0] sm:$0xff] }
 0x133   : > { %v930_v51 = vmax.f32 %v917_v30, 0.0  ;;  %2314 = vmatpush.bf16.msrb.mxu2 %v5856_v43 }
 0x134   : > { %v6999_v50 = vsel %vm2533_vm4, %v6903_v48, %v6985_v58  ;;  %v5841_v48 = vld [vmem:[%s8012_s4 + $0x148] sm:$0xff]  ;;  %2459 = vmatpush.bf16.msrb.mxu3 %v5865_v60 }
 0x135   : > { %v1021_v41 = vmul.f32 %v1007_v1, %v930_v51 }
 0x136   : > { %v887_v59 = vpop.f32.mrf.mxu3  ;;  %2086 = vmatpush.bf16.msra.mxu1 %v5842_v33 }
 0x137   : > { %v1034_v32 = vpack.c.bf16 %v1021_v41, %v1021_v41  ;;  %2315 = vmatpush.bf16.msrb.mxu2 %v5855_v61  ;;  %v5876_v41 = vld [vmem:[%s8012_s4 + $0x238] sm:$0xff] }
 0x138   : > { %v1061_v3 = vld [vmem:[#allocation2 + $0x30] sm:$0xf]  ;;  %v1062_v6 = vld [vmem:[#allocation2 + $0x34] sm:$0x1]  ;;  %2626 = vmatpush.bf16.msrb.mxu0 %v5876_v41  ;;  %v2210_v41 = vrot.slane %v2208_v31, 1 }
 0x139   : > { %v6297_v8 = vld [vmem:[#allocation2 + $0x2c] sm:$0xff]   ;;  %1047 = vst [vmem:[#allocation2 + $0x38] sm:$0x3] %v1034_v32  ;;  %v1123_v10 = vunpack.c.l.b16 %v1061_v3  ;;  %v1124_v11 = vunpack.c.l.b16 %v1062_v6  ;;  %v1406_v12 = vld [vmem:[#allocation2 + $0x34] sm:$0x3]  ;;  %v5864_v32 = vld [vmem:[%s8012_s4 + $0x1d8] sm:$0xff] }
 0x13a   : > { %v7001_v53 = vld [vmem:[#allocation2 + $0x2c] sm:$0xff]  ;;  %v1686_v14 = vshrl.u32 %v6297_v8, 16  ;;  %v1689_v16 = vshll.u32 %v6297_v8, 16  ;;  %v1425_v63 = vunpack.c.l.b16 %v1406_v12  ;;  %2087 = vmatpush.bf16.msra.mxu1 %v5841_v48  ;;  %2460 = vmatpush.bf16.msrb.mxu3 %v5864_v32  ;;  %v5873_v32 = vld [vmem:[%s8012_s4 + $0x220] sm:$0xff] }
 0x13b   : > { %v7003_v18 = vpack.c.b16 %v1124_v11, %v1123_v10  ;;  %v2232_v30 = vshll.u32 %v7001_v53, 16  ;;  %v2236_v39 = vshrl.u32 %v7001_v53, 16  ;;  %2316 = vmatpush.bf16.msrb.mxu2 %v5854_v19 }
 0x13c   : > { %v1688_v20 = vrot.slane %v1686_v14, 3  ;;  %v1691_v47 = vrot.slane %v1689_v16, 4  ;;  %v1426_v36 = vpack.c.b16 %v1425_v63, %v1123_v10 }
 0x13d   : > { %v1143_v46 = vrot.slane %v7003_v18, 3  ;;  %v1300_v25 = vshrl.u32 %v7003_v18, 16  ;;  %v1303_v13 = vshll.u32 %v7003_v18, 16  ;;  %v2554_v62 = vrot.slane %v2236_v39, 1 }
 0x13e   : > { %v1692_v9 = vor.u32 %v1691_v47, %v1688_v20  ;;  %v1456_v38 = vshrl.u32 %v1426_v36, 16  ;;  %v1459_v49 = vshll.u32 %v1426_v36, 16  ;;  %v2555_v3 = vrot.slane %v2232_v30, 2  ;;  %2088 = vmatpush.bf16.msra.mxu1 %v5840_v55  ;;  %v5862_v47 = vld [vmem:[%s8012_s4 + $0x1c8] sm:$0xff]  ;;  %v5875_v36 = vld [vmem:[%s8012_s4 + $0x230] sm:$0xff] }
 0x13f   : > { %v1144_v15 = vsel %vm390_vm0, %v1141_v22, %v1143_v46  ;;  %v1302_v17 = vrot.slane %v1300_v25, 2  ;;  %v1305_v51 = vrot.slane %v1303_v13, 3  ;;  %2627 = vmatpush.bf16.msrb.mxu0 %v5875_v36  ;;  %v5861_v13 = vld [vmem:[%s8012_s4 + $0x1c0] sm:$0xff] }
 0x140   : > { %1233 = vmatmul.bf16.gmra.mxu0 %v1144_v15  ;;  %v1693_v34 = vsel %vm663_vm3, %v6947_v44, %v1692_v9  ;;  %v1458_v1 = vrot.slane %v1456_v38, 3  ;;  %v1461_v29 = vrot.slane %v1459_v49, 4  ;;  %v1588_v43 = vld [vmem:[#allocation2 + $0x38] sm:$0x3]  ;;  %v5853_v44 = vld [vmem:[%s8012_s4 + $0x180] sm:$0xff]  ;;  %v2556_v63 = vor.u32 %v2555_v3, %v2554_v62  ;;  %v6157_v49 = vld [vmem:[#allocation2 + $0x8] sm:$0xff]  }
 0x141   : > { %v1306_v22 = vor.u32 %v1305_v51, %v1302_v17  ;;  %v7031_v59 = vunpack.c.l.b16 %v1588_v43  ;;  %v7039_v33 = vld [vmem:[#allocation2 + $0x34] sm:$0xff]  ;;  %1786 = vmatmul.bf16.gmra.mxu3 %v1693_v34  ;;  %2317 = vmatpush.bf16.msrb.mxu2 %v5853_v44  ;;  %v1974_v15 = vshll.u32 %v6157_v49, 16  ;;  %v2203_v17 = vshll.u32 %v6778_v35, 16  ;;  %v5874_v51 = vld [vmem:[%s8012_s4 + $0x228] sm:$0xff] }
 0x142   : > { %v1462_v61 = vor.u32 %v1461_v29, %v1458_v1  ;;  %v2240_v11 = vshll.u32 %v7039_v33, 16  ;;  %v2244_v12 = vshrl.u32 %v7039_v33, 16  ;;  %v1979_v34 = vshll.u32 %v6754_v45, 16 }
 0x143   : > { %v1307_v6 = vsel %vm478_vm2, %v6939_v21, %v1306_v22  ;;  %v1640_v8 = vpack.c.b16 %v7031_v59, %v6036_v57  ;;  %v5863_v21 = vld [vmem:[%s8012_s4 + $0x1d0] sm:$0xff]  ;;  %2628 = vmatpush.bf16.msrb.mxu0 %v5874_v51  ;;  %v1976_v1 = vrot.slane %v1974_v15, 1  ;;  %v2205_v29 = vrot.slane %v2203_v17, 1 }
 0x144   : > { %1396 = vmatmul.bf16.gmra.mxu1 %v1307_v6  ;;  %v1463_v10 = vsel %vm663_vm3, %v6945_v42, %v1462_v61  ;;  %v2558_v18 = vrot.slane %v2244_v12, 1  ;;  %2461 = vmatpush.bf16.msrb.mxu3 %v5863_v21  ;;  %v7059_v42 = vsel %vm2533_vm4, %v6985_v58, %v2556_v63  ;;  %v2559_v48 = vrot.slane %v2240_v11, 2 }
 0x145   : > { %1552 = vmatmul.bf16.gmra.mxu2 %v1463_v10  ;;  %v1695_v14 = vshrl.u32 %v1640_v8, 16  ;;  %v1698_v16 = vshll.u32 %v1640_v8, 16  ;;  %v1981_v43 = vrot.slane %v1979_v34, 1  ;;  %v2389_v62 = vrot.slane %v6809_v5, 1 }
 0x146   : > { %v7069_v60 = vor.u32 %v2559_v48, %v2558_v18  ;;  %v2388_v6 = vrot.slane %v6799_v54, 1  ;;  %v1983_v8 = vshrl.u32 %v6754_v45, 16  ;;  %v2214_v18 = vor.u32 %v2212_v27, %v2210_v41 }
 0x147   : > { %v1697_v19 = vrot.slane %v1695_v14, 3  ;;  %v1700_v20 = vrot.slane %v1698_v16, 4  ;;  %2629 = vmatpush.bf16.msrb.mxu0 %v5873_v32  ;;  %v2218_v14 = vrot.slane %v2216_v23, 1  ;;  %v5872_v23 = vld [vmem:[%s8012_s4 + $0x218] sm:$0xff]  ;;  %v2391_v27 = vrot.slane %v6862_v0, 1 }
 0x148   : > { %2462 = vmatpush.bf16.msrb.mxu3 %v5862_v47  ;;  %v7073_v58 = vsel %vm2533_vm4, %v2556_v63, %v7069_v60  ;;  %v2390_v16 = vsel %vm2387_vm6, %v2388_v6, %v2389_v62  ;;  %v1985_v21 = vor.u32 %v1983_v8, %v1981_v43  ;;  %v1991_v15 = vshrl.u32 %v6780_v37, 16 }
 0x149   : > { %v1701_v25 = vor.u32 %v1700_v20, %v1697_v19  ;;  %v2219_v54 = vsel %vm1970_vm5, %v2214_v18, %v2218_v14  ;;  %v2226_v51 = vrot.slane %v2224_v52, 1  ;;  %v2392_v34 = vsel %vm2387_vm6, %v2389_v62, %v2391_v27 }
 0x14a   : > { %v1999_v8 = vshrl.u32 %v6821_v28, 16 }
 0x14b   : > { %v1702_v38 = vsel %vm663_vm3, %v1692_v9, %v1701_v25  ;;  %v2201_v9 = vshrl.u32 %v6778_v35, 16  ;;  %v1987_v35 = vshll.u32 %v6780_v37, 16  ;;  %2630 = vmatpush.bf16.msrb.mxu0 %v5872_v23  ;;  %v2230_v18 = vor.u32 %v2228_v40, %v2226_v51 }
 0x14c   : > { %2463 = vmatpush.bf16.msrb.mxu3 %v5861_v13  ;;  %v2011_v40 = vshll.u32 %v6943_v56, 16 }
 0x14d   : > { %v1989_v10 = vrot.slane %v1987_v35, 1  ;;  %v2393_v35 = vrot.slane %v6931_v4, 1 }
 0x14f   : > { %v1990_v48 = vsel %vm1970_vm5, %v1985_v21, %v1989_v10 }
 0x150   : > { %1238 = vmatmul.bf16.gmra.mxu0 %v1143_v46  ;;  %v1972_v46 = vshrl.u32 %v6157_v49, 16 }
 0x151   : > { %1791 = vmatmul.bf16.gmra.mxu3 %v1702_v38 }
 0x152   : > { %v1977_v55 = vor.u32 %v1976_v1, %v1972_v46  ;;  %v1993_v1 = vor.u32 %v1991_v15, %v1989_v10  ;;  %v2222_v46 = vor.u32 %v2220_v24, %v2218_v14  ;;  %v2003_v24 = vshll.u32 %v6874_v26, 16 }
 0x153   : > { %v2234_v14 = vrot.slane %v2232_v30, 1  ;;  %v5870_v30 = vld [vmem:[%s8012_s4 + $0x208] sm:$0xff]  ;;  %v2242_v15 = vrot.slane %v2240_v11, 1 }
 0x154   : > { %1401 = vmatmul.bf16.gmra.mxu1 %v1306_v22  ;;  %v2206_v22 = vor.u32 %v2205_v29, %v2201_v9  ;;  %v1982_v57 = vsel %vm1970_vm5, %v1977_v55, %v1981_v43  ;;  %v2227_v9 = vsel %vm1970_vm5, %v2222_v46, %v2226_v51  ;;  %v2005_v10 = vrot.slane %v2003_v24, 1  ;;  %v5869_v46 = vld [vmem:[%s8012_s4 + $0x200] sm:$0xff] }
 0x155   : > { %1557 = vmatmul.bf16.gmra.mxu2 %v1462_v61 }
 0x156   : > { %v2211_v44 = vsel %vm1970_vm5, %v2206_v22, %v2210_v41 }
 0x160   : > { %1901 = vmatmul.bf16.vlgmr.msra.gmra.mxu0 %v6157_v49 }
 0x161   : > { %1796 = vmatmul.bf16.gmra.mxu3 %v1701_v25  ;;  %v1995_v25 = vshll.u32 %v6821_v28, 16 }
 0x163   : > { %v1997_v17 = vrot.slane %v1995_v25, 1  ;;  %v2395_v25 = vrot.slane %v7001_v53, 1 }
 0x164   : > { %2089 = vmatmul.bf16.vlgmr.msra.gmra.mxu1 %v1982_v57  ;;  %v5871_v57 = vld [vmem:[%s8012_s4 + $0x210] sm:$0xff] }
 0x165   : > { %2318 = vmatmul.bf16.vlgmr.msrb.gmra.mxu2 %v2211_v44  ;;  %v1998_v43 = vsel %vm1970_vm5, %v1993_v1, %v1997_v17  ;;  %2631 = vmatpush.bf16.msrb.mxu0 %v5871_v57  ;;  %v2001_v21 = vor.u32 %v1999_v8, %v1997_v17  ;;  %v1949_v17 = vld [vmem:[#allocation2 + $0x38] sm:$0x7]  ;;  %v2396_v51 = vsel %vm2387_vm6, %v2393_v35, %v2395_v25  ;;  %v2015_v8 = vshrl.u32 %v6943_v56, 16 }
 0x169   : > { %v1209_v61 = vpop.f32.mrf.mxu0  ;;  %2632 = vmatpush.bf16.msrb.mxu0 %v5870_v30 }
 0x16d   : > { %v1372_v31 = vpop.f32.mrf.mxu1  ;;  %2633 = vmatpush.bf16.msrb.mxu0 %v5869_v46 }
 0x16e   : > { %v1373_v3 = vadd.f32 %v1372_v31, %v1209_v61 }
 0x170   : > { %1906 = vmatmul.bf16.gmra.mxu0 %v6754_v45 }
 0x171   : > { %2464 = vmatmul.bf16.vlgmr.msrb.gmra.mxu3 %v2390_v16  ;;  %v1211_v63 = vpop.f32.mrf.mxu0  ;;  %v2394_v16 = vsel %vm2387_vm6, %v2391_v27, %v2393_v35 }
 0x174   : > { %2094 = vmatmul.bf16.gmra.mxu1 %v1990_v48  ;;  %v1528_v19 = vpop.f32.mrf.mxu2  ;;  %v2006_v48 = vsel %vm1970_vm5, %v2001_v21, %v2005_v10 }
 0x175   : > { %2323 = vmatmul.bf16.gmra.mxu2 %v2219_v54  ;;  %v1562_v20 = vadd.f32 %v1528_v19, %v1373_v3  ;;  %v1374_v45 = vpop.f32.mrf.mxu1  ;;  %v2235_v54 = vsel %vm1970_vm5, %v2230_v18, %v2234_v14 }
 0x176   : > { %v1375_v47 = vadd.f32 %v1374_v45, %v1211_v63 }
 0x179   : > { %v1214_v36 = vpop.f32.mrf.mxu0 }
 0x17c   : > { %v1530_v5 = vpop.f32.mrf.mxu2 }
 0x17d   : > { %v1563_v13 = vadd.f32 %v1530_v5, %v1375_v47  ;;  %v1377_v38 = vpop.f32.mrf.mxu1 }
 0x17e   : > { %v1378_v49 = vadd.f32 %v1377_v38, %v1214_v36  ;;  %v2007_v38 = vshrl.u32 %v6874_v26, 16 }
 0x180   : > { %1911 = vmatmul.bf16.gmra.mxu0 %v6780_v37 }
 0x181   : > { %2469 = vmatmul.bf16.gmra.mxu3 %v2392_v34  ;;  %v1216_v29 = vpop.f32.mrf.mxu0  ;;  %v2009_v34 = vor.u32 %v2007_v38, %v2005_v10 }
 0x184   : > { %2099 = vmatmul.bf16.gmra.mxu1 %v1998_v43  ;;  %v1533_v41 = vpop.f32.mrf.mxu2  ;;  %v1767_v55 = vpop.f32.mrf.mxu3 }
 0x185   : > { %2328 = vmatmul.bf16.gmra.mxu2 %v2227_v9  ;;  %v1564_v37 = vadd.f32 %v1533_v41, %v1378_v49  ;;  %v7118_v22 = vadd.f32 %v1767_v55, %v1562_v20  ;;  %v1379_v52 = vpop.f32.mrf.mxu1  ;;  %v2013_v49 = vrot.slane %v2011_v40, 1  ;;  %v2149_v9 = vld [vmem:[#allocation2 + $0x3c] sm:$0x7] }
 0x186   : > { %v1380_v44 = vadd.f32 %v1379_v52, %v1216_v29  ;;  %v2238_v29 = vor.u32 %v2236_v39, %v2234_v14  ;;  %v2192_v39 = vunpack.c.l.b16 %v2149_v9  ;;  %v2246_v14 = vor.u32 %v2244_v12, %v2242_v15 }
 0x187   : > { %v2014_v43 = vsel %vm1970_vm5, %v2009_v34, %v2013_v49  ;;  %v2017_v18 = vor.u32 %v2015_v8, %v2013_v49 }
 0x188   : > { %v2243_v11 = vsel %vm1970_vm5, %v2238_v29, %v2242_v15 }
 0x189   : > { %v1219_v0 = vpop.f32.mrf.mxu0 }
 0x18c   : > { %v1535_v32 = vpop.f32.mrf.mxu2  ;;  %v1769_v61 = vpop.f32.mrf.mxu3 }
 0x18d   : > { %v1565_v62 = vadd.f32 %v1535_v32, %v1380_v44  ;;  %v7125_v31 = vadd.f32 %v1769_v61, %v1563_v13  ;;  %v1382_v3 = vpop.f32.mrf.mxu1 }
 0x18e   : > { %v1383_v6 = vadd.f32 %v1382_v3, %v1219_v0  ;;  %v2199_v0 = vpack.c.b16 %v2192_v39, %v2192_v39 }
 0x190   : > { %1916 = vmatmul.bf16.gmra.mxu0 %v6821_v28  ;;  %v2248_v32 = vshll.u32 %v2199_v0, 16  ;;  %v2252_v40 = vshrl.u32 %v2199_v0, 16 }
 0x191   : > { %2474 = vmatmul.bf16.gmra.mxu3 %v2394_v16  ;;  %v7132_v63 = vpop.f32.mrf.mxu0 }
 0x192   : > { %v2250_v16 = vrot.slane %v2248_v32, 1 }
 0x194   : > { %2104 = vmatmul.bf16.gmra.mxu1 %v2006_v48  ;;  %v1538_v19 = vpop.f32.mrf.mxu2  ;;  %v1772_v28 = vpop.f32.mrf.mxu3  ;;  %v2254_v15 = vor.u32 %v2252_v40, %v2250_v16 }
 0x195   : > { %2333 = vmatmul.bf16.gmra.mxu2 %v2235_v54  ;;  %v1566_v20 = vadd.f32 %v1538_v19, %v1383_v6  ;;  %v7141_v45 = vadd.f32 %v1772_v28, %v1564_v37  ;;  %v7143_v47 = vpop.f32.mrf.mxu1  ;;  %v2251_v19 = vsel %vm1970_vm5, %v2246_v14, %v2250_v16 }
 0x199   : > { %v1224_v4 = vpop.f32.mrf.mxu0 }
 0x19c   : > { %v7146_v23 = vpop.f32.mrf.mxu2  ;;  %v1774_v36 = vpop.f32.mrf.mxu3 }
 0x19d   : > { %v7149_v5 = vadd.f32 %v1774_v36, %v1565_v62  ;;  %v1387_v27 = vpop.f32.mrf.mxu1  ;;  %v2397_v62 = vrot.slane %v7039_v33, 1 }
 0x19e   : > { %v1388_v13 = vadd.f32 %v1387_v27, %v1224_v4  ;;  %v2399_v4 = vrot.slane %v2199_v0, 1 }
 0x19f   : > { %v2398_v21 = vsel %vm2387_vm6, %v2395_v25, %v2397_v62  ;;  %v1837_v25 = vpack.c.b16 %v7031_v59, %v7031_v59 }
 0x1a0   : > { %1921 = vmatmul.bf16.gmra.mxu0 %v6874_v26  ;;  %v1968_v26 = vunpack.c.l.b16 %v1949_v17  ;;  %v2400_v49 = vsel %vm2387_vm6, %v2397_v62, %v2399_v4 }
 0x1a1   : > { %2479 = vmatmul.bf16.gmra.mxu3 %v2396_v51  ;;  %v7156_v1 = vpop.f32.mrf.mxu0 }
 0x1a2   : > { %v1969_v57 = vpack.c.b16 %v1968_v26, %v1968_v26 }
 0x1a4   : > { %2109 = vmatmul.bf16.gmra.mxu1 %v2014_v43  ;;  %v1543_v41 = vpop.f32.mrf.mxu2  ;;  %v1777_v55 = vpop.f32.mrf.mxu3  ;;  %v2019_v24 = vshll.u32 %v1969_v57, 16 }
 0x1a5   : > { %2338 = vmatmul.bf16.gmra.mxu2 %v2243_v11  ;;  %v1568_v37 = vadd.f32 %v1543_v41, %v1388_v13  ;;  %v7165_v52 = vadd.f32 %v1777_v55, %v1566_v20  ;;  %v7167_v53 = vpop.f32.mrf.mxu1  ;;  %v2023_v13 = vshrl.u32 %v1969_v57, 16 }
 0x1a6   : > { %v2021_v10 = vrot.slane %v2019_v24, 1 }
 0x1a8   : > { %v2022_v48 = vsel %vm1970_vm5, %v2017_v18, %v2021_v10  ;;  %v2025_v51 = vor.u32 %v2023_v13, %v2021_v10 }
 0x1a9   : > { %v1229_v44 = vpop.f32.mrf.mxu0 }
 0x1ac   : > { %v7169_v61 = vpop.f32.mrf.mxu2  ;;  %v7171_v35 = vpop.f32.mrf.mxu3 }
 0x1ad   : > { %v1392_v3 = vpop.f32.mrf.mxu1 }
 0x1ae   : > { %v1393_v6 = vadd.f32 %v1392_v3, %v1229_v44 }
 0x1b0   : > { %1926 = vmatmul.bf16.gmra.mxu0 %v6943_v56 }
 0x1b1   : > { %2484 = vmatmul.bf16.gmra.mxu3 %v2398_v21  ;;  %v7180_v54 = vpop.f32.mrf.mxu0 }
 0x1b4   : > { %2114 = vmatmul.bf16.gmra.mxu1 %v2022_v48  ;;  %v1548_v28 = vpop.f32.mrf.mxu2  ;;  %v1782_v30 = vpop.f32.mrf.mxu3 }
 0x1b5   : > { %2343 = vmatmul.bf16.gmra.mxu2 %v2251_v19  ;;  %v1570_v20 = vadd.f32 %v1548_v28, %v1393_v6  ;;  %v7183_v56 = vadd.f32 %v1782_v30, %v1568_v37  ;;  %v7185_v33 = vpop.f32.mrf.mxu1 }
 0x1bc   : > { %v7187_v36 = vpop.f32.mrf.mxu3  ;;  %v7191_v27 = vpop.f32.mrf.mxu2 }
 0x1bd   : > { %v1234_v12 = vpop.f32.mrf.mxu0 }
 0x1c0   : > { %1931 = vmatmul.bf16.gmra.mxu0 %v1837_v25 }
 0x1c1   : > { %v1397_v38 = vpop.f32.mrf.mxu1  ;;  %2489 = vmatmul.bf16.gmra.mxu3 %v2400_v49 }
 0x1c2   : > { %v1398_v17 = vadd.f32 %v1397_v38, %v1234_v12  ;;  %v5896_v12 = vld [vmem:[%s8014_s6 + $0x70] sm:$0xff] }
 0x1c4   : > { %2119 = vmatmul.bf16.gmra.mxu1 %v2025_v51  ;;  %v1787_v29 = vpop.f32.mrf.mxu3  ;;  %v5895_v51 = vld [vmem:[%s8014_s6 + $0x68] sm:$0xff] }
 0x1c5   : > { %2348 = vmatmul.bf16.gmra.mxu2 %v2254_v15  ;;  %v7194_v34 = vpop.f32.mrf.mxu0  ;;  %v7196_v46 = vadd.f32 %v1787_v29, %v1570_v20 }
 0x1c8   : > { %v1553_v43 = vpop.f32.mrf.mxu2 }
 0x1c9   : > { %v1572_v59 = vadd.f32 %v1553_v43, %v1398_v17  ;;  %v7198_v26 = vpop.f32.mrf.mxu1 }
 0x1cc   : > { %v7200_v11 = vpop.f32.mrf.mxu3 }
 0x1cd   : > { %v1239_v9 = vpop.f32.mrf.mxu0 }
 0x1d0   : > { %v7202_v41 = vpop.f32.mrf.mxu2  ;;  %2634 = vmatmul.bf16.vlgmr.msrb.gmra.mxu0 %v6851_v7  ;;  %v5897_v7 = vld [vmem:[%s8014_s6 + $0x78] sm:$0xff] }
 0x1d1   : > { %v1402_v55 = vpop.f32.mrf.mxu1  ;;  %2494 = vmatmul.bf16.gmra.mxu3 %v2399_v4  ;;  %2980 = vmatpush.bf16.msrb.mxu1 %v5897_v7 }
 0x1d2   : > { %v1403_v37 = vadd.f32 %v1402_v55, %v1239_v9 }
 0x1d4   : > { %v1792_v57 = vpop.f32.mrf.mxu3 }
 0x1d5   : > { %v1241_v39 = vpop.f32.mrf.mxu0  ;;  %v7205_v44 = vadd.f32 %v1792_v57, %v1572_v59  ;;  %2981 = vmatpush.bf16.msrb.mxu1 %v5896_v12 }
 0x1d8   : > { %v1558_v0 = vpop.f32.mrf.mxu2 }
 0x1d9   : > { %v1574_v24 = vadd.f32 %v1558_v0, %v1403_v37  ;;  %v1404_v32 = vpop.f32.mrf.mxu1  ;;  %2982 = vmatpush.bf16.msrb.mxu1 %v5895_v51  ;;  %v2512_v0 = vld [vmem:[#allocation2 + $0x3c] sm:$0xf] }
 0x1dc   : > { %v7207_v3 = vpop.f32.mrf.mxu3 }
 0x1dd   : > { %v1902_v62 = vpop.f32.mrf.mxu0 }
 0x1de   : > { %v1936_v6 = vadd.f32 %v1902_v62, %v7118_v22  ;;  %v2531_v62 = vunpack.c.l.b16 %v2512_v0  ;;  %v5892_v0 = vld [vmem:[%s8014_s6 + $0x50] sm:$0xff] }
 0x1e0   : > { %v1560_v8 = vpop.f32.mrf.mxu2  ;;  %2639 = vmatmul.bf16.gmra.mxu0 %v6917_v2 }
 0x1e1   : > { %v2090_v10 = vpop.f32.mrf.mxu1 }
 0x1e2   : > { %v2124_v14 = vadd.f32 %v2090_v10, %v1936_v6  ;;  %v2532_v10 = vpack.c.b16 %v2531_v62, %v2531_v62 }
 0x1e4   : > { %v1797_v21 = vpop.f32.mrf.mxu3 }
 0x1e5   : > { %v1904_v16 = vpop.f32.mrf.mxu0  ;;  %v7217_v48 = vadd.f32 %v1797_v21, %v1574_v24  ;;  %v2563_v21 = vshrl.u32 %v2532_v10, 16 }
 0x1e6   : > { %v7215_v18 = vadd.f32 %v1904_v16, %v7125_v31 }
 0x1e8   : > { %v2319_v19 = vpop.f32.mrf.mxu2 }
 0x1e9   : > { %v2353_v28 = vadd.f32 %v2319_v19, %v2124_v14  ;;  %v7219_v22 = vpop.f32.mrf.mxu1  ;;  %v2566_v19 = vshll.u32 %v2532_v10, 16 }
 0x1eb   : > { %v2568_v12 = vrot.slane %v2566_v19, 2  ;;  %v5891_v19 = vld [vmem:[%s8014_s6 + $0x48] sm:$0xff] }
 0x1ec   : > { %v1799_v2 = vpop.f32.mrf.mxu3 }
 0x1ed   : > { %v1907_v30 = vpop.f32.mrf.mxu0 }
 0x1ee   : > { %v1938_v20 = vadd.f32 %v1907_v30, %v7141_v45 }
 0x1f0   : > { %v7225_v4 = vpop.f32.mrf.mxu2  ;;  %2644 = vmatmul.bf16.gmra.mxu0 %v6999_v50 }
 0x1f1   : > { %v2095_v31 = vpop.f32.mrf.mxu1 }
 0x1f2   : > { %v2126_v40 = vadd.f32 %v2095_v31, %v1938_v20  ;;  %v2565_v20 = vrot.slane %v2563_v21, 1  ;;  %v5905_v21 = vld [vmem:[%s8014_s6 + $0xb8] sm:$0xff] }
 0x1f3   : > { %3299 = vmatpush.bf16.msra.mxu3 %v5905_v21 }
 0x1f4   : > { %v2465_v38 = vpop.f32.mrf.mxu3 }
 0x1f5   : > { %v1909_v25 = vpop.f32.mrf.mxu0  ;;  %v7231_v49 = vadd.f32 %v2465_v38, %v2353_v28 }
 0x1f6   : > { %v7229_v13 = vadd.f32 %v1909_v25, %v7149_v5  ;;  %v5893_v25 = vld [vmem:[%s8014_s6 + $0x58] sm:$0xff] }
 0x1f8   : > { %v2324_v15 = vpop.f32.mrf.mxu2 }
 0x1f9   : > { %v2355_v45 = vadd.f32 %v2324_v15, %v2126_v40  ;;  %v7233_v17 = vpop.f32.mrf.mxu1 }
 0x1fc   : > { %v7239_v43 = vpop.f32.mrf.mxu3 }
 0x1fd   : > { %v1912_v50 = vpop.f32.mrf.mxu0 }
 0x1fe   : > { %v1940_v29 = vadd.f32 %v1912_v50, %v7165_v52  ;;  %v5894_v52 = vld [vmem:[%s8014_s6 + $0x60] sm:$0xff] }
 0x1ff   : > { %2983 = vmatpush.bf16.msrb.mxu1 %v5894_v52 }
 0x200   : > { %v7241_v59 = vpop.f32.mrf.mxu2  ;;  %2649 = vmatmul.bf16.gmra.mxu0 %v7059_v42 }
 0x201   : > { %v2100_v5 = vpop.f32.mrf.mxu1 }
 0x202   : > { %v2128_v9 = vadd.f32 %v2100_v5, %v1940_v29 }
 0x203   : > { %2984 = vmatpush.bf16.msrb.mxu1 %v5893_v25  ;;  %v5888_v25 = vld [vmem:[%s8014_s6 + $0x30] sm:$0xff] }
 0x204   : > { %v2470_v37 = vpop.f32.mrf.mxu3 }
 0x205   : > { %v7244_v55 = vpop.f32.mrf.mxu0  ;;  %v7246_v39 = vadd.f32 %v2470_v37, %v2355_v45 }
 0x207   : > { %2985 = vmatpush.bf16.msrb.mxu1 %v5892_v0 }
 0x208   : > { %v2329_v57 = vpop.f32.mrf.mxu2 }
 0x209   : > { %v2357_v24 = vadd.f32 %v2329_v57, %v2128_v9  ;;  %v7248_v32 = vpop.f32.mrf.mxu1 }
 0x20b   : > { %2986 = vmatpush.bf16.msrb.mxu1 %v5891_v19 }
 0x20c   : > { %v7254_v8 = vpop.f32.mrf.mxu3 }
 0x20d   : > { %v1917_v6 = vpop.f32.mrf.mxu0 }
 0x20e   : > { %v1942_v42 = vadd.f32 %v1917_v6, %v7183_v56 }
 0x210   : > { %v7256_v7 = vpop.f32.mrf.mxu2  ;;  %2654 = vmatmul.bf16.gmra.mxu0 %v7073_v58  ;;  %v2569_v58 = vor.u32 %v2568_v12, %v2565_v20 }
 0x211   : > { %v2105_v14 = vpop.f32.mrf.mxu1 }
 0x212   : > { %v2130_v16 = vadd.f32 %v2105_v14, %v1942_v42  ;;  %v2570_v51 = vsel %vm2533_vm4, %v7069_v60, %v2569_v58 }
 0x214   : > { %v2475_v30 = vpop.f32.mrf.mxu3 }
 0x215   : > { %v7259_v28 = vpop.f32.mrf.mxu0  ;;  %v7261_v2 = vadd.f32 %v2475_v30, %v2357_v24 }
 0x218   : > { %v2334_v31 = vpop.f32.mrf.mxu2 }
 0x219   : > { %v2359_v56 = vadd.f32 %v2334_v31, %v2130_v16  ;;  %v7263_v40 = vpop.f32.mrf.mxu1  ;;  %v5889_v16 = vld [vmem:[%s8014_s6 + $0x38] sm:$0xff] }
 0x21a   : > { %3143 = vmatpush.bf16.msra.mxu2 %v5889_v16  ;;  %v5913_v16 = vld [vmem:[%s8014_s6 + $0xf8] sm:$0xff] }
 0x21b   : > { %3538 = vmatpush.bf16.msra.mxu0 %v5913_v16 }
 0x21c   : > { %v7269_v45 = vpop.f32.mrf.mxu3 }
 0x21d   : > { %v1922_v38 = vpop.f32.mrf.mxu0 }
 0x21e   : > { %v1944_v15 = vadd.f32 %v1922_v38, %v7196_v46  ;;  %3144 = vmatpush.bf16.msra.mxu2 %v5888_v25 }
 0x220   : > { %v7273_v50 = vpop.f32.mrf.mxu2  ;;  %2659 = vmatmul.bf16.gmra.mxu0 %v2570_v51 }
 0x221   : > { %v2110_v29 = vpop.f32.mrf.mxu1 }
 0x222   : > { %v2132_v5 = vadd.f32 %v2110_v29, %v1944_v15  ;;  %v5887_v29 = vld [vmem:[%s8014_s6 + $0x28] sm:$0xff] }
 0x223   : > { %3145 = vmatpush.bf16.msra.mxu2 %v5887_v29 }
 0x224   : > { %v2480_v37 = vpop.f32.mrf.mxu3 }
 0x225   : > { %v7275_v9 = vpop.f32.mrf.mxu0  ;;  %v7277_v57 = vadd.f32 %v2480_v37, %v2359_v56 }
 0x228   : > { %v2339_v46 = vpop.f32.mrf.mxu2 }
 0x229   : > { %v2361_v24 = vadd.f32 %v2339_v46, %v2132_v5  ;;  %v7282_v52 = vpop.f32.mrf.mxu1  ;;  %v5903_v5 = vld [vmem:[%s8014_s6 + $0xa8] sm:$0xff] }
 0x22c   : > { %v7285_v6 = vpop.f32.mrf.mxu3 }
 0x22d   : > { %v1927_v60 = vpop.f32.mrf.mxu0 }
 0x22e   : > { %v1946_v62 = vadd.f32 %v1927_v60, %v7205_v44  ;;  %v5890_v60 = vld [vmem:[%s8014_s6 + $0x40] sm:$0xff] }
 0x22f   : > { %2987 = vmatpush.bf16.msrb.mxu1 %v5890_v60  ;;  %v7367_v60 = vld [vmem:[%s8013_s5] ss:$0 sm:$0xff] }
 0x230   : > { %v7287_v42 = vpop.f32.mrf.mxu2  ;;  %2664 = vmatmul.bf16.gmra.mxu0 %v2569_v58  ;;  %v5904_v58 = vld [vmem:[%s8014_s6 + $0xb0] sm:$0xff] }
 0x231   : > { %v2115_v10 = vpop.f32.mrf.mxu1  ;;  %3300 = vmatpush.bf16.msra.mxu3 %v5904_v58  ;;  %v5884_v58 = vld [vmem:[%s8014_s6 + $0x10] sm:$0xff] }
 0x232   : > { %v2134_v14 = vadd.f32 %v2115_v10, %v1946_v62  ;;  %v5885_v10 = vld [vmem:[%s8014_s6 + $0x18] sm:$0xff] }
 0x234   : > { %v2485_v30 = vpop.f32.mrf.mxu3 }
 0x235   : > { %v7298_v44 = vpop.f32.mrf.mxu0  ;;  %v7300_v20 = vadd.f32 %v2485_v30, %v2361_v24  ;;  %3301 = vmatpush.bf16.msra.mxu3 %v5903_v5  ;;  %v5902_v24 = vld [vmem:[%s8014_s6 + $0xa0] sm:$0xff]  ;;  %v5883_v5 = vld [vmem:[%s8014_s6 + $0x8] sm:$0xff] }
 0x238   : > { %v2344_v12 = vpop.f32.mrf.mxu2 }
 0x239   : > { %v2363_v31 = vadd.f32 %v2344_v12, %v2134_v14  ;;  %v7302_v56 = vpop.f32.mrf.mxu1  ;;  %3302 = vmatpush.bf16.msra.mxu3 %v5902_v24  ;;  %v5901_v14 = vld [vmem:[%s8014_s6 + $0x98] sm:$0xff] }
 0x23c   : > { %v7311_v51 = vpop.f32.mrf.mxu3 }
 0x23d   : > { %v1932_v38 = vpop.f32.mrf.mxu0  ;;  %3303 = vmatpush.bf16.msra.mxu3 %v5901_v14  ;;  %v5882_v14 = vld [vmem:[%s8014_s6] sm:$0xff] }
 0x23e   : > { %v1948_v15 = vadd.f32 %v1932_v38, %v7217_v48  ;;  %v5886_v48 = vld [vmem:[%s8014_s6 + $0x20] sm:$0xff]  ;;  %v5900_v38 = vld [vmem:[%s8014_s6 + $0x90] sm:$0xff] }
 0x23f   : > { %3146 = vmatpush.bf16.msra.mxu2 %v5886_v48  ;;  %v2125_v48 = vadd.f32 %v7219_v22, %v7215_v18  ;;  %v5898_v18 = vld [vmem:[%s8014_s6 + $0x80] sm:$0xff] }
 0x240   : > { %v7319_v37 = vpop.f32.mrf.mxu2  ;;  %v5910_v22 = vld [vmem:[%s8014_s6 + $0xe0] sm:$0xff] }
 0x241   : > { %v2120_v0 = vpop.f32.mrf.mxu1  ;;  %3304 = vmatpush.bf16.msra.mxu3 %v5900_v38 }
 0x242   : > { %v2136_v46 = vadd.f32 %v2120_v0, %v1948_v15  ;;  %v5912_v15 = vld [vmem:[%s8014_s6 + $0xf0] sm:$0xff]  ;;  %v5899_v0 = vld [vmem:[%s8014_s6 + $0x88] sm:$0xff] }
 0x243   : > { %3147 = vmatpush.bf16.msra.mxu2 %v5885_v10  ;;  %3539 = vmatpush.bf16.msra.mxu0 %v5912_v15  ;;  %v2354_v10 = vadd.f32 %v7225_v4, %v2125_v48  ;;  %v5921_v4 = vld [vmem:[%s8014_s6 + $0x138] sm:$0xff]  ;;  %v2829_v15 = vld [vmem:[#allocation3] sm:$0xc] }
 0x244   : > { %v2490_v21 = vpop.f32.mrf.mxu3  ;;  %3673 = vmatpush.bf16.msra.mxu1 %v5921_v4 }
 0x245   : > { %v1934_v62 = vpop.f32.mrf.mxu0  ;;  %v7339_v19 = vadd.f32 %v2490_v21, %v2363_v31  ;;  %3305 = vmatpush.bf16.msra.mxu3 %v5899_v0  ;;  %v2859_v0 = vld [vmem:[#allocation3] sm:$0x8] }
 0x247   : > { %3148 = vmatpush.bf16.msra.mxu2 %v5884_v58  ;;  %v5909_v58 = vld [vmem:[%s8014_s6 + $0xd8] sm:$0xff] }
 0x248   : > { %v2349_v30 = vpop.f32.mrf.mxu2 }
 0x249   : > { %v2365_v12 = vadd.f32 %v2349_v30, %v2136_v46  ;;  %v2122_v25 = vpop.f32.mrf.mxu1  ;;  %v5911_v46 = vld [vmem:[%s8014_s6 + $0xe8] sm:$0xff]  ;;  %3306 = vmatpush.bf16.msra.mxu3 %v5898_v18 }
 0x24a   : > { %3540 = vmatpush.bf16.msra.mxu0 %v5911_v46 }
 0x24b   : > { %3149 = vmatpush.bf16.msra.mxu2 %v5883_v5 }
 0x24c   : > { %v7350_v29 = vpop.f32.mrf.mxu3 }
 0x24d   : > { %v2635_v31 = vpop.f32.mrf.mxu0 }
 0x24e   : > { %v2669_v24 = vadd.f32 %v2635_v31, %v7231_v49  ;;  %v2500_v49 = vadd.f32 %v7239_v43, %v2354_v10  ;;  %3541 = vmatpush.bf16.msra.mxu0 %v5910_v22  ;;  %v2830_v43 = vld [vmem:[#allocation3 + $0x4] sm:$0xf]  ;;  %v2732_v10 = vpop.permute.xlu2 %2731 }
 0x24f   : > { %3150 = vmatpush.bf16.msra.mxu2 %v5882_v14  ;;  %v2892_v48 = vunpack.c.l.b16 %v2830_v43  ;;  %v5908_v14 = vld [vmem:[%s8014_s6 + $0xd0] sm:$0xff] }
 0x250   : > { %v2351_v62 = vpop.f32.mrf.mxu2  ;;  %v2685_v16 = vadd.f32 %v7367_v60, %v2669_v24  ;;  %v3024_v24 = vunpack.c.l.b16 %v2829_v15 }
 0x251   : > { %v2727_v62 = vpop.permute.xlu1 %2726 }
 0x252   : > { %v2698_v31 = vmax.f32 %v2685_v16, 0.0  ;;  %3542 = vmatpush.bf16.msra.mxu0 %v5909_v58  ;;  %v3025_v16 = vpack.c.b16 %v2892_v48, %v3024_v24 }
 0x254   : > { %v2495_v30 = vpop.f32.mrf.mxu3  ;;  %v2789_v18 = vmul.f32 %v2727_v62, %v2698_v31  ;;  %v3027_v31 = vshrl.u32 %v3025_v16, 16 }
 0x255   : > { %v2637_v21 = vpop.f32.mrf.mxu0  ;;  %v7387_v38 = vadd.f32 %v2495_v30, %v2365_v12  ;;  %v2891_v12 = vunpack.c.l.b16 %v2859_v0  ;;  %v5907_v30 = vld [vmem:[%s8014_s6 + $0xc8] sm:$0xff]  ;;  %v5906_v0 = vld [vmem:[%s8014_s6 + $0xc0] sm:$0xff] }
 0x256   : > { %v2670_v25 = vadd.f32 %v2637_v21, %v2500_v49  ;;  %3543 = vmatpush.bf16.msra.mxu0 %v5908_v14 }
 0x257   : > { %v2905_v43 = vpack.c.b16 %v2892_v48, %v2891_v12 }
 0x258   : > { %v2686_v5 = vadd.f32 %v7367_v60, %v2670_v25  ;;  %v2127_v25 = vadd.f32 %v7233_v17, %v7229_v13  ;;  %v5920_v17 = vld [vmem:[%s8014_s6 + $0x130] sm:$0xff] }
 0x259   : > { %v3208_v62 = vshrl.u32 %v2905_v43, 16  ;;  %v3211_v13 = vshll.u32 %v2905_v43, 16  ;;  %3674 = vmatpush.bf16.msra.mxu1 %v5920_v17 }
 0x25a   : > { %v2699_v46 = vmax.f32 %v2686_v5, 0.0  ;;  %v2356_v15 = vadd.f32 %v7241_v59, %v2127_v25  ;;  %v3030_v5 = vshll.u32 %v3025_v16, 16  ;;  %3544 = vmatpush.bf16.msra.mxu0 %v5907_v30  ;;  %v1385_v59 = vadd.f32 %v7143_v47, %v7132_v63 }
 0x25b   : > { %v3210_v16 = vrot.slane %v3208_v62, 3 }
 0x25c   : > { %v2790_v22 = vmul.f32 %v2732_v10, %v2699_v46  ;;  %v2497_v21 = vpop.f32.mrf.mxu3  ;;  %v2502_v46 = vadd.f32 %v7254_v8, %v2356_v15  ;;  %v3029_v10 = vrot.slane %v3027_v31, 2  ;;  %v3032_v14 = vrot.slane %v3030_v5, 3  ;;  %v2737_v31 = vpop.permute.xlu0 %2736 }
 0x25d   : > { %v2640_v49 = vpop.f32.mrf.mxu0  ;;  %v3213_v21 = vrot.slane %v3211_v13, 4 }
 0x25e   : > { %v7393_v4 = vpack.c.bf16 %v2790_v22, %v2789_v18  ;;  %v2671_v58 = vadd.f32 %v2640_v49, %v7246_v39  ;;  %3545 = vmatpush.bf16.msra.mxu0 %v5906_v0  ;;  %v1567_v18 = vadd.f32 %v7146_v23, %v1385_v59  ;;  %v2912_v22 = vrot.slane %v2905_v43, 3  ;;  %v2742_v23 = vpop.permute.xlu1 %2741 }
 0x25f   : > { %v3033_v15 = vor.u32 %v3032_v14, %v3029_v10  ;;  %v3214_v13 = vor.u32 %v3213_v21, %v3210_v16  ;;  %v5919_v21 = vld [vmem:[%s8014_s6 + $0x128] sm:$0xff] }
 0x260   : > { %6163 = vst [vmem:[#allocation3 + $0x8] sm:$0xff] %v7393_v4   ;;  %v2687_v24 = vadd.f32 %v7367_v60, %v2671_v58  ;;  %v1806_v25 = vadd.f32 %v7171_v35, %v1567_v18  ;;  %3675 = vmatpush.bf16.msra.mxu1 %v5919_v21 }
 0x262   : > { %v2700_v12 = vmax.f32 %v2687_v24, 0.0  ;;  %v1941_v35 = vadd.f32 %v7244_v55, %v1806_v25 }
 0x264   : > { %v2791_v24 = vmul.f32 %v2737_v31, %v2700_v12 }
 0x265   : > { %v2642_v39 = vpop.f32.mrf.mxu0 }
 0x266   : > { %v2672_v48 = vadd.f32 %v2642_v39, %v2502_v46 }
 0x267   : > { %v7414_v8 = vld [vmem:[#allocation3 + $0x8] sm:$0xff] }
 0x268   : > { %v2688_v49 = vadd.f32 %v7367_v60, %v2672_v48  ;;  %v2913_v30 = vrot.slane %v7414_v8, 3  ;;  %v3035_v63 = vshrl.u32 %v7414_v8, 16  ;;  %v3038_v47 = vshll.u32 %v7414_v8, 16  ;;  %v6247_v48 = vld [vmem:[#allocation3 + $0x4] sm:$0x8] }
 0x269   : > { %v6299_v8 = vld [vmem:[#allocation3 + $0x4] sm:$0xf0]  }
 0x26a   : > { %v2701_v58 = vmax.f32 %v2688_v49, 0.0  ;;  %v2914_v5 = vsel %vm390_vm0, %v2912_v22, %v2913_v30  ;;  %v3037_v43 = vrot.slane %v3035_v63, 2  ;;  %v3040_v0 = vrot.slane %v3038_v47, 3 }
 0x26b   : > { %v3215_v46 = vrot.slane %v3035_v63, 3  ;;  %2988 = vmatmul.bf16.vlgmr.msrb.gmra.mxu1 %v2914_v5  ;;  %v3216_v17 = vrot.slane %v3038_v47, 4  ;;  %v2129_v49 = vadd.f32 %v7248_v32, %v1941_v35  ;;  %v6248_v16 = vor.u32 %v6299_v8, %v6247_v48  ;;  %v2752_v8 = vpop.permute.xlu0 %2751 }
 0x26c   : > { %v2792_v62 = vmul.f32 %v2742_v23, %v2701_v58  ;;  %v3041_v39 = vor.u32 %v3040_v0, %v3037_v43  ;;  %v1390_v58 = vadd.f32 %v7167_v53, %v7156_v1 }
 0x26d   : > { %v2645_v59 = vpop.f32.mrf.mxu0  ;;  %v3217_v14 = vor.u32 %v3216_v17, %v3215_v46  ;;  %v2358_v55 = vadd.f32 %v7256_v7, %v2129_v49  ;;  %v3422_v47 = vshrl.u32 %v6248_v16, 16  ;;  %v3425_v32 = vshll.u32 %v6248_v16, 16 }
 0x26e   : > { %v7423_v18 = vpack.c.bf16 %v2792_v62, %v2791_v24  ;;  %v2673_v10 = vadd.f32 %v2645_v59, %v7261_v2  ;;  %v3042_v22 = vsel %vm478_vm2, %v3033_v15, %v3041_v39  ;;  %v1569_v43 = vadd.f32 %v7169_v61, %v1390_v58  ;;  %v2747_v24 = vpop.permute.xlu2 %2746 }
 0x26f   : > { %3151 = vmatmul.bf16.vlgmr.msra.gmra.mxu2 %v3042_v22  ;;  %v3218_v12 = vsel %vm663_vm3, %v3214_v13, %v3217_v14  ;;  %v2504_v63 = vadd.f32 %v7269_v45, %v2358_v55  ;;  %v3424_v0 = vrot.slane %v3422_v47, 3  ;;  %v3427_v46 = vrot.slane %v3425_v32, 4 }
 0x270   : > { %6164 = vst [vmem:[#allocation3 + $0x10] sm:$0xff] %v7423_v18   ;;  %3307 = vmatmul.bf16.vlgmr.msra.gmra.mxu3 %v3218_v12  ;;  %v2689_v2 = vadd.f32 %v7367_v60, %v2673_v10  ;;  %v1808_v1 = vadd.f32 %v7187_v36, %v1569_v43 }
 0x272   : > { %v2702_v15 = vmax.f32 %v2689_v2, 0.0  ;;  %v1943_v55 = vadd.f32 %v7259_v28, %v1808_v1 }
 0x274   : > { %v2793_v53 = vmul.f32 %v2747_v24, %v2702_v15  ;;  %v2131_v28 = vadd.f32 %v7263_v40, %v1943_v55  ;;  %v1395_v40 = vadd.f32 %v7185_v33, %v7180_v54 }
 0x275   : > { %v2647_v25 = vpop.f32.mrf.mxu0 }
 0x276   : > { %v2674_v31 = vadd.f32 %v2647_v25, %v2504_v63  ;;  %v3428_v63 = vor.u32 %v3427_v46, %v3424_v0 }
 0x277   : > { %v7438_v23 = vld [vmem:[#allocation3 + $0x10] sm:$0xff] }
 0x278   : > { %v6301_v5 = vld [vmem:[#allocation3 + $0xc] sm:$0xff]   ;;  %v2690_v7 = vadd.f32 %v7367_v60, %v2674_v31  ;;  %v2915_v45 = vrot.slane %v7438_v23, 3  ;;  %v3044_v62 = vshrl.u32 %v7438_v23, 16  ;;  %v3047_v13 = vshll.u32 %v7438_v23, 16 }
 0x279   : > { %v3430_v17 = vshrl.u32 %v6301_v5, 16  ;;  %v3433_v48 = vshll.u32 %v6301_v5, 16  ;;  %v7452_v47 = vld [vmem:[#allocation3 + $0xc] sm:$0xff]  }
 0x27a   : > { %v2703_v59 = vmax.f32 %v2690_v7, 0.0  ;;  %v2916_v61 = vsel %vm390_vm0, %v2913_v30, %v2915_v45  ;;  %v3046_v35 = vrot.slane %v3044_v62, 2  ;;  %v3049_v10 = vrot.slane %v3047_v13, 3  ;;  %v6379_v32 = vld [vmem:[#allocation3 + $0xc] sm:$0xf0] }
 0x27b   : > { %v3219_v22 = vrot.slane %v3044_v62, 3  ;;  %2993 = vmatmul.bf16.gmra.mxu1 %v2916_v61  ;;  %v3220_v12 = vrot.slane %v3047_v13, 4  ;;  %v3432_v16 = vrot.slane %v3430_v17, 3  ;;  %v3435_v21 = vrot.slane %v3433_v48, 4  ;;  %v6380_v5 = vld [vmem:[#allocation3 + $0xc] sm:$0xe] }
 0x27c   : > { %v2794_v49 = vmul.f32 %v2752_v8, %v2703_v59  ;;  %v7450_v36 = vor.u32 %v3049_v10, %v3046_v35  ;;  %v1571_v62 = vadd.f32 %v7191_v27, %v1395_v40  ;;  %v2757_v8 = vpop.permute.xlu1 %2756 }
 0x27d   : > { %v2650_v2 = vpop.f32.mrf.mxu0  ;;  %v7457_v58 = vor.u32 %v3220_v12, %v3219_v22  ;;  %v7459_v15 = vor.u32 %v3435_v21, %v3432_v16 }
 0x27e   : > { %v7454_v25 = vpack.c.bf16 %v2794_v49, %v2793_v53  ;;  %v2675_v30 = vadd.f32 %v2650_v2, %v7277_v57  ;;  %v3051_v31 = vsel %vm478_vm2, %v3041_v39, %v7450_v36  ;;  %v5918_v57 = vld [vmem:[%s8014_s6 + $0x120] sm:$0xff]  ;;  %v2360_v39 = vadd.f32 %v7273_v50, %v2131_v28 }
 0x27f   : > { %3156 = vmatmul.bf16.gmra.mxu2 %v3051_v31  ;;  %v3222_v43 = vsel %vm663_vm3, %v3217_v14, %v7457_v58  ;;  %v3437_v7 = vsel %vm663_vm3, %v3428_v63, %v7459_v15  ;;  %3676 = vmatpush.bf16.msra.mxu1 %v5918_v57  ;;  %v7477_v14 = vor.u32 %v6380_v5, %v6379_v32 }
 0x280   : > { %6165 = vst [vmem:[#allocation3 + $0x18] sm:$0xff] %v7454_v25   ;;  %3312 = vmatmul.bf16.gmra.mxu3 %v3222_v43  ;;  %3546 = vmatmul.bf16.vlgmr.msra.gmra.mxu0 %v3437_v7  ;;  %v2691_v0 = vadd.f32 %v7367_v60, %v2675_v30  ;;  %v2506_v46 = vadd.f32 %v7285_v6, %v2360_v39 }
 0x281   : > { %v1810_v50 = vadd.f32 %v7200_v11, %v1571_v62  ;;  %v4312_v48 = vshrl.u32 %v7477_v14, 16  ;;  %v4315_v49 = vshll.u32 %v7477_v14, 16  ;;  %v2762_v11 = vpop.permute.xlu2 %2761 }
 0x282   : > { %v2704_v13 = vmax.f32 %v2691_v0, 0.0 }
 0x283   : > { %v1945_v31 = vadd.f32 %v7275_v9, %v1810_v50  ;;  %v4314_v40 = vrot.slane %v4312_v48, 1  ;;  %v1400_v48 = vadd.f32 %v7198_v26, %v7194_v34 }
 0x284   : > { %v2795_v35 = vmul.f32 %v2757_v8, %v2704_v13 }
 0x285   : > { %v2652_v24 = vpop.f32.mrf.mxu0 }
 0x286   : > { %v2676_v17 = vadd.f32 %v2652_v24, %v2506_v46  ;;  %v4317_v46 = vrot.slane %v4315_v49, 2  ;;  %v2133_v24 = vadd.f32 %v7282_v52, %v1945_v31 }
 0x287   : > { %v7480_v1 = vld [vmem:[#allocation3 + $0x18] sm:$0xff] }
 0x288   : > { %v6303_v53 = vld [vmem:[#allocation3 + $0x14] sm:$0xff]   ;;  %v2692_v59 = vadd.f32 %v7367_v60, %v2676_v17  ;;  %v2917_v54 = vrot.slane %v7480_v1, 3  ;;  %v3053_v33 = vshrl.u32 %v7480_v1, 16  ;;  %v3056_v6 = vshll.u32 %v7480_v1, 16 }
 0x289   : > { %v3439_v61 = vshrl.u32 %v6303_v53, 16  ;;  %v7488_v27 = vld [vmem:[#allocation3 + $0x14] sm:$0xff]  ;;  %v3442_v22 = vshll.u32 %v6303_v53, 16  ;;  %v2362_v13 = vadd.f32 %v7287_v42, %v2133_v24  ;;  %v4318_v53 = vor.u32 %v4317_v46, %v4314_v40 }
 0x28a   : > { %v2705_v10 = vmax.f32 %v2692_v59, 0.0  ;;  %v2918_v12 = vsel %vm390_vm0, %v2915_v45, %v2917_v54  ;;  %v3055_v16 = vrot.slane %v3053_v33, 2  ;;  %v3058_v21 = vrot.slane %v3056_v6, 3 }
 0x28b   : > { %v3223_v55 = vrot.slane %v3053_v33, 3  ;;  %2998 = vmatmul.bf16.gmra.mxu1 %v2918_v12  ;;  %v3224_v63 = vrot.slane %v3056_v6, 4  ;;  %v3441_v32 = vrot.slane %v3439_v61, 3  ;;  %v3444_v30 = vrot.slane %v3442_v22, 4 }
 0x28c   : > { %v2796_v2 = vmul.f32 %v2762_v11, %v2705_v10  ;;  %v7497_v28 = vor.u32 %v3058_v21, %v3055_v16  ;;  %v3987_v43 = vshll.u32 %v7488_v27, 16  ;;  %v3991_v7 = vshrl.u32 %v7488_v27, 16  ;;  %v2767_v10 = vpop.permute.xlu0 %2766 }
 0x28d   : > { %v2655_v5 = vpop.f32.mrf.mxu0  ;;  %v7504_v57 = vor.u32 %v3224_v63, %v3223_v55  ;;  %v7506_v39 = vor.u32 %v3444_v30, %v3441_v32  ;;  %v2508_v50 = vadd.f32 %v7311_v51, %v2362_v13  ;;  %v1573_v42 = vadd.f32 %v7202_v41, %v1400_v48  ;;  %v5916_v51 = vld [vmem:[%s8014_s6 + $0x110] sm:$0xff]  ;;  %v2772_v55 = vpop.permute.xlu1 %2771 }
 0x28e   : > { %v7501_v23 = vpack.c.bf16 %v2796_v2, %v2795_v35  ;;  %v2677_v45 = vadd.f32 %v2655_v5, %v7300_v20  ;;  %v3060_v0 = vsel %vm478_vm2, %v7450_v36, %v7497_v28  ;;  %v4319_v9 = vrot.slane %v3991_v7, 1  ;;  %v5917_v36 = vld [vmem:[%s8014_s6 + $0x118] sm:$0xff] }
 0x28f   : > { %3161 = vmatmul.bf16.gmra.mxu2 %v3060_v0  ;;  %v3226_v20 = vsel %vm663_vm3, %v7457_v58, %v7504_v57  ;;  %v3446_v62 = vsel %vm663_vm3, %v7459_v15, %v7506_v39  ;;  %v4320_v52 = vrot.slane %v3987_v43, 2  ;;  %3677 = vmatpush.bf16.msra.mxu1 %v5917_v36  ;;  %v1812_v12 = vadd.f32 %v7207_v3, %v1573_v42 }
 0x290   : > { %6166 = vst [vmem:[#allocation3 + $0x20] sm:$0xff] %v7501_v23   ;;  %3317 = vmatmul.bf16.gmra.mxu3 %v3226_v20  ;;  %3551 = vmatmul.bf16.gmra.mxu0 %v3446_v62  ;;  %v2693_v17 = vadd.f32 %v7367_v60, %v2677_v45 }
 0x291   : > { %v4321_v58 = vor.u32 %v4320_v52, %v4319_v9  ;;  %v1947_v3 = vadd.f32 %v7298_v44, %v1812_v12 }
 0x292   : > { %v2706_v8 = vmax.f32 %v2693_v17, 0.0 }
 0x293   : > { %v7530_v15 = vsel %vm2533_vm4, %v4318_v53, %v4321_v58  ;;  %3678 = vmatpush.bf16.msra.mxu1 %v5916_v51  ;;  %v2135_v52 = vadd.f32 %v7302_v56, %v1947_v3 }
 0x294   : > { %v2797_v16 = vmul.f32 %v2767_v10, %v2706_v8 }
 0x295   : > { %v2657_v59 = vpop.f32.mrf.mxu0  ;;  %v2364_v17 = vadd.f32 %v7319_v37, %v2135_v52 }
 0x296   : > { %v2678_v33 = vadd.f32 %v2657_v59, %v2508_v50  ;;  %v5942_v59 = vld [vmem:[%s8014_s6 + $0x1b8] sm:$0xff] }
 0x297   : > { %v7534_v6 = vld [vmem:[#allocation3 + $0x20] sm:$0xff]  ;;  %v2510_v50 = vadd.f32 %v7350_v29, %v2364_v17  ;;  %v5928_v29 = vld [vmem:[%s8014_s6 + $0x170] sm:$0xff]  ;;  %4089 = vmatpush.bf16.msrb.mxu3 %v5942_v59 }
 0x298   : > { %v6305_v61 = vld [vmem:[#allocation3 + $0x1c] sm:$0xff]   ;;  %v2694_v35 = vadd.f32 %v7367_v60, %v2678_v33  ;;  %v2919_v22 = vrot.slane %v7534_v6, 3  ;;  %v3062_v49 = vshrl.u32 %v7534_v6, 16  ;;  %v3065_v34 = vshll.u32 %v7534_v6, 16 }
 0x299   : > { %v3448_v26 = vshrl.u32 %v6305_v61, 16  ;;  %v7544_v11 = vld [vmem:[#allocation3 + $0x1c] sm:$0xff]  ;;  %v3451_v21 = vshll.u32 %v6305_v61, 16 }
 0x29a   : > { %v2707_v41 = vmax.f32 %v2694_v35, 0.0  ;;  %v2920_v2 = vsel %vm390_vm0, %v2917_v54, %v2919_v22  ;;  %v3064_v63 = vrot.slane %v3062_v49, 2  ;;  %v3067_v32 = vrot.slane %v3065_v34, 3  ;;  %v5941_v35 = vld [vmem:[%s8014_s6 + $0x1b0] sm:$0xff]  ;;  %v5926_v17 = vld [vmem:[%s8014_s6 + $0x160] sm:$0xff] }
 0x29b   : > { %v3227_v30 = vrot.slane %v3062_v49, 3  ;;  %3003 = vmatmul.bf16.gmra.mxu1 %v2920_v2  ;;  %v3228_v5 = vrot.slane %v3065_v34, 4  ;;  %v3450_v45 = vrot.slane %v3448_v26, 3  ;;  %v3453_v0 = vrot.slane %v3451_v21, 4  ;;  %v2782_v2 = vpop.permute.xlu0 %2781  ;;  %4090 = vmatpush.bf16.msrb.mxu3 %v5941_v35 }
 0x29c   : > { %v2798_v31 = vmul.f32 %v2772_v55, %v2707_v41  ;;  %v7553_v40 = vor.u32 %v3067_v32, %v3064_v63  ;;  %v3995_v46 = vshll.u32 %v7544_v11, 16  ;;  %v3999_v24 = vshrl.u32 %v7544_v11, 16  ;;  %v5927_v55 = vld [vmem:[%s8014_s6 + $0x168] sm:$0xff] }
 0x29d   : > { %v2660_v9 = vpop.f32.mrf.mxu0  ;;  %v7560_v20 = vor.u32 %v3228_v5, %v3227_v30  ;;  %v7562_v62 = vor.u32 %v3453_v0, %v3450_v45  ;;  %v5940_v5 = vld [vmem:[%s8014_s6 + $0x1a8] sm:$0xff] }
 0x29e   : > { %v7557_v1 = vpack.c.bf16 %v2798_v31, %v2797_v16  ;;  %v2679_v54 = vadd.f32 %v2660_v9, %v7339_v19  ;;  %v3069_v36 = vsel %vm478_vm2, %v7497_v28, %v7553_v40  ;;  %v4323_v44 = vrot.slane %v3999_v24, 1 }
 0x29f   : > { %3166 = vmatmul.bf16.gmra.mxu2 %v3069_v36  ;;  %v3230_v19 = vsel %vm663_vm3, %v7504_v57, %v7560_v20  ;;  %v3455_v13 = vsel %vm663_vm3, %v7506_v39, %v7562_v62  ;;  %v4324_v28 = vrot.slane %v3995_v46, 2  ;;  %v5915_v57 = vld [vmem:[%s8014_s6 + $0x108] sm:$0xff]  ;;  %v5929_v39 = vld [vmem:[%s8014_s6 + $0x178] sm:$0xff]  ;;  %4091 = vmatpush.bf16.msrb.mxu3 %v5940_v5 }
 0x2a0   : > { %6167 = vst [vmem:[#allocation3 + $0x28] sm:$0xff] %v7557_v1   ;;  %3322 = vmatmul.bf16.gmra.mxu3 %v3230_v19  ;;  %3556 = vmatmul.bf16.gmra.mxu0 %v3455_v13  ;;  %v2695_v56 = vadd.f32 %v7367_v60, %v2679_v54 }
 0x2a1   : > { %v7581_v53 = vor.u32 %v4324_v28, %v4323_v44  ;;  %3679 = vmatpush.bf16.msra.mxu1 %v5915_v57  ;;  %3860 = vmatpush.bf16.msrb.mxu2 %v5929_v39  ;;  %v5914_v57 = vld [vmem:[%s8014_s6 + $0x100] sm:$0xff]  ;;  %v5950_v39 = vld [vmem:[%s8014_s6 + $0x1f8] sm:$0xff] }
 0x2a2   : > { %v2708_v8 = vmax.f32 %v2695_v56, 0.0  ;;  %v5939_v56 = vld [vmem:[%s8014_s6 + $0x1a0] sm:$0xff]  ;;  %4234 = vmatpush.bf16.msrb.mxu0 %v5950_v39 }
 0x2a3   : > { %v7595_v37 = vsel %vm2533_vm4, %v4321_v58, %v7581_v53  ;;  %v2777_v58 = vpop.permute.xlu2 %2776  ;;  %4092 = vmatpush.bf16.msrb.mxu3 %v5939_v56  ;;  %v5947_v56 = vld [vmem:[%s8014_s6 + $0x1e0] sm:$0xff] }
 0x2a4   : > { %v2799_v16 = vmul.f32 %v2777_v58, %v2708_v8  ;;  %v5925_v8 = vld [vmem:[%s8014_s6 + $0x158] sm:$0xff]  ;;  %v5924_v58 = vld [vmem:[%s8014_s6 + $0x150] sm:$0xff] }
 0x2a5   : > { %v2662_v48 = vpop.f32.mrf.mxu0  ;;  %3861 = vmatpush.bf16.msrb.mxu2 %v5928_v29  ;;  %3680 = vmatpush.bf16.msra.mxu1 %v5914_v57  ;;  %v5949_v29 = vld [vmem:[%s8014_s6 + $0x1f0] sm:$0xff] }
 0x2a6   : > { %v2680_v33 = vadd.f32 %v2662_v48, %v2510_v50  ;;  %v2787_v48 = vpop.permute.xlu1 %2786  ;;  %4235 = vmatpush.bf16.msrb.mxu0 %v5949_v29  ;;  %v5958_v29 = vld [vmem:[%s8014_s6 + $0x238] sm:$0xff] }
 0x2a7   : > { %v7600_v61 = vld [vmem:[#allocation3 + $0x28] sm:$0xff] }
 0x2a8   : > { %v6307_v42 = vld [vmem:[#allocation3 + $0x24] sm:$0xff]   ;;  %v2696_v51 = vadd.f32 %v7367_v60, %v2680_v33  ;;  %v2921_v10 = vrot.slane %v7600_v61, 3  ;;  %v3071_v49 = vshrl.u32 %v7600_v61, 16  ;;  %v3074_v34 = vshll.u32 %v7600_v61, 16  ;;  %v5938_v33 = vld [vmem:[%s8014_s6 + $0x198] sm:$0xff]  ;;  %v5922_v61 = vld [vmem:[%s8014_s6 + $0x140] sm:$0xff] }
 0x2a9   : > { %v3457_v26 = vshrl.u32 %v6307_v42, 16  ;;  %v7609_v12 = vld [vmem:[#allocation3 + $0x24] sm:$0xff]  ;;  %v3460_v21 = vshll.u32 %v6307_v42, 16  ;;  %3862 = vmatpush.bf16.msrb.mxu2 %v5927_v55  ;;  %4093 = vmatpush.bf16.msrb.mxu3 %v5938_v33 }
 0x2aa   : > { %v2709_v41 = vmax.f32 %v2696_v51, 0.0  ;;  %v2922_v63 = vsel %vm390_vm0, %v2919_v22, %v2921_v10  ;;  %v3073_v32 = vrot.slane %v3071_v49, 2  ;;  %v3076_v30 = vrot.slane %v3074_v34, 3  ;;  %4403 = vmatpush.bf16.msrb.mxu1 %v5958_v29 }
 0x2ab   : > { %v3231_v31 = vrot.slane %v3071_v49, 3  ;;  %3008 = vmatmul.bf16.gmra.mxu1 %v2922_v63  ;;  %v3232_v0 = vrot.slane %v3074_v34, 4  ;;  %v3459_v3 = vrot.slane %v3457_v26, 3  ;;  %v3462_v9 = vrot.slane %v3460_v21, 4  ;;  %v5937_v49 = vld [vmem:[%s8014_s6 + $0x190] sm:$0xff]  ;;  %v5948_v63 = vld [vmem:[%s8014_s6 + $0x1e8] sm:$0xff] }
 0x2ac   : > { %v2800_v45 = vmul.f32 %v2782_v2, %v2709_v41  ;;  %v7622_v36 = vor.u32 %v3076_v30, %v3073_v32  ;;  %v4003_v6 = vshll.u32 %v7609_v12, 16  ;;  %v4007_v22 = vshrl.u32 %v7609_v12, 16  ;;  %4236 = vmatpush.bf16.msrb.mxu0 %v5948_v63 }
 0x2ad   : > { %v2665_v54 = vpop.f32.mrf.mxu0  ;;  %v7629_v19 = vor.u32 %v3232_v0, %v3231_v31  ;;  %v7631_v13 = vor.u32 %v3462_v9, %v3459_v3  ;;  %3863 = vmatpush.bf16.msrb.mxu2 %v5926_v17  ;;  %4094 = vmatpush.bf16.msrb.mxu3 %v5937_v49  ;;  %v3989_v29 = vrot.slane %v3987_v43, 1  ;;  %v4166_v43 = vrot.slane %v7477_v14, 1 }
 0x2ae   : > { %v7626_v44 = vpack.c.bf16 %v2800_v45, %v2799_v16  ;;  %v2681_v52 = vadd.f32 %v2665_v54, %v7387_v38  ;;  %v3078_v28 = vsel %vm478_vm2, %v7553_v40, %v7622_v36  ;;  %v4327_v59 = vrot.slane %v4007_v22, 1  ;;  %v5923_v45 = vld [vmem:[%s8014_s6 + $0x148] sm:$0xff] }
 0x2af   : > { %3171 = vmatmul.bf16.gmra.mxu2 %v3078_v28  ;;  %v3234_v50 = vsel %vm663_vm3, %v7560_v20, %v7629_v19  ;;  %v3464_v40 = vsel %vm663_vm3, %v7562_v62, %v7631_v13  ;;  %v4328_v20 = vrot.slane %v4003_v6, 2  ;;  %v5936_v54 = vld [vmem:[%s8014_s6 + $0x188] sm:$0xff] }
 0x2b0   : > { %6168 = vst [vmem:[#allocation3 + $0x30] sm:$0xff] %v7626_v44   ;;  %v2697_v38 = vadd.f32 %v7367_v60, %v2681_v52  ;;  %3327 = vmatmul.bf16.gmra.mxu3 %v3234_v50  ;;  %3561 = vmatmul.bf16.gmra.mxu0 %v3464_v40 }
 0x2b1   : > { %v7669_v42 = vor.u32 %v4328_v20, %v4327_v59  ;;  %3864 = vmatpush.bf16.msrb.mxu2 %v5925_v8  ;;  %4095 = vmatpush.bf16.msrb.mxu3 %v5936_v54  ;;  %v5944_v54 = vld [vmem:[%s8014_s6 + $0x1c8] sm:$0xff] }
 0x2b2   : > { %v2710_v60 = vmax.f32 %v2697_v38, 0.0  ;;  %4237 = vmatpush.bf16.msrb.mxu0 %v5947_v56 }
 0x2b3   : > { %v7680_v34 = vsel %vm2533_vm4, %v7581_v53, %v7669_v42 }
 0x2b4   : > { %v2801_v62 = vmul.f32 %v2787_v48, %v2710_v60 }
 0x2b5   : > { %v2667_v35 = vpop.f32.mrf.mxu0  ;;  %3865 = vmatpush.bf16.msrb.mxu2 %v5924_v58 }
 0x2b6   : > { %v2814_v51 = vpack.c.bf16 %v2801_v62, %v2801_v62  ;;  %v6090_v35 = vunpack.c.h.b16 %v7626_v44 }
 0x2b7   : > { %v2841_v26 = vld [vmem:[#allocation3 + $0x30] sm:$0xf]  ;;  %v2842_v16 = vld [vmem:[#allocation3 + $0x34] sm:$0x1] }
 0x2b8   : > { %v6308_v41 = vld [vmem:[#allocation3 + $0x2c] sm:$0xff]   ;;  %2827 = vst [vmem:[#allocation3 + $0x38] sm:$0x3] %v2814_v51  ;;  %v2903_v21 = vunpack.c.l.b16 %v2841_v26  ;;  %v2904_v55 = vunpack.c.l.b16 %v2842_v16  ;;  %v3186_v2 = vld [vmem:[#allocation3 + $0x34] sm:$0x3] }
 0x2b9   : > { %v7685_v32 = vld [vmem:[#allocation3 + $0x2c] sm:$0xff]  ;;  %v3466_v30 = vshrl.u32 %v6308_v41, 16  ;;  %v3469_v31 = vshll.u32 %v6308_v41, 16  ;;  %v3205_v5 = vunpack.c.l.b16 %v3186_v2  ;;  %3866 = vmatpush.bf16.msrb.mxu2 %v5923_v45  ;;  %v5946_v26 = vld [vmem:[%s8014_s6 + $0x1d8] sm:$0xff] }
 0x2ba   : > { %v7687_v53 = vpack.c.b16 %v2904_v55, %v2903_v21  ;;  %v4011_v38 = vshll.u32 %v7685_v32, 16  ;;  %v4015_v39 = vshrl.u32 %v7685_v32, 16  ;;  %4238 = vmatpush.bf16.msrb.mxu0 %v5946_v26 }
 0x2bb   : > { %v3468_v0 = vrot.slane %v3466_v30, 3  ;;  %v3471_v3 = vrot.slane %v3469_v31, 4  ;;  %v3206_v9 = vpack.c.b16 %v3205_v5, %v2903_v21 }
 0x2bc   : > { %v2923_v52 = vrot.slane %v7687_v53, 3  ;;  %v3080_v28 = vshrl.u32 %v7687_v53, 16  ;;  %v3083_v17 = vshll.u32 %v7687_v53, 16  ;;  %v4331_v16 = vrot.slane %v4015_v39, 1 }
 0x2bd   : > { %v3472_v50 = vor.u32 %v3471_v3, %v3468_v0  ;;  %v3236_v40 = vshrl.u32 %v3206_v9, 16  ;;  %v3239_v57 = vshll.u32 %v3206_v9, 16  ;;  %v4332_v41 = vrot.slane %v4011_v38, 2  ;;  %3867 = vmatpush.bf16.msrb.mxu2 %v5922_v61 }
 0x2be   : > { %v2924_v60 = vsel %vm390_vm0, %v2921_v10, %v2923_v52  ;;  %v3082_v59 = vrot.slane %v3080_v28, 2  ;;  %v3085_v20 = vrot.slane %v3083_v17, 3  ;;  %v5957_v28 = vld [vmem:[%s8014_s6 + $0x230] sm:$0xff]  ;;  %vm4625_vm0 = vsmask.f32 3328 }
 0x2bf   : > { %3013 = vmatmul.bf16.gmra.mxu1 %v2924_v60  ;;  %v3473_v48 = vsel %vm663_vm3, %v7631_v13, %v3472_v50  ;;  %v3238_v62 = vrot.slane %v3236_v40, 3  ;;  %v3241_v8 = vrot.slane %v3239_v57, 4  ;;  %v3368_v33 = vld [vmem:[#allocation3 + $0x38] sm:$0x3]  ;;  %v5935_v13 = vld [vmem:[%s8014_s6 + $0x180] sm:$0xff]  ;;  %v4333_v53 = vor.u32 %v4332_v41, %v4331_v16 }
 0x2c0   : > { %v3086_v10 = vor.u32 %v3085_v20, %v3082_v59  ;;  %v7715_v51 = vunpack.c.l.b16 %v3368_v33  ;;  %v7720_v58 = vld [vmem:[#allocation3 + $0x34] sm:$0xff]  ;;  %3566 = vmatmul.bf16.gmra.mxu0 %v3473_v48  ;;  %4096 = vmatpush.bf16.msrb.mxu3 %v5935_v13  ;;  %v5943_v40 = vld [vmem:[%s8014_s6 + $0x1c0] sm:$0xff]  ;;  %v3753_v60 = vshll.u32 %v7393_v4, 16  ;;  %v3982_v59 = vshll.u32 %v7452_v47, 16  ;;  %v5956_v20 = vld [vmem:[%s8014_s6 + $0x228] sm:$0xff] }
 0x2c1   : > { %v3242_v49 = vor.u32 %v3241_v8, %v3238_v62  ;;  %v4019_v63 = vshll.u32 %v7720_v58, 16  ;;  %v4023_v30 = vshrl.u32 %v7720_v58, 16  ;;  %v7741_v45 = vsel %vm2533_vm4, %v7669_v42, %v4333_v53  ;;  %4404 = vmatpush.bf16.msrb.mxu1 %v5957_v28 }
 0x2c2   : > { %v3087_v21 = vsel %vm478_vm2, %v7622_v36, %v3086_v10  ;;  %v3420_v55 = vpack.c.b16 %v7715_v51, %v6090_v35  ;;  %v5945_v36 = vld [vmem:[%s8014_s6 + $0x1d0] sm:$0xff]  ;;  %v3758_v48 = vshll.u32 %v7423_v18, 16  ;;  %v3755_v62 = vrot.slane %v3753_v60, 1  ;;  %vm7980_vm2 = vmor %vm4625_vm0, %vm4626_vm1 }
 0x2c3   : > { %3176 = vmatmul.bf16.gmra.mxu2 %v3087_v21  ;;  %v3243_v2 = vsel %vm663_vm3, %v7629_v19, %v3242_v49  ;;  %v4335_v19 = vrot.slane %v4023_v30, 1  ;;  %v4336_v0 = vrot.slane %v4019_v63, 2  ;;  %4239 = vmatpush.bf16.msrb.mxu0 %v5945_v36  ;;  %v3984_v8 = vrot.slane %v3982_v59, 1 }
 0x2c4   : > { %3332 = vmatmul.bf16.gmra.mxu3 %v3243_v2  ;;  %v3475_v31 = vshrl.u32 %v3420_v55, 16  ;;  %v3478_v5 = vshll.u32 %v3420_v55, 16  ;;  %v3980_v33 = vshrl.u32 %v7452_v47, 16  ;;  %v4167_v47 = vrot.slane %v7488_v27, 1 }
 0x2c5   : > { %v7753_v17 = vor.u32 %v4336_v0, %v4335_v19  ;;  %4405 = vmatpush.bf16.msrb.mxu1 %v5956_v20  ;;  %v3762_v16 = vshrl.u32 %v7423_v18, 16  ;;  %v3997_v21 = vrot.slane %v3995_v46, 1  ;;  %v5954_v46 = vld [vmem:[%s8014_s6 + $0x218] sm:$0xff]  ;;  %v4169_v28 = vrot.slane %v7544_v11, 1 }
 0x2c6   : > { %v3477_v3 = vrot.slane %v3475_v31, 3  ;;  %v3480_v9 = vrot.slane %v3478_v5, 4  ;;  %v4168_v55 = vsel %vm2387_vm6, %v4166_v43, %v4167_v47  ;;  %v3993_v5 = vor.u32 %v3991_v7, %v3989_v29 }
 0x2c7   : > { %v7757_v42 = vsel %vm2533_vm4, %v4333_v53, %v7753_v17  ;;  %4240 = vmatpush.bf16.msrb.mxu0 %v5944_v54  ;;  %v4005_v20 = vrot.slane %v4003_v6, 1  ;;  %v5953_v6 = vld [vmem:[%s8014_s6 + $0x210] sm:$0xff] }
 0x2c8   : > { %v3481_v56 = vor.u32 %v3480_v9, %v3477_v3  ;;  %v3998_v14 = vsel %vm1970_vm5, %v3993_v5, %v3997_v21  ;;  %v3774_v9 = vshll.u32 %v7501_v23, 16 }
 0x2ca   : > { %v3482_v57 = vsel %vm663_vm3, %v3472_v50, %v3481_v56  ;;  %v3760_v50 = vrot.slane %v3758_v48, 1  ;;  %v3776_v60 = vrot.slane %v3774_v9, 1  ;;  %v4170_v48 = vsel %vm2387_vm6, %v4167_v47, %v4169_v28 }
 0x2cb   : > { %4241 = vmatpush.bf16.msrb.mxu0 %v5943_v40  ;;  %v4171_v47 = vrot.slane %v7609_v12, 1 }
 0x2cc   : > { %v3764_v2 = vor.u32 %v3762_v16, %v3760_v50 }
 0x2cf   : > { %3018 = vmatmul.bf16.gmra.mxu1 %v2923_v52  ;;  %v3751_v52 = vshrl.u32 %v7393_v4, 16 }
 0x2d0   : > { %3571 = vmatmul.bf16.gmra.mxu0 %v3482_v57  ;;  %v3770_v57 = vshrl.u32 %v7454_v25, 16 }
 0x2d1   : > { %v3756_v61 = vor.u32 %v3755_v62, %v3751_v52  ;;  %v4001_v52 = vor.u32 %v3999_v24, %v3997_v21  ;;  %v3782_v24 = vshll.u32 %v7557_v1, 16 }
 0x2d3   : > { %3181 = vmatmul.bf16.gmra.mxu2 %v3086_v10  ;;  %v3985_v10 = vor.u32 %v3984_v8, %v3980_v33  ;;  %v3761_v35 = vsel %vm1970_vm5, %v3756_v61, %v3760_v50  ;;  %v4006_v33 = vsel %vm1970_vm5, %v4001_v52, %v4005_v20  ;;  %v3784_v21 = vrot.slane %v3782_v24, 1 }
 0x2d4   : > { %3337 = vmatmul.bf16.gmra.mxu3 %v3242_v49  ;;  %v5955_v49 = vld [vmem:[%s8014_s6 + $0x220] sm:$0xff] }
 0x2d5   : > { %v3990_v13 = vsel %vm1970_vm5, %v3985_v10, %v3989_v29  ;;  %4406 = vmatpush.bf16.msrb.mxu1 %v5955_v49 }
 0x2d9   : > { %4407 = vmatpush.bf16.msrb.mxu1 %v5954_v46 }
 0x2dd   : > { %4408 = vmatpush.bf16.msrb.mxu1 %v5953_v6 }
 0x2df   : > { %3681 = vmatmul.bf16.vlgmr.msra.gmra.mxu1 %v7393_v4  ;;  %v3766_v4 = vshll.u32 %v7454_v25, 16 }
 0x2e0   : > { %3576 = vmatmul.bf16.gmra.mxu0 %v3481_v56 }
 0x2e1   : > { %v3768_v41 = vrot.slane %v3766_v4, 1 }
 0x2e3   : > { %3868 = vmatmul.bf16.vlgmr.msrb.gmra.mxu2 %v3761_v35  ;;  %v3769_v36 = vsel %vm1970_vm5, %v3764_v2, %v3768_v41  ;;  %v3772_v62 = vor.u32 %v3770_v57, %v3768_v41  ;;  %v3778_v41 = vshrl.u32 %v7501_v23, 16  ;;  %v4013_v2 = vrot.slane %v4011_v38, 1  ;;  %v5952_v38 = vld [vmem:[%s8014_s6 + $0x208] sm:$0xff] }
 0x2e4   : > { %4097 = vmatmul.bf16.vlgmr.msrb.gmra.mxu3 %v3990_v13  ;;  %4409 = vmatpush.bf16.msrb.mxu1 %v5952_v38  ;;  %v3786_v57 = vshrl.u32 %v7557_v1, 16 }
 0x2e5   : > { %v3777_v50 = vsel %vm1970_vm5, %v3772_v62, %v3776_v60  ;;  %v3780_v5 = vor.u32 %v3778_v41, %v3776_v60  ;;  %v3729_v62 = vld [vmem:[#allocation3 + $0x38] sm:$0x7] }
 0x2e6   : > { %v3788_v52 = vor.u32 %v3786_v57, %v3784_v21 }
 0x2e8   : > { %v2989_v26 = vpop.f32.mrf.mxu1 }
 0x2ef   : > { %3686 = vmatmul.bf16.gmra.mxu1 %v7423_v18 }
 0x2f0   : > { %4242 = vmatmul.bf16.vlgmr.msrb.gmra.mxu0 %v4168_v55  ;;  %v2991_v31 = vpop.f32.mrf.mxu1 }
 0x2f2   : > { %v3152_v53 = vpop.f32.mrf.mxu2 }
 0x2f3   : > { %3873 = vmatmul.bf16.gmra.mxu2 %v3769_v36  ;;  %v3153_v19 = vadd.f32 %v3152_v53, %v2989_v26  ;;  %v3308_v18 = vpop.f32.mrf.mxu3  ;;  %v3785_v53 = vsel %vm1970_vm5, %v3780_v5, %v3784_v21 }
 0x2f4   : > { %4102 = vmatmul.bf16.gmra.mxu3 %v3998_v14  ;;  %v4009_v14 = vor.u32 %v4007_v22, %v4005_v20  ;;  %v3790_v22 = vshll.u32 %v7626_v44, 16 }
 0x2f5   : > { %v3342_v0 = vadd.f32 %v3308_v18, %v3153_v19 }
 0x2f6   : > { %v4014_v19 = vsel %vm1970_vm5, %v4009_v14, %v4013_v2  ;;  %v3792_v60 = vrot.slane %v3790_v22, 1 }
 0x2f8   : > { %v2994_v3 = vpop.f32.mrf.mxu1 }
 0x2fa   : > { %v3154_v27 = vpop.f32.mrf.mxu2 }
 0x2fb   : > { %v3155_v7 = vadd.f32 %v3154_v27, %v2991_v31  ;;  %v3310_v54 = vpop.f32.mrf.mxu3  ;;  %v4172_v31 = vsel %vm2387_vm6, %v4169_v28, %v4171_v47  ;;  %v4173_v28 = vrot.slane %v7685_v32, 1 }
 0x2fd   : > { %v3343_v56 = vadd.f32 %v3310_v54, %v3155_v7  ;;  %v3547_v40 = vpop.f32.mrf.mxu0 }
 0x2fe   : > { %v7797_v59 = vadd.f32 %v3547_v40, %v3342_v0 }
 0x2ff   : > { %3691 = vmatmul.bf16.gmra.mxu1 %v7454_v25 }
 0x300   : > { %4247 = vmatmul.bf16.gmra.mxu0 %v4170_v48  ;;  %v2996_v8 = vpop.f32.mrf.mxu1  ;;  %v4021_v48 = vrot.slane %v4019_v63, 1 }
 0x302   : > { %v3157_v29 = vpop.f32.mrf.mxu2 }
 0x303   : > { %3878 = vmatmul.bf16.gmra.mxu2 %v3777_v50  ;;  %v3158_v61 = vadd.f32 %v3157_v29, %v2994_v3  ;;  %v3313_v25 = vpop.f32.mrf.mxu3  ;;  %v5951_v29 = vld [vmem:[%s8014_s6 + $0x200] sm:$0xff] }
 0x304   : > { %4107 = vmatmul.bf16.gmra.mxu3 %v4006_v33  ;;  %v4017_v33 = vor.u32 %v4015_v39, %v4013_v2  ;;  %4410 = vmatpush.bf16.msrb.mxu1 %v5951_v29  ;;  %v4175_v2 = vrot.slane %v7720_v58, 1 }
 0x305   : > { %v3344_v10 = vadd.f32 %v3313_v25, %v3158_v61  ;;  %v3549_v35 = vpop.f32.mrf.mxu0  ;;  %v3793_v61 = vsel %vm1970_vm5, %v3788_v52, %v3792_v60  ;;  %v3748_v25 = vunpack.c.l.b16 %v3729_v62 }
 0x306   : > { %v7810_v13 = vadd.f32 %v3549_v35, %v3343_v56  ;;  %v4022_v63 = vsel %vm1970_vm5, %v4017_v33, %v4021_v48 }
 0x307   : > { %v3749_v39 = vpack.c.b16 %v3748_v25, %v3748_v25 }
 0x308   : > { %v2999_v11 = vpop.f32.mrf.mxu1 }
 0x309   : > { %v3802_v52 = vshrl.u32 %v3749_v39, 16 }
 0x30a   : > { %v3159_v49 = vpop.f32.mrf.mxu2 }
 0x30b   : > { %v3160_v26 = vadd.f32 %v3159_v49, %v2996_v8  ;;  %v3315_v4 = vpop.f32.mrf.mxu3  ;;  %v4174_v8 = vsel %vm2387_vm6, %v4171_v47, %v4173_v28  ;;  %v3798_v47 = vshll.u32 %v3749_v39, 16 }
 0x30d   : > { %v3345_v43 = vadd.f32 %v3315_v4, %v3160_v26  ;;  %v3552_v16 = vpop.f32.mrf.mxu0  ;;  %v3800_v14 = vrot.slane %v3798_v47, 1 }
 0x30e   : > { %v7815_v55 = vadd.f32 %v3552_v16, %v3344_v10 }
 0x30f   : > { %3696 = vmatmul.bf16.gmra.mxu1 %v7501_v23  ;;  %v3804_v29 = vor.u32 %v3802_v52, %v3800_v14 }
 0x310   : > { %4252 = vmatmul.bf16.gmra.mxu0 %v4172_v31  ;;  %v3001_v36 = vpop.f32.mrf.mxu1 }
 0x312   : > { %v3162_v18 = vpop.f32.mrf.mxu2 }
 0x313   : > { %3883 = vmatmul.bf16.gmra.mxu2 %v3785_v53  ;;  %v3163_v0 = vadd.f32 %v3162_v18, %v2999_v11  ;;  %v3318_v23 = vpop.f32.mrf.mxu3 }
 0x314   : > { %4112 = vmatmul.bf16.gmra.mxu3 %v4014_v19  ;;  %v4025_v19 = vor.u32 %v4023_v30, %v4021_v48 }
 0x315   : > { %v3346_v46 = vadd.f32 %v3318_v23, %v3163_v0  ;;  %v3554_v3 = vpop.f32.mrf.mxu0  ;;  %v4176_v0 = vsel %vm2387_vm6, %v4173_v28, %v4175_v2 }
 0x316   : > { %v7828_v9 = vadd.f32 %v3554_v3, %v3345_v43 }
 0x318   : > { %v3004_v12 = vpop.f32.mrf.mxu1 }
 0x31a   : > { %v3164_v27 = vpop.f32.mrf.mxu2 }
 0x31b   : > { %v3165_v7 = vadd.f32 %v3164_v27, %v3001_v36  ;;  %v3320_v54 = vpop.f32.mrf.mxu3  ;;  %v3794_v36 = vshrl.u32 %v7626_v44, 16 }
 0x31d   : > { %v3347_v56 = vadd.f32 %v3320_v54, %v3165_v7  ;;  %v3557_v40 = vpop.f32.mrf.mxu0  ;;  %v3796_v23 = vor.u32 %v3794_v36, %v3792_v60  ;;  %v3617_v60 = vpack.c.b16 %v7715_v51, %v7715_v51 }
 0x31e   : > { %v7833_v20 = vadd.f32 %v3557_v40, %v3346_v46 }
 0x31f   : > { %3701 = vmatmul.bf16.gmra.mxu1 %v7557_v1  ;;  %v3928_v1 = vld [vmem:[#allocation3 + $0x3c] sm:$0x7]  ;;  %v3801_v38 = vsel %vm1970_vm5, %v3796_v23, %v3800_v14 }
 0x320   : > { %4257 = vmatmul.bf16.gmra.mxu0 %v4174_v8  ;;  %v3006_v50 = vpop.f32.mrf.mxu1  ;;  %v3971_v11 = vunpack.c.l.b16 %v3928_v1 }
 0x322   : > { %v3167_v10 = vpop.f32.mrf.mxu2  ;;  %v7848_v26 = vpack.c.b16 %v3971_v11, %v3971_v11 }
 0x323   : > { %3888 = vmatmul.bf16.gmra.mxu2 %v3793_v61  ;;  %v3168_v35 = vadd.f32 %v3167_v10, %v3004_v12  ;;  %v3323_v6 = vpop.f32.mrf.mxu3 }
 0x324   : > { %4117 = vmatmul.bf16.gmra.mxu3 %v4022_v63  ;;  %v4027_v16 = vshll.u32 %v7848_v26, 16  ;;  %v4177_v28 = vrot.slane %v7848_v26, 1  ;;  %v4031_v40 = vshrl.u32 %v7848_v26, 16 }
 0x325   : > { %v3348_v24 = vadd.f32 %v3323_v6, %v3168_v35  ;;  %v3559_v32 = vpop.f32.mrf.mxu0 }
 0x326   : > { %v7846_v49 = vadd.f32 %v3559_v32, %v3347_v56  ;;  %v4029_v18 = vrot.slane %v4027_v16, 1 }
 0x328   : > { %v3009_v4 = vpop.f32.mrf.mxu1  ;;  %v4030_v46 = vsel %vm1970_vm5, %v4025_v19, %v4029_v18  ;;  %v4033_v33 = vor.u32 %v4031_v40, %v4029_v18 }
 0x32a   : > { %v3169_v43 = vpop.f32.mrf.mxu2 }
 0x32b   : > { %v3170_v41 = vadd.f32 %v3169_v43, %v3006_v50  ;;  %v3325_v21 = vpop.f32.mrf.mxu3  ;;  %v4178_v50 = vsel %vm2387_vm6, %v4175_v2, %v4177_v28 }
 0x32d   : > { %v3349_v31 = vadd.f32 %v3325_v21, %v3170_v41  ;;  %v3562_v5 = vpop.f32.mrf.mxu0 }
 0x32e   : > { %v7853_v53 = vadd.f32 %v3562_v5, %v3348_v24 }
 0x32f   : > { %3706 = vmatmul.bf16.gmra.mxu1 %v7626_v44 }
 0x330   : > { %4262 = vmatmul.bf16.gmra.mxu0 %v4176_v0  ;;  %v3011_v12 = vpop.f32.mrf.mxu1 }
 0x332   : > { %v3172_v3 = vpop.f32.mrf.mxu2 }
 0x333   : > { %3893 = vmatmul.bf16.gmra.mxu2 %v3801_v38  ;;  %v3173_v22 = vadd.f32 %v3172_v3, %v3009_v4  ;;  %v3328_v27 = vpop.f32.mrf.mxu3 }
 0x334   : > { %4122 = vmatmul.bf16.gmra.mxu3 %v4030_v46 }
 0x335   : > { %v3350_v7 = vadd.f32 %v3328_v27, %v3173_v22  ;;  %v3564_v44 = vpop.f32.mrf.mxu0 }
 0x336   : > { %v7861_v54 = vadd.f32 %v3564_v44, %v3349_v31 }
 0x33a   : > { %v3174_v58 = vpop.f32.mrf.mxu2 }
 0x33b   : > { %v3175_v56 = vadd.f32 %v3174_v58, %v3011_v12  ;;  %v3330_v57 = vpop.f32.mrf.mxu3 }
 0x33c   : > { %v3014_v30 = vpop.f32.mrf.mxu1 }
 0x33d   : > { %v3351_v48 = vadd.f32 %v3330_v57, %v3175_v56  ;;  %v3567_v62 = vpop.f32.mrf.mxu0 }
 0x33e   : > { %v7867_v8 = vadd.f32 %v3567_v62, %v3350_v7 }
 0x33f   : > { %3711 = vmatmul.bf16.gmra.mxu1 %v3617_v60 }
 0x340   : > { %4267 = vmatmul.bf16.gmra.mxu0 %v4178_v50 }
 0x343   : > { %3898 = vmatmul.bf16.gmra.mxu2 %v3804_v29 }
 0x344   : > { %v3016_v61 = vpop.f32.mrf.mxu1  ;;  %4127 = vmatmul.bf16.gmra.mxu3 %v4033_v33 }
 0x345   : > { %v3569_v1 = vpop.f32.mrf.mxu0 }
 0x346   : > { %v3177_v25 = vpop.f32.mrf.mxu2  ;;  %v7870_v35 = vadd.f32 %v3569_v1, %v3351_v48 }
 0x347   : > { %v3178_v63 = vadd.f32 %v3177_v25, %v3014_v30  ;;  %v3333_v10 = vpop.f32.mrf.mxu3 }
 0x349   : > { %v3352_v51 = vadd.f32 %v3333_v10, %v3178_v63 }
 0x34c   : > { %v3019_v6 = vpop.f32.mrf.mxu1 }
 0x34d   : > { %v3572_v24 = vpop.f32.mrf.mxu0 }
 0x34e   : > { %v3179_v11 = vpop.f32.mrf.mxu2  ;;  %v7872_v26 = vadd.f32 %v3572_v24, %v3352_v51 }
 0x34f   : > { %v3180_v32 = vadd.f32 %v3179_v11, %v3016_v61  ;;  %v3335_v39 = vpop.f32.mrf.mxu3  ;;  %4411 = vmatmul.bf16.vlgmr.msrb.gmra.mxu1 %v7530_v15 }
 0x350   : > { %4272 = vmatmul.bf16.gmra.mxu0 %v4177_v28 }
 0x351   : > { %v3353_v4 = vadd.f32 %v3335_v39, %v3180_v32  ;;  %v4290_v32 = vld [vmem:[#allocation3 + $0x3c] sm:$0xf] }
 0x352   : > { %v4309_v39 = vunpack.c.l.b16 %v4290_v32 }
 0x354   : > { %v3021_v47 = vpop.f32.mrf.mxu1 }
 0x355   : > { %v3574_v16 = vpop.f32.mrf.mxu0 }
 0x356   : > { %v3182_v43 = vpop.f32.mrf.mxu2  ;;  %v7875_v2 = vadd.f32 %v3574_v16, %v3353_v4 }
 0x357   : > { %v3183_v41 = vadd.f32 %v3182_v43, %v3019_v6  ;;  %v3338_v21 = vpop.f32.mrf.mxu3 }
 0x359   : > { %v3354_v31 = vadd.f32 %v3338_v21, %v3183_v41  ;;  %v4310_v41 = vpack.c.b16 %v4309_v39, %v4309_v39 }
 0x35c   : > { %v3682_v5 = vpop.f32.mrf.mxu1 }
 0x35d   : > { %v3716_v36 = vadd.f32 %v3682_v5, %v7797_v59  ;;  %v3577_v19 = vpop.f32.mrf.mxu0  ;;  %v4340_v5 = vshrl.u32 %v4310_v41, 16 }
 0x35e   : > { %v3184_v14 = vpop.f32.mrf.mxu2  ;;  %v7878_v0 = vadd.f32 %v3577_v19, %v3354_v31 }
 0x35f   : > { %v3340_v18 = vpop.f32.mrf.mxu3  ;;  %4416 = vmatmul.bf16.gmra.mxu1 %v7595_v37 }
 0x364   : > { %v3684_v15 = vpop.f32.mrf.mxu1 }
 0x365   : > { %v3717_v23 = vadd.f32 %v3684_v15, %v7810_v13  ;;  %v3579_v38 = vpop.f32.mrf.mxu0 }
 0x366   : > { %v3869_v46 = vpop.f32.mrf.mxu2 }
 0x367   : > { %v3903_v3 = vadd.f32 %v3869_v46, %v3716_v36  ;;  %v4098_v12 = vpop.f32.mrf.mxu3  ;;  %v4343_v36 = vshll.u32 %v4310_v41, 16 }
 0x369   : > { %v4132_v22 = vadd.f32 %v4098_v12, %v3903_v3  ;;  %v4345_v38 = vrot.slane %v4343_v36, 2 }
 0x36c   : > { %v3687_v27 = vpop.f32.mrf.mxu1 }
 0x36d   : > { %v3718_v7 = vadd.f32 %v3687_v27, %v7815_v55  ;;  %v4243_v59 = vpop.f32.mrf.mxu0 }
 0x36e   : > { %v3871_v44 = vpop.f32.mrf.mxu2  ;;  %v7883_v56 = vadd.f32 %v4243_v59, %v4132_v22 }
 0x36f   : > { %v3904_v58 = vadd.f32 %v3871_v44, %v3717_v23  ;;  %v4100_v30 = vpop.f32.mrf.mxu3  ;;  %4421 = vmatmul.bf16.gmra.mxu1 %v7680_v34  ;;  %v4342_v23 = vrot.slane %v4340_v5, 1 }
 0x371   : > { %v4133_v37 = vadd.f32 %v4100_v30, %v3904_v58  ;;  %v4346_v22 = vor.u32 %v4345_v38, %v4342_v23  ;;  %v7926_v23 = vld [vmem:[%s8015_s7] ss:$0 sm:$0xff] }
 0x373   : > { %v4347_v59 = vsel %vm2533_vm4, %v7753_v17, %v4346_v22 }
 0x374   : > { %v3689_v28 = vpop.f32.mrf.mxu1 }
 0x375   : > { %v3719_v13 = vadd.f32 %v3689_v28, %v7828_v9  ;;  %v4245_v57 = vpop.f32.mrf.mxu0 }
 0x376   : > { %v3874_v40 = vpop.f32.mrf.mxu2  ;;  %v7887_v62 = vadd.f32 %v4245_v57, %v4133_v37 }
 0x377   : > { %v3905_v60 = vadd.f32 %v3874_v40, %v3718_v7  ;;  %v4103_v48 = vpop.f32.mrf.mxu3 }
 0x379   : > { %v4134_v52 = vadd.f32 %v4103_v48, %v3905_v60 }
 0x37c   : > { %v3692_v55 = vpop.f32.mrf.mxu1 }
 0x37d   : > { %v3720_v50 = vadd.f32 %v3692_v55, %v7833_v20  ;;  %v4248_v29 = vpop.f32.mrf.mxu0 }
 0x37e   : > { %v3876_v33 = vpop.f32.mrf.mxu2  ;;  %v7890_v1 = vadd.f32 %v4248_v29, %v4134_v52 }
 0x37f   : > { %v3906_v61 = vadd.f32 %v3876_v33, %v3719_v13  ;;  %v4105_v25 = vpop.f32.mrf.mxu3  ;;  %4426 = vmatmul.bf16.gmra.mxu1 %v7741_v45 }
 0x381   : > { %v4135_v34 = vadd.f32 %v4105_v25, %v3906_v61 }
 0x384   : > { %v3694_v9 = vpop.f32.mrf.mxu1 }
 0x385   : > { %v3721_v63 = vadd.f32 %v3694_v9, %v7846_v49  ;;  %v4250_v51 = vpop.f32.mrf.mxu0 }
 0x386   : > { %v3879_v10 = vpop.f32.mrf.mxu2  ;;  %v7894_v24 = vadd.f32 %v4250_v51, %v4135_v34 }
 0x387   : > { %v3907_v6 = vadd.f32 %v3879_v10, %v3720_v50  ;;  %v4108_v11 = vpop.f32.mrf.mxu3 }
 0x389   : > { %v4136_v20 = vadd.f32 %v4108_v11, %v3907_v6 }
 0x38c   : > { %v3697_v4 = vpop.f32.mrf.mxu1 }
 0x38d   : > { %v3722_v47 = vadd.f32 %v3697_v4, %v7853_v53  ;;  %v4253_v16 = vpop.f32.mrf.mxu0 }
 0x38e   : > { %v3881_v43 = vpop.f32.mrf.mxu2  ;;  %v7897_v31 = vadd.f32 %v4253_v16, %v4136_v20 }
 0x38f   : > { %v3908_v45 = vadd.f32 %v3881_v43, %v3721_v63  ;;  %v4110_v21 = vpop.f32.mrf.mxu3  ;;  %4431 = vmatmul.bf16.gmra.mxu1 %v7757_v42 }
 0x391   : > { %v4137_v49 = vadd.f32 %v4110_v21, %v3908_v45 }
 0x394   : > { %v3699_v14 = vpop.f32.mrf.mxu1 }
 0x395   : > { %v3723_v19 = vadd.f32 %v3699_v14, %v7861_v54  ;;  %v4255_v15 = vpop.f32.mrf.mxu0 }
 0x396   : > { %v3884_v18 = vpop.f32.mrf.mxu2  ;;  %v7901_v3 = vadd.f32 %v4255_v15, %v4137_v49 }
 0x397   : > { %v3909_v53 = vadd.f32 %v3884_v18, %v3722_v47  ;;  %v4113_v46 = vpop.f32.mrf.mxu3 }
 0x399   : > { %v4138_v12 = vadd.f32 %v4113_v46, %v3909_v53  ;;  %v6175_v46 = vld [vmem:[#allocation2 + $0x8] sm:$0xff]  }
 0x39c   : > { %v3702_v27 = vpop.f32.mrf.mxu1 }
 0x39d   : > { %v3724_v7 = vadd.f32 %v3702_v27, %v7867_v8  ;;  %v4258_v44 = vpop.f32.mrf.mxu0  ;;  %v6093_v27 = vunpack.c.l.bf16 %v6175_v46 }
 0x39e   : > { %v3886_v42 = vpop.f32.mrf.mxu2  ;;  %v7906_v30 = vadd.f32 %v4258_v44, %v4138_v12 }
 0x39f   : > { %v3910_v58 = vadd.f32 %v3886_v42, %v3723_v19  ;;  %v4115_v54 = vpop.f32.mrf.mxu3  ;;  %4436 = vmatmul.bf16.gmra.mxu1 %v4347_v59 }
 0x3a1   : > { %v4139_v37 = vadd.f32 %v4115_v54, %v3910_v58 }
 0x3a4   : > { %v3704_v28 = vpop.f32.mrf.mxu1 }
 0x3a5   : > { %v3725_v13 = vadd.f32 %v3704_v28, %v7870_v35  ;;  %v4260_v57 = vpop.f32.mrf.mxu0 }
 0x3a6   : > { %v3889_v40 = vpop.f32.mrf.mxu2  ;;  %v7909_v52 = vadd.f32 %v4260_v57, %v4139_v37  ;;  %v6176_v57 = vld [vmem:[#allocation2 + $0x10] sm:$0xff]  }
 0x3a7   : > { %v3911_v60 = vadd.f32 %v3889_v40, %v3724_v7  ;;  %v4118_v48 = vpop.f32.mrf.mxu3 }
 0x3a9   : > { %v4140_v8 = vadd.f32 %v4118_v48, %v3911_v60 }
 0x3ac   : > { %v3707_v55 = vpop.f32.mrf.mxu1 }
 0x3ad   : > { %v3726_v50 = vadd.f32 %v3707_v55, %v7872_v26  ;;  %v4263_v33 = vpop.f32.mrf.mxu0 }
 0x3ae   : > { %v3891_v17 = vpop.f32.mrf.mxu2  ;;  %v7912_v25 = vadd.f32 %v4263_v33, %v4140_v8  ;;  %v6097_v8 = vunpack.c.l.bf16 %v6176_v57 }
 0x3af   : > { %v3912_v29 = vadd.f32 %v3891_v17, %v3725_v13  ;;  %v4120_v61 = vpop.f32.mrf.mxu3  ;;  %4441 = vmatmul.bf16.gmra.mxu1 %v4346_v22  ;;  %v6098_v17 = vunpack.c.h.bf16 %v6176_v57 }
 0x3b1   : > { %v4141_v34 = vadd.f32 %v4120_v61, %v3912_v29 }
 0x3b4   : > { %v3709_v9 = vpop.f32.mrf.mxu1 }
 0x3b5   : > { %v3727_v35 = vadd.f32 %v3709_v9, %v7875_v2  ;;  %v4265_v10 = vpop.f32.mrf.mxu0 }
 0x3b6   : > { %v3894_v63 = vpop.f32.mrf.mxu2  ;;  %v7915_v11 = vadd.f32 %v4265_v10, %v4141_v34 }
 0x3b7   : > { %v3913_v51 = vadd.f32 %v3894_v63, %v3726_v50  ;;  %v4123_v6 = vpop.f32.mrf.mxu3 }
 0x3b9   : > { %v4142_v32 = vadd.f32 %v4123_v6, %v3913_v51 }
 0x3bc   : > { %v3712_v20 = vpop.f32.mrf.mxu1 }
 0x3bd   : > { %v3728_v26 = vadd.f32 %v3712_v20, %v7878_v0  ;;  %v4268_v4 = vpop.f32.mrf.mxu0 }
 0x3be   : > { %v3896_v39 = vpop.f32.mrf.mxu2  ;;  %v7918_v16 = vadd.f32 %v4268_v4, %v4142_v32  ;;  %v6177_v32 = vld [vmem:[#allocation2 + $0x18] sm:$0xff]  }
 0x3bf   : > { %v3914_v47 = vadd.f32 %v3896_v39, %v3727_v35  ;;  %v4125_v43 = vpop.f32.mrf.mxu3 }
 0x3c1   : > { %v4143_v41 = vadd.f32 %v4125_v43, %v3914_v47 }
 0x3c4   : > { %v3714_v45 = vpop.f32.mrf.mxu1 }
 0x3c5   : > { %v4270_v2 = vpop.f32.mrf.mxu0  ;;  %v6102_v45 = vunpack.c.h.bf16 %v6177_v32 }
 0x3c6   : > { %v3899_v21 = vpop.f32.mrf.mxu2  ;;  %v7920_v5 = vadd.f32 %v4270_v2, %v4143_v41  ;;  %v6101_v41 = vunpack.c.l.bf16 %v6177_v32 }
 0x3c7   : > { %v3915_v49 = vadd.f32 %v3899_v21, %v3728_v26  ;;  %v4128_v36 = vpop.f32.mrf.mxu3 }
 0x3c9   : > { %v4144_v14 = vadd.f32 %v4128_v36, %v3915_v49 }
 0x3cc   : > { %v4412_v19 = vpop.f32.mrf.mxu1 }
 0x3cd   : > { %v4273_v15 = vpop.f32.mrf.mxu0  ;;  %v4446_v0 = vadd.f32 %v4412_v19, %v7883_v56  ;;  %v6094_v56 = vunpack.c.h.bf16 %v6175_v46 }
 0x3ce   : > { %v3901_v18 = vpop.f32.mrf.mxu2  ;;  %v7928_v38 = vadd.f32 %v4273_v15, %v4144_v14 }
 0x3cf   : > { %v4130_v53 = vpop.f32.mrf.mxu3  ;;  %v4462_v12 = vadd.f32 %v7926_v23, %v4446_v0 }
 0x3d1   : > { %v4501_v44 = vadd.f32 %v6093_v27, %v4462_v12 }
 0x3d3   : > { %v4514_v54 = vmax.f32 %v4501_v44, 0.0 }
 0x3d4   : > { %v4414_v22 = vpop.f32.mrf.mxu1 }
 0x3d5   : > { %v4447_v7 = vadd.f32 %v4414_v22, %v7887_v62  ;;  %v4275_v42 = vpop.f32.mrf.mxu0 }
 0x3d7   : > { %v4463_v59 = vadd.f32 %v7926_v23, %v4447_v7 }
 0x3d9   : > { %v4502_v58 = vadd.f32 %v6094_v56, %v4463_v59 }
 0x3db   : > { %v4515_v37 = vmax.f32 %v4502_v58, 0.0 }
 0x3dc   : > { %v4417_v28 = vpop.f32.mrf.mxu1 }
 0x3dd   : > { %v6118_v13 = vpack.c.bf16 %v4515_v37, %v4514_v54  ;;  %v4448_v40 = vadd.f32 %v4417_v28, %v7890_v1 }
 0x3df   : > { %6181 = vst [vmem:[#allocation2 + $0x8] sm:$0xff] %v6118_v13   ;;  %v4464_v60 = vadd.f32 %v7926_v23, %v4448_v40 }
 0x3e1   : > { %v4503_v55 = vadd.f32 %v6097_v8, %v4464_v60 }
 0x3e3   : > { %v4516_v61 = vmax.f32 %v4503_v55, 0.0 }
 0x3e4   : > { %v4419_v48 = vpop.f32.mrf.mxu1 }
 0x3e5   : > { %v4449_v62 = vadd.f32 %v4419_v48, %v7894_v24  ;;  %v6178_v48 = vld [vmem:[#allocation2 + $0x20] sm:$0xff]  }
 0x3e6   : > { %v4553_v29 = vld [vmem:[#allocation2 + $0xc] sm:$0xe] }
 0x3e7   : > { %v4465_v50 = vadd.f32 %v7926_v23, %v4449_v62  ;;  %v4559_v63 = vshrl.u32 %v4553_v29, 16  ;;  %v4562_v10 = vshll.u32 %v4553_v29, 16 }
 0x3e9   : > { %v4504_v33 = vadd.f32 %v6098_v17, %v4465_v50  ;;  %v4561_v51 = vrot.slane %v4559_v63, 5  ;;  %v4564_v6 = vrot.slane %v4562_v10, 6  ;;  %v6105_v17 = vunpack.c.l.bf16 %v6178_v48 }
 0x3eb   : > { %v4517_v34 = vmax.f32 %v4504_v33, 0.0  ;;  %v4565_v39 = vor.u32 %v4564_v6, %v4561_v51 }
 0x3ec   : > { %v4422_v9 = vpop.f32.mrf.mxu1 }
 0x3ed   : > { %v6123_v35 = vpack.c.bf16 %v4517_v34, %v4516_v61  ;;  %v4450_v1 = vadd.f32 %v4422_v9, %v7897_v31  ;;  %v4566_v7 = vrot.slane %v4565_v39, 4  ;;  %v6106_v34 = vunpack.c.h.bf16 %v6178_v48 }
 0x3ef   : > { %6182 = vst [vmem:[#allocation2 + $0x10] sm:$0xff] %v6123_v35   ;;  %v4466_v24 = vadd.f32 %v7926_v23, %v4450_v1 }
 0x3f1   : > { %v4505_v19 = vadd.f32 %v6101_v41, %v4466_v24 }
 0x3f3   : > { %v4518_v56 = vmax.f32 %v4505_v19, 0.0 }
 0x3f4   : > { %v4424_v20 = vpop.f32.mrf.mxu1 }
 0x3f5   : > { %v4451_v26 = vadd.f32 %v4424_v20, %v7901_v3 }
 0x3f6   : > { %v4554_v4 = vld [vmem:[#allocation2 + $0x10] sm:$0x3]  ;;  %v4578_v47 = vld [vmem:[#allocation2 + $0x10] sm:$0xc]  ;;  %v4579_v43 = vld [vmem:[#allocation2 + $0x14] sm:$0x7] }
 0x3f7   : > { %v4568_v31 = vshrl.u32 %v4554_v4, 16  ;;  %v4571_v21 = vshll.u32 %v4554_v4, 16  ;;  %v4584_v2 = vshrl.u32 %v4578_v47, 16  ;;  %v4587_v49 = vshll.u32 %v4578_v47, 16  ;;  %v4603_v50 = vld [vmem:[#allocation2 + $0x14] sm:$0x8] }
 0x3f8   : > { %v4593_v36 = vshrl.u32 %v4579_v43, 16  ;;  %v4596_v14 = vshll.u32 %v4579_v43, 16  ;;  %v4467_v18 = vadd.f32 %v7926_v23, %v4451_v26  ;;  %v4609_v9 = vshrl.u32 %v4603_v50, 16 }
 0x3f9   : > { %v4570_v15 = vrot.slane %v4568_v31, 5  ;;  %v4573_v0 = vrot.slane %v4571_v21, 6  ;;  %v4586_v53 = vrot.slane %v4584_v2, 6  ;;  %v4589_v3 = vrot.slane %v4587_v49, 7  ;;  %v6179_v31 = vld [vmem:[#allocation2 + $0x28] sm:$0xff]  }
 0x3fa   : > { %v4595_v12 = vrot.slane %v4593_v36, 6  ;;  %v4598_v22 = vrot.slane %v4596_v14, 7  ;;  %v4506_v27 = vadd.f32 %v6102_v45, %v4467_v18  ;;  %v5780_v24 = vrot.slane %v4609_v9, 11 }
 0x3fb   : > { %v4574_v42 = vor.u32 %v4573_v0, %v4570_v15  ;;  %v4590_v44 = vor.u32 %v4589_v3, %v4586_v53  ;;  %v6109_v14 = vunpack.c.l.bf16 %v6179_v31 }
 0x3fc   : > { %v4519_v58 = vmax.f32 %v4506_v27, 0.0  ;;  %v4427_v54 = vpop.f32.mrf.mxu1  ;;  %v4599_v13 = vor.u32 %v4598_v22, %v4595_v12 }
 0x3fd   : > { %v4575_v37 = vsel %vm7944_vm11, %v4566_v7, %v4574_v42  ;;  %v4591_v28 = vrot.slane %v4590_v44, 4  ;;  %v4452_v60 = vadd.f32 %v4427_v54, %v7906_v30 }
 0x3fe   : > { %4577 = vst [vmem:[%s7951_s23] sm:$0xf] %v4575_v37  ;;  %v6128_v40 = vpack.c.bf16 %v4519_v58, %v4518_v56 }
 0x3ff   : > { %v4600_v57 = vsel %vm7955_vm12, %v4591_v28, %v4599_v13  ;;  %v4468_v8 = vadd.f32 %v7926_v23, %v4452_v60 }
 0x400   : > { %4602 = vst [vmem:[%s7951_s23 + $0x4] sm:$0xf] %v4600_v57 }
 0x401   : > { %6183 = vst [vmem:[#allocation2 + $0x18] sm:$0xff] %v6128_v40   ;;  %v4507_v61 = vadd.f32 %v6105_v17, %v4468_v8 }
 0x404   : > { %v4429_v62 = vpop.f32.mrf.mxu1 }
 0x405   : > { %v4453_v55 = vadd.f32 %v4429_v62, %v7909_v52  ;;  %v4520_v52 = vmax.f32 %v4507_v61, 0.0 }
 0x407   : > { %v4469_v33 = vadd.f32 %v7926_v23, %v4453_v55 }
 0x408   : > { %v4604_v29 = vld [vmem:[#allocation2 + $0x18] sm:$0xf]  ;;  %v4623_v1 = vld [vmem:[#allocation2 + $0x1c] sm:$0xf] }
 0x409   : > { %v4614_v35 = vshrl.u32 %v4604_v29, 16  ;;  %v4508_v30 = vadd.f32 %v6106_v34, %v4469_v33  ;;  %v4617_v10 = vshll.u32 %v4604_v29, 16  ;;  %v4629_v26 = vshrl.u32 %v4623_v1, 16  ;;  %v6180_v34 = vld [vmem:[#allocation2 + $0x30] sm:$0xff]  }
 0x40a   : > { %v4632_v39 = vshll.u32 %v4623_v1, 16 }
 0x40b   : > { %v4616_v63 = vrot.slane %v4614_v35, 7  ;;  %v4521_v6 = vmax.f32 %v4508_v30, 0.0  ;;  %v4631_v41 = vrot.slane %v4629_v26, 4  ;;  %v6114_v26 = vunpack.c.h.bf16 %v6180_v34 }
 0x40c   : > { %v4432_v32 = vpop.f32.mrf.mxu1  ;;  %v4634_v45 = vrot.slane %v4632_v39, 5 }
 0x40d   : > { %v4619_v20 = vor.u32 %v4617_v10, %v4616_v63  ;;  %v6133_v4 = vpack.c.bf16 %v4521_v6, %v4520_v52  ;;  %v4454_v43 = vadd.f32 %v4432_v32, %v7912_v25  ;;  %v6110_v25 = vunpack.c.h.bf16 %v6179_v31 }
 0x40e   : > { %v4635_v36 = vor.u32 %v4634_v45, %v4631_v41  ;;  %v6113_v10 = vunpack.c.l.bf16 %v6180_v34 }
 0x40f   : > { %v4620_v47 = vsel %vm7969_vm15, %v5780_v24, %v4619_v20  ;;  %6184 = vst [vmem:[#allocation2 + $0x20] sm:$0xff] %v6133_v4   ;;  %v4470_v21 = vadd.f32 %v7926_v23, %v4454_v43 }
 0x410   : > { %4622 = vst [vmem:[%s7951_s23 + $0x8] sm:$0xf] %v4620_v47  ;;  %v4636_v7 = vrot.slane %v4635_v36, 4 }
 0x411   : > { %v4509_v53 = vadd.f32 %v6109_v14, %v4470_v21 }
 0x413   : > { %v4522_v40 = vmax.f32 %v4509_v53, 0.0 }
 0x414   : > { %v4434_v2 = vpop.f32.mrf.mxu1 }
 0x415   : > { %v4455_v49 = vadd.f32 %v4434_v2, %v7915_v11 }
 0x416   : > { %v4624_v18 = vld [vmem:[#allocation2 + $0x20] sm:$0x1]  ;;  %v4644_v15 = vld [vmem:[#allocation2 + $0x20] sm:$0xe]  ;;  %v4645_v0 = vld [vmem:[#allocation2 + $0x24] sm:$0x3] }
 0x417   : > { %v4471_v19 = vadd.f32 %v7926_v23, %v4455_v49  ;;  %v4638_v3 = vshll.u32 %v4624_v18, 16  ;;  %v4647_v12 = vshrl.u32 %v4644_v15, 16  ;;  %v4650_v22 = vshll.u32 %v4644_v15, 16  ;;  %v4666_v28 = vld [vmem:[#allocation2 + $0x24] sm:$0xc] }
 0x418   : > { %v4656_v27 = vshrl.u32 %v4645_v0, 16  ;;  %v4659_v11 = vshll.u32 %v4645_v0, 16  ;;  %v4669_v62 = vshrl.u32 %v4666_v28, 16  ;;  %v4672_v33 = vshll.u32 %v4666_v28, 16  ;;  %v4487_v15 = vld [vmem:[#allocation2 + $0x38] sm:$0x3] }
 0x419   : > { %v4510_v44 = vadd.f32 %v6110_v25, %v4471_v19  ;;  %v4640_v56 = vrot.slane %v4638_v3, 5  ;;  %v4649_v58 = vrot.slane %v4647_v12, 5  ;;  %v4652_v54 = vrot.slane %v4650_v22, 6 }
 0x41a   : > { %v4658_v37 = vrot.slane %v4656_v27, 5  ;;  %v4661_v13 = vrot.slane %v4659_v11, 6  ;;  %v4671_v9 = vrot.slane %v4669_v62, 6  ;;  %v4674_v35 = vrot.slane %v4672_v33, 7 }
 0x41b   : > { %v4523_v57 = vmax.f32 %v4510_v44, 0.0  ;;  %v4641_v48 = vsel %vm7980_vm2, %v4636_v7, %v4640_v56  ;;  %v4653_v8 = vor.u32 %v4652_v54, %v4649_v58  ;;  %v4500_v22 = vunpack.c.l.bf16 %v4487_v15 }
 0x41c   : > { %v4437_v60 = vpop.f32.mrf.mxu1  ;;  %4643 = vst [vmem:[%s7951_s23 + $0xc] sm:$0xf] %v4641_v48  ;;  %v4662_v17 = vor.u32 %v4661_v13, %v4658_v37  ;;  %v4675_v52 = vor.u32 %v4674_v35, %v4671_v9 }
 0x41d   : > { %v6138_v55 = vpack.c.bf16 %v4523_v57, %v4522_v40  ;;  %v4654_v50 = vrot.slane %v4653_v8, 4  ;;  %v4456_v29 = vadd.f32 %v4437_v60, %v7918_v16 }
 0x41e   : > { %v4676_v49 = vrot.slane %v4675_v52, 4 }
 0x41f   : > { %6185 = vst [vmem:[#allocation2 + $0x28] sm:$0xff] %v6138_v55   ;;  %v4663_v61 = vsel %vm7944_vm11, %v4654_v50, %v4662_v17  ;;  %v4472_v30 = vadd.f32 %v7926_v23, %v4456_v29 }
 0x420   : > { %4665 = vst [vmem:[%s7951_s23 + $0x10] sm:$0xf] %v4663_v61 }
 0x421   : > { %v4511_v20 = vadd.f32 %v6113_v10, %v4472_v30 }
 0x424   : > { %v4439_v63 = vpop.f32.mrf.mxu1 }
 0x425   : > { %v4457_v1 = vadd.f32 %v4439_v63, %v7920_v5  ;;  %v4524_v5 = vmax.f32 %v4511_v20, 0.0 }
 0x426   : > { %v4667_v6 = vld [vmem:[#allocation2 + $0x28] sm:$0x7]  ;;  %v4688_v32 = vld [vmem:[#allocation2 + $0x28] sm:$0x8]  ;;  %v4689_v24 = vld [vmem:[#allocation2 + $0x2c] sm:$0xf] }
 0x427   : > { %v4473_v16 = vadd.f32 %v7926_v23, %v4457_v1  ;;  %v4678_v46 = vshrl.u32 %v4667_v6, 16  ;;  %v4681_v39 = vshll.u32 %v4667_v6, 16  ;;  %v4691_v4 = vshrl.u32 %v4688_v32, 16 }
 0x428   : > { %v4696_v47 = vshrl.u32 %v4689_v24, 16  ;;  %v4699_v21 = vshll.u32 %v4689_v24, 16 }
 0x429   : > { %v4512_v43 = vadd.f32 %v6114_v26, %v4473_v16  ;;  %v4680_v41 = vrot.slane %v4678_v46, 6  ;;  %v4683_v45 = vrot.slane %v4681_v39, 7  ;;  %v5781_v14 = vrot.slane %v4691_v4, 11 }
 0x42a   : > { %v4698_v31 = vrot.slane %v4696_v47, 7 }
 0x42b   : > { %v4525_v2 = vmax.f32 %v4512_v43, 0.0  ;;  %v4684_v36 = vor.u32 %v4683_v45, %v4680_v41 }
 0x42c   : > { %v4701_v19 = vor.u32 %v4699_v21, %v4698_v31  ;;  %v4442_v18 = vpop.f32.mrf.mxu1 }
 0x42d   : > { %v6143_v0 = vpack.c.bf16 %v4525_v2, %v4524_v5  ;;  %v4458_v53 = vadd.f32 %v4442_v18, %v7928_v38  ;;  %v4685_v25 = vsel %vm7955_vm12, %v4676_v49, %v4684_v36 }
 0x42e   : > { %v4702_v3 = vsel %vm7969_vm15, %v5781_v14, %v4701_v19  ;;  %4687 = vst [vmem:[%s7951_s23 + $0x14] sm:$0xf] %v4685_v25 }
 0x42f   : > { %v4474_v12 = vadd.f32 %v7926_v23, %v4458_v53  ;;  %4704 = vst [vmem:[%s7951_s23 + $0x18] sm:$0xf] %v4702_v3 }
 0x430   : > { %6186 = vst [vmem:[#allocation2 + $0x30] sm:$0xff] %v6143_v0  }
 0x431   : > { %v4513_v27 = vadd.f32 %v4500_v22, %v4474_v12 }
 0x433   : > { %v4526_v7 = vmax.f32 %v4513_v27, 0.0 }
 0x434   : > { %v4444_v11 = vpop.f32.mrf.mxu1 }
 0x435   : > { %v4539_v44 = vpack.c.bf16 %v4526_v7, %v4526_v7 }
 0x437   : > { %4552 = vst [vmem:[#allocation2 + $0x38] sm:$0x3] %v4539_v44  ;;  %v4705_v56 = vld [vmem:[#allocation2 + $0x30] sm:$0xf]  ;;  %v4706_v38 = vld [vmem:[#allocation2 + $0x34] sm:$0x1] }
 0x438   : > { %v4708_v58 = vshrl.u32 %v4705_v56, 16  ;;  %v4711_v59 = vshll.u32 %v4705_v56, 16  ;;  %v4717_v51 = vshll.u32 %v4706_v38, 16 }
 0x43a   : > { %v4710_v54 = vrot.slane %v4708_v58, 4  ;;  %v4713_v37 = vrot.slane %v4711_v59, 5  ;;  %v4719_v40 = vrot.slane %v4717_v51, 5 }
 0x43c   : > { %v4714_v28 = vor.u32 %v4713_v37, %v4710_v54 }
 0x43e   : > { %v4715_v13 = vrot.slane %v4714_v28, 4 }
 0x440   : > { %v4720_v23 = vsel %vm7980_vm2, %v4715_v13, %v4719_v40 }
 0x441   : > { %4722 = vst [vmem:[%s7951_s23 + $0x1c] sm:$0xf] %v4720_v23 }
 0x442 PF: > { %s19_s27 = sadd.s32 1, %s6384_s27  }
 0x443   : > { %p16_p7 = scmp.ge.s32.totalorder %s19_s27, 4  }
 0x445   :  { %18 = sbr.rel (!%p16_p7) target bundleno = 1 (0x1), region = 106 }
 0x44a   :  { %4744 = vsyncpa [#allocation5], 1 }
 0x44b   :  { %4746 = vsyncpa [#allocation5 + $0x1], 1 }

// kernel: down_sample_res_net_forward.4
= control target key start
LH: loop header
LB: loop body
LE: loop exit
PB: predicated region body
PF: predicated region fallthrough
CT: control target
= control target key end

     0   :  { %13 = vsyncpa [#allocation5], 0  ;;  %s7595_s0 = inlined_call_operand.vmem [shape: bf16[2,52,512], index: 0, kind: input, shape index: {}]   ;;  %s7596_s1 = inlined_call_operand.hbm [shape: f32[52,1], index: 1, kind: input, shape index: {}]   ;;  %s7597_s2 = inlined_call_operand.vmem [shape: bf16[4,512,128], index: 2, kind: input, shape index: {}]   ;;  %s7598_s3 = inlined_call_operand.vmem [shape: f32[1,128], index: 3, kind: input, shape index: {}]   ;;  %s7599_s4 = inlined_call_operand.hbm [shape: bf16[9,128,128], index: 4, kind: input, shape index: {}]   ;;  %s7600_s5 = inlined_call_operand.vmem [shape: f32[1,1,128], index: 5, kind: input, shape index: {}]   ;;  %s7601_s6 = inlined_call_operand.hbm [shape: bf16[9,128,128], index: 6, kind: input, shape index: {}]   ;;  %s7602_s7 = inlined_call_operand.vmem [shape: f32[1,1,128], index: 7, kind: input, shape index: {}]   ;;  %s7603_s8 = inlined_call_operand.vmem [shape: bf16[2,16,128], index: 8, kind: output, shape index: {}]  }
   0x1   :  { %14 = vsyncpa [#allocation7], 0  ;;  %s6536_s27 = smov 0  }
   0x2 LB: > { %s255_s30 = sshll.u32 %s7599_s4, 4  ;;  %s6545_s9 = sadd.s32 4294967295, %s6481_s27   ;;  %s6481_s27 = sphi %s6536_s27, %s20_s27   ;;  %s256_s30 = int_to_ptr.hbm [resolvable:$true] %s255_s30 }
   0x3   : > { %p4655_p0 = scmp.ge.s32.totalorder %s6481_s27, 1  ;;  %p224_p1 = scmp.lt.s32.totalorder %s6481_s27, 3 }
   0x4   : > { %p6349_p2 = scmp.eq.s32.totalorder %s6545_s9, 0  ;;  %s6483_s11 = smov [#allocation6]  }
   0x5   : > { %p6550_p3 = pnand %p4655_p0, %p224_p1  ;;  %s257_s12 = sshll.u32 %s6483_s11, 4  ;;  %s258_s12 = int_to_ptr.vmem [resolvable:$true] %s257_s12 }
   0x6   : > { %s235_s15 = sshll.u32 %s7596_s1, 4  ;;  %s6484_s17 = smov [#allocation4]   ;;  %s236_s15 = int_to_ptr.hbm [resolvable:$true] %s235_s15 }
   0x7   : > { %p6339_p4 = pneg %p6550_p3  ;;  %s237_s18 = sshll.u32 %s6484_s17, 4  ;;  %s238_s18 = int_to_ptr.vmem [resolvable:$true] %s237_s18 }
   0x8   : > { %s6485_s19 = smov 64   ;;  %s6486_s20 = smov 4  }
   0x9   : > { %p6561_p5 = pnand %p6349_p2, %p6339_p4  ;;  %s272_s23 = sshll.u32 %s7601_s6, 4  ;;  %s273_s23 = int_to_ptr.hbm [resolvable:$true] %s272_s23 }
   0xa   : > { %s6487_s24 = smov 128   ;;  %s6488_s25 = smov 8  }
   0xb   : > { %6345 = dma.hbm_to_vmem [thread:$0]  (!%p6561_p5), %s256_s30, 9216, %s258_s12, [#allocation7], %s6485_s19, %s6485_s19, %s6486_s20  }
   0xc   : > { %6342 = dma.hbm_to_vmem [thread:$0]  (!%p6561_p5), %s236_s15, 896, %s238_s18, [#allocation5], %s6487_s24, %s6487_s24, %s6488_s25  }
   0xd   : > { %s6489_s26 = smov [#allocation8]   ;;  %301 = sbr.rel (%p6550_p3) target bundleno = 932 (0x3a4), region = 52 }
   0xe   : > { %s274_s28 = sshll.u32 %s6489_s26, 4  ;;  %s275_s28 = int_to_ptr.vmem [resolvable:$true] %s274_s28 }
   0xf   : > { %6348 = dma.hbm_to_vmem [thread:$0]  (!%p6561_p5), %s273_s23, 9216, %s275_s28, [#allocation7], %s6485_s19, %s6485_s19, %s6486_s20  }
  0x12   : > { %6472 = dma.done.wait (%p6349_p2), [#allocation5], 896  }
  0x13   : > { %6474 = vsyncadd (%p6349_p2), [#allocation5], 4294966400 }
  0x14   : > { %6476 = dma.done.wait (%p6349_p2), [#allocation7], 18432  }
  0x15   : > { %6478 = vsyncadd (%p6349_p2), [#allocation7], 4294948864  ;;  %v6026_v0 = vld [vmem:[%s7597_s2 + $0x138] sm:$0xff]  ;;  %v6025_v2 = vld [vmem:[%s7597_s2 + $0x130] sm:$0xff]  ;;  %p346_p6 = scmp.lt.s32.totalorder %s6545_s9, 1  ;;  %vm547_vm0 = vcmask 1046528  }
  0x16   : > { %v6034_v1 = vld [vmem:[%s7597_s2 + $0x178] sm:$0xff]  ;;  %6310 = vmatpush.bf16.msra.mxu2 %v6026_v0  ;;  %v6033_v3 = vld [vmem:[%s7597_s2 + $0x170] sm:$0xff]  ;;  %772 = vmatpush.bf16.msra.mxu0 %v6026_v0  ;;  %v6024_v4 = vld [vmem:[%s7597_s2 + $0x128] sm:$0xff]  ;;  %vm874_vm1 = vsmask.f32 7424  ;;  %vm3114_vm5 = vcmask 1044480  }
  0x17   : > { %6318 = vmatpush.bf16.msra.mxu3 %v6034_v1  ;;  %795 = vmatpush.bf16.msra.mxu1 %v6034_v1  ;;  %v6032_v5 = vld [vmem:[%s7597_s2 + $0x168] sm:$0xff]  ;;  %s7607_s9 = smov (!%p346_p6, %s6545_s9), 1  ;;  %v6023_v6 = vld [vmem:[%s7597_s2 + $0x120] sm:$0xff]  ;;  %v6022_v8 = vld [vmem:[%s7597_s2 + $0x118] sm:$0xff]  ;;  %vm1388_vm2 = vsmask.f32 4352 }
  0x18   : > { %v6031_v7 = vld [vmem:[%s7597_s2 + $0x160] sm:$0xff]  ;;  %s6326_s24 = smul.u32 112, %s7607_s9  ;;  %v6030_v9 = vld [vmem:[%s7597_s2 + $0x158] sm:$0xff]  ;;  %v6021_v10 = vld [vmem:[%s7597_s2 + $0x110] sm:$0xff]  ;;  %vm2483_vm3 = vsmask.f32 6400 }
  0x19   : > { %v6029_v12 = vld [vmem:[%s7597_s2 + $0x150] sm:$0xff]  ;;  %v6020_v17 = vld [vmem:[%s7597_s2 + $0x108] sm:$0xff]  ;;  %v6019_v33 = vld [vmem:[%s7597_s2 + $0x100] sm:$0xff]  ;;  %vm2987_vm4 = vsmask.f32 5376 }
  0x1a   : > { %6311 = vmatpush.bf16.msra.mxu2 %v6025_v2  ;;  %773 = vmatpush.bf16.msra.mxu0 %v6025_v2  ;;  %s6622_s11 = scalar_lea.vmem %s7595_s0, %s6326_s24  ;;  %v6028_v24 = vld [vmem:[%s7597_s2 + $0x148] sm:$0xff]  ;;  %v6027_v34 = vld [vmem:[%s7597_s2 + $0x140] sm:$0xff]  ;;  %v6042_v35 = vld [vmem:[%s7597_s2 + $0x1b8] sm:$0xff]  ;;  %vm4505_vm6 = vsmask.f32 256  ;;  %s5982_s24 = sshll.u32 %s7607_s9, 3 }
  0x1b   : > { %6319 = vmatpush.bf16.msra.mxu3 %v6033_v3  ;;  %796 = vmatpush.bf16.msra.mxu1 %v6033_v3  ;;  %v372_v11 = vld [vmem:[%s6622_s11 + $0x40] sm:$0x77]  ;;  %v366_v13 = vld [vmem:[%s6622_s11 + $0x10] sm:$0xff]  ;;  %v6050_v36 = vld [vmem:[%s7597_s2 + $0x1f8] sm:$0xff]  ;;  %vm4506_vm7 = vsmask.f32 4368  ;;  %s355_s9 = scalar_lea.vmem %s7603_s8, %s5982_s24 }
  0x1c   : > { %v438_v14 = vld [vmem:[%s6622_s11] sm:$0xee]  ;;  %v531_v15 = vunpack.c.l.b16 %v372_v11  ;;  %v532_v16 = vunpack.c.h.b16 %v372_v11  ;;  %v5985_v19 = vld [vmem:[%s6622_s11 + $0x2c] sm:$0xf0]  ;;  %v6638_v21 = vunpack.c.l.b16 %v366_v13  ;;  %v6640_v23 = vunpack.c.h.b16 %v366_v13  ;;  %v4735_v26 = vld [vmem:[%s6622_s11 + $0x30] sm:$0xf0] }
  0x1d   : > { %v4733_v18 = vld [vmem:[%s6622_s11 + $0x20] sm:$0xf]  ;;  %v515_v20 = vunpack.c.l.b16 %v438_v14  ;;  %v516_v22 = vunpack.c.h.b16 %v438_v14  ;;  %v5983_v25 = vld [vmem:[%s6622_s11 + $0x24] sm:$0xf]  ;;  %v5994_v43 = vld [vmem:[%s7597_s2 + $0x38] sm:$0xff] }
  0x1e   : > { %6312 = vmatpush.bf16.msra.mxu2 %v6024_v4  ;;  %774 = vmatpush.bf16.msra.mxu0 %v6024_v4  ;;  %v6647_v27 = vpack.c.b16 %v531_v15, %v531_v15  ;;  %v6649_v28 = vor.u32 %v5985_v19, %v4733_v18  ;;  %v6652_v30 = vpack.c.b16 %v532_v16, %v532_v16  ;;  %v6002_v44 = vld [vmem:[%s7597_s2 + $0x78] sm:$0xff]  ;;  %v6041_v45 = vld [vmem:[%s7597_s2 + $0x1b0] sm:$0xff]  ;;  %v6040_v51 = vld [vmem:[%s7597_s2 + $0x1a8] sm:$0xff]  ;;  %vm4525_vm8 = vsmask.f32 3328 }
  0x1f   : > { %6320 = vmatpush.bf16.msra.mxu3 %v6032_v5  ;;  %797 = vmatpush.bf16.msra.mxu1 %v6032_v5  ;;  %v535_v29 = vpack.c.b16 %v6638_v21, %v515_v20  ;;  %v536_v31 = vpack.c.b16 %v6640_v23, %v516_v22  ;;  %v6655_v32 = vor.u32 %v5983_v25, %v4735_v26  ;;  %v6049_v46 = vld [vmem:[%s7597_s2 + $0x1f0] sm:$0xff]  ;;  %v6048_v52 = vld [vmem:[%s7597_s2 + $0x1e8] sm:$0xff]  ;;  %v6039_v55 = vld [vmem:[%s7597_s2 + $0x1a0] sm:$0xff]  ;;  %vm4526_vm9 = vsmask.f32 7440 }
  0x20   : > { %v560_v37 = vrot.slane %v6647_v27, 1  ;;  %v549_v38 = vrot.slane %v6649_v28, 1  ;;  %v562_v40 = vrot.slane %v6652_v30, 1  ;;  %v5993_v49 = vld [vmem:[%s7597_s2 + $0x30] sm:$0xff]  ;;  %v5992_v53 = vld [vmem:[%s7597_s2 + $0x28] sm:$0xff]  ;;  %v6047_v56 = vld [vmem:[%s7597_s2 + $0x1e0] sm:$0xff] }
  0x21   : > { %v548_v39 = vrot.slane %v535_v29, 1  ;;  %v551_v41 = vrot.slane %v536_v31, 1  ;;  %v552_v42 = vrot.slane %v6655_v32, 1  ;;  %v6001_v50 = vld [vmem:[%s7597_s2 + $0x70] sm:$0xff]  ;;  %v6000_v54 = vld [vmem:[%s7597_s2 + $0x68] sm:$0xff]  ;;  %v364_v57 = vld [vmem:[%s6622_s11] sm:$0xff] }
  0x22   : > { %6313 = vmatpush.bf16.msra.mxu2 %v6023_v6  ;;  %775 = vmatpush.bf16.msra.mxu0 %v6023_v6  ;;  %v6038_v58 = vld [vmem:[%s7597_s2 + $0x198] sm:$0xff]  ;;  %v5991_v59 = vld [vmem:[%s7597_s2 + $0x20] sm:$0xff]  ;;  %v439_v63 = vld [vmem:[%s6622_s11 + $0x8] sm:$0xee]  ;;  %v866_v0 = vunpack.c.l.b16 %v364_v57  ;;  %v867_v1 = vunpack.c.h.b16 %v364_v57  ;;  %v561_v16 = vsel %vm547_vm0, %v549_v38, %v560_v37 }
  0x23   : > { %6321 = vmatpush.bf16.msra.mxu3 %v6031_v7  ;;  %798 = vmatpush.bf16.msra.mxu1 %v6031_v7  ;;  %v550_v47 = vsel %vm547_vm0, %v548_v39, %v549_v38  ;;  %v553_v48 = vsel %vm547_vm0, %v551_v41, %v552_v42  ;;  %v5999_v60 = vld [vmem:[%s7597_s2 + $0x60] sm:$0xff]  ;;  %v6046_v61 = vld [vmem:[%s7597_s2 + $0x1d8] sm:$0xff]  ;;  %v517_v4 = vunpack.c.l.b16 %v439_v63  ;;  %v6037_v6 = vld [vmem:[%s7597_s2 + $0x190] sm:$0xff] }
  0x24   : > { %v367_v62 = vld [vmem:[%s6622_s11 + $0x18] sm:$0xff]  ;;  %v6045_v7 = vld [vmem:[%s7597_s2 + $0x1d0] sm:$0xff]  ;;  %v870_v14 = vpack.c.b16 %v6638_v21, %v866_v0  ;;  %v871_v15 = vpack.c.b16 %v6640_v23, %v867_v1  ;;  %v6036_v22 = vld [vmem:[%s7597_s2 + $0x188] sm:$0xff] }
  0x25   : > { %v5990_v2 = vld [vmem:[%s7597_s2 + $0x18] sm:$0xff]  ;;  %v6740_v5 = vunpack.c.l.b16 %v367_v62  ;;  %v5989_v18 = vld [vmem:[%s7597_s2 + $0x10] sm:$0xff]  ;;  %v6008_v1 = vld [vmem:[%s7597_s2 + $0xa8] sm:$0xff] }
  0x26   : > { %6314 = vmatpush.bf16.msra.mxu2 %v6022_v8  ;;  %776 = vmatpush.bf16.msra.mxu0 %v6022_v8  ;;  %v5998_v3 = vld [vmem:[%s7597_s2 + $0x58] sm:$0xff]  ;;  %v4741_v8 = vld [vmem:[%s6622_s11 + $0x28] sm:$0xf]  ;;  %v5997_v20 = vld [vmem:[%s7597_s2 + $0x50] sm:$0xff]  ;;  %v878_v31 = vshll.u32 %v870_v14, 16 }
  0x27   : > { %6322 = vmatpush.bf16.msra.mxu3 %v6030_v9  ;;  %799 = vmatpush.bf16.msra.mxu1 %v6030_v9  ;;  %v518_v9 = vunpack.c.h.b16 %v439_v63  ;;  %v5986_v11 = vld [vmem:[%s6622_s11 + $0x34] sm:$0xf0]  ;;  %v4743_v13 = vld [vmem:[%s6622_s11 + $0x38] sm:$0xf0]  ;;  %v537_v19 = vpack.c.b16 %v6740_v5, %v517_v4  ;;  %vm4507_vm10 = vmor %vm4505_vm6, %vm4506_vm7 }
  0x28   : > { %v6779_v25 = vor.u32 %v5986_v11, %v4741_v8  ;;  %v6006_v11 = vld [vmem:[%s7597_s2 + $0x98] sm:$0xff]  ;;  %vm4527_vm11 = vmor %vm4525_vm8, %vm4526_vm9 }
  0x29   : > { %v554_v38 = vrot.slane %v537_v19, 1 }
  0x2a   : > { %6315 = vmatpush.bf16.msra.mxu2 %v6021_v10  ;;  %777 = vmatpush.bf16.msra.mxu0 %v6021_v10  ;;  %v6749_v10 = vunpack.c.h.b16 %v367_v62  ;;  %v555_v39 = vrot.slane %v6779_v25, 1 }
  0x2b   : > { %6323 = vmatpush.bf16.msra.mxu3 %v6029_v12  ;;  %800 = vmatpush.bf16.msra.mxu1 %v6029_v12  ;;  %v5984_v12 = vld [vmem:[%s6622_s11 + $0x2c] sm:$0xf] }
  0x2c   : > { %v538_v26 = vpack.c.b16 %v6749_v10, %v518_v9  ;;  %v6782_v29 = vor.u32 %v5984_v12, %v4743_v13  ;;  %v923_v12 = vshrl.u32 %v6649_v28, 16  ;;  %v927_v13 = vshll.u32 %v6647_v27, 16 }
  0x2e   : > { %6316 = vmatpush.bf16.msra.mxu2 %v6020_v17  ;;  %778 = vmatpush.bf16.msra.mxu0 %v6020_v17  ;;  %v563_v17 = vsel %vm547_vm0, %v552_v42, %v562_v40  ;;  %v558_v41 = vrot.slane %v6782_v29, 1  ;;  %v6010_v42 = vld [vmem:[%s7597_s2 + $0xb8] sm:$0xff] }
  0x2f   : > { %6324 = vmatpush.bf16.msra.mxu3 %v6028_v24  ;;  %801 = vmatpush.bf16.msra.mxu1 %v6028_v24  ;;  %v6044_v24 = vld [vmem:[%s7597_s2 + $0x1c8] sm:$0xff] }
  0x32   : > { %6317 = vmatpush.bf16.msra.mxu2 %v6019_v33  ;;  %779 = vmatpush.bf16.msra.mxu0 %v6019_v33  ;;  %v890_v33 = vshll.u32 %v871_v15, 16 }
  0x33   : > { %6325 = vmatpush.bf16.msra.mxu3 %v6027_v34  ;;  %802 = vmatpush.bf16.msra.mxu1 %v6027_v34  ;;  %v5988_v34 = vld [vmem:[%s7597_s2 + $0x8] sm:$0xff] }
  0x35   : > { %790 = vmatmul.bf16.vlgmr.msra.gmra.mxu2 %v560_v37  ;;  %780 = vmatmul.bf16.vlgmr.msra.gmra.mxu0 %v550_v47  ;;  %v6043_v37 = vld [vmem:[%s7597_s2 + $0x1c0] sm:$0xff]  ;;  %v888_v47 = vshrl.u32 %v871_v15, 16  ;;  %v931_v15 = vshrl.u32 %v6655_v32, 16 }
  0x36   : > { %818 = vmatpush.bf16.msrb.mxu2 %v6042_v35  ;;  %813 = vmatmul.bf16.vlgmr.msra.gmra.mxu3 %v562_v40  ;;  %v5996_v35 = vld [vmem:[%s7597_s2 + $0x48] sm:$0xff]  ;;  %v557_v40 = vrot.slane %v538_v26, 1  ;;  %v6058_v26 = vld [vmem:[%s7597_s2 + $0x238] sm:$0xff] }
  0x37   : > { %841 = vmatpush.bf16.msrb.mxu3 %v6050_v36  ;;  %1171 = vmatpush.bf16.msrb.mxu0 %v5994_v43  ;;  %v6035_v36 = vld [vmem:[%s7597_s2 + $0x180] sm:$0xff]  ;;  %v6018_v43 = vld [vmem:[%s7597_s2 + $0xf8] sm:$0xff] }
  0x38   : > { %1194 = vmatpush.bf16.msrb.mxu1 %v6002_v44  ;;  %v876_v44 = vshrl.u32 %v870_v14, 16  ;;  %v6014_v14 = vld [vmem:[%s7597_s2 + $0xd8] sm:$0xff] }
  0x39   : > { %803 = vmatmul.bf16.vlgmr.msra.gmra.mxu1 %v553_v48  ;;  %v892_v48 = vrot.slane %v890_v33, 1 }
  0x3a   : > { %819 = vmatpush.bf16.msrb.mxu2 %v6041_v45  ;;  %v883_v45 = vshll.u32 %v6649_v28, 16 }
  0x3b   : > { %842 = vmatpush.bf16.msrb.mxu3 %v6049_v46  ;;  %1172 = vmatpush.bf16.msrb.mxu0 %v5993_v49  ;;  %v880_v46 = vrot.slane %v878_v31, 1  ;;  %v895_v49 = vshll.u32 %v6655_v32, 16  ;;  %v6013_v32 = vld [vmem:[%s7597_s2 + $0xd0] sm:$0xff]  ;;  %v6066_v31 = vld [vmem:[%s7597_s2 + $0x278] sm:$0xff] }
  0x3c   : > { %1195 = vmatpush.bf16.msrb.mxu1 %v6001_v50  ;;  %v556_v50 = vsel %vm547_vm0, %v554_v38, %v555_v39  ;;  %v6065_v38 = vld [vmem:[%s7597_s2 + $0x270] sm:$0xff] }
  0x3d   : > { %v881_v57 = vor.u32 %v880_v46, %v876_v44 }
  0x3e   : > { %820 = vmatpush.bf16.msrb.mxu2 %v6040_v51  ;;  %v559_v51 = vsel %vm547_vm0, %v557_v40, %v558_v41  ;;  %v6003_v40 = vld [vmem:[%s7597_s2 + $0x80] sm:$0xff] }
  0x3f   : > { %843 = vmatpush.bf16.msrb.mxu3 %v6048_v52  ;;  %1173 = vmatpush.bf16.msrb.mxu0 %v5992_v53  ;;  %v5987_v52 = vld [vmem:[%s7597_s2] sm:$0xff] }
  0x40   : > { %1196 = vmatpush.bf16.msrb.mxu1 %v6000_v54  ;;  %v5995_v53 = vld [vmem:[%s7597_s2 + $0x40] sm:$0xff]  ;;  %v6009_v54 = vld [vmem:[%s7597_s2 + $0xb0] sm:$0xff] }
  0x42   : > { %821 = vmatpush.bf16.msrb.mxu2 %v6039_v55  ;;  %v6017_v55 = vld [vmem:[%s7597_s2 + $0xf0] sm:$0xff] }
  0x43   : > { %844 = vmatpush.bf16.msrb.mxu3 %v6047_v56  ;;  %1174 = vmatpush.bf16.msrb.mxu0 %v5991_v59  ;;  %v373_v56 = vld [vmem:[%s6622_s11 + $0x48] sm:$0x77]  ;;  %v893_v59 = vor.u32 %v892_v48, %v888_v47  ;;  %v6073_v48 = vld [vmem:[%s7597_s2 + $0x2b0] sm:$0xff] }
  0x44   : > { %1197 = vmatpush.bf16.msrb.mxu1 %v5999_v60  ;;  %v897_v60 = vrot.slane %v895_v49, 1  ;;  %v534_v62 = vunpack.c.h.b16 %v373_v56  ;;  %v6081_v49 = vld [vmem:[%s7597_s2 + $0x2f0] sm:$0xff] }
  0x45   : > { %785 = vmatmul.bf16.gmra.mxu0 %v561_v16  ;;  %v935_v16 = vshll.u32 %v6652_v30, 16 }
  0x46   : > { %822 = vmatpush.bf16.msrb.mxu2 %v6038_v58  ;;  %v885_v58 = vrot.slane %v883_v45, 1  ;;  %v898_v0 = vsel %vm874_vm1, %v893_v59, %v897_v60  ;;  %v6831_v4 = vpack.c.b16 %v534_v62, %v534_v62  ;;  %v6063_v59 = vld [vmem:[%s7597_s2 + $0x260] sm:$0xff] }
  0x47   : > { %845 = vmatpush.bf16.msrb.mxu3 %v6046_v61  ;;  %1175 = vmatpush.bf16.msrb.mxu0 %v5990_v2  ;;  %v533_v61 = vunpack.c.l.b16 %v373_v56  ;;  %v6016_v2 = vld [vmem:[%s7597_s2 + $0xe8] sm:$0xff]  ;;  %v937_v28 = vrot.slane %v935_v16, 1 }
  0x48   : > { %1198 = vmatpush.bf16.msrb.mxu1 %v5998_v3  ;;  %v886_v63 = vsel %vm874_vm1, %v881_v57, %v885_v58  ;;  %v566_v9 = vrot.slane %v6831_v4, 1  ;;  %v925_v19 = vor.u32 %v923_v12, %v885_v58  ;;  %v6055_v58 = vld [vmem:[%s7597_s2 + $0x220] sm:$0xff] }
  0x49   : > { %808 = vmatmul.bf16.gmra.mxu1 %v563_v17  ;;  %v6829_v3 = vpack.c.b16 %v533_v61, %v533_v61  ;;  %v907_v61 = vshll.u32 %v6779_v25, 16 }
  0x4a   : > { %823 = vmatpush.bf16.msrb.mxu2 %v6037_v6  ;;  %v6007_v6 = vld [vmem:[%s7597_s2 + $0xa0] sm:$0xff] }
  0x4b   : > { %846 = vmatpush.bf16.msrb.mxu3 %v6045_v7  ;;  %1176 = vmatpush.bf16.msrb.mxu0 %v5989_v18  ;;  %v6015_v7 = vld [vmem:[%s7597_s2 + $0xe0] sm:$0xff]  ;;  %v564_v8 = vrot.slane %v6829_v3, 1  ;;  %v567_v18 = vsel %vm547_vm0, %v558_v41, %v566_v9 }
  0x4c   : > { %1199 = vmatpush.bf16.msrb.mxu1 %v5997_v20  ;;  %v929_v20 = vrot.slane %v927_v13, 1  ;;  %v6011_v41 = vld [vmem:[%s7597_s2 + $0xc0] sm:$0xff] }
  0x4d   : > { %v565_v17 = vsel %vm547_vm0, %v555_v39, %v564_v8  ;;  %v365_v39 = vld [vmem:[%s6622_s11 + $0x8] sm:$0xff] }
  0x4e   : > { %824 = vmatpush.bf16.msrb.mxu2 %v6036_v22  ;;  %v933_v22 = vor.u32 %v931_v15, %v897_v60  ;;  %v930_v33 = vsel %vm874_vm1, %v925_v19, %v929_v20  ;;  %v868_v44 = vunpack.c.l.b16 %v365_v39  ;;  %v869_v45 = vunpack.c.h.b16 %v365_v39  ;;  %v6078_v15 = vld [vmem:[%s7597_s2 + $0x2d8] sm:$0xff]  ;;  %v6053_v19 = vld [vmem:[%s7597_s2 + $0x210] sm:$0xff] }
  0x4f   : > { %847 = vmatpush.bf16.msrb.mxu3 %v6044_v24  ;;  %1177 = vmatpush.bf16.msrb.mxu0 %v5988_v34  ;;  %v6005_v24 = vld [vmem:[%s7597_s2 + $0x90] sm:$0xff] }
  0x50   : > { %1200 = vmatpush.bf16.msrb.mxu1 %v5996_v35  ;;  %v938_v34 = vsel %vm874_vm1, %v933_v22, %v937_v28  ;;  %v6004_v35 = vld [vmem:[%s7597_s2 + $0x88] sm:$0xff]  ;;  %v872_v46 = vpack.c.b16 %v6740_v5, %v868_v44  ;;  %v873_v47 = vpack.c.b16 %v6749_v10, %v869_v45  ;;  %v6077_v22 = vld [vmem:[%s7597_s2 + $0x2d0] sm:$0xff]  ;;  %v6051_v45 = vld [vmem:[%s7597_s2 + $0x200] sm:$0xff] }
  0x52   : > { %825 = vmatpush.bf16.msrb.mxu2 %v6035_v36  ;;  %v6012_v36 = vld [vmem:[%s7597_s2 + $0xc8] sm:$0xff]  ;;  %v900_v60 = vshrl.u32 %v872_v46, 16 }
  0x53   : > { %848 = vmatpush.bf16.msrb.mxu3 %v6043_v37  ;;  %1178 = vmatpush.bf16.msrb.mxu0 %v5987_v52  ;;  %v6057_v37 = vld [vmem:[%s7597_s2 + $0x230] sm:$0xff]  ;;  %v6056_v52 = vld [vmem:[%s7597_s2 + $0x228] sm:$0xff] }
  0x54   : > { %1201 = vmatpush.bf16.msrb.mxu1 %v5995_v53  ;;  %v6064_v53 = vld [vmem:[%s7597_s2 + $0x268] sm:$0xff] }
  0x55   : > { %826 = vmatmul.bf16.vlgmr.msrb.gmra.mxu2 %v556_v50  ;;  %v955_v50 = vshrl.u32 %v6647_v27, 16  ;;  %v6072_v27 = vld [vmem:[%s7597_s2 + $0x2a8] sm:$0xff] }
  0x56   : > { %1217 = vmatpush.bf16.msra.mxu2 %v6010_v42  ;;  %849 = vmatmul.bf16.vlgmr.msrb.gmra.mxu3 %v559_v51  ;;  %v6074_v42 = vld [vmem:[%s7597_s2 + $0x2b8] sm:$0xff]  ;;  %v958_v51 = vshrl.u32 %v6652_v30, 16  ;;  %v6080_v30 = vld [vmem:[%s7597_s2 + $0x2e8] sm:$0xff] }
  0x57   : > { %1240 = vmatpush.bf16.msra.mxu3 %v6018_v43  ;;  %1179 = vmatmul.bf16.vlgmr.msrb.gmra.mxu0 %v886_v63  ;;  %v6082_v43 = vld [vmem:[%s7597_s2 + $0x2f8] sm:$0xff]  ;;  %v957_v56 = vor.u32 %v955_v50, %v929_v20  ;;  %v912_v63 = vshrl.u32 %v873_v47, 16  ;;  %v6061_v20 = vld [vmem:[%s7597_s2 + $0x250] sm:$0xff] }
  0x58   : > { %1697 = vmatpush.bf16.msra.mxu0 %v6058_v26  ;;  %1720 = vmatpush.bf16.msra.mxu1 %v6066_v31  ;;  %v960_v57 = vor.u32 %v958_v51, %v937_v28  ;;  %v939_v28 = vshrl.u32 %v6779_v25, 16  ;;  %v6052_v26 = vld [vmem:[%s7597_s2 + $0x208] sm:$0xff]  ;;  %v947_v31 = vshrl.u32 %v6782_v29, 16  ;;  %v6059_v51 = vld [vmem:[%s7597_s2 + $0x240] sm:$0xff] }
  0x59   : > { %1202 = vmatmul.bf16.vlgmr.msrb.gmra.mxu1 %v898_v0  ;;  %v6060_v25 = vld [vmem:[%s7597_s2 + $0x248] sm:$0xff] }
  0x5a   : > { %1218 = vmatpush.bf16.msra.mxu2 %v6009_v54  ;;  %v902_v54 = vshll.u32 %v872_v46, 16  ;;  %v6067_v46 = vld [vmem:[%s7597_s2 + $0x280] sm:$0xff] }
  0x5b   : > { %1241 = vmatpush.bf16.msra.mxu3 %v6017_v55  ;;  %v914_v55 = vshll.u32 %v873_v47, 16 }
  0x5c   : > { %1698 = vmatpush.bf16.msra.mxu0 %v6057_v37  ;;  %1721 = vmatpush.bf16.msra.mxu1 %v6065_v38  ;;  %v904_v62 = vrot.slane %v902_v54, 1  ;;  %v6975_v37 = vld [vmem:[%s6622_s11 + $0x30] sm:$0xff]  ;;  %v6075_v54 = vld [vmem:[%s7597_s2 + $0x2c0] sm:$0xff] }
  0x5d   : > { %v916_v0 = vrot.slane %v914_v55, 1 }
  0x5e   : > { %1219 = vmatpush.bf16.msra.mxu2 %v6008_v1  ;;  %v919_v1 = vshll.u32 %v6782_v29, 16 }
  0x5f   : > { %1242 = vmatpush.bf16.msra.mxu3 %v6016_v2  ;;  %v6071_v2 = vld [vmem:[%s7597_s2 + $0x2a0] sm:$0xff]  ;;  %v917_v12 = vor.u32 %v916_v0, %v912_v63 }
  0x60   : > { %1699 = vmatpush.bf16.msra.mxu0 %v6056_v52  ;;  %1722 = vmatpush.bf16.msra.mxu1 %v6064_v53  ;;  %v921_v13 = vrot.slane %v919_v1, 1 }
  0x62   : > { %1220 = vmatpush.bf16.msra.mxu2 %v6007_v6  ;;  %v6079_v6 = vld [vmem:[%s7597_s2 + $0x2e0] sm:$0xff] }
  0x63   : > { %1243 = vmatpush.bf16.msra.mxu3 %v6015_v7  ;;  %v6054_v7 = vld [vmem:[%s7597_s2 + $0x218] sm:$0xff] }
  0x64   : > { %1700 = vmatpush.bf16.msra.mxu0 %v6055_v58  ;;  %1723 = vmatpush.bf16.msra.mxu1 %v6063_v59 }
  0x65   : > { %831 = vmatmul.bf16.gmra.mxu2 %v565_v17  ;;  %v922_v17 = vsel %vm874_vm1, %v917_v12, %v921_v13 }
  0x66   : > { %1221 = vmatpush.bf16.msra.mxu2 %v6006_v11  ;;  %854 = vmatmul.bf16.gmra.mxu3 %v567_v18  ;;  %v909_v11 = vrot.slane %v907_v61, 1  ;;  %v6069_v18 = vld [vmem:[%s7597_s2 + $0x290] sm:$0xff] }
  0x67   : > { %1244 = vmatpush.bf16.msra.mxu3 %v6014_v14  ;;  %1184 = vmatmul.bf16.gmra.mxu0 %v930_v33  ;;  %v6070_v14 = vld [vmem:[%s7597_s2 + $0x298] sm:$0xff]  ;;  %v951_v33 = vshll.u32 %v6831_v4, 16 }
  0x68   : > { %1701 = vmatpush.bf16.msra.mxu0 %v6054_v7 }
  0x69   : > { %1207 = vmatmul.bf16.gmra.mxu1 %v938_v34  ;;  %v6076_v34 = vld [vmem:[%s7597_s2 + $0x2c8] sm:$0xff]  ;;  %v6991_v50 = vrot.slane %v951_v33, 1 }
  0x6a   : > { %1222 = vmatpush.bf16.msra.mxu2 %v6005_v24  ;;  %v943_v24 = vshll.u32 %v6829_v3, 16 }
  0x6b   : > { %1245 = vmatpush.bf16.msra.mxu3 %v6013_v32  ;;  %v6068_v32 = vld [vmem:[%s7597_s2 + $0x288] sm:$0xff] }
  0x6c   : > { %1702 = vmatpush.bf16.msra.mxu0 %v6053_v19  ;;  %v6981_v44 = vrot.slane %v943_v24, 1  ;;  %v6090_v19 = vld [vmem:[%s7597_s2 + $0x338] sm:$0xff]  ;;  %v7036_v24 = vld [vmem:[%s6622_s11 + $0x40] sm:$0xff] }
  0x6d   : > { %v1368_v33 = vunpack.c.l.b16 %v7036_v24 }
  0x6e   : > { %1223 = vmatpush.bf16.msra.mxu2 %v6004_v35  ;;  %v1263_v35 = vld [vmem:[%s6622_s11] sm:$0x88] }
  0x6f   : > { %1246 = vmatpush.bf16.msra.mxu3 %v6012_v36  ;;  %v6972_v36 = vld [vmem:[%s6622_s11 + $0x20] sm:$0xff]  ;;  %v1352_v38 = vunpack.c.l.b16 %v1263_v35  ;;  %v1353_v39 = vunpack.c.h.b16 %v1263_v35  ;;  %v6089_v35 = vld [vmem:[%s7597_s2 + $0x330] sm:$0xff] }
  0x70   : > { %v1360_v29 = vunpack.c.l.b16 %v6972_v36  ;;  %1703 = vmatpush.bf16.msra.mxu0 %v6052_v26  ;;  %v6113_v26 = vld [vmem:[%s7597_s2 + $0x3f0] sm:$0xff] }
  0x71   : > { %v1376_v47 = vpack.c.b16 %v6638_v21, %v1352_v38  ;;  %v6097_v38 = vld [vmem:[%s7597_s2 + $0x370] sm:$0xff] }
  0x72   : > { %1224 = vmatpush.bf16.msra.mxu2 %v6003_v40  ;;  %v1364_v40 = vunpack.c.l.b16 %v6975_v37 }
  0x73   : > { %1247 = vmatpush.bf16.msra.mxu3 %v6011_v41  ;;  %v1361_v41 = vunpack.c.h.b16 %v6972_v36  ;;  %v1390_v55 = vshrl.u32 %v1376_v47, 16 }
  0x74   : > { %v1380_v52 = vpack.c.b16 %v1364_v40, %v1360_v29  ;;  %1704 = vmatpush.bf16.msra.mxu0 %v6051_v45  ;;  %v961_v45 = vshrl.u32 %v6829_v3, 16 }
  0x75   : > { %836 = vmatmul.bf16.gmra.mxu2 %v564_v8  ;;  %v6062_v8 = vld [vmem:[%s7597_s2 + $0x258] sm:$0xff]  ;;  %v1392_v61 = vrot.slane %v1390_v55, 3  ;;  %v6112_v55 = vld [vmem:[%s7597_s2 + $0x3e8] sm:$0xff] }
  0x76   : > { %1743 = vmatpush.bf16.msrb.mxu2 %v6074_v42  ;;  %859 = vmatmul.bf16.gmra.mxu3 %v566_v9  ;;  %v905_v9 = vor.u32 %v904_v62, %v900_v60  ;;  %v1365_v42 = vunpack.c.h.b16 %v6975_v37  ;;  %v1401_v58 = vshll.u32 %v1380_v52, 16 }
  0x77   : > { %1766 = vmatpush.bf16.msrb.mxu3 %v6082_v43  ;;  %1189 = vmatmul.bf16.gmra.mxu0 %v957_v56  ;;  %v941_v43 = vor.u32 %v939_v28, %v909_v11  ;;  %v6105_v28 = vld [vmem:[%s7597_s2 + $0x3b0] sm:$0xff] }
  0x78   : > { %1724 = vmatpush.bf16.msra.mxu1 %v6062_v8  ;;  %v910_v16 = vsel %vm874_vm1, %v905_v9, %v909_v11  ;;  %v1381_v53 = vpack.c.b16 %v1365_v42, %v1361_v41  ;;  %2075 = vmatpush.bf16.msrb.mxu0 %v6090_v19 }
  0x79   : > { %1212 = vmatmul.bf16.gmra.mxu1 %v960_v57  ;;  %v1398_v57 = vshrl.u32 %v1380_v52, 16  ;;  %v6104_v52 = vld [vmem:[%s7597_s2 + $0x3a8] sm:$0xff] }
  0x7a   : > { %1744 = vmatpush.bf16.msrb.mxu2 %v6073_v48  ;;  %v1377_v48 = vpack.c.b16 %v6640_v23, %v1353_v39  ;;  %v1415_v59 = vshrl.u32 %v1381_v53, 16  ;;  %v1418_v60 = vshll.u32 %v1381_v53, 16 }
  0x7b   : > { %1767 = vmatpush.bf16.msrb.mxu3 %v6081_v49  ;;  %v949_v49 = vor.u32 %v947_v31, %v921_v13  ;;  %v1400_v1 = vrot.slane %v1398_v57, 3  ;;  %v946_v13 = vsel %vm874_vm1, %v941_v43, %v6981_v44  ;;  %v1273_v31 = vld [vmem:[%s6622_s11 + $0x50] sm:$0x33] }
  0x7c   : > { %1725 = vmatpush.bf16.msra.mxu1 %v6061_v20  ;;  %v1410_v56 = vshll.u32 %v1377_v48, 16  ;;  %v1420_v7 = vrot.slane %v1418_v60, 4  ;;  %v6098_v20 = vld [vmem:[%s7597_s2 + $0x378] sm:$0xff]  ;;  %v7056_v39 = vunpack.c.l.b16 %v1273_v31  ;;  %v7058_v43 = vunpack.c.h.b16 %v1273_v31  ;;  %2076 = vmatpush.bf16.msrb.mxu0 %v6089_v35 }
  0x7e   : > { %1745 = vmatpush.bf16.msrb.mxu2 %v6072_v27  ;;  %v1393_v27 = vshll.u32 %v1376_v47, 16  ;;  %v1412_v0 = vrot.slane %v1410_v56, 4  ;;  %v964_v47 = vshrl.u32 %v6831_v4, 16 }
  0x7f   : > { %1768 = vmatpush.bf16.msrb.mxu3 %v6080_v30  ;;  %v1407_v30 = vshrl.u32 %v1377_v48, 16 }
  0x80   : > { %1726 = vmatpush.bf16.msra.mxu1 %v6060_v25  ;;  %v1395_v62 = vrot.slane %v1393_v27, 4  ;;  %v1369_v25 = vunpack.c.h.b16 %v7036_v24 }
  0x81   : > { %v1409_v63 = vrot.slane %v1407_v30, 3 }
  0x82   : > { %1746 = vmatpush.bf16.msrb.mxu2 %v6071_v2  ;;  %v1403_v2 = vrot.slane %v1401_v58, 4  ;;  %v1396_v8 = vor.u32 %v1395_v62, %v1392_v61 }
  0x83   : > { %1769 = vmatpush.bf16.msrb.mxu3 %v6079_v6  ;;  %v1417_v6 = vrot.slane %v1415_v59, 3  ;;  %v1413_v9 = vor.u32 %v1412_v0, %v1409_v63  ;;  %v963_v63 = vor.u32 %v961_v45, %v6981_v44 }
  0x84   : > { %1727 = vmatpush.bf16.msra.mxu1 %v6059_v51  ;;  %v7007_v11 = vor.u32 %v1403_v2, %v1400_v1  ;;  %v1385_v51 = vpack.c.b16 %v7058_v43, %v1369_v25  ;;  %v966_v2 = vor.u32 %v964_v47, %v6991_v50 }
  0x85   : > { %1225 = vmatmul.bf16.vlgmr.msra.gmra.mxu2 %v910_v16  ;;  %v7009_v12 = vor.u32 %v1420_v7, %v1417_v6 }
  0x86   : > { %1747 = vmatpush.bf16.msrb.mxu2 %v6070_v14  ;;  %1248 = vmatmul.bf16.vlgmr.msra.gmra.mxu3 %v922_v17  ;;  %v954_v14 = vsel %vm874_vm1, %v949_v49, %v6991_v50  ;;  %v6106_v17 = vld [vmem:[%s7597_s2 + $0x3b8] sm:$0xff]  ;;  %v1384_v49 = vpack.c.b16 %v7056_v39, %v1368_v33  ;;  %v1467_v56 = vshrl.u32 %v1385_v51, 16  ;;  %v1470_v57 = vshll.u32 %v1385_v51, 16 }
  0x87   : > { %1770 = vmatpush.bf16.msrb.mxu3 %v6078_v15  ;;  %v1405_v15 = vsel %vm1388_vm2, %v1396_v8, %v7007_v11  ;;  %v1422_v16 = vsel %vm1388_vm2, %v1413_v9, %v7009_v12 }
  0x88   : > { %1705 = vmatmul.bf16.vlgmr.msra.gmra.mxu0 %v1405_v15  ;;  %2098 = vmatpush.bf16.msrb.mxu1 %v6098_v20  ;;  %v1458_v27 = vshrl.u32 %v1384_v49, 16  ;;  %v1461_v30 = vshll.u32 %v1384_v49, 16  ;;  %v1469_v61 = vrot.slane %v1467_v56, 3  ;;  %v1472_v62 = vrot.slane %v1470_v57, 4  ;;  %v6088_v20 = vld [vmem:[%s7597_s2 + $0x328] sm:$0xff]  ;;  %v6094_v56 = vld [vmem:[%s7597_s2 + $0x358] sm:$0xff] }
  0x89   : > { %1728 = vmatmul.bf16.vlgmr.msra.gmra.mxu1 %v1422_v16  ;;  %2077 = vmatpush.bf16.msrb.mxu0 %v6088_v20  ;;  %v6101_v57 = vld [vmem:[%s7597_s2 + $0x390] sm:$0xff]  ;;  %v6092_v20 = vld [vmem:[%s7597_s2 + $0x348] sm:$0xff] }
  0x8a   : > { %1748 = vmatpush.bf16.msrb.mxu2 %v6069_v18  ;;  %v6114_v18 = vld [vmem:[%s7597_s2 + $0x3f8] sm:$0xff]  ;;  %v1460_v59 = vrot.slane %v1458_v27, 3  ;;  %v1463_v60 = vrot.slane %v1461_v30, 4  ;;  %v1473_v8 = vor.u32 %v1472_v62, %v1469_v61 }
  0x8b   : > { %1771 = vmatpush.bf16.msrb.mxu3 %v6077_v22  ;;  %v1264_v22 = vld [vmem:[%s6622_s11 + $0x8] sm:$0x88]  ;;  %v1274_v27 = vld [vmem:[%s6622_s11 + $0x58] sm:$0x33] }
  0x8c   : > { %v1355_v53 = vunpack.c.h.b16 %v1264_v22  ;;  %2099 = vmatpush.bf16.msrb.mxu1 %v6097_v38  ;;  %v1464_v7 = vor.u32 %v1463_v60, %v1460_v59  ;;  %v6086_v30 = vld [vmem:[%s7597_s2 + $0x318] sm:$0xff] }
  0x8e   : > { %1749 = vmatpush.bf16.msrb.mxu2 %v6068_v32  ;;  %v7039_v32 = vld [vmem:[%s6622_s11 + $0x28] sm:$0xff]  ;;  %v1379_v1 = vpack.c.b16 %v6749_v10, %v1355_v53  ;;  %v1465_v44 = vsel %vm1388_vm2, %v7007_v11, %v1464_v7  ;;  %v6110_v53 = vld [vmem:[%s7597_s2 + $0x3d8] sm:$0xff] }
  0x8f   : > { %1772 = vmatpush.bf16.msrb.mxu3 %v6076_v34  ;;  %v7048_v34 = vld [vmem:[%s6622_s11 + $0x38] sm:$0xff]  ;;  %v1362_v48 = vunpack.c.l.b16 %v7039_v32  ;;  %v1363_v4 = vunpack.c.h.b16 %v7039_v32  ;;  %v6096_v11 = vld [vmem:[%s7597_s2 + $0x368] sm:$0xff] }
  0x90   : > { %v1366_v3 = vunpack.c.l.b16 %v7048_v34  ;;  %v1444_v50 = vshll.u32 %v1379_v1, 16  ;;  %2100 = vmatpush.bf16.msrb.mxu1 %v6096_v11 }
  0x92   : > { %1750 = vmatpush.bf16.msrb.mxu2 %v6067_v46  ;;  %v1354_v46 = vunpack.c.l.b16 %v1264_v22  ;;  %v1382_v0 = vpack.c.b16 %v1366_v3, %v1362_v48  ;;  %v6111_v22 = vld [vmem:[%s7597_s2 + $0x3e0] sm:$0xff]  ;;  %v1446_v49 = vrot.slane %v1444_v50, 4 }
  0x93   : > { %1773 = vmatpush.bf16.msrb.mxu3 %v6075_v54  ;;  %v1367_v54 = vunpack.c.h.b16 %v7048_v34 }
  0x94   : > { %v1378_v58 = vpack.c.b16 %v6740_v5, %v1354_v46  ;;  %v1432_v15 = vshrl.u32 %v1382_v0, 16  ;;  %v1435_v16 = vshll.u32 %v1382_v0, 16  ;;  %v6102_v46 = vld [vmem:[%s7597_s2 + $0x398] sm:$0xff] }
  0x95   : > { %1230 = vmatmul.bf16.gmra.mxu2 %v946_v13  ;;  %v1383_v6 = vpack.c.b16 %v1367_v54, %v1363_v4  ;;  %v1474_v13 = vsel %vm1388_vm2, %v7009_v12, %v1473_v8  ;;  %v6103_v12 = vld [vmem:[%s7597_s2 + $0x3a0] sm:$0xff] }
  0x96   : > { %1253 = vmatmul.bf16.gmra.mxu3 %v954_v14  ;;  %2121 = vmatpush.bf16.msra.mxu2 %v6106_v17  ;;  %v1424_v9 = vshrl.u32 %v1378_v58, 16  ;;  %v1427_v14 = vshll.u32 %v1378_v58, 16  ;;  %v1441_v17 = vshrl.u32 %v1379_v1, 16  ;;  %v1434_v38 = vrot.slane %v1432_v15, 3  ;;  %v6109_v15 = vld [vmem:[%s7597_s2 + $0x3d0] sm:$0xff] }
  0x97   : > { %2144 = vmatpush.bf16.msra.mxu3 %v6114_v18  ;;  %v1449_v18 = vshrl.u32 %v1383_v6, 16  ;;  %v1452_v19 = vshll.u32 %v1383_v6, 16  ;;  %v1437_v45 = vrot.slane %v1435_v16, 4  ;;  %v7135_v1 = vunpack.c.h.b16 %v1274_v27 }
  0x98   : > { %1710 = vmatmul.bf16.gmra.mxu0 %v1465_v44  ;;  %v1426_v31 = vrot.slane %v1424_v9, 3  ;;  %v1429_v35 = vrot.slane %v1427_v14, 4  ;;  %v1443_v47 = vrot.slane %v1441_v17, 3  ;;  %v6093_v14 = vld [vmem:[%s7597_s2 + $0x350] sm:$0xff] }
  0x99   : > { %1733 = vmatmul.bf16.gmra.mxu1 %v1474_v13  ;;  %v1451_v51 = vrot.slane %v1449_v18, 3  ;;  %v1438_v59 = vor.u32 %v1437_v45, %v1434_v38  ;;  %v6085_v13 = vld [vmem:[%s7597_s2 + $0x310] sm:$0xff]  ;;  %v6100_v38 = vld [vmem:[%s7597_s2 + $0x388] sm:$0xff] }
  0x9a   : > { %2122 = vmatpush.bf16.msra.mxu2 %v6105_v28  ;;  %v6087_v28 = vld [vmem:[%s7597_s2 + $0x320] sm:$0xff]  ;;  %v1430_v58 = vor.u32 %v1429_v35, %v1426_v31  ;;  %v1447_v60 = vor.u32 %v1446_v49, %v1443_v47  ;;  %v6108_v45 = vld [vmem:[%s7597_s2 + $0x3c8] sm:$0xff] }
  0x9b   : > { %2145 = vmatpush.bf16.msra.mxu3 %v6113_v26  ;;  %v6095_v26 = vld [vmem:[%s7597_s2 + $0x360] sm:$0xff]  ;;  %2078 = vmatpush.bf16.msrb.mxu0 %v6087_v28 }
  0x9c   : > { %2101 = vmatpush.bf16.msrb.mxu1 %v6095_v26  ;;  %v6083_v47 = vld [vmem:[%s7597_s2 + $0x300] sm:$0xff] }
  0x9d   : > { %v6091_v49 = vld [vmem:[%s7597_s2 + $0x340] sm:$0xff] }
  0x9e   : > { %2123 = vmatpush.bf16.msra.mxu2 %v6104_v52  ;;  %v1454_v52 = vrot.slane %v1452_v19, 4  ;;  %v6084_v19 = vld [vmem:[%s7597_s2 + $0x308] sm:$0xff] }
  0x9f   : > { %2146 = vmatpush.bf16.msra.mxu3 %v6112_v55  ;;  %v7119_v55 = vld [vmem:[%s6622_s11 + $0x48] sm:$0xff]  ;;  %2079 = vmatpush.bf16.msrb.mxu0 %v6086_v30 }
  0xa0   : > { %v1455_v61 = vor.u32 %v1454_v52, %v1451_v51  ;;  %v1370_v62 = vunpack.c.l.b16 %v7119_v55  ;;  %v1371_v0 = vunpack.c.h.b16 %v7119_v55  ;;  %2102 = vmatpush.bf16.msrb.mxu1 %v6094_v56  ;;  %v1859_v56 = vpack.c.b16 %v1360_v29, %v6638_v21 }
  0xa2   : > { %2124 = vmatpush.bf16.msra.mxu2 %v6103_v12  ;;  %v1456_v6 = vsel %vm1388_vm2, %v1447_v60, %v1455_v61  ;;  %v1387_v44 = vpack.c.b16 %v7135_v1, %v1371_v0 }
  0xa3   : > { %2147 = vmatpush.bf16.msra.mxu3 %v6111_v22  ;;  %2080 = vmatpush.bf16.msrb.mxu0 %v6085_v13  ;;  %v1864_v13 = vpack.c.b16 %v1369_v25, %v1365_v42  ;;  %v2187_v25 = vld [vmem:[#allocation4 + $0x18] sm:$0xff] }
  0xa4   : > { %v1485_v50 = vshrl.u32 %v1387_v44, 16  ;;  %v1488_v18 = vshll.u32 %v1387_v44, 16  ;;  %2103 = vmatpush.bf16.msrb.mxu1 %v6093_v14  ;;  %v2186_v14 = vld [vmem:[#allocation4 + $0x10] sm:$0xff] }
  0xa5   : > { %1235 = vmatmul.bf16.gmra.mxu2 %v963_v63  ;;  %v7132_v63 = vunpack.c.l.b16 %v1274_v27 }
  0xa6   : > { %1258 = vmatmul.bf16.gmra.mxu3 %v966_v2  ;;  %2125 = vmatpush.bf16.msra.mxu2 %v6102_v46  ;;  %v1439_v2 = vsel %vm1388_vm2, %v1430_v58, %v1438_v59  ;;  %v1487_v28 = vrot.slane %v1485_v50, 3  ;;  %v1490_v26 = vrot.slane %v1488_v18, 4  ;;  %v6107_v58 = vld [vmem:[%s7597_s2 + $0x3c0] sm:$0xff] }
  0xa7   : > { %2148 = vmatpush.bf16.msra.mxu3 %v6110_v53  ;;  %v1386_v9 = vpack.c.b16 %v7132_v63, %v1370_v62  ;;  %2081 = vmatpush.bf16.msrb.mxu0 %v6084_v19  ;;  %v6099_v53 = vld [vmem:[%s7597_s2 + $0x380] sm:$0xff]  ;;  %v1862_v19 = vpack.c.b16 %v1363_v4, %v6749_v10  ;;  %v1869_v34 = vpack.c.b16 %v7132_v63, %v7132_v63 }
  0xa8   : > { %1715 = vmatmul.bf16.gmra.mxu0 %v1464_v7  ;;  %2104 = vmatpush.bf16.msrb.mxu1 %v6092_v20  ;;  %v1491_v52 = vor.u32 %v1490_v26, %v1487_v28  ;;  %v1868_v28 = vpack.c.b16 %v7058_v43, %v7058_v43  ;;  %v1865_v43 = vpack.c.b16 %v1370_v62, %v1366_v3 }
  0xa9   : > { %1738 = vmatmul.bf16.gmra.mxu1 %v1473_v8  ;;  %v1476_v16 = vshrl.u32 %v1386_v9, 16  ;;  %v1479_v17 = vshll.u32 %v1386_v9, 16 }
  0xaa   : > { %2126 = vmatpush.bf16.msra.mxu2 %v6101_v57  ;;  %v1860_v57 = vpack.c.b16 %v1361_v41, %v6640_v23  ;;  %v6490_v23 = vmov 0   ;;  %v7194_v41 = vld [vmem:[#allocation4 + $0x8] sm:$0xff] }
  0xab   : > { %2149 = vmatpush.bf16.msra.mxu3 %v6109_v15  ;;  %v1478_v12 = vrot.slane %v1476_v16, 3  ;;  %v1481_v22 = vrot.slane %v1479_v17, 4  ;;  %2082 = vmatpush.bf16.msrb.mxu0 %v6083_v47  ;;  %357 = vst [vmem:[#allocation2] sm:$0xf] %v6490_v23  ;;  %v1866_v47 = vpack.c.b16 %v1371_v0, %v1367_v54  ;;  %v1870_v54 = vpack.c.b16 %v7135_v1, %v7135_v1 }
  0xac   : > { %2105 = vmatpush.bf16.msrb.mxu1 %v6091_v49  ;;  %6371 = vset.pattern.permute.xlu0 %v6490_v23  ;;  %358 = vst [vmem:[#allocation2 + $0x14] sm:$0xc] %v6490_v23 }
  0xad   : > { %v1482_v51 = vor.u32 %v1481_v22, %v1478_v12  ;;  %6372 = vset.pattern.permute.xlu1 %v6490_v23  ;;  %2192 = vperm.xlu0 %6371, %v7194_v41   ;;  %359 = vst [vmem:[#allocation2 + $0x18] sm:$0x3] %v6490_v23  ;;  %v3337_v12 = vld [vmem:[#allocation4 + $0x28] sm:$0xf]  ;;  %v1867_v22 = vpack.c.b16 %v7056_v39, %v7056_v39 }
  0xae   : > { %2127 = vmatpush.bf16.msra.mxu2 %v6100_v38  ;;  %6373 = vset.pattern.permute.xlu2 %v6490_v23  ;;  %360 = vst [vmem:[#allocation3] sm:$0xf] %v6490_v23 }
  0xaf   : > { %2150 = vmatpush.bf16.msra.mxu3 %v6108_v45  ;;  %v1483_v60 = vsel %vm1388_vm2, %v1438_v59, %v1482_v51  ;;  %361 = vst [vmem:[#allocation3 + $0x14] sm:$0xc] %v6490_v23  ;;  %2202 = vperm.xlu1 %6372, %v2187_v25  }
  0xb0   : > { %362 = vst [vmem:[#allocation3 + $0x18] sm:$0x3] %v6490_v23  ;;  %v2189_v23 = vld [vmem:[#allocation4 + $0x28] sm:$0xf] }
  0xb1   : > { %2212 = vperm.xlu2 %6373, %v2189_v23   ;;  %v6130_v23 = vld [vmem:[#allocation6 + $0x70] sm:$0xff] }
  0xb2   : > { %v781_v7 = vpop.f32.mrf.mxu0  ;;  %2128 = vmatpush.bf16.msra.mxu2 %v6099_v53 }
  0xb3   : > { %2151 = vmatpush.bf16.msra.mxu3 %v6107_v58 }
  0xb5   : > { %1751 = vmatmul.bf16.vlgmr.msrb.gmra.mxu2 %v1439_v2  ;;  %v1492_v2 = vsel %vm1388_vm2, %v1455_v61, %v1491_v52  ;;  %v1863_v61 = vpack.c.b16 %v1368_v33, %v1364_v40  ;;  %2197 = vperm.xlu0 %6371, %v2186_v14  }
  0xb6   : > { %1774 = vmatmul.bf16.vlgmr.msrb.gmra.mxu3 %v1456_v6  ;;  %v804_v8 = vpop.f32.mrf.mxu1 }
  0xb7   : > { %v7160_v11 = vadd.f32 %v804_v8, %v781_v7  ;;  %v1861_v8 = vpack.c.b16 %v1362_v48, %v6740_v5 }
  0xb8   : > { %v791_v31 = vpop.f32.mrf.mxu2  ;;  %2083 = vmatmul.bf16.vlgmr.msrb.gmra.mxu0 %v1859_v56 }
  0xb9   : > { %v814_v35 = vpop.f32.mrf.mxu3  ;;  %2106 = vmatmul.bf16.vlgmr.msrb.gmra.mxu1 %v1860_v57  ;;  %3340 = vperm.xlu2 %6373, %v7194_v41  }
  0xba   : > { %v7168_v46 = vadd.f32 %v814_v35, %v791_v31  ;;  %v7179_v27 = vpop.f32.mrf.mxu0 }
  0xbd   : > { %3345 = vperm.xlu0 %6371, %v2186_v14  }
  0xbe   : > { %v7181_v30 = vpop.f32.mrf.mxu1 }
  0xc0   : > { %v793_v6 = vpop.f32.mrf.mxu2 }
  0xc1   : > { %v816_v9 = vpop.f32.mrf.mxu3 }
  0xc2   : > { %v786_v21 = vpop.f32.mrf.mxu0 }
  0xc5   : > { %1756 = vmatmul.bf16.gmra.mxu2 %v1483_v60  ;;  %3360 = vperm.xlu0 %6371, %v3337_v12  }
  0xc6   : > { %1779 = vmatmul.bf16.gmra.mxu3 %v1492_v2  ;;  %v809_v29 = vpop.f32.mrf.mxu1 }
  0xc7   : > { %v810_v36 = vadd.f32 %v809_v29, %v786_v21 }
  0xc8   : > { %2088 = vmatmul.bf16.gmra.mxu0 %v1863_v61 }
  0xc9   : > { %2111 = vmatmul.bf16.gmra.mxu1 %v1864_v13 }
  0xca   : > { %v7196_v44 = vpop.f32.mrf.mxu0 }
  0xce   : > { %v7198_v59 = vpop.f32.mrf.mxu1 }
  0xd4   : > { %v1180_v33 = vpop.f32.mrf.mxu0 }
  0xd5   : > { %1761 = vmatmul.bf16.gmra.mxu2 %v1482_v51 }
  0xd6   : > { %1784 = vmatmul.bf16.gmra.mxu3 %v1491_v52  ;;  %v1203_v37 = vpop.f32.mrf.mxu1 }
  0xd8   : > { %v827_v15 = vpop.f32.mrf.mxu2  ;;  %2093 = vmatmul.bf16.gmra.mxu0 %v1867_v22 }
  0xd9   : > { %v850_v16 = vpop.f32.mrf.mxu3  ;;  %v828_v40 = vadd.f32 %v827_v15, %v7160_v11  ;;  %v2188_v11 = vld [vmem:[#allocation4 + $0x20] sm:$0xff]  ;;  %2116 = vmatmul.bf16.gmra.mxu1 %v1868_v28 }
  0xda   : > { %2207 = vperm.xlu1 %6372, %v2188_v11   ;;  %3355 = vperm.xlu2 %6373, %v2188_v11  }
  0xdb   : > { %v851_v17 = vadd.f32 %v850_v16, %v828_v40 }
  0xdc   : > { %v7214_v7 = vpop.f32.mrf.mxu0 }
  0xdd   : > { %v1181_v24 = vadd.f32 %v1180_v33, %v851_v17 }
  0xde   : > { %v7222_v20 = vpop.f32.mrf.mxu1 }
  0xdf   : > { %v1204_v42 = vadd.f32 %v1203_v37, %v1181_v24 }
  0xe0   : > { %v7210_v50 = vpop.f32.mrf.mxu2 }
  0xe1   : > { %v7212_v18 = vpop.f32.mrf.mxu3 }
  0xe2   : > { %3350 = vperm.xlu1 %6372, %v2187_v25  }
  0xe4   : > { %v1185_v48 = vpop.f32.mrf.mxu0 }
  0xe5   : > { %2129 = vmatmul.bf16.vlgmr.msra.gmra.mxu2 %v1861_v8 }
  0xe6   : > { %2152 = vmatmul.bf16.vlgmr.msra.gmra.mxu3 %v1862_v19  ;;  %v1208_v32 = vpop.f32.mrf.mxu1 }
  0xe8   : > { %v832_v26 = vpop.f32.mrf.mxu2 }
  0xe9   : > { %v855_v31 = vpop.f32.mrf.mxu3  ;;  %v833_v5 = vadd.f32 %v832_v26, %v810_v36 }
  0xeb   : > { %v856_v10 = vadd.f32 %v855_v31, %v833_v5 }
  0xec   : > { %v7232_v39 = vpop.f32.mrf.mxu0 }
  0xed   : > { %v1186_v4 = vadd.f32 %v1185_v48, %v856_v10 }
  0xee   : > { %v7242_v49 = vpop.f32.mrf.mxu1 }
  0xef   : > { %v1209_v35 = vadd.f32 %v1208_v32, %v1186_v4 }
  0xf0   : > { %v7228_v38 = vpop.f32.mrf.mxu2 }
  0xf1   : > { %v7230_v45 = vpop.f32.mrf.mxu3 }
  0xf4   : > { %v1190_v56 = vpop.f32.mrf.mxu0 }
  0xf5   : > { %2134 = vmatmul.bf16.gmra.mxu2 %v1865_v43 }
  0xf6   : > { %2157 = vmatmul.bf16.gmra.mxu3 %v1866_v47  ;;  %v1213_v57 = vpop.f32.mrf.mxu1 }
  0xf8   : > { %v837_v51 = vpop.f32.mrf.mxu2 }
  0xf9   : > { %v860_v52 = vpop.f32.mrf.mxu3  ;;  %v838_v53 = vadd.f32 %v837_v51, %v7168_v46 }
  0xfb   : > { %v861_v58 = vadd.f32 %v860_v52, %v838_v53 }
  0xfc   : > { %v1192_v55 = vpop.f32.mrf.mxu0 }
  0xfd   : > { %v1191_v60 = vadd.f32 %v1190_v56, %v861_v58  ;;  %v6131_v56 = vld [vmem:[#allocation6 + $0x78] sm:$0xff] }
  0xfe   : > { %v1215_v62 = vpop.f32.mrf.mxu1  ;;  %2339 = vmatpush.bf16.msra.mxu0 %v6131_v56  ;;  %v6144_v56 = vld [vmem:[#allocation6 + $0xe0] sm:$0xff] }
  0xff   : > { %v1214_v2 = vadd.f32 %v1213_v57, %v1191_v60 }
 0x100   : > { %v839_v6 = vpop.f32.mrf.mxu2 }
 0x101   : > { %v862_v3 = vpop.f32.mrf.mxu3 }
 0x102   : > { %2340 = vmatpush.bf16.msra.mxu0 %v6130_v23  ;;  %v6118_v23 = vld [vmem:[#allocation6 + $0x10] sm:$0xff] }
 0x105   : > { %2139 = vmatmul.bf16.gmra.mxu2 %v1869_v34  ;;  %v1706_v61 = vpop.f32.mrf.mxu0 }
 0x106   : > { %2162 = vmatmul.bf16.gmra.mxu3 %v1870_v54  ;;  %v1729_v13 = vpop.f32.mrf.mxu1 }
 0x107   : > { %v1730_v63 = vadd.f32 %v1729_v13, %v1706_v61  ;;  %v6139_v61 = vld [vmem:[#allocation6 + $0xb8] sm:$0xff] }
 0x108   : > { %v1226_v0 = vpop.f32.mrf.mxu2  ;;  %2556 = vmatpush.bf16.msrb.mxu2 %v6139_v61 }
 0x109   : > { %v1249_v9 = vpop.f32.mrf.mxu3  ;;  %v1227_v46 = vadd.f32 %v1226_v0, %v1204_v42 }
 0x10b   : > { %v1250_v21 = vadd.f32 %v1249_v9, %v1227_v46 }
 0x10d   : > { %v7253_v16 = vpop.f32.mrf.mxu0 }
 0x10e   : > { %v7255_v40 = vpop.f32.mrf.mxu1 }
 0x110   : > { %v7249_v29 = vpop.f32.mrf.mxu2 }
 0x111   : > { %v7251_v36 = vpop.f32.mrf.mxu3 }
 0x115   : > { %v1711_v24 = vpop.f32.mrf.mxu0 }
 0x116   : > { %v1734_v42 = vpop.f32.mrf.mxu1 }
 0x117   : > { %v1735_v25 = vadd.f32 %v1734_v42, %v1711_v24  ;;  %v6138_v24 = vld [vmem:[#allocation6 + $0xb0] sm:$0xff] }
 0x118   : > { %v1231_v14 = vpop.f32.mrf.mxu2  ;;  %2557 = vmatpush.bf16.msrb.mxu2 %v6138_v24 }
 0x119   : > { %v1254_v15 = vpop.f32.mrf.mxu3  ;;  %v1232_v1 = vadd.f32 %v1231_v14, %v1209_v35  ;;  %v6122_v14 = vld [vmem:[#allocation6 + $0x30] sm:$0xff] }
 0x11b   : > { %v1255_v33 = vadd.f32 %v1254_v15, %v1232_v1  ;;  %v6147_v1 = vld [vmem:[#allocation6 + $0xf8] sm:$0xff] }
 0x11c   : > { %2699 = vmatpush.bf16.msrb.mxu3 %v6147_v1  ;;  %v7308_v1 = vld [vmem:[%s7598_s3] ss:$0 sm:$0xff] }
 0x11d   : > { %v7262_v22 = vpop.f32.mrf.mxu0 }
 0x11e   : > { %v7264_v28 = vpop.f32.mrf.mxu1 }
 0x120   : > { %v7258_v37 = vpop.f32.mrf.mxu2 }
 0x121   : > { %v7260_v17 = vpop.f32.mrf.mxu3 }
 0x125   : > { %v1716_v41 = vpop.f32.mrf.mxu0 }
 0x126   : > { %v1739_v48 = vpop.f32.mrf.mxu1 }
 0x127   : > { %v1740_v32 = vadd.f32 %v1739_v48, %v1716_v41  ;;  %v6137_v48 = vld [vmem:[#allocation6 + $0xa8] sm:$0xff] }
 0x128   : > { %v1236_v8 = vpop.f32.mrf.mxu2  ;;  %2558 = vmatpush.bf16.msrb.mxu2 %v6137_v48 }
 0x129   : > { %v1259_v19 = vpop.f32.mrf.mxu3  ;;  %v1237_v12 = vadd.f32 %v1236_v8, %v1214_v2  ;;  %v6121_v8 = vld [vmem:[#allocation6 + $0x28] sm:$0xff] }
 0x12b   : > { %v1260_v26 = vadd.f32 %v1259_v19, %v1237_v12  ;;  %v807_v19 = vadd.f32 %v7181_v30, %v7179_v27  ;;  %v6136_v27 = vld [vmem:[#allocation6 + $0xa0] sm:$0xff]  ;;  %v6119_v30 = vld [vmem:[#allocation6 + $0x18] sm:$0xff] }
 0x12c   : > { %2559 = vmatpush.bf16.msrb.mxu2 %v6136_v27 }
 0x12d   : > { %v1718_v43 = vpop.f32.mrf.mxu0 }
 0x12e   : > { %v1741_v47 = vpop.f32.mrf.mxu1  ;;  %v6145_v43 = vld [vmem:[#allocation6 + $0xe8] sm:$0xff] }
 0x12f   : > { %v6127_v47 = vld [vmem:[#allocation6 + $0x58] sm:$0xff] }
 0x130   : > { %v1238_v31 = vpop.f32.mrf.mxu2 }
 0x131   : > { %v1261_v5 = vpop.f32.mrf.mxu3  ;;  %v6146_v31 = vld [vmem:[#allocation6 + $0xf0] sm:$0xff] }
 0x132   : > { %2700 = vmatpush.bf16.msrb.mxu3 %v6146_v31 }
 0x135   : > { %v2084_v57 = vpop.f32.mrf.mxu0 }
 0x136   : > { %v2107_v58 = vpop.f32.mrf.mxu1  ;;  %2701 = vmatpush.bf16.msrb.mxu3 %v6145_v43  ;;  %v2193_v43 = vpop.permute.xlu0 %2192 }
 0x138   : > { %v1752_v10 = vpop.f32.mrf.mxu2 }
 0x139   : > { %v1775_v4 = vpop.f32.mrf.mxu3  ;;  %v1753_v35 = vadd.f32 %v1752_v10, %v1730_v63 }
 0x13a   : > { %2702 = vmatpush.bf16.msrb.mxu3 %v6144_v56 }
 0x13b   : > { %v1776_v11 = vadd.f32 %v1775_v4, %v1753_v35  ;;  %v6120_v4 = vld [vmem:[#allocation6 + $0x20] sm:$0xff]  ;;  %v830_v35 = vadd.f32 %v7210_v50, %v807_v19 }
 0x13d   : > { %v7266_v51 = vadd.f32 %v1776_v11, %v1250_v21  ;;  %v7272_v3 = vpop.f32.mrf.mxu0  ;;  %v6123_v21 = vld [vmem:[#allocation6 + $0x38] sm:$0xff]  ;;  %v2108_v11 = vadd.f32 %v2107_v58, %v2084_v57  ;;  %v6134_v57 = vld [vmem:[#allocation6 + $0x90] sm:$0xff]  ;;  %v812_v58 = vadd.f32 %v7198_v59, %v7196_v44  ;;  %v6124_v59 = vld [vmem:[#allocation6 + $0x40] sm:$0xff] }
 0x13e   : > { %v7274_v34 = vpop.f32.mrf.mxu1  ;;  %2439 = vmatpush.bf16.msra.mxu1 %v6123_v21  ;;  %v6142_v44 = vld [vmem:[#allocation6 + $0xd0] sm:$0xff] }
 0x13f   : > { %v2110_v31 = vadd.f32 %v7274_v34, %v7272_v3 }
 0x140   : > { %v7268_v52 = vpop.f32.mrf.mxu2 }
 0x141   : > { %v7270_v53 = vpop.f32.mrf.mxu3 }
 0x142   : > { %2440 = vmatpush.bf16.msra.mxu1 %v6122_v14  ;;  %v1732_v14 = vadd.f32 %v7255_v40, %v7253_v16  ;;  %v6133_v16 = vld [vmem:[#allocation6 + $0x88] sm:$0xff] }
 0x144   : > { %v1755_v24 = vadd.f32 %v7268_v52, %v1732_v14 }
 0x145   : > { %v7282_v9 = vpop.f32.mrf.mxu0 }
 0x146   : > { %v7284_v46 = vpop.f32.mrf.mxu1  ;;  %2441 = vmatpush.bf16.msra.mxu1 %v6121_v8  ;;  %v835_v8 = vadd.f32 %v7228_v38, %v812_v58  ;;  %v6132_v38 = vld [vmem:[#allocation6 + $0x80] sm:$0xff] }
 0x148   : > { %v1757_v60 = vpop.f32.mrf.mxu2 }
 0x149   : > { %v1780_v2 = vpop.f32.mrf.mxu3  ;;  %v1758_v6 = vadd.f32 %v1757_v60, %v1735_v25  ;;  %v6128_v25 = vld [vmem:[#allocation6 + $0x60] sm:$0xff]  ;;  %v6126_v60 = vld [vmem:[#allocation6 + $0x50] sm:$0xff] }
 0x14a   : > { %2442 = vmatpush.bf16.msra.mxu1 %v6120_v4 }
 0x14b   : > { %v1781_v54 = vadd.f32 %v1780_v2, %v1758_v6 }
 0x14d   : > { %v7276_v55 = vadd.f32 %v1781_v54, %v1255_v33  ;;  %v6129_v33 = vld [vmem:[#allocation6 + $0x68] sm:$0xff]  ;;  %v7290_v5 = vpop.f32.mrf.mxu0  ;;  %v6135_v54 = vld [vmem:[#allocation6 + $0x98] sm:$0xff] }
 0x14e   : > { %2341 = vmatpush.bf16.msra.mxu0 %v6129_v33  ;;  %v7292_v41 = vpop.f32.mrf.mxu1  ;;  %2443 = vmatpush.bf16.msra.mxu1 %v6119_v30 }
 0x14f   : > { %2560 = vmatpush.bf16.msrb.mxu2 %v6135_v54 }
 0x150   : > { %v7278_v62 = vpop.f32.mrf.mxu2 }
 0x151   : > { %v7280_v0 = vpop.f32.mrf.mxu3 }
 0x152   : > { %2342 = vmatpush.bf16.msra.mxu0 %v6128_v25  ;;  %2444 = vmatpush.bf16.msra.mxu1 %v6118_v23 }
 0x153   : > { %2561 = vmatpush.bf16.msrb.mxu2 %v6134_v57 }
 0x155   : > { %v7296_v2 = vpop.f32.mrf.mxu0 }
 0x156   : > { %2343 = vmatpush.bf16.msra.mxu0 %v6127_v47  ;;  %v7298_v6 = vpop.f32.mrf.mxu1 }
 0x157   : > { %2562 = vmatpush.bf16.msrb.mxu2 %v6133_v16 }
 0x158   : > { %v1762_v13 = vpop.f32.mrf.mxu2 }
 0x159   : > { %v1785_v63 = vpop.f32.mrf.mxu3  ;;  %v1763_v15 = vadd.f32 %v1762_v13, %v1740_v32 }
 0x15a   : > { %2344 = vmatpush.bf16.msra.mxu0 %v6126_v60  ;;  %v6155_v60 = vld [vmem:[#allocation6 + $0x138] sm:$0xff] }
 0x15b   : > { %v1786_v42 = vadd.f32 %v1785_v63, %v1763_v15  ;;  %v6143_v63 = vld [vmem:[#allocation6 + $0xd8] sm:$0xff]  ;;  %2563 = vmatpush.bf16.msrb.mxu2 %v6132_v38 }
 0x15c   : > { %2703 = vmatpush.bf16.msrb.mxu3 %v6143_v63  ;;  %v6153_v63 = vld [vmem:[#allocation6 + $0x128] sm:$0xff] }
 0x15d   : > { %v7288_v12 = vadd.f32 %v1786_v42, %v1260_v26  ;;  %v853_v26 = vadd.f32 %v7212_v18, %v830_v35  ;;  %v6125_v18 = vld [vmem:[#allocation6 + $0x48] sm:$0xff]  ;;  %v2096_v40 = vpop.f32.mrf.mxu0 }
 0x15e   : > { %2345 = vmatpush.bf16.msra.mxu0 %v6125_v18  ;;  %v2119_v25 = vpop.f32.mrf.mxu1  ;;  %v6163_v40 = vld [vmem:[#allocation6 + $0x178] sm:$0xff] }
 0x15f   : > { %v1183_v61 = vadd.f32 %v7214_v7, %v853_v26  ;;  %v6117_v7 = vld [vmem:[#allocation6 + $0x8] sm:$0xff]  ;;  %v2113_v26 = vadd.f32 %v7284_v46, %v7282_v9 }
 0x160   : > { %v1764_v32 = vpop.f32.mrf.mxu2  ;;  %2445 = vmatpush.bf16.msra.mxu1 %v6117_v7  ;;  %2704 = vmatpush.bf16.msrb.mxu3 %v6142_v44  ;;  %v6305_v44 = vld [vmem:[#allocation2] sm:$0xe] }
 0x161   : > { %v1787_v10 = vpop.f32.mrf.mxu3  ;;  %v1206_v33 = vadd.f32 %v7222_v20, %v1183_v61  ;;  %v6141_v20 = vld [vmem:[#allocation6 + $0xc8] sm:$0xff] }
 0x162   : > { %2346 = vmatpush.bf16.msra.mxu0 %v6124_v59  ;;  %v1778_v10 = vadd.f32 %v7270_v53, %v1755_v24 }
 0x163   : > { %v1229_v19 = vadd.f32 %v7249_v29, %v1206_v33  ;;  %v858_v29 = vadd.f32 %v7230_v45, %v835_v8 }
 0x164   : > { %2705 = vmatpush.bf16.msrb.mxu3 %v6141_v20 }
 0x165   : > { %v1252_v3 = vadd.f32 %v7251_v36, %v1229_v19  ;;  %v1188_v53 = vadd.f32 %v7232_v39, %v858_v29  ;;  %v1737_v36 = vadd.f32 %v7264_v28, %v7262_v22  ;;  %v2203_v22 = vpop.permute.xlu1 %2202  ;;  %v2115_v28 = vadd.f32 %v7292_v41, %v7290_v5  ;;  %v6152_v41 = vld [vmem:[#allocation6 + $0x120] sm:$0xff]  ;;  %v6161_v29 = vld [vmem:[#allocation6 + $0x168] sm:$0xff] }
 0x166   : > { %2798 = vmatpush.bf16.msrb.mxu0 %v6155_v60  ;;  %v2118_v5 = vadd.f32 %v7298_v6, %v7296_v2  ;;  %v6180_v2 = vld [vmem:[#allocation6 + $0x1f8] sm:$0xff] }
 0x167   : > { %v1790_v27 = vadd.f32 %v1778_v10, %v1252_v3  ;;  %v1211_v23 = vadd.f32 %v7242_v49, %v1188_v53  ;;  %v1760_v61 = vadd.f32 %v7278_v62, %v1737_v36  ;;  %v6151_v6 = vld [vmem:[#allocation6 + $0x118] sm:$0xff] }
 0x168   : > { %v2130_v50 = vpop.f32.mrf.mxu2 }
 0x169   : > { %v2153_v21 = vpop.f32.mrf.mxu3  ;;  %v2131_v13 = vadd.f32 %v2130_v50, %v2108_v11  ;;  %v6140_v11 = vld [vmem:[#allocation6 + $0xc0] sm:$0xff]  ;;  %v1234_v39 = vadd.f32 %v7258_v37, %v1211_v23  ;;  %v1783_v18 = vadd.f32 %v7280_v0, %v1760_v61  ;;  %v2198_v37 = vpop.permute.xlu0 %2197 }
 0x16a   : > { %2706 = vmatpush.bf16.msrb.mxu3 %v6140_v11 }
 0x16b   : > { %v2154_v15 = vadd.f32 %v2153_v21, %v2131_v13  ;;  %v6154_v21 = vld [vmem:[#allocation6 + $0x130] sm:$0xff]  ;;  %v1257_v14 = vadd.f32 %v7260_v17, %v1234_v39 }
 0x16c   : > { %2799 = vmatpush.bf16.msrb.mxu0 %v6154_v21 }
 0x16d   : > { %v2167_v42 = vadd.f32 %v2154_v15, %v7266_v51  ;;  %v6116_v51 = vld [vmem:[#allocation6] sm:$0xff]  ;;  %v2208_v10 = vpop.permute.xlu1 %2207 }
 0x16e   : > { %2446 = vmatpush.bf16.msra.mxu1 %v6116_v51  ;;  %v6162_v51 = vld [vmem:[#allocation6 + $0x170] sm:$0xff]  ;;  %3171 = vmatpush.bf16.msra.mxu3 %v6180_v2  ;;  %v6168_v2 = vld [vmem:[#allocation6 + $0x198] sm:$0xff] }
 0x16f   : > { %v2175_v48 = vadd.f32 %v7308_v1, %v2167_v42 }
 0x170   : > { %v2132_v52 = vpop.f32.mrf.mxu2  ;;  %2800 = vmatpush.bf16.msrb.mxu0 %v6153_v63 }
 0x171   : > { %v2155_v32 = vpop.f32.mrf.mxu3  ;;  %v2180_v4 = vmax.f32 %v2175_v48, 0.0  ;;  %v2133_v35 = vadd.f32 %v2132_v52, %v2110_v31 }
 0x172   : > { %2921 = vmatpush.bf16.msrb.mxu1 %v6163_v40 }
 0x173   : > { %v2215_v34 = vmul.f32 %v2193_v43, %v2180_v4  ;;  %v2156_v47 = vadd.f32 %v2155_v32, %v2133_v35  ;;  %v2584_v32 = vld [vmem:[#allocation2] sm:$0x8]  ;;  %v6172_v4 = vld [vmem:[#allocation6 + $0x1b8] sm:$0xff] }
 0x174   : > { %2801 = vmatpush.bf16.msrb.mxu0 %v6152_v41  ;;  %v2613_v3 = vunpack.c.l.b16 %v2584_v32  ;;  %3065 = vmatpush.bf16.msra.mxu2 %v6172_v4  ;;  %v6149_v4 = vld [vmem:[#allocation6 + $0x108] sm:$0xff] }
 0x175   : > { %v2220_v30 = vpack.c.bf16 %v2215_v34, %v2215_v34  ;;  %v2168_v56 = vadd.f32 %v2156_v47, %v1790_v27  ;;  %v6171_v47 = vld [vmem:[#allocation6 + $0x1b0] sm:$0xff] }
 0x176   : > { %2922 = vmatpush.bf16.msrb.mxu1 %v6162_v51  ;;  %v6179_v27 = vld [vmem:[#allocation6 + $0x1f0] sm:$0xff] }
 0x177   : > { %2225 = vst [vmem:[#allocation2 + $0x4] sm:$0xf] %v2220_v30  ;;  %v2176_v9 = vadd.f32 %v7308_v1, %v2168_v56  ;;  %v6150_v56 = vld [vmem:[#allocation6 + $0x110] sm:$0xff]  ;;  %3172 = vmatpush.bf16.msra.mxu3 %v6179_v27 }
 0x178   : > { %v2135_v54 = vpop.f32.mrf.mxu2  ;;  %2802 = vmatpush.bf16.msrb.mxu0 %v6151_v6  ;;  %3066 = vmatpush.bf16.msra.mxu2 %v6171_v47  ;;  %v6176_v6 = vld [vmem:[#allocation6 + $0x1d8] sm:$0xff] }
 0x179   : > { %v2158_v45 = vpop.f32.mrf.mxu3  ;;  %v2136_v50 = vadd.f32 %v2135_v54, %v2113_v26  ;;  %v2181_v57 = vmax.f32 %v2176_v9, 0.0  ;;  %v6160_v9 = vld [vmem:[#allocation6 + $0x160] sm:$0xff] }
 0x17a   : > { %2923 = vmatpush.bf16.msrb.mxu1 %v6161_v29  ;;  %v6167_v29 = vld [vmem:[#allocation6 + $0x190] sm:$0xff] }
 0x17b   : > { %v2159_v46 = vadd.f32 %v2158_v45, %v2136_v50  ;;  %v2216_v33 = vmul.f32 %v2198_v37, %v2181_v57  ;;  %v2213_v50 = vpop.permute.xlu2 %2212 }
 0x17c   : > { %2803 = vmatpush.bf16.msrb.mxu0 %v6150_v56  ;;  %v6156_v56 = vld [vmem:[#allocation6 + $0x140] sm:$0xff] }
 0x17d   : > { %v2169_v13 = vadd.f32 %v2159_v46, %v7276_v55  ;;  %v1792_v55 = vadd.f32 %v1783_v18, %v1257_v14 }
 0x17e   : > { %v6304_v0 = vld [vmem:[#allocation2] sm:$0xf0]  ;;  %2924 = vmatpush.bf16.msrb.mxu1 %v6160_v9 }
 0x17f   : > { %v2177_v49 = vadd.f32 %v7308_v1, %v2169_v13  ;;  %v6269_v25 = vld [vmem:[#allocation2] sm:$0xff]   ;;  %v6306_v8 = vor.u32 %v6305_v44, %v6304_v0 }
 0x180   : > { %v2137_v58 = vpop.f32.mrf.mxu2  ;;  %v2368_v52 = vshll.u32 %v6269_v25, 16  ;;  %v2366_v45 = vshrl.u32 %v6269_v25, 16  ;;  %2804 = vmatpush.bf16.msrb.mxu0 %v6149_v4 }
 0x181   : > { %v2160_v62 = vpop.f32.mrf.mxu3  ;;  %v2182_v15 = vmax.f32 %v2177_v49, 0.0  ;;  %v2138_v7 = vadd.f32 %v2137_v58, %v2115_v28  ;;  %v2485_v38 = vshrl.u32 %v6306_v8, 16  ;;  %v2488_v34 = vshll.u32 %v6306_v8, 16 }
 0x182   : > { %v2370_v11 = vrot.slane %v2368_v52, 1  ;;  %v2283_v54 = vrot.slane %v6306_v8, 1  ;;  %v6177_v8 = vld [vmem:[#allocation6 + $0x1e0] sm:$0xff] }
 0x183   : > { %v2217_v24 = vmul.f32 %v2203_v22, %v2182_v15  ;;  %v2161_v42 = vadd.f32 %v2160_v62, %v2138_v7  ;;  %v2487_v61 = vrot.slane %v2485_v38, 1  ;;  %v2490_v63 = vrot.slane %v2488_v34, 2  ;;  %v6170_v22 = vld [vmem:[#allocation6 + $0x1a8] sm:$0xff]  ;;  %v6175_v34 = vld [vmem:[#allocation6 + $0x1d0] sm:$0xff] }
 0x184   : > { %v2371_v49 = vor.u32 %v2370_v11, %v2366_v45  ;;  %3067 = vmatpush.bf16.msra.mxu2 %v6170_v22  ;;  %v6166_v45 = vld [vmem:[#allocation6 + $0x188] sm:$0xff]  ;;  %v6188_v22 = vld [vmem:[#allocation6 + $0x238] sm:$0xff] }
 0x185   : > { %v7336_v59 = vpack.c.bf16 %v2217_v24, %v2216_v33  ;;  %v2170_v16 = vadd.f32 %v2161_v42, %v1792_v55  ;;  %v2491_v44 = vor.u32 %v2490_v63, %v2487_v61 }
 0x187   : > { %6298 = vst [vmem:[#allocation2 + $0x8] sm:$0xff] %v7336_v59   ;;  %v2178_v17 = vadd.f32 %v7308_v1, %v2170_v16  ;;  %v2631_v53 = vshrl.u32 %v7336_v59, 16 }
 0x188   : > { %v2140_v19 = vpop.f32.mrf.mxu2 }
 0x189   : > { %v2163_v31 = vpop.f32.mrf.mxu3  ;;  %v2183_v48 = vmax.f32 %v2178_v17, 0.0  ;;  %v2141_v20 = vadd.f32 %v2140_v19, %v2118_v5  ;;  %v2633_v62 = vrot.slane %v2631_v53, 3  ;;  %v6169_v5 = vld [vmem:[#allocation6 + $0x1a0] sm:$0xff]  ;;  %v6159_v17 = vld [vmem:[#allocation6 + $0x158] sm:$0xff] }
 0x18a   : > { %2925 = vmatpush.bf16.msrb.mxu1 %v6159_v17  ;;  %3068 = vmatpush.bf16.msra.mxu2 %v6169_v5  ;;  %v2949_v5 = vld [vmem:[#allocation2 + $0x4] sm:$0xc] }
 0x18b   : > { %v2218_v35 = vmul.f32 %v2208_v10, %v2183_v48  ;;  %v2164_v43 = vadd.f32 %v2163_v31, %v2141_v20  ;;  %v6158_v10 = vld [vmem:[#allocation6 + $0x150] sm:$0xff]  ;;  %v2978_v17 = vunpack.c.l.b16 %v2949_v5 }
 0x18d   : > { %v2223_v30 = vpack.c.bf16 %v2218_v35, %v2218_v35  ;;  %v2171_v26 = vadd.f32 %v2164_v43, %v7288_v12  ;;  %v2634_v12 = vshll.u32 %v7336_v59, 16  ;;  %v6157_v35 = vld [vmem:[#allocation6 + $0x148] sm:$0xff] }
 0x18e   : > { %v7344_v60 = vld [vmem:[#allocation2 + $0x8] sm:$0xff]  ;;  %2926 = vmatpush.bf16.msrb.mxu1 %v6158_v10  ;;  %3069 = vmatpush.bf16.msra.mxu2 %v6168_v2 }
 0x18f   : > { %v7346_v36 = vld [vmem:[#allocation2 + $0x4] sm:$0xff]   ;;  %2228 = vst [vmem:[#allocation2 + $0x10] sm:$0xf] %v2223_v30  ;;  %v2179_v21 = vadd.f32 %v7308_v1, %v2171_v26  ;;  %v2284_v46 = vrot.slane %v7344_v60, 1  ;;  %v2373_v39 = vshll.u32 %v7344_v60, 16  ;;  %v2377_v13 = vshrl.u32 %v7344_v60, 16 }
 0x190   : > { %v2614_v23 = vunpack.c.l.b16 %v7346_v36  ;;  %v2142_v18 = vpop.f32.mrf.mxu2  ;;  %v6178_v1 = vld [vmem:[#allocation6 + $0x1e8] sm:$0xff]  ;;  %v2636_v42 = vrot.slane %v2634_v12, 4 }
 0x191   : > { %v2165_v57 = vpop.f32.mrf.mxu3  ;;  %v2184_v28 = vmax.f32 %v2179_v21, 0.0  ;;  %v2285_v14 = vsel %vm547_vm0, %v2283_v54, %v2284_v46  ;;  %v7359_v15 = vrot.slane %v2373_v39, 1  ;;  %v2493_v7 = vrot.slane %v2373_v39, 2  ;;  %3173 = vmatpush.bf16.msra.mxu3 %v6178_v1  ;;  %v6174_v12 = vld [vmem:[#allocation6 + $0x1c8] sm:$0xff] }
 0x192   : > { %v2619_v58 = vpack.c.b16 %v2614_v23, %v2613_v3  ;;  %v2492_v37 = vrot.slane %v2377_v13, 1  ;;  %2347 = vmatmul.bf16.vlgmr.msra.gmra.mxu0 %v2285_v14  ;;  %v7369_v20 = vor.u32 %v2636_v42, %v2633_v62  ;;  %v6148_v3 = vld [vmem:[#allocation6 + $0x100] sm:$0xff]  ;;  %2927 = vmatpush.bf16.msrb.mxu1 %v6157_v35  ;;  %v6274_v42 = vunpack.c.l.b16 %v7336_v59 }
 0x193   : > { %v2219_v55 = vmul.f32 %v2213_v50, %v2184_v28  ;;  %v2376_v0 = vsel %vm874_vm1, %v2371_v49, %v7359_v15  ;;  %3070 = vmatpush.bf16.msra.mxu2 %v6167_v29  ;;  %2805 = vmatpush.bf16.msrb.mxu0 %v6148_v3  ;;  %v2379_v9 = vor.u32 %v2377_v13, %v7359_v15  ;;  %v6165_v28 = vld [vmem:[#allocation6 + $0x180] sm:$0xff]  ;;  %v2954_v29 = vld [vmem:[#allocation2 + $0x18] sm:$0x1] }
 0x194   : > { %v2623_v33 = vshrl.u32 %v2619_v58, 16  ;;  %v2626_v24 = vshll.u32 %v2619_v58, 16  ;;  %v7365_v16 = vor.u32 %v2493_v7, %v2492_v37  ;;  %2447 = vmatmul.bf16.vlgmr.msra.gmra.mxu1 %v2376_v0  ;;  %v6173_v14 = vld [vmem:[#allocation6 + $0x1c0] sm:$0xff]  ;;  %v6187_v37 = vld [vmem:[#allocation6 + $0x230] sm:$0xff] }
 0x195   : > { %v2224_v41 = vpack.c.bf16 %v2219_v55, %v2219_v55  ;;  %3174 = vmatpush.bf16.msra.mxu3 %v6177_v8  ;;  %v6186_v55 = vld [vmem:[#allocation6 + $0x228] sm:$0xff]  ;;  %v6185_v0 = vld [vmem:[#allocation6 + $0x220] sm:$0xff] }
 0x196   : > { %v2625_v40 = vrot.slane %v2623_v33, 3  ;;  %v2628_v25 = vrot.slane %v2626_v24, 4  ;;  %v2495_v19 = vsel %vm2483_vm3, %v2491_v44, %v7365_v16  ;;  %v2235_v31 = vld [vmem:[#allocation2 + $0x10] sm:$0x7]  ;;  %2928 = vmatpush.bf16.msrb.mxu1 %v6156_v56  ;;  %v6275_v44 = vunpack.c.h.b16 %v7336_v59 }
 0x197   : > { %2229 = vst [vmem:[#allocation2 + $0x14] sm:$0x3] %v2224_v41  ;;  %2564 = vmatmul.bf16.vlgmr.msrb.gmra.mxu2 %v2495_v19  ;;  %v2279_v52 = vunpack.c.l.b16 %v2235_v31  ;;  %v7376_v38 = vld [vmem:[#allocation2 + $0x10] sm:$0xf]  ;;  %3292 = vmatpush.bf16.msra.mxu0 %v6188_v22  ;;  %v2979_v41 = vunpack.c.h.b16 %v7346_v36  ;;  %v6184_v19 = vld [vmem:[#allocation6 + $0x218] sm:$0xff] }
 0x198   : > { %v2629_v48 = vor.u32 %v2628_v25, %v2625_v40  ;;  %v2617_v11 = vunpack.c.l.b16 %v7376_v38  ;;  %3071 = vmatpush.bf16.msra.mxu2 %v6166_v45  ;;  %v7403_v25 = vld [vmem:[#allocation2 + $0xc] sm:$0xff]  ;;  %v2983_v45 = vunpack.c.l.b16 %v2954_v29 }
 0x199   : > { %v7373_v51 = vpack.c.b16 %v2279_v52, %v2279_v52  ;;  %3175 = vmatpush.bf16.msra.mxu3 %v6176_v6  ;;  %v2984_v31 = vpack.c.b16 %v2979_v41, %v2978_v17  ;;  %v2997_v59 = vshrl.u32 %v7403_v25, 16  ;;  %v3116_v56 = vrot.slane %v7403_v25, 3 }
 0x19a   : > { %v2638_v32 = vsel %vm1388_vm2, %v2629_v48, %v7369_v20  ;;  %v2745_v40 = vpack.c.b16 %v2617_v11, %v6275_v44  ;;  %v3199_v44 = vld [vmem:[#allocation2 + $0x18] sm:$0x3] }
 0x19b   : > { %2707 = vmatmul.bf16.vlgmr.msrb.gmra.mxu3 %v2638_v32  ;;  %v2381_v43 = vshll.u32 %v7373_v51, 16  ;;  %v2286_v47 = vrot.slane %v7373_v51, 1  ;;  %3293 = vmatpush.bf16.msra.mxu0 %v6187_v37  ;;  %v2385_v33 = vshrl.u32 %v7373_v51, 16  ;;  %v3093_v32 = vld [vmem:[#allocation2 + $0x4] sm:$0x8]  ;;  %v2989_v36 = vshrl.u32 %v2984_v31, 16 }
 0x19c   : > { %3072 = vmatpush.bf16.msra.mxu2 %v6165_v28  ;;  %v2855_v48 = vshll.u32 %v2745_v40, 16  ;;  %v2992_v51 = vshll.u32 %v2984_v31, 16  ;;  %v2999_v2 = vrot.slane %v2997_v59, 2  ;;  %v3112_v35 = vunpack.c.l.b16 %v3093_v32 }
 0x19d   : > { %v2383_v54 = vrot.slane %v2381_v43, 1  ;;  %3176 = vmatpush.bf16.msra.mxu3 %v6175_v34  ;;  %v2287_v61 = vsel %vm547_vm0, %v2284_v46, %v2286_v47  ;;  %v2991_v3 = vrot.slane %v2989_v36, 2 }
 0x19e   : > { %v7379_v27 = vld [vmem:[#allocation2 + $0x10] sm:$0xff]   ;;  %v2857_v4 = vrot.slane %v2855_v48, 1  ;;  %v2994_v34 = vrot.slane %v2992_v51, 3 }
 0x19f   : > { %v2589_v30 = vld [vmem:[#allocation2 + $0x14] sm:$0x3]  ;;  %v2481_v26 = vunpack.c.l.b16 %v7379_v27  ;;  %v2384_v1 = vsel %vm874_vm1, %v2379_v9, %v2383_v54  ;;  %3294 = vmatpush.bf16.msra.mxu0 %v6186_v55  ;;  %v2387_v24 = vor.u32 %v2385_v33, %v2383_v54  ;;  %v2982_v54 = vunpack.c.h.b16 %v7379_v27 }
 0x1a0   : > { %v7383_v53 = vunpack.c.l.b16 %v2589_v30  ;;  %v2826_v43 = vld [vmem:[#allocation2 + $0x14] sm:$0x7]  ;;  %v2859_v27 = vshrl.u32 %v2745_v40, 16 }
 0x1a1   : > { %v2482_v50 = vpack.c.b16 %v2481_v26, %v2481_v26  ;;  %3177 = vmatpush.bf16.msra.mxu3 %v6174_v12  ;;  %v2845_v26 = vunpack.c.l.b16 %v2826_v43 }
 0x1a2   : > { %v2621_v21 = vpack.c.b16 %v7383_v53, %v2617_v11  ;;  %2352 = vmatmul.bf16.gmra.mxu0 %v2287_v61 }
 0x1a3   : > { %v2497_v39 = vshrl.u32 %v2482_v50, 16  ;;  %v2500_v63 = vshll.u32 %v2482_v50, 16  ;;  %3295 = vmatpush.bf16.msra.mxu0 %v6185_v0  ;;  %v2995_v50 = vor.u32 %v2994_v34, %v2991_v3  ;;  %v2846_v12 = vpack.c.b16 %v2845_v26, %v2845_v26 }
 0x1a4   : > { %v2640_v18 = vshrl.u32 %v2621_v21, 16  ;;  %v2643_v57 = vshll.u32 %v2621_v21, 16  ;;  %2452 = vmatmul.bf16.gmra.mxu1 %v2384_v1 }
 0x1a5   : > { %v2499_v49 = vrot.slane %v2497_v39, 1  ;;  %v2502_v58 = vrot.slane %v2500_v63, 2  ;;  %3178 = vmatpush.bf16.msra.mxu3 %v6173_v14  ;;  %v2986_v39 = vpack.c.b16 %v2983_v45, %v2982_v54  ;;  %v6182_v63 = vld [vmem:[#allocation6 + $0x208] sm:$0xff]  ;;  %v2867_v37 = vshrl.u32 %v2846_v12, 16 }
 0x1a6   : > { %v2642_v62 = vrot.slane %v2640_v18, 3  ;;  %v2645_v46 = vrot.slane %v2643_v57, 4  ;;  %v2863_v18 = vshll.u32 %v2846_v12, 16  ;;  %v6181_v57 = vld [vmem:[#allocation6 + $0x200] sm:$0xff] }
 0x1a7   : > { %v2503_v60 = vor.u32 %v2502_v58, %v2499_v49  ;;  %3296 = vmatpush.bf16.msra.mxu0 %v6184_v19  ;;  %v3006_v22 = vshrl.u32 %v2986_v39, 16  ;;  %v3009_v1 = vshll.u32 %v2986_v39, 16 }
 0x1a8   : > { %v2646_v13 = vor.u32 %v2645_v46, %v2642_v62  ;;  %v2865_v28 = vrot.slane %v2863_v18, 1  ;;  %v2861_v62 = vor.u32 %v2859_v27, %v2857_v4 }
 0x1a9   : > { %v2504_v15 = vsel %vm2483_vm3, %v7365_v16, %v2503_v60  ;;  %v2744_v16 = vpack.c.b16 %v6274_v42, %v2614_v23  ;;  %v3000_v23 = vshll.u32 %v7403_v25, 16  ;;  %v3008_v49 = vrot.slane %v3006_v22, 2 }
 0x1aa   : > { %v2647_v7 = vsel %vm1388_vm2, %v7369_v20, %v2646_v13  ;;  %2569 = vmatmul.bf16.gmra.mxu2 %v2504_v15  ;;  %v6183_v20 = vld [vmem:[#allocation6 + $0x210] sm:$0xff]  ;;  %v3011_v58 = vrot.slane %v3009_v1, 3  ;;  %v2866_v46 = vsel %vm874_vm1, %v2861_v62, %v2865_v28  ;;  %v2869_v55 = vor.u32 %v2867_v37, %v2865_v28 }
 0x1ab   : > { %2712 = vmatmul.bf16.gmra.mxu3 %v2647_v7  ;;  %v2850_v8 = vshll.u32 %v2744_v16, 16  ;;  %v2848_v10 = vshrl.u32 %v2744_v16, 16  ;;  %3297 = vmatpush.bf16.msra.mxu0 %v6183_v20  ;;  %v3002_v6 = vrot.slane %v3000_v23, 3  ;;  %v2746_v7 = vpack.c.b16 %v7383_v53, %v7383_v53 }
 0x1ac   : > { %v3012_v14 = vor.u32 %v3011_v58, %v3008_v49  ;;  %v3228_v42 = vrot.slane %v2997_v59, 3  ;;  %v3229_v0 = vrot.slane %v3000_v23, 4 }
 0x1ad   : > { %v2852_v52 = vrot.slane %v2850_v8, 1  ;;  %v3003_v11 = vor.u32 %v3002_v6, %v2999_v2 }
 0x1af   : > { %v2853_v38 = vor.u32 %v2852_v52, %v2848_v10  ;;  %v3004_v61 = vsel %vm2987_vm4, %v2995_v50, %v3003_v11  ;;  %3298 = vmatpush.bf16.msra.mxu0 %v6182_v63 }
 0x1b1   : > { %v2858_v30 = vsel %vm874_vm1, %v2853_v38, %v2857_v4 }
 0x1b2   : > { %2357 = vmatmul.bf16.gmra.mxu0 %v2286_v47  ;;  %v3113_v47 = vpack.c.b16 %v2979_v41, %v3112_v35  ;;  %v3230_v41 = vor.u32 %v3229_v0, %v3228_v42 }
 0x1b3   : > { %3299 = vmatpush.bf16.msra.mxu0 %v6181_v57 }
 0x1b4   : > { %2457 = vmatmul.bf16.gmra.mxu1 %v2387_v24  ;;  %v3115_v21 = vrot.slane %v3113_v47, 3  ;;  %v3221_v33 = vshrl.u32 %v3113_v47, 16  ;;  %v3224_v24 = vshll.u32 %v3113_v47, 16 }
 0x1b6   : > { %v3117_v9 = vsel %vm3114_vm5, %v3115_v21, %v3116_v56  ;;  %v3226_v5 = vrot.slane %v3224_v24, 4  ;;  %v6204_v24 = vld [vmem:[#allocation8 + $0x70] sm:$0xff] }
 0x1ba   : > { %2574 = vmatmul.bf16.gmra.mxu2 %v2503_v60  ;;  %v3118_v60 = vrot.slane %v2986_v39, 3 }
 0x1bb   : > { %2717 = vmatmul.bf16.gmra.mxu3 %v2646_v13  ;;  %v3013_v13 = vsel %vm2987_vm4, %v3003_v11, %v3012_v14 }
 0x1bc   : > { %v3119_v15 = vsel %vm3114_vm5, %v3116_v56, %v3118_v60 }
 0x1c2   : > { %2806 = vmatmul.bf16.vlgmr.msrb.gmra.mxu0 %v2744_v16  ;;  %v3223_v16 = vrot.slane %v3221_v33, 3 }
 0x1c4   : > { %2929 = vmatmul.bf16.vlgmr.msrb.gmra.mxu1 %v2858_v30  ;;  %v3227_v53 = vor.u32 %v3226_v5, %v3223_v16 }
 0x1c6   : > { %v3231_v17 = vsel %vm1388_vm2, %v3227_v53, %v3230_v41 }
 0x1ca   : > { %3073 = vmatmul.bf16.vlgmr.msra.gmra.mxu2 %v3004_v61 }
 0x1cb   : > { %3179 = vmatmul.bf16.vlgmr.msra.gmra.mxu3 %v3117_v9 }
 0x1d2   : > { %2811 = vmatmul.bf16.gmra.mxu0 %v2745_v40  ;;  %v3218_v40 = vunpack.c.l.b16 %v3199_v44 }
 0x1d4   : > { %2934 = vmatmul.bf16.gmra.mxu1 %v2866_v46  ;;  %v3219_v8 = vpack.c.b16 %v3218_v40, %v2982_v54 }
 0x1d6   : > { %v3233_v19 = vshrl.u32 %v3219_v8, 16  ;;  %v3236_v31 = vshll.u32 %v3219_v8, 16  ;;  %v6197_v8 = vld [vmem:[#allocation8 + $0x38] sm:$0xff] }
 0x1d7   : > { %3587 = vmatpush.bf16.msrb.mxu2 %v6197_v8  ;;  %v6229_v8 = vld [vmem:[#allocation8 + $0x138] sm:$0xff] }
 0x1d8   : > { %v3235_v48 = vrot.slane %v3233_v19, 3  ;;  %v3238_v20 = vrot.slane %v3236_v31, 4  ;;  %v6221_v19 = vld [vmem:[#allocation8 + $0xf8] sm:$0xff] }
 0x1d9   : > { %3846 = vmatpush.bf16.msrb.mxu0 %v6221_v19  ;;  %v6214_v19 = vld [vmem:[#allocation8 + $0xc0] sm:$0xff] }
 0x1da   : > { %3078 = vmatmul.bf16.gmra.mxu2 %v3013_v13  ;;  %v3239_v52 = vor.u32 %v3238_v20, %v3235_v48  ;;  %v6213_v48 = vld [vmem:[#allocation8 + $0xb8] sm:$0xff]  ;;  %v6196_v20 = vld [vmem:[#allocation8 + $0x30] sm:$0xff] }
 0x1db   : > { %3184 = vmatmul.bf16.gmra.mxu3 %v3119_v15  ;;  %v6205_v15 = vld [vmem:[#allocation8 + $0x78] sm:$0xff]  ;;  %3588 = vmatpush.bf16.msrb.mxu2 %v6196_v20  ;;  %v6228_v20 = vld [vmem:[#allocation8 + $0x130] sm:$0xff] }
 0x1dc   : > { %v3240_v59 = vsel %vm1388_vm2, %v3230_v41, %v3239_v52  ;;  %3487 = vmatpush.bf16.msra.mxu1 %v6205_v15  ;;  %v6203_v41 = vld [vmem:[#allocation8 + $0x68] sm:$0xff]  ;;  %3703 = vmatpush.bf16.msrb.mxu3 %v6213_v48 }
 0x1e0   : > { %3488 = vmatpush.bf16.msra.mxu1 %v6204_v24  ;;  %v6198_v24 = vld [vmem:[#allocation8 + $0x40] sm:$0xff] }
 0x1e2   : > { %2816 = vmatmul.bf16.gmra.mxu0 %v2746_v7 }
 0x1e4   : > { %2939 = vmatmul.bf16.gmra.mxu1 %v2869_v55 }
 0x1e5   : > { %3489 = vmatpush.bf16.msra.mxu1 %v6203_v41  ;;  %v6215_v41 = vld [vmem:[#allocation8 + $0xc8] sm:$0xff] }
 0x1ea   : > { %3083 = vmatmul.bf16.gmra.mxu2 %v3012_v14 }
 0x1eb   : > { %3189 = vmatmul.bf16.gmra.mxu3 %v3118_v60 }
 0x1f2   : > { %3300 = vmatmul.bf16.vlgmr.msra.gmra.mxu0 %v3231_v17  ;;  %v6202_v17 = vld [vmem:[#allocation8 + $0x60] sm:$0xff] }
 0x1f3   : > { %3490 = vmatpush.bf16.msra.mxu1 %v6202_v17 }
 0x202   : > { %3305 = vmatmul.bf16.gmra.mxu0 %v3240_v59  ;;  %v6220_v59 = vld [vmem:[#allocation8 + $0xf0] sm:$0xff] }
 0x203   : > { %3847 = vmatpush.bf16.msrb.mxu0 %v6220_v59 }
 0x20f   : > { %v2348_v25 = vpop.f32.mrf.mxu0 }
 0x211   : > { %v2448_v23 = vpop.f32.mrf.mxu1 }
 0x212   : > { %v2449_v32 = vadd.f32 %v2448_v23, %v2348_v25  ;;  %3310 = vmatmul.bf16.gmra.mxu0 %v3239_v52 }
 0x217   : > { %v2350_v36 = vpop.f32.mrf.mxu0 }
 0x219   : > { %v2450_v51 = vpop.f32.mrf.mxu1 }
 0x21a   : > { %v2565_v10 = vpop.f32.mrf.mxu2  ;;  %v2451_v43 = vadd.f32 %v2450_v51, %v2350_v36 }
 0x21b   : > { %v2579_v4 = vadd.f32 %v2565_v10, %v2449_v32 }
 0x21e   : > { %v2708_v2 = vpop.f32.mrf.mxu3 }
 0x21f   : > { %v7427_v6 = vadd.f32 %v2708_v2, %v2579_v4  ;;  %v2353_v35 = vpop.f32.mrf.mxu0  ;;  %v6201_v2 = vld [vmem:[#allocation8 + $0x58] sm:$0xff] }
 0x220   : > { %3491 = vmatpush.bf16.msra.mxu1 %v6201_v2 }
 0x221   : > { %v2453_v38 = vpop.f32.mrf.mxu1 }
 0x222   : > { %v2567_v29 = vpop.f32.mrf.mxu2  ;;  %v2454_v3 = vadd.f32 %v2453_v38, %v2353_v35  ;;  %v6212_v35 = vld [vmem:[#allocation8 + $0xb0] sm:$0xff]  ;;  %v6219_v38 = vld [vmem:[#allocation8 + $0xe8] sm:$0xff] }
 0x223   : > { %v2580_v34 = vadd.f32 %v2567_v29, %v2451_v43  ;;  %v6195_v43 = vld [vmem:[#allocation8 + $0x28] sm:$0xff]  ;;  %3704 = vmatpush.bf16.msrb.mxu3 %v6212_v35  ;;  %3848 = vmatpush.bf16.msrb.mxu0 %v6219_v38  ;;  %v3346_v35 = vpop.permute.xlu0 %3345 }
 0x224   : > { %3589 = vmatpush.bf16.msrb.mxu2 %v6195_v43  ;;  %v3351_v43 = vpop.permute.xlu1 %3350 }
 0x226   : > { %v2710_v47 = vpop.f32.mrf.mxu3 }
 0x227   : > { %v7429_v30 = vadd.f32 %v2710_v47, %v2580_v34  ;;  %v2355_v26 = vpop.f32.mrf.mxu0  ;;  %v6200_v34 = vld [vmem:[#allocation8 + $0x50] sm:$0xff]  ;;  %v6194_v47 = vld [vmem:[#allocation8 + $0x20] sm:$0xff] }
 0x228   : > { %3492 = vmatpush.bf16.msra.mxu1 %v6200_v34  ;;  %3590 = vmatpush.bf16.msrb.mxu2 %v6194_v47 }
 0x229   : > { %v2455_v11 = vpop.f32.mrf.mxu1 }
 0x22a   : > { %v2456_v9 = vadd.f32 %v2455_v11, %v2355_v26  ;;  %v6218_v26 = vld [vmem:[#allocation8 + $0xe0] sm:$0xff] }
 0x22b   : > { %3849 = vmatpush.bf16.msrb.mxu0 %v6218_v26 }
 0x22d   : > { %v2570_v56 = vpop.f32.mrf.mxu2 }
 0x22e   : > { %v2713_v54 = vpop.f32.mrf.mxu3  ;;  %v2581_v45 = vadd.f32 %v2570_v56, %v2454_v3 }
 0x22f   : > { %v2358_v21 = vpop.f32.mrf.mxu0 }
 0x230   : > { %v7431_v50 = vadd.f32 %v2713_v54, %v2581_v45  ;;  %v7466_v54 = vld [vmem:[%s7600_s5] ss:$0 sm:$0xff] }
 0x231   : > { %v2458_v12 = vpop.f32.mrf.mxu1 }
 0x232   : > { %v2459_v61 = vadd.f32 %v2458_v12, %v2358_v21 }
 0x235   : > { %v2572_v39 = vpop.f32.mrf.mxu2 }
 0x236   : > { %v2715_v63 = vpop.f32.mrf.mxu3  ;;  %v2582_v18 = vadd.f32 %v2572_v39, %v2456_v9  ;;  %v6210_v9 = vld [vmem:[#allocation8 + $0xa0] sm:$0xff]  ;;  %v6193_v39 = vld [vmem:[#allocation8 + $0x18] sm:$0xff] }
 0x237   : > { %v2360_v22 = vpop.f32.mrf.mxu0  ;;  %3591 = vmatpush.bf16.msrb.mxu2 %v6193_v39  ;;  %v3731_v39 = vld [vmem:[#allocation3] sm:$0x8] }
 0x238   : > { %v7433_v57 = vadd.f32 %v2715_v63, %v2582_v18  ;;  %v6217_v63 = vld [vmem:[#allocation8 + $0xd8] sm:$0xff]  ;;  %v6199_v18 = vld [vmem:[#allocation8 + $0x48] sm:$0xff] }
 0x239   : > { %v2460_v1 = vpop.f32.mrf.mxu1  ;;  %3850 = vmatpush.bf16.msrb.mxu0 %v6217_v63  ;;  %3493 = vmatpush.bf16.msra.mxu1 %v6199_v18  ;;  %v6236_v18 = vld [vmem:[#allocation8 + $0x170] sm:$0xff] }
 0x23d   : > { %v2575_v27 = vpop.f32.mrf.mxu2  ;;  %3494 = vmatpush.bf16.msra.mxu1 %v6198_v24 }
 0x23e   : > { %v2718_v28 = vpop.f32.mrf.mxu3  ;;  %v2583_v49 = vadd.f32 %v2575_v27, %v2459_v61 }
 0x23f   : > { %v2807_v62 = vpop.f32.mrf.mxu0 }
 0x240   : > { %v7435_v58 = vadd.f32 %v2718_v28, %v2583_v49  ;;  %v2821_v25 = vadd.f32 %v2807_v62, %v7427_v6  ;;  %v6211_v6 = vld [vmem:[#allocation8 + $0xa8] sm:$0xff]  ;;  %v6209_v49 = vld [vmem:[#allocation8 + $0x98] sm:$0xff]  ;;  %v3341_v62 = vpop.permute.xlu2 %3340 }
 0x241   : > { %v2930_v46 = vpop.f32.mrf.mxu1  ;;  %3705 = vmatpush.bf16.msrb.mxu3 %v6211_v6  ;;  %3945 = vmatpush.bf16.msrb.mxu1 %v6229_v8 }
 0x242   : > { %v2944_v51 = vadd.f32 %v2930_v46, %v2821_v25  ;;  %v6192_v46 = vld [vmem:[#allocation8 + $0x10] sm:$0xff] }
 0x243   : > { %3592 = vmatpush.bf16.msrb.mxu2 %v6192_v46  ;;  %v6245_v46 = vld [vmem:[#allocation8 + $0x1b0] sm:$0xff] }
 0x245   : > { %v2577_v14 = vpop.f32.mrf.mxu2  ;;  %3706 = vmatpush.bf16.msrb.mxu3 %v6210_v9  ;;  %3946 = vmatpush.bf16.msrb.mxu1 %v6228_v20  ;;  %v6234_v20 = vld [vmem:[#allocation8 + $0x160] sm:$0xff] }
 0x246   : > { %v2720_v60 = vpop.f32.mrf.mxu3  ;;  %v6216_v14 = vld [vmem:[#allocation8 + $0xd0] sm:$0xff] }
 0x247   : > { %v2809_v13 = vpop.f32.mrf.mxu0  ;;  %3851 = vmatpush.bf16.msrb.mxu0 %v6216_v14  ;;  %v6235_v14 = vld [vmem:[#allocation8 + $0x168] sm:$0xff] }
 0x248   : > { %v2822_v11 = vadd.f32 %v2809_v13, %v7429_v30  ;;  %v3356_v63 = vpop.permute.xlu2 %3355 }
 0x249   : > { %v2932_v7 = vpop.f32.mrf.mxu1  ;;  %3707 = vmatpush.bf16.msrb.mxu3 %v6209_v49  ;;  %v3760_v49 = vunpack.c.l.b16 %v3731_v39 }
 0x24a   : > { %v2945_v12 = vadd.f32 %v2932_v7, %v2822_v11 }
 0x24b   : > { %3852 = vmatpush.bf16.msrb.mxu0 %v6215_v41 }
 0x24d   : > { %v3074_v37 = vpop.f32.mrf.mxu2 }
 0x24e   : > { %v3180_v55 = vpop.f32.mrf.mxu3  ;;  %v3088_v4 = vadd.f32 %v3074_v37, %v2944_v51 }
 0x24f   : > { %v2812_v33 = vpop.f32.mrf.mxu0  ;;  %3853 = vmatpush.bf16.msrb.mxu0 %v6214_v19 }
 0x250   : > { %v3194_v56 = vadd.f32 %v3180_v55, %v3088_v4  ;;  %v2823_v30 = vadd.f32 %v2812_v33, %v7431_v50  ;;  %v6208_v33 = vld [vmem:[#allocation8 + $0x90] sm:$0xff]  ;;  %v6227_v4 = vld [vmem:[#allocation8 + $0x128] sm:$0xff] }
 0x251   : > { %v7437_v42 = vpop.f32.mrf.mxu1  ;;  %3708 = vmatpush.bf16.msrb.mxu3 %v6208_v33  ;;  %3947 = vmatpush.bf16.msrb.mxu1 %v6227_v4 }
 0x252   : > { %v2946_v15 = vadd.f32 %v7437_v42, %v2823_v30  ;;  %v6207_v42 = vld [vmem:[#allocation8 + $0x88] sm:$0xff]  ;;  %v6254_v30 = vld [vmem:[#allocation8 + $0x1f8] sm:$0xff] }
 0x253   : > { %4316 = vmatpush.bf16.msra.mxu0 %v6254_v30  ;;  %v6232_v30 = vld [vmem:[#allocation8 + $0x150] sm:$0xff] }
 0x255   : > { %v3076_v0 = vpop.f32.mrf.mxu2  ;;  %3709 = vmatpush.bf16.msrb.mxu3 %v6207_v42 }
 0x256   : > { %v7439_v44 = vpop.f32.mrf.mxu3  ;;  %v3089_v22 = vadd.f32 %v3076_v0, %v2945_v12  ;;  %v6191_v0 = vld [vmem:[#allocation8 + $0x8] sm:$0xff] }
 0x257   : > { %v7441_v16 = vpop.f32.mrf.mxu0  ;;  %3593 = vmatpush.bf16.msrb.mxu2 %v6191_v0 }
 0x258   : > { %v3195_v7 = vadd.f32 %v7439_v44, %v3089_v22  ;;  %v2824_v17 = vadd.f32 %v7441_v16, %v7433_v57  ;;  %v6190_v44 = vld [vmem:[#allocation8] sm:$0xff] }
 0x259   : > { %v7443_v5 = vpop.f32.mrf.mxu1  ;;  %v6206_v57 = vld [vmem:[#allocation8 + $0x80] sm:$0xff] }
 0x25a   : > { %v2947_v25 = vadd.f32 %v7443_v5, %v2824_v17  ;;  %3710 = vmatpush.bf16.msrb.mxu3 %v6206_v57  ;;  %v6252_v57 = vld [vmem:[#allocation8 + $0x1e8] sm:$0xff] }
 0x25b   : > { %3594 = vmatpush.bf16.msrb.mxu2 %v6190_v44 }
 0x25d   : > { %v7445_v40 = vpop.f32.mrf.mxu2 }
 0x25e   : > { %v7447_v53 = vpop.f32.mrf.mxu3  ;;  %v3090_v50 = vadd.f32 %v7445_v40, %v2946_v15 }
 0x25f   : > { %v7449_v31 = vpop.f32.mrf.mxu0 }
 0x260   : > { %v3196_v48 = vadd.f32 %v7447_v53, %v3090_v50  ;;  %v2825_v53 = vadd.f32 %v7449_v31, %v7435_v58  ;;  %v6224_v50 = vld [vmem:[#allocation8 + $0x110] sm:$0xff] }
 0x261   : > { %v7451_v52 = vpop.f32.mrf.mxu1 }
 0x262   : > { %v2948_v26 = vadd.f32 %v7451_v52, %v2825_v53  ;;  %v6246_v52 = vld [vmem:[#allocation8 + $0x1b8] sm:$0xff] }
 0x263   : > { %4211 = vmatpush.bf16.msra.mxu3 %v6246_v52  ;;  %v6223_v52 = vld [vmem:[#allocation8 + $0x108] sm:$0xff] }
 0x265   : > { %v7454_v23 = vpop.f32.mrf.mxu2 }
 0x266   : > { %v7456_v32 = vpop.f32.mrf.mxu3  ;;  %v3091_v16 = vadd.f32 %v7454_v23, %v2947_v25  ;;  %v6308_v23 = vld [vmem:[#allocation3] sm:$0xe] }
 0x267   : > { %v2819_v36 = vpop.f32.mrf.mxu0  ;;  %4212 = vmatpush.bf16.msra.mxu3 %v6245_v46 }
 0x268   : > { %v3197_v5 = vadd.f32 %v7456_v32, %v3091_v16  ;;  %v3361_v16 = vpop.permute.xlu0 %3360 }
 0x269   : > { %v2942_v10 = vpop.f32.mrf.mxu1 }
 0x26d   : > { %v7458_v29 = vpop.f32.mrf.mxu2 }
 0x26e   : > { %v7460_v3 = vpop.f32.mrf.mxu3  ;;  %v3092_v31 = vadd.f32 %v7458_v29, %v2948_v26 }
 0x26f   : > { %v3301_v45 = vpop.f32.mrf.mxu0 }
 0x270   : > { %v3315_v21 = vadd.f32 %v3301_v45, %v3194_v56  ;;  %v6226_v45 = vld [vmem:[#allocation8 + $0x120] sm:$0xff]  ;;  %v3198_v22 = vadd.f32 %v7460_v3, %v3092_v31 }
 0x271   : > { %3948 = vmatpush.bf16.msrb.mxu1 %v6226_v45 }
 0x272   : > { %v3323_v61 = vadd.f32 %v7466_v54, %v3315_v21  ;;  %v6237_v21 = vld [vmem:[#allocation8 + $0x178] sm:$0xff] }
 0x273   : > { %4068 = vmatpush.bf16.msra.mxu2 %v6237_v21  ;;  %v6233_v21 = vld [vmem:[#allocation8 + $0x158] sm:$0xff] }
 0x274   : > { %v3328_v1 = vmax.f32 %v3323_v61, 0.0 }
 0x275   : > { %v3086_v27 = vpop.f32.mrf.mxu2 }
 0x276   : > { %v3192_v28 = vpop.f32.mrf.mxu3  ;;  %v3363_v60 = vmul.f32 %v3341_v62, %v3328_v1 }
 0x277   : > { %v3303_v13 = vpop.f32.mrf.mxu0  ;;  %v6225_v28 = vld [vmem:[#allocation8 + $0x118] sm:$0xff]  ;;  %4069 = vmatpush.bf16.msra.mxu2 %v6236_v18 }
 0x278   : > { %v3368_v37 = vpack.c.bf16 %v3363_v60, %v3363_v60  ;;  %v3316_v55 = vadd.f32 %v3303_v13, %v3195_v7  ;;  %3949 = vmatpush.bf16.msrb.mxu1 %v6225_v28  ;;  %v6242_v18 = vld [vmem:[#allocation8 + $0x198] sm:$0xff]  ;;  %v6241_v28 = vld [vmem:[#allocation8 + $0x190] sm:$0xff] }
 0x27a   : > { %3373 = vst [vmem:[#allocation3 + $0x4] sm:$0xf] %v3368_v37  ;;  %v3324_v40 = vadd.f32 %v7466_v54, %v3316_v55  ;;  %v6253_v37 = vld [vmem:[#allocation8 + $0x1f0] sm:$0xff] }
 0x27b   : > { %4070 = vmatpush.bf16.msra.mxu2 %v6235_v14  ;;  %4317 = vmatpush.bf16.msra.mxu0 %v6253_v37 }
 0x27c   : > { %v3329_v51 = vmax.f32 %v3324_v40, 0.0  ;;  %v6244_v40 = vld [vmem:[#allocation8 + $0x1a8] sm:$0xff]  ;;  %3950 = vmatpush.bf16.msrb.mxu1 %v6224_v50 }
 0x27d   : > { %4213 = vmatpush.bf16.msra.mxu3 %v6244_v40  ;;  %v6240_v50 = vld [vmem:[#allocation8 + $0x188] sm:$0xff] }
 0x27e   : > { %v3364_v38 = vmul.f32 %v3346_v35, %v3329_v51 }
 0x27f   : > { %v3306_v59 = vpop.f32.mrf.mxu0  ;;  %4071 = vmatpush.bf16.msra.mxu2 %v6234_v20  ;;  %4318 = vmatpush.bf16.msra.mxu0 %v6252_v57 }
 0x280   : > { %v3317_v36 = vadd.f32 %v3306_v59, %v3196_v48  ;;  %3951 = vmatpush.bf16.msrb.mxu1 %v6223_v52 }
 0x281   : > { %v6307_v47 = vld [vmem:[#allocation3] sm:$0xf0] }
 0x282   : > { %v3325_v10 = vadd.f32 %v7466_v54, %v3317_v36  ;;  %v6282_v58 = vld [vmem:[#allocation3] sm:$0xff]   ;;  %v6309_v12 = vor.u32 %v6308_v23, %v6307_v47  ;;  %v6243_v23 = vld [vmem:[#allocation8 + $0x1a0] sm:$0xff] }
 0x283   : > { %v3516_v9 = vshll.u32 %v6282_v58, 16  ;;  %v3514_v33 = vshrl.u32 %v6282_v58, 16  ;;  %v6251_v58 = vld [vmem:[#allocation8 + $0x1e0] sm:$0xff]  ;;  %4214 = vmatpush.bf16.msra.mxu3 %v6243_v23  ;;  %4072 = vmatpush.bf16.msra.mxu2 %v6233_v21  ;;  %v4096_v23 = vld [vmem:[#allocation3 + $0x4] sm:$0xc] }
 0x284   : > { %v3330_v2 = vmax.f32 %v3325_v10, 0.0  ;;  %v3632_v27 = vshrl.u32 %v6309_v12, 16  ;;  %v3635_v62 = vshll.u32 %v6309_v12, 16  ;;  %v3431_v55 = vrot.slane %v6309_v12, 1  ;;  %4319 = vmatpush.bf16.msra.mxu0 %v6251_v58 }
 0x285   : > { %v3518_v15 = vrot.slane %v3516_v9, 1  ;;  %v4125_v21 = vunpack.c.l.b16 %v4096_v23 }
 0x286   : > { %v3365_v6 = vmul.f32 %v3351_v43, %v3330_v2  ;;  %v3634_v42 = vrot.slane %v3632_v27, 1  ;;  %v3637_v48 = vrot.slane %v3635_v62, 2  ;;  %v6249_v62 = vld [vmem:[#allocation8 + $0x1d0] sm:$0xff] }
 0x287   : > { %v3308_v34 = vpop.f32.mrf.mxu0  ;;  %v3519_v25 = vor.u32 %v3518_v15, %v3514_v33  ;;  %4215 = vmatpush.bf16.msra.mxu3 %v6242_v18  ;;  %4073 = vmatpush.bf16.msra.mxu2 %v6232_v30 }
 0x288   : > { %v7484_v11 = vpack.c.bf16 %v3365_v6, %v3364_v38  ;;  %v3318_v56 = vadd.f32 %v3308_v34, %v3197_v5  ;;  %v3638_v34 = vor.u32 %v3637_v48, %v3634_v42 }
 0x28a   : > { %6300 = vst [vmem:[#allocation3 + $0x8] sm:$0xff] %v7484_v11   ;;  %v3326_v32 = vadd.f32 %v7466_v54, %v3318_v56  ;;  %v3778_v7 = vshrl.u32 %v7484_v11, 16  ;;  %v3781_v17 = vshll.u32 %v7484_v11, 16 }
 0x28b   : > { %4216 = vmatpush.bf16.msra.mxu3 %v6241_v28 }
 0x28c   : > { %v3331_v61 = vmax.f32 %v3326_v32, 0.0  ;;  %v3780_v36 = vrot.slane %v3778_v7, 3  ;;  %v3783_v5 = vrot.slane %v3781_v17, 4 }
 0x28e   : > { %v3366_v1 = vmul.f32 %v3356_v63, %v3331_v61  ;;  %v7516_v61 = vor.u32 %v3783_v5, %v3780_v36  ;;  %v6239_v36 = vld [vmem:[#allocation8 + $0x180] sm:$0xff] }
 0x28f   : > { %v3311_v29 = vpop.f32.mrf.mxu0  ;;  %4217 = vmatpush.bf16.msra.mxu3 %v6240_v50 }
 0x290   : > { %v3371_v60 = vpack.c.bf16 %v3366_v1, %v3366_v1  ;;  %v3319_v13 = vadd.f32 %v3311_v29, %v3198_v22  ;;  %v6250_v22 = vld [vmem:[#allocation8 + $0x1d8] sm:$0xff]  ;;  %v6222_v29 = vld [vmem:[#allocation8 + $0x100] sm:$0xff] }
 0x291   : > { %v7491_v3 = vld [vmem:[#allocation3 + $0x8] sm:$0xff]  ;;  %4320 = vmatpush.bf16.msra.mxu0 %v6250_v22  ;;  %3952 = vmatpush.bf16.msrb.mxu1 %v6222_v29  ;;  %v4101_v29 = vld [vmem:[#allocation3 + $0x18] sm:$0x1] }
 0x292   : > { %v7493_v24 = vld [vmem:[#allocation3 + $0x4] sm:$0xff]   ;;  %3376 = vst [vmem:[#allocation3 + $0x10] sm:$0xf] %v3371_v60  ;;  %v3327_v0 = vadd.f32 %v7466_v54, %v3319_v13  ;;  %v3432_v8 = vrot.slane %v7491_v3, 1  ;;  %v3521_v44 = vshll.u32 %v7491_v3, 16  ;;  %v3525_v19 = vshrl.u32 %v7491_v3, 16 }
 0x293   : > { %v3761_v41 = vunpack.c.l.b16 %v7493_v24  ;;  %4218 = vmatpush.bf16.msra.mxu3 %v6239_v36 }
 0x294   : > { %v3332_v59 = vmax.f32 %v3327_v0, 0.0  ;;  %v3433_v51 = vsel %vm547_vm0, %v3431_v55, %v3432_v8  ;;  %v7506_v10 = vrot.slane %v3521_v44, 1  ;;  %v3639_v4 = vrot.slane %v3525_v19, 1  ;;  %v6248_v0 = vld [vmem:[#allocation8 + $0x1c8] sm:$0xff] }
 0x295   : > { %v3766_v54 = vpack.c.b16 %v3761_v41, %v3760_v49  ;;  %v3640_v53 = vrot.slane %v3521_v44, 2  ;;  %3495 = vmatmul.bf16.vlgmr.msra.gmra.mxu1 %v3433_v51  ;;  %v6231_v49 = vld [vmem:[#allocation8 + $0x148] sm:$0xff]  ;;  %4321 = vmatpush.bf16.msra.mxu0 %v6249_v62  ;;  %v6230_v44 = vld [vmem:[#allocation8 + $0x140] sm:$0xff] }
 0x296   : > { %v3367_v2 = vmul.f32 %v3361_v16, %v3332_v59  ;;  %v3524_v6 = vsel %vm874_vm1, %v3519_v25, %v7506_v10  ;;  %4074 = vmatpush.bf16.msra.mxu2 %v6231_v49  ;;  %v3527_v42 = vor.u32 %v3525_v19, %v7506_v10  ;;  %v6262_v25 = vld [vmem:[#allocation8 + $0x238] sm:$0xff] }
 0x297   : > { %v3770_v35 = vshrl.u32 %v3766_v54, 16  ;;  %v3773_v43 = vshll.u32 %v3766_v54, 16  ;;  %v3313_v38 = vpop.f32.mrf.mxu0  ;;  %v7512_v47 = vor.u32 %v3640_v53, %v3639_v4  ;;  %3595 = vmatmul.bf16.vlgmr.msrb.gmra.mxu2 %v3524_v6  ;;  %v6247_v4 = vld [vmem:[#allocation8 + $0x1c0] sm:$0xff]  ;;  %4437 = vmatpush.bf16.msra.mxu1 %v6262_v25 }
 0x298   : > { %v3372_v26 = vpack.c.bf16 %v3367_v2, %v3367_v2  ;;  %v6261_v2 = vld [vmem:[#allocation8 + $0x230] sm:$0xff]  ;;  %v6287_v38 = vunpack.c.l.b16 %v7484_v11  ;;  %v6259_v6 = vld [vmem:[#allocation8 + $0x220] sm:$0xff] }
 0x299   : > { %v3772_v56 = vrot.slane %v3770_v35, 3  ;;  %v3775_v45 = vrot.slane %v3773_v43, 4  ;;  %v3642_v31 = vsel %vm2483_vm3, %v3638_v34, %v7512_v47  ;;  %v3383_v32 = vld [vmem:[#allocation3 + $0x10] sm:$0x7]  ;;  %4322 = vmatpush.bf16.msra.mxu0 %v6248_v0  ;;  %v6260_v35 = vld [vmem:[#allocation8 + $0x228] sm:$0xff]  ;;  %v6288_v34 = vunpack.c.h.b16 %v7484_v11 }
 0x29a   : > { %3377 = vst [vmem:[#allocation3 + $0x14] sm:$0x3] %v3372_v26  ;;  %3711 = vmatmul.bf16.vlgmr.msrb.gmra.mxu3 %v3642_v31  ;;  %v3427_v9 = vunpack.c.l.b16 %v3383_v32  ;;  %v7523_v27 = vld [vmem:[#allocation3 + $0x10] sm:$0xf]  ;;  %4075 = vmatpush.bf16.msra.mxu2 %v6230_v44  ;;  %v4126_v26 = vunpack.c.h.b16 %v7493_v24 }
 0x29b   : > { %v3776_v12 = vor.u32 %v3775_v45, %v3772_v56  ;;  %v3764_v15 = vunpack.c.l.b16 %v7523_v27  ;;  %4438 = vmatpush.bf16.msra.mxu1 %v6261_v2  ;;  %v7550_v45 = vld [vmem:[#allocation3 + $0xc] sm:$0xff] }
 0x29c   : > { %v7520_v63 = vpack.c.b16 %v3427_v9, %v3427_v9  ;;  %v6258_v31 = vld [vmem:[#allocation8 + $0x218] sm:$0xff]  ;;  %v4131_v32 = vpack.c.b16 %v4126_v26, %v4125_v21  ;;  %v4143_v11 = vshrl.u32 %v7550_v45, 16 }
 0x29d   : > { %v3785_v39 = vsel %vm1388_vm2, %v3776_v12, %v7516_v61  ;;  %4323 = vmatpush.bf16.msra.mxu0 %v6247_v4  ;;  %v3892_v56 = vpack.c.b16 %v3764_v15, %v6288_v34  ;;  %v4344_v34 = vld [vmem:[#allocation3 + $0x18] sm:$0x3] }
 0x29e   : > { %3854 = vmatmul.bf16.vlgmr.msrb.gmra.mxu0 %v3785_v39  ;;  %v3529_v1 = vshll.u32 %v7520_v63, 16  ;;  %v3434_v46 = vrot.slane %v7520_v63, 1  ;;  %v3533_v43 = vshrl.u32 %v7520_v63, 16  ;;  %v4239_v39 = vld [vmem:[#allocation3 + $0x4] sm:$0x8]  ;;  %v4135_v24 = vshrl.u32 %v4131_v32, 16 }
 0x29f   : > { %4439 = vmatpush.bf16.msra.mxu1 %v6260_v35  ;;  %v4002_v12 = vshll.u32 %v3892_v56, 16  ;;  %v4138_v63 = vshll.u32 %v4131_v32, 16  ;;  %v4145_v30 = vrot.slane %v4143_v11, 2  ;;  %v4006_v36 = vshrl.u32 %v3892_v56, 16 }
 0x2a0   : > { %v3531_v37 = vrot.slane %v3529_v1, 1  ;;  %v3435_v17 = vsel %vm547_vm0, %v3432_v8, %v3434_v46  ;;  %v4258_v1 = vunpack.c.l.b16 %v4239_v39  ;;  %v4137_v49 = vrot.slane %v4135_v24, 2 }
 0x2a1   : > { %v7526_v14 = vld [vmem:[#allocation3 + $0x10] sm:$0xff]   ;;  %v4004_v18 = vrot.slane %v4002_v12, 1  ;;  %v4140_v62 = vrot.slane %v4138_v63, 3 }
 0x2a2   : > { %v3736_v60 = vld [vmem:[#allocation3 + $0x14] sm:$0x3]  ;;  %v3629_v13 = vunpack.c.l.b16 %v7526_v14  ;;  %v3532_v54 = vsel %vm874_vm1, %v3527_v42, %v3531_v37  ;;  %v3535_v5 = vor.u32 %v3533_v43, %v3531_v37  ;;  %v4261_v37 = vrot.slane %v7550_v45, 3 }
 0x2a3   : > { %v7530_v7 = vunpack.c.l.b16 %v3736_v60  ;;  %4440 = vmatpush.bf16.msra.mxu1 %v6259_v6  ;;  %v3973_v27 = vld [vmem:[#allocation3 + $0x14] sm:$0x7]  ;;  %v4129_v50 = vunpack.c.h.b16 %v7526_v14 }
 0x2a4   : > { %v3630_v55 = vpack.c.b16 %v3629_v13, %v3629_v13  ;;  %v3992_v13 = vunpack.c.l.b16 %v3973_v27 }
 0x2a5   : > { %v3768_v33 = vpack.c.b16 %v7530_v7, %v3764_v15  ;;  %3500 = vmatmul.bf16.gmra.mxu1 %v3435_v17 }
 0x2a6   : > { %v3644_v48 = vshrl.u32 %v3630_v55, 16  ;;  %v3647_v40 = vshll.u32 %v3630_v55, 16  ;;  %v4130_v55 = vunpack.c.l.b16 %v4101_v29  ;;  %v3993_v17 = vpack.c.b16 %v3992_v13, %v3992_v13 }
 0x2a7   : > { %v3787_v20 = vshrl.u32 %v3768_v33, 16  ;;  %v3790_v59 = vshll.u32 %v3768_v33, 16  ;;  %3600 = vmatmul.bf16.gmra.mxu2 %v3532_v54  ;;  %4441 = vmatpush.bf16.msra.mxu1 %v6258_v31  ;;  %v4141_v33 = vor.u32 %v4140_v62, %v4137_v49 }
 0x2a8   : > { %v3646_v57 = vrot.slane %v3644_v48, 1  ;;  %v3649_v16 = vrot.slane %v3647_v40, 2  ;;  %v4133_v48 = vpack.c.b16 %v4130_v55, %v4129_v50  ;;  %v6256_v40 = vld [vmem:[#allocation8 + $0x208] sm:$0xff]  ;;  %v4014_v2 = vshrl.u32 %v3993_v17, 16 }
 0x2a9   : > { %v3789_v51 = vrot.slane %v3787_v20, 3  ;;  %v3792_v8 = vrot.slane %v3790_v59, 4  ;;  %v4010_v20 = vshll.u32 %v3993_v17, 16  ;;  %v6255_v59 = vld [vmem:[#allocation8 + $0x200] sm:$0xff] }
 0x2aa   : > { %v3650_v3 = vor.u32 %v3649_v16, %v3646_v57  ;;  %v4152_v25 = vshrl.u32 %v4133_v48, 16  ;;  %v4155_v54 = vshll.u32 %v4133_v48, 16 }
 0x2ab   : > { %v3793_v19 = vor.u32 %v3792_v8, %v3789_v51  ;;  %v4012_v57 = vrot.slane %v4010_v20, 1  ;;  %v4008_v51 = vor.u32 %v4006_v36, %v4004_v18 }
 0x2ac   : > { %v3651_v10 = vsel %vm2483_vm3, %v7512_v47, %v3650_v3  ;;  %v3891_v47 = vpack.c.b16 %v6287_v38, %v3761_v41  ;;  %v4146_v41 = vshll.u32 %v7550_v45, 16  ;;  %v4154_v14 = vrot.slane %v4152_v25, 2 }
 0x2ad   : > { %v3794_v53 = vsel %vm1388_vm2, %v7516_v61, %v3793_v19  ;;  %3716 = vmatmul.bf16.gmra.mxu3 %v3651_v10  ;;  %v6257_v61 = vld [vmem:[#allocation8 + $0x210] sm:$0xff]  ;;  %v4157_v16 = vrot.slane %v4155_v54, 3  ;;  %v4013_v8 = vsel %vm874_vm1, %v4008_v51, %v4012_v57  ;;  %v4016_v35 = vor.u32 %v4014_v2, %v4012_v57 }
 0x2ae   : > { %3859 = vmatmul.bf16.gmra.mxu0 %v3794_v53  ;;  %v3997_v58 = vshll.u32 %v3891_v47, 16  ;;  %v3995_v52 = vshrl.u32 %v3891_v47, 16  ;;  %4442 = vmatpush.bf16.msra.mxu1 %v6257_v61  ;;  %v4148_v22 = vrot.slane %v4146_v41, 3  ;;  %v3893_v53 = vpack.c.b16 %v7530_v7, %v7530_v7 }
 0x2af   : > { %v4158_v4 = vor.u32 %v4157_v16, %v4154_v14  ;;  %v4373_v38 = vrot.slane %v4143_v11, 3  ;;  %v4374_v6 = vrot.slane %v4146_v41, 4 }
 0x2b0   : > { %v3999_v9 = vrot.slane %v3997_v58, 1  ;;  %v4149_v15 = vor.u32 %v4148_v22, %v4145_v30 }
 0x2b2   : > { %v4000_v28 = vor.u32 %v3999_v9, %v3995_v52  ;;  %v4150_v42 = vsel %vm2987_vm4, %v4141_v33, %v4149_v15  ;;  %4443 = vmatpush.bf16.msra.mxu1 %v6256_v40 }
 0x2b4   : > { %v4005_v60 = vsel %vm874_vm1, %v4000_v28, %v4004_v18 }
 0x2b5   : > { %3505 = vmatmul.bf16.gmra.mxu1 %v3434_v46  ;;  %v4259_v46 = vpack.c.b16 %v4126_v26, %v4258_v1  ;;  %v4375_v26 = vor.u32 %v4374_v6, %v4373_v38 }
 0x2b6   : > { %4444 = vmatpush.bf16.msra.mxu1 %v6255_v59 }
 0x2b7   : > { %3605 = vmatmul.bf16.gmra.mxu2 %v3535_v5  ;;  %v4260_v0 = vrot.slane %v4259_v46, 3  ;;  %v4366_v43 = vshrl.u32 %v4259_v46, 16  ;;  %v4369_v5 = vshll.u32 %v4259_v46, 16 }
 0x2b9   : > { %v4262_v44 = vsel %vm3114_vm5, %v4260_v0, %v4261_v37  ;;  %v4371_v23 = vrot.slane %v4369_v5, 4 }
 0x2bd   : > { %3721 = vmatmul.bf16.gmra.mxu3 %v3650_v3  ;;  %v4263_v3 = vrot.slane %v4133_v48, 3 }
 0x2be   : > { %3864 = vmatmul.bf16.gmra.mxu0 %v3793_v19  ;;  %v4159_v19 = vsel %vm2987_vm4, %v4149_v15, %v4158_v4 }
 0x2bf   : > { %v4264_v10 = vsel %vm3114_vm5, %v4261_v37, %v4263_v3 }
 0x2c5   : > { %3953 = vmatmul.bf16.vlgmr.msrb.gmra.mxu1 %v3891_v47  ;;  %v4368_v47 = vrot.slane %v4366_v43, 3 }
 0x2c7   : > { %4076 = vmatmul.bf16.vlgmr.msra.gmra.mxu2 %v4005_v60  ;;  %v4372_v7 = vor.u32 %v4371_v23, %v4368_v47 }
 0x2c9   : > { %v4376_v21 = vsel %vm1388_vm2, %v4372_v7, %v4375_v26 }
 0x2cd   : > { %4219 = vmatmul.bf16.vlgmr.msra.gmra.mxu3 %v4150_v42 }
 0x2ce   : > { %4324 = vmatmul.bf16.vlgmr.msra.gmra.mxu0 %v4262_v44 }
 0x2d5   : > { %3958 = vmatmul.bf16.gmra.mxu1 %v3892_v56  ;;  %v4363_v56 = vunpack.c.l.b16 %v4344_v34 }
 0x2d7   : > { %4081 = vmatmul.bf16.gmra.mxu2 %v4013_v8  ;;  %v4364_v58 = vpack.c.b16 %v4363_v56, %v4129_v50 }
 0x2d9   : > { %v4378_v31 = vshrl.u32 %v4364_v58, 16  ;;  %v4381_v32 = vshll.u32 %v4364_v58, 16 }
 0x2db   : > { %v4380_v12 = vrot.slane %v4378_v31, 3  ;;  %v4383_v61 = vrot.slane %v4381_v32, 4 }
 0x2dd   : > { %4224 = vmatmul.bf16.gmra.mxu3 %v4159_v19  ;;  %v4384_v9 = vor.u32 %v4383_v61, %v4380_v12 }
 0x2de   : > { %4329 = vmatmul.bf16.gmra.mxu0 %v4264_v10 }
 0x2df   : > { %v4385_v11 = vsel %vm1388_vm2, %v4375_v26, %v4384_v9 }
 0x2e5   : > { %3963 = vmatmul.bf16.gmra.mxu1 %v3893_v53 }
 0x2e7   : > { %4086 = vmatmul.bf16.gmra.mxu2 %v4016_v35 }
 0x2ed   : > { %4229 = vmatmul.bf16.gmra.mxu3 %v4158_v4 }
 0x2ee   : > { %4334 = vmatmul.bf16.gmra.mxu0 %v4263_v3 }
 0x2f5   : > { %4445 = vmatmul.bf16.vlgmr.msra.gmra.mxu1 %v4376_v21 }
 0x305   : > { %4450 = vmatmul.bf16.gmra.mxu1 %v4385_v11 }
 0x312   : > { %v3496_v45 = vpop.f32.mrf.mxu1 }
 0x315   : > { %4455 = vmatmul.bf16.gmra.mxu1 %v4384_v9 }
 0x31a   : > { %v3498_v39 = vpop.f32.mrf.mxu1  ;;  %v3596_v24 = vpop.f32.mrf.mxu2 }
 0x31b   : > { %v3855_v41 = vpop.f32.mrf.mxu0  ;;  %v3597_v63 = vadd.f32 %v3596_v24, %v3496_v45 }
 0x31d   : > { %v3712_v52 = vpop.f32.mrf.mxu3 }
 0x31e   : > { %v3726_v18 = vadd.f32 %v3712_v52, %v3597_v63  ;;  %v4473_v63 = vld [vmem:[#allocation2 + $0x4] sm:$0xf] }
 0x320   : > { %v3869_v30 = vadd.f32 %v3855_v41, %v3726_v18  ;;  %v7577_v41 = vld [vmem:[%s7602_s7] ss:$0 sm:$0xff] }
 0x322   : > { %v3501_v1 = vpop.f32.mrf.mxu1  ;;  %v3598_v27 = vpop.f32.mrf.mxu2 }
 0x323   : > { %v3857_v22 = vpop.f32.mrf.mxu0  ;;  %v3599_v28 = vadd.f32 %v3598_v27, %v3498_v39 }
 0x325   : > { %v3714_v29 = vpop.f32.mrf.mxu3 }
 0x326   : > { %v3727_v49 = vadd.f32 %v3714_v29, %v3599_v28 }
 0x328   : > { %v3870_v62 = vadd.f32 %v3857_v22, %v3727_v49 }
 0x32a   : > { %v3503_v60 = vpop.f32.mrf.mxu1  ;;  %v3601_v13 = vpop.f32.mrf.mxu2 }
 0x32b   : > { %v3860_v46 = vpop.f32.mrf.mxu0  ;;  %v3602_v15 = vadd.f32 %v3601_v13, %v3501_v1  ;;  %v4478_v1 = vunpack.c.l.bf16 %v4473_v63 }
 0x330   : > { %v3717_v37 = vpop.f32.mrf.mxu3 }
 0x331   : > { %v3728_v50 = vadd.f32 %v3717_v37, %v3602_v15 }
 0x332   : > { %v3506_v33 = vpop.f32.mrf.mxu1  ;;  %v3603_v0 = vpop.f32.mrf.mxu2 }
 0x333   : > { %v3862_v55 = vpop.f32.mrf.mxu0  ;;  %v3871_v17 = vadd.f32 %v3860_v46, %v3728_v50  ;;  %v3604_v42 = vadd.f32 %v3603_v0, %v3503_v60 }
 0x338   : > { %v3719_v44 = vpop.f32.mrf.mxu3 }
 0x339   : > { %v3729_v48 = vadd.f32 %v3719_v44, %v3604_v42 }
 0x33a   : > { %v3508_v20 = vpop.f32.mrf.mxu1  ;;  %v3606_v59 = vpop.f32.mrf.mxu2 }
 0x33b   : > { %v3865_v40 = vpop.f32.mrf.mxu0  ;;  %v3872_v25 = vadd.f32 %v3862_v55, %v3729_v48  ;;  %v3607_v54 = vadd.f32 %v3606_v59, %v3506_v33  ;;  %v6302_v33 = vld [vmem:[#allocation2 + $0x8] sm:$0xff]  }
 0x340   : > { %v3722_v36 = vpop.f32.mrf.mxu3 }
 0x341   : > { %v3730_v57 = vadd.f32 %v3722_v36, %v3607_v54  ;;  %v6292_v36 = vunpack.c.h.bf16 %v6302_v33 }
 0x342   : > { %v3608_v16 = vpop.f32.mrf.mxu2  ;;  %v3954_v51 = vpop.f32.mrf.mxu1 }
 0x343   : > { %v3867_v14 = vpop.f32.mrf.mxu0  ;;  %v3873_v8 = vadd.f32 %v3865_v40, %v3730_v57  ;;  %v3968_v21 = vadd.f32 %v3954_v51, %v3869_v30  ;;  %v6291_v40 = vunpack.c.l.bf16 %v6302_v33 }
 0x348   : > { %v3724_v4 = vpop.f32.mrf.mxu3 }
 0x34a   : > { %v3956_v19 = vpop.f32.mrf.mxu1  ;;  %v4077_v10 = vpop.f32.mrf.mxu2 }
 0x34b   : > { %v4325_v3 = vpop.f32.mrf.mxu0  ;;  %v4091_v12 = vadd.f32 %v4077_v10, %v3968_v21  ;;  %v3969_v52 = vadd.f32 %v3956_v19, %v3870_v62  ;;  %v4476_v19 = vld [vmem:[#allocation2 + $0x10] sm:$0xf] }
 0x350   : > { %v4220_v53 = vpop.f32.mrf.mxu3 }
 0x351   : > { %v4234_v61 = vadd.f32 %v4220_v53, %v4091_v12 }
 0x352   : > { %v3959_v35 = vpop.f32.mrf.mxu1  ;;  %v4079_v43 = vpop.f32.mrf.mxu2 }
 0x353   : > { %v4327_v2 = vpop.f32.mrf.mxu0  ;;  %v4339_v45 = vadd.f32 %v4325_v3, %v4234_v61  ;;  %v4092_v22 = vadd.f32 %v4079_v43, %v3969_v52  ;;  %v3970_v49 = vadd.f32 %v3959_v35, %v3871_v17  ;;  %v4481_v43 = vunpack.c.l.bf16 %v4476_v19 }
 0x358   : > { %v4222_v5 = vpop.f32.mrf.mxu3 }
 0x359   : > { %v4235_v27 = vadd.f32 %v4222_v5, %v4092_v22 }
 0x35a   : > { %v3961_v6 = vpop.f32.mrf.mxu1  ;;  %v4082_v34 = vpop.f32.mrf.mxu2 }
 0x35b   : > { %v4330_v38 = vpop.f32.mrf.mxu0  ;;  %v4093_v13 = vadd.f32 %v4082_v34, %v3970_v49  ;;  %v4340_v37 = vadd.f32 %v4327_v2, %v4235_v27  ;;  %v3971_v0 = vadd.f32 %v3961_v6, %v3872_v25  ;;  %v4477_v34 = vld [vmem:[#allocation2 + $0x14] sm:$0x3] }
 0x360   : > { %v4225_v47 = vpop.f32.mrf.mxu3 }
 0x361   : > { %v4236_v50 = vadd.f32 %v4225_v47, %v4093_v13 }
 0x362   : > { %v3964_v26 = vpop.f32.mrf.mxu1  ;;  %v4084_v56 = vpop.f32.mrf.mxu2 }
 0x363   : > { %v4332_v23 = vpop.f32.mrf.mxu0  ;;  %v4341_v42 = vadd.f32 %v4330_v38, %v4236_v50  ;;  %v4094_v48 = vadd.f32 %v4084_v56, %v3971_v0  ;;  %v3972_v14 = vadd.f32 %v3964_v26, %v3873_v8 }
 0x368   : > { %v4227_v7 = vpop.f32.mrf.mxu3 }
 0x369   : > { %v4237_v59 = vadd.f32 %v4227_v7, %v4094_v48 }
 0x36a   : > { %v3966_v31 = vpop.f32.mrf.mxu1  ;;  %v4087_v32 = vpop.f32.mrf.mxu2 }
 0x36b   : > { %v4335_v58 = vpop.f32.mrf.mxu0  ;;  %v4342_v4 = vadd.f32 %v4332_v23, %v4237_v59  ;;  %v4095_v25 = vadd.f32 %v4087_v32, %v3972_v14  ;;  %v4482_v31 = vunpack.c.l.bf16 %v4477_v34 }
 0x370   : > { %v4230_v9 = vpop.f32.mrf.mxu3 }
 0x371   : > { %v4238_v2 = vadd.f32 %v4230_v9, %v4095_v25 }
 0x372   : > { %v4089_v39 = vpop.f32.mrf.mxu2  ;;  %v4446_v24 = vpop.f32.mrf.mxu1 }
 0x373   : > { %v4337_v11 = vpop.f32.mrf.mxu0  ;;  %v4460_v18 = vadd.f32 %v4446_v24, %v4339_v45  ;;  %v4343_v6 = vadd.f32 %v4335_v58, %v4238_v2 }
 0x375   : > { %v4468_v30 = vadd.f32 %v7577_v41, %v4460_v18 }
 0x377   : > { %v4483_v28 = vadd.f32 %v4478_v1, %v4468_v30 }
 0x378   : > { %v4232_v29 = vpop.f32.mrf.mxu3 }
 0x379   : > { %v4488_v46 = vmax.f32 %v4483_v28, 0.0 }
 0x37a   : > { %v4448_v60 = vpop.f32.mrf.mxu1 }
 0x37b   : > { %v4493_v15 = vpack.c.bf16 %v4488_v46, %v4488_v46  ;;  %v4461_v55 = vadd.f32 %v4448_v60, %v4340_v37 }
 0x37d   : > { %4498 = vst [vmem:[#allocation2 + $0x4] sm:$0xf] %v4493_v15  ;;  %v4469_v62 = vadd.f32 %v7577_v41, %v4461_v55 }
 0x37f   : > { %v4484_v54 = vadd.f32 %v6291_v40, %v4469_v62 }
 0x381   : > { %v4489_v16 = vmax.f32 %v4484_v54, 0.0 }
 0x382   : > { %v4451_v44 = vpop.f32.mrf.mxu1 }
 0x383   : > { %v4462_v20 = vadd.f32 %v4451_v44, %v4341_v42 }
 0x384   : > { %v4503_v47 = vld [vmem:[#allocation2 + $0x4] sm:$0x8] }
 0x385   : > { %v4470_v17 = vadd.f32 %v7577_v41, %v4462_v20  ;;  %v4509_v32 = vshrl.u32 %v4503_v47, 16 }
 0x387   : > { %v4485_v57 = vadd.f32 %v6292_v36, %v4470_v17  ;;  %v5979_v28 = vrot.slane %v4509_v32, 11 }
 0x389   : > { %v4490_v51 = vmax.f32 %v4485_v57, 0.0 }
 0x38a   : > { %v4453_v3 = vpop.f32.mrf.mxu1 }
 0x38b   : > { %v6296_v10 = vpack.c.bf16 %v4490_v51, %v4489_v16  ;;  %v4463_v53 = vadd.f32 %v4453_v3, %v4342_v4 }
 0x38d   : > { %6303 = vst [vmem:[#allocation2 + $0x8] sm:$0xff] %v6296_v10   ;;  %v4471_v35 = vadd.f32 %v7577_v41, %v4463_v53 }
 0x38f   : > { %v4486_v5 = vadd.f32 %v4481_v43, %v4471_v35 }
 0x391   : > { %v4491_v38 = vmax.f32 %v4486_v5, 0.0 }
 0x392   : > { %v4456_v8 = vpop.f32.mrf.mxu1 }
 0x393   : > { %v4496_v23 = vpack.c.bf16 %v4491_v38, %v4491_v38  ;;  %v4464_v26 = vadd.f32 %v4456_v8, %v4343_v6 }
 0x394   : > { %v4504_v56 = vld [vmem:[#allocation2 + $0x8] sm:$0x3]  ;;  %v4523_v7 = vld [vmem:[#allocation2 + $0x8] sm:$0xc]  ;;  %v4544_v21 = vld [vmem:[#allocation2 + $0xc] sm:$0xe] }
 0x395   : > { %v4514_v12 = vshrl.u32 %v4504_v56, 16  ;;  %v4529_v61 = vshrl.u32 %v4523_v7, 16  ;;  %v4532_v9 = vshll.u32 %v4523_v7, 16  ;;  %4501 = vst [vmem:[#allocation2 + $0x10] sm:$0xf] %v4496_v23  ;;  %v4517_v58 = vshll.u32 %v4504_v56, 16 }
 0x396   : > { %v4524_v11 = vld [vmem:[#allocation2 + $0xc] sm:$0x1]  ;;  %v4546_v45 = vshrl.u32 %v4544_v21, 16  ;;  %v4549_v39 = vshll.u32 %v4544_v21, 16  ;;  %v4472_v24 = vadd.f32 %v7577_v41, %v4464_v26 }
 0x397   : > { %v4516_v63 = vrot.slane %v4514_v12, 7  ;;  %v4531_v52 = vrot.slane %v4529_v61, 4  ;;  %v4534_v18 = vrot.slane %v4532_v9, 5  ;;  %v4538_v22 = vshll.u32 %v4524_v11, 16 }
 0x398   : > { %v4548_v30 = vrot.slane %v4546_v45, 5  ;;  %v4551_v1 = vrot.slane %v4549_v39, 6  ;;  %v4487_v27 = vadd.f32 %v4482_v31, %v4472_v24 }
 0x399   : > { %v4519_v29 = vor.u32 %v4517_v58, %v4516_v63  ;;  %v4535_v49 = vor.u32 %v4534_v18, %v4531_v52  ;;  %v4540_v37 = vrot.slane %v4538_v22, 5 }
 0x39a   : > { %v4552_v41 = vor.u32 %v4551_v1, %v4548_v30  ;;  %v4492_v46 = vmax.f32 %v4487_v27, 0.0  ;;  %v4458_v60 = vpop.f32.mrf.mxu1 }
 0x39b   : > { %v4520_v13 = vsel %vm4507_vm10, %v5979_v28, %v4519_v29  ;;  %v4536_v15 = vrot.slane %v4535_v49, 4 }
 0x39c   : > { %4522 = vst [vmem:[%s355_s9] sm:$0x3] %v4520_v13  ;;  %v4553_v50 = vrot.slane %v4552_v41, 4  ;;  %v4556_v55 = vld [vmem:[#allocation2 + $0x10] sm:$0x7]  ;;  %v4497_v33 = vpack.c.bf16 %v4492_v46, %v4492_v46 }
 0x39d   : > { %v4541_v0 = vsel %vm4527_vm11, %v4536_v15, %v4540_v37  ;;  %v4558_v62 = vshrl.u32 %v4556_v55, 16  ;;  %v4561_v42 = vshll.u32 %v4556_v55, 16 }
 0x39e   : > { %4543 = vst [vmem:[%s355_s9] sm:$0xc] %v4541_v0 }
 0x39f   : > { %4555 = vst [vmem:[%s355_s9 + $0x4] sm:$0x3] %v4553_v50  ;;  %v4560_v44 = vrot.slane %v4558_v62, 6  ;;  %v4563_v48 = vrot.slane %v4561_v42, 7 }
 0x3a0   : > { %4502 = vst [vmem:[#allocation2 + $0x14] sm:$0x3] %v4497_v33 }
 0x3a1   : > { %v4564_v40 = vor.u32 %v4563_v48, %v4560_v44 }
 0x3a3   : > { %4566 = vst [vmem:[%s355_s9 + $0x4] sm:$0xc] %v4564_v40 }
 0x3a4 PF: > { %s20_s27 = sadd.s32 1, %s6481_s27  }
 0x3a5   : > { %p17_p7 = scmp.ge.s32.totalorder %s20_s27, 4  }
 0x3a7   :  { %19 = sbr.rel (!%p17_p7) target bundleno = 2 (0x2), region = 114 }
 0x3ac   :  { %4588 = vsyncpa [#allocation5], 1 }
 0x3ad   :  { %4590 = vsyncpa [#allocation5 + $0x1], 1 }
 0x3ae   :  { %4591 = vsyncpa [#allocation7], 1 }

// kernel: down_sample_res_net_forward.5
= control target key start
LH: loop header
LB: loop body
LE: loop exit
PB: predicated region body
PF: predicated region fallthrough
CT: control target
= control target key end

     0   :  { %13 = vsyncpa [#allocation5], 0  ;;  %s6460_s0 = inlined_call_operand.vmem [shape: bf16[2,32,512], index: 0, kind: input, shape index: {}]   ;;  %s6461_s1 = inlined_call_operand.hbm [shape: f32[32,1], index: 1, kind: input, shape index: {}]   ;;  %s6462_s2 = inlined_call_operand.vmem [shape: bf16[4,512,128], index: 2, kind: input, shape index: {}]   ;;  %s6463_s3 = inlined_call_operand.hbm [shape: f32[1,128], index: 3, kind: input, shape index: {}]   ;;  %s6464_s4 = inlined_call_operand.hbm [shape: bf16[9,128,128], index: 4, kind: input, shape index: {}]   ;;  %s6465_s5 = inlined_call_operand.hbm [shape: f32[1,1,128], index: 5, kind: input, shape index: {}]   ;;  %s6466_s6 = inlined_call_operand.hbm [shape: bf16[9,128,128], index: 6, kind: input, shape index: {}]   ;;  %s6467_s7 = inlined_call_operand.hbm [shape: f32[1,1,128], index: 7, kind: input, shape index: {}]   ;;  %s6468_s8 = inlined_call_operand.vmem [shape: bf16[2,4,128], index: 8, kind: output, shape index: {}]  }
   0x1   :  { %14 = vsyncpa [#allocation7], 0 }
   0x2   :  { %15 = vsyncpa [#allocation10], 0 }
   0x3   :  { %16 = vsyncpa [#allocation13], 0  ;;  %s5808_s27 = smov 0  }
   0x4 LB: > { %s255_s30 = sshll.u32 %s6463_s3, 4  ;;  %s5817_s9 = sadd.s32 4294967295, %s5750_s27   ;;  %s5750_s27 = sphi %s5808_s27, %s22_s27   ;;  %s256_s30 = int_to_ptr.hbm [resolvable:$true] %s255_s30 }
   0x5   : > { %p3896_p0 = scmp.ge.s32.totalorder %s5750_s27, 1  ;;  %p226_p1 = scmp.lt.s32.totalorder %s5750_s27, 3 }
   0x6   : > { %p5512_p2 = scmp.eq.s32.totalorder %s5817_s9, 0  ;;  %s5752_s11 = smov [#allocation6]  }
   0x7   : > { %p5822_p3 = pnand %p3896_p0, %p226_p1  ;;  %s257_s12 = sshll.u32 %s5752_s11, 4  ;;  %s258_s12 = int_to_ptr.vmem [resolvable:$true] %s257_s12 }
   0x8   : > { %s281_s15 = sshll.u32 %s6465_s5, 4  ;;  %s237_s18 = sshll.u32 %s6461_s1, 4  ;;  %s282_s15 = int_to_ptr.hbm [resolvable:$true] %s281_s15  ;;  %s238_s18 = int_to_ptr.hbm [resolvable:$true] %s237_s18 }
   0x9   : > { %p5493_p4 = pneg %p5822_p3  ;;  %s5753_s20 = smov [#allocation9]  }
   0xa   : > { %s283_s21 = sshll.u32 %s5753_s20, 4  ;;  %s5754_s22 = smov [#allocation4]   ;;  %s284_s21 = int_to_ptr.vmem [resolvable:$true] %s283_s21 }
   0xb   : > { %p5836_p5 = pnand %p5512_p2, %p5493_p4  ;;  %s239_s23 = sshll.u32 %s5754_s22, 4  ;;  %s240_s23 = int_to_ptr.vmem [resolvable:$true] %s239_s23 }
   0xc   : > { %s5755_s24 = smov 128   ;;  %s5756_s25 = smov 8  }
   0xd   : > { %5499 = dma.hbm_to_vmem [thread:$0]  (!%p5836_p5), %s256_s30, 16, %s258_s12, [#allocation7]  }
   0xe   : > { %5505 = dma.hbm_to_vmem [thread:$0]  (!%p5836_p5), %s282_s15, 16, %s284_s21, [#allocation10]  }
   0xf   : > { %5496 = dma.hbm_to_vmem [thread:$0]  (!%p5836_p5), %s238_s18, 512, %s240_s23, [#allocation5], %s5755_s24, %s5755_s24, %s5756_s25  }
  0x10   : > { %s266_s29 = sshll.u32 %s6464_s4, 4  ;;  %s5757_s11 = smov [#allocation8]   ;;  %s267_s29 = int_to_ptr.hbm [resolvable:$true] %s266_s29 }
  0x11   : > { %s268_s13 = sshll.u32 %s5757_s11, 4  ;;  %s292_s14 = sshll.u32 %s6466_s6, 4  ;;  %s269_s13 = int_to_ptr.vmem [resolvable:$true] %s268_s13  ;;  %s293_s14 = int_to_ptr.hbm [resolvable:$true] %s292_s14 }
  0x12   : > { %s5758_s15 = smov 64   ;;  %s5759_s16 = smov 4  }
  0x13   : > { %5502 = dma.hbm_to_vmem [thread:$0]  (!%p5836_p5), %s267_s29, 9216, %s269_s13, [#allocation7], %s5758_s15, %s5758_s15, %s5759_s16  }
  0x14   : > { %s5760_s17 = smov [#allocation11]   ;;  %s307_s22 = sshll.u32 %s6467_s7, 4  ;;  %s308_s22 = int_to_ptr.hbm [resolvable:$true] %s307_s22 }
  0x15   : > { %s294_s18 = sshll.u32 %s5760_s17, 4  ;;  %s5761_s23 = smov [#allocation12]   ;;  %s295_s18 = int_to_ptr.vmem [resolvable:$true] %s294_s18 }
  0x16   : > { %5508 = dma.hbm_to_vmem [thread:$0]  (!%p5836_p5), %s293_s14, 9216, %s295_s18, [#allocation10], %s5758_s15, %s5758_s15, %s5759_s16  }
  0x17   : > { %s309_s24 = sshll.u32 %s5761_s23, 4  ;;  %330 = sbr.rel (%p5822_p3) target bundleno = 724 (0x2d4), region = 52  ;;  %s310_s24 = int_to_ptr.vmem [resolvable:$true] %s309_s24 }
  0x18   : > { %5511 = dma.hbm_to_vmem [thread:$0]  (!%p5836_p5), %s308_s22, 16, %s310_s24, [#allocation13]  }
  0x1c   : > { %5733 = dma.done.wait (%p5512_p2), [#allocation5], 512  }
  0x1d   : > { %5735 = vsyncadd (%p5512_p2), [#allocation5], 4294966784 }
  0x1e   : > { %5737 = dma.done.wait (%p5512_p2), [#allocation7], 9232  }
  0x1f   : > { %5739 = vsyncadd (%p5512_p2), [#allocation7], 4294958064 }
  0x20   : > { %5741 = dma.done.wait (%p5512_p2), [#allocation10], 9232  }
  0x21   : > { %5743 = vsyncadd (%p5512_p2), [#allocation10], 4294958064 }
  0x22   : > { %5745 = dma.done.wait (%p5512_p2), [#allocation13], 16  }
  0x23   : > { %5747 = vsyncadd (%p5512_p2), [#allocation13], 4294967280  ;;  %v5236_v0 = vld [vmem:[%s6462_s2 + $0x138] sm:$0xff]  ;;  %v5235_v4 = vld [vmem:[%s6462_s2 + $0x130] sm:$0xff]  ;;  %p389_p6 = scmp.lt.s32.totalorder %s5817_s9, 1  ;;  %vm567_vm0 = vcmask 1045504  }
  0x24   : > { %v5244_v1 = vld [vmem:[%s6462_s2 + $0x178] sm:$0xff]  ;;  %776 = vmatpush.bf16.msra.mxu0 %v5236_v0  ;;  %v5243_v5 = vld [vmem:[%s6462_s2 + $0x170] sm:$0xff]  ;;  %v5234_v8 = vld [vmem:[%s6462_s2 + $0x128] sm:$0xff]  ;;  %vm842_vm1 = vsmask.f32 6400  ;;  %vm3769_vm5 = vcmask 1041408  }
  0x25   : > { %v5252_v2 = vld [vmem:[%s6462_s2 + $0x1b8] sm:$0xff]  ;;  %790 = vmatpush.bf16.msra.mxu1 %v5244_v1  ;;  %v5251_v6 = vld [vmem:[%s6462_s2 + $0x1b0] sm:$0xff]  ;;  %v5242_v9 = vld [vmem:[%s6462_s2 + $0x168] sm:$0xff]  ;;  %s6472_s9 = smov (!%p389_p6, %s5817_s9), 1  ;;  %vm1252_vm2 = vsmask.f32 4352 }
  0x26   : > { %v5260_v3 = vld [vmem:[%s6462_s2 + $0x1f8] sm:$0xff]  ;;  %804 = vmatpush.bf16.msra.mxu2 %v5252_v2  ;;  %v5259_v7 = vld [vmem:[%s6462_s2 + $0x1f0] sm:$0xff]  ;;  %v5250_v10 = vld [vmem:[%s6462_s2 + $0x1a8] sm:$0xff]  ;;  %s5196_s30 = sshll.u32 %s6472_s9, 6  ;;  %vm2139_vm3 = vsmask.f32 5376 }
  0x27   : > { %818 = vmatpush.bf16.msra.mxu3 %v5260_v3  ;;  %v5258_v11 = vld [vmem:[%s6462_s2 + $0x1e8] sm:$0xff]  ;;  %v5233_v12 = vld [vmem:[%s6462_s2 + $0x120] sm:$0xff]  ;;  %s5935_s20 = scalar_lea.vmem %s6460_s0, %s5196_s30  ;;  %v5232_v16 = vld [vmem:[%s6462_s2 + $0x118] sm:$0xff]  ;;  %vm2440_vm4 = vsmask.f32 7424  ;;  %s3913_s11 = sshll.u32 %s6472_s9, 1 }
  0x28   : > { %777 = vmatpush.bf16.msra.mxu0 %v5235_v4  ;;  %v5241_v13 = vld [vmem:[%s6462_s2 + $0x160] sm:$0xff]  ;;  %v5240_v17 = vld [vmem:[%s6462_s2 + $0x158] sm:$0xff]  ;;  %v406_v20 = vld [vmem:[%s5935_s20 + $0x10] sm:$0xff]  ;;  %s397_s30 = scalar_lea.vmem %s6468_s8, %s3913_s11 }
  0x29   : > { %791 = vmatpush.bf16.msra.mxu1 %v5243_v5  ;;  %v5249_v14 = vld [vmem:[%s6462_s2 + $0x1a0] sm:$0xff]  ;;  %v5248_v18 = vld [vmem:[%s6462_s2 + $0x198] sm:$0xff]  ;;  %v409_v24 = vld [vmem:[%s5935_s20 + $0x28] sm:$0x33]  ;;  %v5961_v29 = vunpack.c.l.b16 %v406_v20  ;;  %v5971_v37 = vunpack.c.h.b16 %v406_v20 }
  0x2a   : > { %805 = vmatpush.bf16.msra.mxu2 %v5251_v6  ;;  %v5257_v15 = vld [vmem:[%s6462_s2 + $0x1e0] sm:$0xff]  ;;  %v5256_v19 = vld [vmem:[%s6462_s2 + $0x1d8] sm:$0xff]  ;;  %v475_v25 = vld [vmem:[%s5935_s20 + $0x8] sm:$0xcc]  ;;  %v557_v35 = vunpack.c.l.b16 %v409_v24  ;;  %v558_v41 = vunpack.c.h.b16 %v409_v24 }
  0x2b   : > { %819 = vmatpush.bf16.msra.mxu3 %v5259_v7  ;;  %v408_v21 = vld [vmem:[%s5935_s20 + $0x20] sm:$0x33]  ;;  %v474_v22 = vld [vmem:[%s5935_s20] sm:$0xcc]  ;;  %v407_v23 = vld [vmem:[%s5935_s20 + $0x18] sm:$0xff]  ;;  %v549_v33 = vunpack.c.l.b16 %v475_v25  ;;  %v550_v39 = vunpack.c.h.b16 %v475_v25 }
  0x2c   : > { %778 = vmatpush.bf16.msra.mxu0 %v5234_v8  ;;  %v5231_v26 = vld [vmem:[%s6462_s2 + $0x110] sm:$0xff]  ;;  %v547_v28 = vunpack.c.l.b16 %v474_v22  ;;  %v555_v30 = vunpack.c.l.b16 %v408_v21  ;;  %v5969_v34 = vunpack.c.l.b16 %v407_v23  ;;  %v548_v36 = vunpack.c.h.b16 %v474_v22  ;;  %v5230_v42 = vld [vmem:[%s6462_s2 + $0x108] sm:$0xff]  ;;  %v5229_v54 = vld [vmem:[%s6462_s2 + $0x100] sm:$0xff] }
  0x2d   : > { %792 = vmatpush.bf16.msra.mxu1 %v5242_v9  ;;  %v5239_v27 = vld [vmem:[%s6462_s2 + $0x150] sm:$0xff]  ;;  %v556_v38 = vunpack.c.h.b16 %v408_v21  ;;  %v5973_v40 = vunpack.c.h.b16 %v407_v23  ;;  %v5238_v43 = vld [vmem:[%s6462_s2 + $0x148] sm:$0xff]  ;;  %v5991_v49 = vpack.c.b16 %v557_v35, %v557_v35  ;;  %v5997_v53 = vpack.c.b16 %v558_v41, %v558_v41  ;;  %v5237_v55 = vld [vmem:[%s6462_s2 + $0x140] sm:$0xff] }
  0x2e   : > { %806 = vmatpush.bf16.msra.mxu2 %v5250_v10  ;;  %v5247_v31 = vld [vmem:[%s6462_s2 + $0x190] sm:$0xff]  ;;  %v559_v44 = vpack.c.b16 %v5961_v29, %v547_v28  ;;  %v5246_v45 = vld [vmem:[%s6462_s2 + $0x188] sm:$0xff]  ;;  %v5988_v47 = vpack.c.b16 %v555_v30, %v555_v30  ;;  %v561_v48 = vpack.c.b16 %v5969_v34, %v549_v33  ;;  %v560_v50 = vpack.c.b16 %v5971_v37, %v548_v36  ;;  %v5245_v56 = vld [vmem:[%s6462_s2 + $0x180] sm:$0xff] }
  0x2f   : > { %820 = vmatpush.bf16.msra.mxu3 %v5258_v11  ;;  %v5255_v32 = vld [vmem:[%s6462_s2 + $0x1d0] sm:$0xff]  ;;  %v5254_v46 = vld [vmem:[%s6462_s2 + $0x1c8] sm:$0xff]  ;;  %v5994_v51 = vpack.c.b16 %v556_v38, %v556_v38  ;;  %v562_v52 = vpack.c.b16 %v5973_v40, %v550_v39  ;;  %v5253_v57 = vld [vmem:[%s6462_s2 + $0x1c0] sm:$0xff]  ;;  %v575_v61 = vrot.slane %v5991_v49, 2  ;;  %v578_v3 = vrot.slane %v5997_v53, 2 }
  0x30   : > { %779 = vmatpush.bf16.msra.mxu0 %v5233_v12  ;;  %v568_v58 = vrot.slane %v559_v44, 2  ;;  %v569_v59 = vrot.slane %v5988_v47, 2  ;;  %v574_v60 = vrot.slane %v561_v48, 2  ;;  %v5204_v62 = vld [vmem:[%s6462_s2 + $0x38] sm:$0xff]  ;;  %v571_v0 = vrot.slane %v560_v50, 2  ;;  %v5203_v8 = vld [vmem:[%s6462_s2 + $0x30] sm:$0xff] }
  0x31   : > { %793 = vmatpush.bf16.msra.mxu1 %v5241_v13  ;;  %v5212_v63 = vld [vmem:[%s6462_s2 + $0x78] sm:$0xff]  ;;  %v572_v1 = vrot.slane %v5994_v51, 2  ;;  %v577_v2 = vrot.slane %v562_v52, 2  ;;  %v5211_v9 = vld [vmem:[%s6462_s2 + $0x70] sm:$0xff]  ;;  %v5201_v21 = vld [vmem:[%s6462_s2 + $0x20] sm:$0xff]  ;;  %v886_v50 = vshrl.u32 %v5991_v49, 16 }
  0x32   : > { %807 = vmatpush.bf16.msra.mxu2 %v5249_v14  ;;  %v5220_v4 = vld [vmem:[%s6462_s2 + $0xb8] sm:$0xff]  ;;  %v570_v6 = vsel %vm567_vm0, %v568_v58, %v569_v59  ;;  %v576_v7 = vsel %vm567_vm0, %v574_v60, %v575_v61  ;;  %v5219_v12 = vld [vmem:[%s6462_s2 + $0xb0] sm:$0xff]  ;;  %v5202_v14 = vld [vmem:[%s6462_s2 + $0x28] sm:$0xff]  ;;  %v889_v52 = vshll.u32 %v5991_v49, 16  ;;  %v872_v58 = vshll.u32 %v5994_v51, 16 }
  0x33   : > { %821 = vmatpush.bf16.msra.mxu3 %v5257_v15  ;;  %v5228_v5 = vld [vmem:[%s6462_s2 + $0xf8] sm:$0xff]  ;;  %v573_v10 = vsel %vm567_vm0, %v571_v0, %v572_v1  ;;  %v579_v11 = vsel %vm567_vm0, %v577_v2, %v578_v3  ;;  %v5227_v13 = vld [vmem:[%s6462_s2 + $0xf0] sm:$0xff]  ;;  %v5210_v15 = vld [vmem:[%s6462_s2 + $0x68] sm:$0xff]  ;;  %v903_v49 = vshrl.u32 %v5997_v53, 16  ;;  %v906_v61 = vshll.u32 %v5997_v53, 16 }
  0x34   : > { %780 = vmatpush.bf16.msra.mxu0 %v5232_v16  ;;  %v404_v16 = vld [vmem:[%s5935_s20] sm:$0xee]  ;;  %v5200_v30 = vld [vmem:[%s6462_s2 + $0x18] sm:$0xff]  ;;  %v5199_v44 = vld [vmem:[%s6462_s2 + $0x10] sm:$0xff] }
  0x35   : > { %794 = vmatpush.bf16.msra.mxu1 %v5240_v17  ;;  %v5218_v17 = vld [vmem:[%s6462_s2 + $0xa8] sm:$0xff]  ;;  %v834_v20 = vunpack.c.l.b16 %v404_v16  ;;  %v5209_v22 = vld [vmem:[%s6462_s2 + $0x60] sm:$0xff]  ;;  %v5216_v33 = vld [vmem:[%s6462_s2 + $0x98] sm:$0xff] }
  0x36   : > { %808 = vmatpush.bf16.msra.mxu2 %v5248_v18  ;;  %v5226_v18 = vld [vmem:[%s6462_s2 + $0xe8] sm:$0xff]  ;;  %v5217_v24 = vld [vmem:[%s6462_s2 + $0xa0] sm:$0xff]  ;;  %v5224_v35 = vld [vmem:[%s6462_s2 + $0xd8] sm:$0xff] }
  0x37   : > { %822 = vmatpush.bf16.msra.mxu3 %v5256_v19  ;;  %v405_v19 = vld [vmem:[%s5935_s20 + $0x8] sm:$0xee]  ;;  %v5225_v25 = vld [vmem:[%s6462_s2 + $0xe0] sm:$0xff]  ;;  %v838_v28 = vpack.c.b16 %v5961_v29, %v834_v20 }
  0x38   : > { %781 = vmatpush.bf16.msra.mxu0 %v5231_v26  ;;  %v836_v23 = vunpack.c.l.b16 %v405_v19  ;;  %v835_v26 = vunpack.c.h.b16 %v404_v16  ;;  %v5198_v2 = vld [vmem:[%s6462_s2 + $0x8] sm:$0xff]  ;;  %v5197_v16 = vld [vmem:[%s6462_s2] sm:$0xff] }
  0x39   : > { %795 = vmatpush.bf16.msra.mxu1 %v5239_v27  ;;  %v837_v27 = vunpack.c.h.b16 %v405_v19  ;;  %v844_v39 = vshrl.u32 %v838_v28, 16  ;;  %v847_v41 = vshll.u32 %v838_v28, 16  ;;  %v5214_v53 = vld [vmem:[%s6462_s2 + $0x88] sm:$0xff]  ;;  %v5213_v19 = vld [vmem:[%s6462_s2 + $0x80] sm:$0xff] }
  0x3a   : > { %809 = vmatpush.bf16.msra.mxu2 %v5247_v31  ;;  %v5208_v31 = vld [vmem:[%s6462_s2 + $0x58] sm:$0xff]  ;;  %v839_v36 = vpack.c.b16 %v5971_v37, %v835_v26  ;;  %v5221_v20 = vld [vmem:[%s6462_s2 + $0xc0] sm:$0xff] }
  0x3b   : > { %823 = vmatpush.bf16.msra.mxu3 %v5255_v32  ;;  %v840_v32 = vpack.c.b16 %v5969_v34, %v836_v23  ;;  %v841_v38 = vpack.c.b16 %v5973_v40, %v837_v27 }
  0x3c   : > { %782 = vmatpush.bf16.msra.mxu0 %v5230_v42  ;;  %v852_v42 = vshrl.u32 %v5988_v47, 16 }
  0x3d   : > { %796 = vmatpush.bf16.msra.mxu1 %v5238_v43  ;;  %v855_v43 = vshll.u32 %v5988_v47, 16  ;;  %v881_v48 = vshll.u32 %v840_v32, 16  ;;  %v5215_v47 = vld [vmem:[%s6462_s2 + $0x90] sm:$0xff]  ;;  %v895_v59 = vshrl.u32 %v841_v38, 16  ;;  %v898_v60 = vshll.u32 %v841_v38, 16 }
  0x3e   : > { %810 = vmatpush.bf16.msra.mxu2 %v5246_v45  ;;  %v5207_v45 = vld [vmem:[%s6462_s2 + $0x50] sm:$0xff]  ;;  %v854_v0 = vrot.slane %v852_v42, 1 }
  0x3f   : > { %824 = vmatpush.bf16.msra.mxu3 %v5254_v46  ;;  %v878_v46 = vshrl.u32 %v840_v32, 16  ;;  %v857_v1 = vrot.slane %v855_v43, 2  ;;  %v5292_v32 = vld [vmem:[%s6462_s2 + $0x2f8] sm:$0xff]  ;;  %v5283_v42 = vld [vmem:[%s6462_s2 + $0x2b0] sm:$0xff] }
  0x40   : > { %783 = vmatpush.bf16.msra.mxu0 %v5229_v54  ;;  %v5223_v54 = vld [vmem:[%s6462_s2 + $0xd0] sm:$0xff] }
  0x41   : > { %797 = vmatpush.bf16.msra.mxu1 %v5237_v55  ;;  %v861_v55 = vshrl.u32 %v839_v36, 16  ;;  %v880_v3 = vrot.slane %v878_v46, 1  ;;  %v5291_v43 = vld [vmem:[%s6462_s2 + $0x2f0] sm:$0xff]  ;;  %v1164_v46 = vld [vmem:[%s5935_s20 + $0x8] sm:$0x88] }
  0x42   : > { %811 = vmatpush.bf16.msra.mxu2 %v5245_v56  ;;  %v864_v56 = vshll.u32 %v839_v36, 16 }
  0x43   : > { %825 = vmatpush.bf16.msra.mxu3 %v5253_v57  ;;  %784 = vmatmul.bf16.vlgmr.msra.gmra.mxu0 %v570_v6  ;;  %v869_v57 = vshrl.u32 %v5994_v51, 16  ;;  %v5206_v51 = vld [vmem:[%s6462_s2 + $0x48] sm:$0xff]  ;;  %v891_v6 = vrot.slane %v889_v52, 2 }
  0x44   : > { %1107 = vmatpush.bf16.msrb.mxu0 %v5204_v62  ;;  %798 = vmatmul.bf16.vlgmr.msra.gmra.mxu1 %v573_v10  ;;  %v846_v62 = vrot.slane %v844_v39, 1  ;;  %v5267_v39 = vld [vmem:[%s6462_s2 + $0x230] sm:$0xff]  ;;  %v5290_v52 = vld [vmem:[%s6462_s2 + $0x2e8] sm:$0xff] }
  0x45   : > { %1121 = vmatpush.bf16.msrb.mxu1 %v5212_v63  ;;  %812 = vmatmul.bf16.vlgmr.msra.gmra.mxu2 %v576_v7  ;;  %v849_v63 = vrot.slane %v847_v41, 2  ;;  %v5222_v7 = vld [vmem:[%s6462_s2 + $0xc8] sm:$0xff]  ;;  %v871_v10 = vrot.slane %v869_v57, 1  ;;  %v5275_v41 = vld [vmem:[%s6462_s2 + $0x270] sm:$0xff]  ;;  %v5265_v57 = vld [vmem:[%s6462_s2 + $0x220] sm:$0xff] }
  0x46   : > { %1135 = vmatpush.bf16.msrb.mxu2 %v5220_v4  ;;  %826 = vmatmul.bf16.vlgmr.msra.gmra.mxu3 %v579_v11  ;;  %v883_v4 = vrot.slane %v881_v48, 2  ;;  %v874_v11 = vrot.slane %v872_v58, 2  ;;  %v1166_v48 = vld [vmem:[%s5935_s20 + $0x28] sm:$0xff]  ;;  %v5273_v58 = vld [vmem:[%s6462_s2 + $0x260] sm:$0xff] }
  0x47   : > { %1149 = vmatpush.bf16.msrb.mxu3 %v5228_v5  ;;  %v888_v5 = vrot.slane %v886_v50, 1  ;;  %v5282_v50 = vld [vmem:[%s6462_s2 + $0x2a8] sm:$0xff] }
  0x48   : > { %1108 = vmatpush.bf16.msrb.mxu0 %v5203_v8  ;;  %v863_v8 = vrot.slane %v861_v55, 1  ;;  %v875_v27 = vor.u32 %v874_v11, %v871_v10  ;;  %v1238_v55 = vunpack.c.l.b16 %v1164_v46 }
  0x49   : > { %1122 = vmatpush.bf16.msrb.mxu1 %v5211_v9  ;;  %v866_v9 = vrot.slane %v864_v56, 2  ;;  %v892_v23 = vor.u32 %v891_v6, %v888_v5  ;;  %v6173_v56 = vunpack.c.l.b16 %v1166_v48 }
  0x4a   : > { %1136 = vmatpush.bf16.msrb.mxu2 %v5219_v12  ;;  %v897_v12 = vrot.slane %v895_v59, 1  ;;  %v1239_v59 = vunpack.c.h.b16 %v1164_v46  ;;  %v5278_v46 = vld [vmem:[%s6462_s2 + $0x288] sm:$0xff] }
  0x4b   : > { %1150 = vmatpush.bf16.msrb.mxu3 %v5227_v13  ;;  %v900_v13 = vrot.slane %v898_v60, 2  ;;  %v867_v26 = vor.u32 %v866_v9, %v863_v8  ;;  %v6181_v60 = vunpack.c.h.b16 %v1166_v48  ;;  %v5286_v48 = vld [vmem:[%s6462_s2 + $0x2c8] sm:$0xff] }
  0x4c   : > { %1109 = vmatpush.bf16.msrb.mxu0 %v5202_v14  ;;  %v905_v14 = vrot.slane %v903_v49, 1  ;;  %v5281_v49 = vld [vmem:[%s6462_s2 + $0x2a0] sm:$0xff]  ;;  %v1247_v5 = vpack.c.b16 %v5973_v40, %v1239_v59 }
  0x4d   : > { %1123 = vmatpush.bf16.msrb.mxu1 %v5210_v15  ;;  %v908_v15 = vrot.slane %v906_v61, 2  ;;  %v901_v28 = vor.u32 %v900_v13, %v897_v12  ;;  %v876_v36 = vsel %vm842_vm1, %v867_v26, %v875_v27  ;;  %v5289_v61 = vld [vmem:[%s6462_s2 + $0x2e0] sm:$0xff]  ;;  %v1251_v6 = vpack.c.b16 %v6181_v60, %v6181_v60 }
  0x4e   : > { %1137 = vmatpush.bf16.msrb.mxu2 %v5218_v17  ;;  %v5205_v17 = vld [vmem:[%s6462_s2 + $0x40] sm:$0xff] }
  0x4f   : > { %1151 = vmatpush.bf16.msrb.mxu3 %v5226_v18  ;;  %v858_v18 = vor.u32 %v857_v1, %v854_v0 }
  0x50   : > { %1110 = vmatpush.bf16.msrb.mxu0 %v5201_v21  ;;  %v850_v21 = vor.u32 %v849_v63, %v846_v62 }
  0x51   : > { %1124 = vmatpush.bf16.msrb.mxu1 %v5209_v22  ;;  %v884_v22 = vor.u32 %v883_v4, %v880_v3  ;;  %v5264_v3 = vld [vmem:[%s6462_s2 + $0x218] sm:$0xff] }
  0x52   : > { %1138 = vmatpush.bf16.msrb.mxu2 %v5217_v24  ;;  %v5268_v24 = vld [vmem:[%s6462_s2 + $0x238] sm:$0xff] }
  0x53   : > { %1152 = vmatpush.bf16.msrb.mxu3 %v5225_v25  ;;  %v5276_v25 = vld [vmem:[%s6462_s2 + $0x278] sm:$0xff] }
  0x54   : > { %1111 = vmatpush.bf16.msrb.mxu0 %v5200_v30  ;;  %v909_v30 = vor.u32 %v908_v15, %v905_v14  ;;  %v5272_v4 = vld [vmem:[%s6462_s2 + $0x258] sm:$0xff] }
  0x55   : > { %1125 = vmatpush.bf16.msrb.mxu1 %v5208_v31  ;;  %v5284_v31 = vld [vmem:[%s6462_s2 + $0x2b8] sm:$0xff] }
  0x56   : > { %1139 = vmatpush.bf16.msrb.mxu2 %v5216_v33  ;;  %v859_v33 = vsel %vm842_vm1, %v850_v21, %v858_v18  ;;  %v910_v38 = vsel %vm842_vm1, %v901_v28, %v909_v30  ;;  %v1305_v18 = vshrl.u32 %v1247_v5, 16  ;;  %v1316_v21 = vshll.u32 %v1251_v6, 16 }
  0x57   : > { %1153 = vmatpush.bf16.msrb.mxu3 %v5224_v35  ;;  %v893_v35 = vsel %vm842_vm1, %v884_v22, %v892_v23  ;;  %v5279_v22 = vld [vmem:[%s6462_s2 + $0x290] sm:$0xff] }
  0x58   : > { %1112 = vmatpush.bf16.msrb.mxu0 %v5199_v44  ;;  %v5266_v44 = vld [vmem:[%s6462_s2 + $0x228] sm:$0xff]  ;;  %v5287_v23 = vld [vmem:[%s6462_s2 + $0x2d0] sm:$0xff] }
  0x59   : > { %1126 = vmatpush.bf16.msrb.mxu1 %v5207_v45  ;;  %v5274_v45 = vld [vmem:[%s6462_s2 + $0x268] sm:$0xff] }
  0x5a   : > { %1140 = vmatpush.bf16.msrb.mxu2 %v5215_v47  ;;  %v1163_v47 = vld [vmem:[%s5935_s20] sm:$0x88] }
  0x5b   : > { %1154 = vmatpush.bf16.msrb.mxu3 %v5223_v54  ;;  %v1165_v54 = vld [vmem:[%s5935_s20 + $0x20] sm:$0xff]  ;;  %v1236_v62 = vunpack.c.l.b16 %v1163_v47  ;;  %v1237_v0 = vunpack.c.h.b16 %v1163_v47 }
  0x5c   : > { %1113 = vmatpush.bf16.msrb.mxu0 %v5198_v2  ;;  %v6189_v63 = vunpack.c.l.b16 %v1165_v54  ;;  %v6191_v1 = vunpack.c.h.b16 %v1165_v54  ;;  %v1246_v2 = vpack.c.b16 %v5969_v34, %v1238_v55 }
  0x5d   : > { %1127 = vmatpush.bf16.msrb.mxu1 %v5206_v51  ;;  %v1250_v51 = vpack.c.b16 %v6173_v56, %v6173_v56  ;;  %v1244_v8 = vpack.c.b16 %v5961_v29, %v1236_v62  ;;  %v1245_v10 = vpack.c.b16 %v5971_v37, %v1237_v0  ;;  %v5277_v0 = vld [vmem:[%s6462_s2 + $0x280] sm:$0xff] }
  0x5e   : > { %1141 = vmatpush.bf16.msrb.mxu2 %v5214_v53  ;;  %v5280_v53 = vld [vmem:[%s6462_s2 + $0x298] sm:$0xff]  ;;  %v1248_v9 = vpack.c.b16 %v6189_v63, %v6189_v63  ;;  %v1249_v11 = vpack.c.b16 %v6191_v1, %v6191_v1  ;;  %v1288_v12 = vshrl.u32 %v1246_v2, 16  ;;  %v1291_v13 = vshll.u32 %v1246_v2, 16  ;;  %v5285_v2 = vld [vmem:[%s6462_s2 + $0x2c0] sm:$0xff] }
  0x5f   : > { %1155 = vmatpush.bf16.msrb.mxu3 %v5222_v7  ;;  %v5288_v7 = vld [vmem:[%s6462_s2 + $0x2d8] sm:$0xff]  ;;  %v1296_v14 = vshrl.u32 %v1250_v51, 16  ;;  %v1299_v15 = vshll.u32 %v1250_v51, 16  ;;  %v1271_v28 = vshrl.u32 %v1245_v10, 16  ;;  %v1274_v30 = vshll.u32 %v1245_v10, 16 }
  0x60   : > { %1114 = vmatpush.bf16.msrb.mxu0 %v5197_v16  ;;  %v5263_v16 = vld [vmem:[%s6462_s2 + $0x210] sm:$0xff]  ;;  %v1262_v26 = vshrl.u32 %v1248_v9, 16  ;;  %v1265_v27 = vshll.u32 %v1248_v9, 16  ;;  %v5316_v10 = vld [vmem:[%s6462_s2 + $0x3b8] sm:$0xff] }
  0x61   : > { %1128 = vmatpush.bf16.msrb.mxu1 %v5205_v17  ;;  %v5271_v17 = vld [vmem:[%s6462_s2 + $0x250] sm:$0xff]  ;;  %v1273_v55 = vrot.slane %v1271_v28, 3  ;;  %v5313_v28 = vld [vmem:[%s6462_s2 + $0x3a0] sm:$0xff] }
  0x62   : > { %1142 = vmatpush.bf16.msrb.mxu2 %v5213_v19  ;;  %v1308_v19 = vshll.u32 %v1247_v5, 16  ;;  %v1264_v47 = vrot.slane %v1262_v26, 3  ;;  %v1267_v54 = vrot.slane %v1265_v27, 4  ;;  %v5300_v5 = vld [vmem:[%s6462_s2 + $0x338] sm:$0xff]  ;;  %v5297_v26 = vld [vmem:[%s6462_s2 + $0x320] sm:$0xff] }
  0x63   : > { %1156 = vmatpush.bf16.msrb.mxu3 %v5221_v20  ;;  %1115 = vmatmul.bf16.vlgmr.msrb.gmra.mxu0 %v859_v33  ;;  %v1313_v20 = vshrl.u32 %v1251_v6, 16  ;;  %v1290_v33 = vrot.slane %v1288_v12, 3  ;;  %v5308_v6 = vld [vmem:[%s6462_s2 + $0x378] sm:$0xff]  ;;  %v5305_v27 = vld [vmem:[%s6462_s2 + $0x360] sm:$0xff] }
  0x64   : > { %1517 = vmatpush.bf16.msra.mxu0 %v5268_v24  ;;  %1129 = vmatmul.bf16.vlgmr.msrb.gmra.mxu1 %v876_v36  ;;  %v1254_v24 = vshrl.u32 %v1244_v8, 16  ;;  %v1298_v36 = vrot.slane %v1296_v14, 3  ;;  %v5299_v14 = vld [vmem:[%s6462_s2 + $0x330] sm:$0xff] }
  0x65   : > { %1531 = vmatpush.bf16.msra.mxu1 %v5276_v25  ;;  %1143 = vmatmul.bf16.vlgmr.msrb.gmra.mxu2 %v893_v35  ;;  %v1257_v25 = vshll.u32 %v1244_v8, 16  ;;  %v1293_v35 = vrot.slane %v1291_v13, 4 }
  0x66   : > { %1545 = vmatpush.bf16.msra.mxu2 %v5284_v31  ;;  %1157 = vmatmul.bf16.vlgmr.msrb.gmra.mxu3 %v910_v38  ;;  %v1279_v31 = vshrl.u32 %v1249_v11, 16  ;;  %v1301_v38 = vrot.slane %v1299_v15, 4  ;;  %v5307_v15 = vld [vmem:[%s6462_s2 + $0x370] sm:$0xff] }
  0x67   : > { %1559 = vmatpush.bf16.msra.mxu3 %v5292_v32  ;;  %v1282_v32 = vshll.u32 %v1249_v11, 16  ;;  %v1294_v62 = vor.u32 %v1293_v35, %v1290_v33  ;;  %v5324_v11 = vld [vmem:[%s6462_s2 + $0x3f8] sm:$0xff] }
  0x68   : > { %1518 = vmatpush.bf16.msra.mxu0 %v5267_v39  ;;  %v5262_v39 = vld [vmem:[%s6462_s2 + $0x208] sm:$0xff]  ;;  %v1302_v51 = vor.u32 %v1301_v38, %v1298_v36  ;;  %v1906_v33 = vld [vmem:[#allocation4 + $0x10] sm:$0xff]  ;;  %v5295_v38 = vld [vmem:[%s6462_s2 + $0x310] sm:$0xff] }
  0x69   : > { %1532 = vmatpush.bf16.msra.mxu1 %v5275_v41  ;;  %v5270_v41 = vld [vmem:[%s6462_s2 + $0x248] sm:$0xff]  ;;  %v1284_v59 = vrot.slane %v1282_v32, 4  ;;  %v5304_v32 = vld [vmem:[%s6462_s2 + $0x358] sm:$0xff] }
  0x6a   : > { %1546 = vmatpush.bf16.msra.mxu2 %v5283_v42  ;;  %v1307_v42 = vrot.slane %v1305_v18, 3  ;;  %v1303_v12 = vsel %vm1252_vm2, %v1294_v62, %v1302_v51  ;;  %v5315_v18 = vld [vmem:[%s6462_s2 + $0x3b0] sm:$0xff]  ;;  %v5312_v35 = vld [vmem:[%s6462_s2 + $0x398] sm:$0xff]  ;;  %v5336_v51 = vld [vmem:[#allocation8 + $0x58] sm:$0xff] }
  0x6b   : > { %1560 = vmatpush.bf16.msra.mxu3 %v5291_v43  ;;  %v1310_v43 = vrot.slane %v1308_v19, 4  ;;  %v5323_v19 = vld [vmem:[%s6462_s2 + $0x3f0] sm:$0xff]  ;;  %v5320_v36 = vld [vmem:[%s6462_s2 + $0x3d8] sm:$0xff] }
  0x6c   : > { %1519 = vmatpush.bf16.msra.mxu0 %v5266_v44  ;;  %v1315_v44 = vrot.slane %v1313_v20, 3  ;;  %v5762_v20 = vmov 0   ;;  %v5337_v62 = vld [vmem:[#allocation8 + $0x60] sm:$0xff] }
  0x6d   : > { %1533 = vmatpush.bf16.msra.mxu1 %v5274_v45  ;;  %v1318_v45 = vrot.slane %v1316_v21, 4  ;;  %399 = vst [vmem:[#allocation2] sm:$0xf] %v5762_v20  ;;  %v5298_v21 = vld [vmem:[%s6462_s2 + $0x328] sm:$0xff]  ;;  %5543 = vset.pattern.permute.xlu0 %v5762_v20 }
  0x6e   : > { %1547 = vmatpush.bf16.msra.mxu2 %v5282_v50  ;;  %v1256_v50 = vrot.slane %v1254_v24, 3  ;;  %400 = vst [vmem:[#allocation2 + $0xc] sm:$0xf] %v5762_v20  ;;  %v5314_v24 = vld [vmem:[%s6462_s2 + $0x3a8] sm:$0xff]  ;;  %5544 = vset.pattern.permute.xlu1 %v5762_v20 }
  0x6f   : > { %1561 = vmatpush.bf16.msra.mxu3 %v5290_v52  ;;  %v1259_v52 = vrot.slane %v1257_v25, 4  ;;  %401 = vst [vmem:[#allocation3] sm:$0xf] %v5762_v20  ;;  %v5322_v25 = vld [vmem:[%s6462_s2 + $0x3e8] sm:$0xff] }
  0x70   : > { %1520 = vmatpush.bf16.msra.mxu0 %v5265_v57  ;;  %v1276_v57 = vrot.slane %v1274_v30, 4  ;;  %402 = vst [vmem:[#allocation3 + $0xc] sm:$0xf] %v5762_v20  ;;  %v5321_v30 = vld [vmem:[%s6462_s2 + $0x3e0] sm:$0xff] }
  0x71   : > { %1534 = vmatpush.bf16.msra.mxu1 %v5273_v58  ;;  %v1281_v58 = vrot.slane %v1279_v31, 3  ;;  %v5296_v31 = vld [vmem:[%s6462_s2 + $0x318] sm:$0xff] }
  0x72   : > { %1548 = vmatpush.bf16.msra.mxu2 %v5281_v49  ;;  %v5261_v49 = vld [vmem:[%s6462_s2 + $0x200] sm:$0xff]  ;;  %v1277_v8 = vor.u32 %v1276_v57, %v1273_v55  ;;  %v1641_v55 = vpack.c.b16 %v6191_v1, %v5971_v37  ;;  %v1642_v57 = vpack.c.b16 %v6173_v56, %v5969_v34 }
  0x73   : > { %1562 = vmatpush.bf16.msra.mxu3 %v5289_v61  ;;  %v5269_v61 = vld [vmem:[%s6462_s2 + $0x240] sm:$0xff]  ;;  %v1285_v9 = vor.u32 %v1284_v59, %v1281_v58  ;;  %v1643_v58 = vpack.c.b16 %v6181_v60, %v5973_v40  ;;  %v5338_v40 = vld [vmem:[#allocation8 + $0x68] sm:$0xff] }
  0x74   : > { %1521 = vmatpush.bf16.msra.mxu0 %v5264_v3  ;;  %v1311_v3 = vor.u32 %v1310_v43, %v1307_v42  ;;  %v5319_v42 = vld [vmem:[%s6462_s2 + $0x3d0] sm:$0xff]  ;;  %v5294_v43 = vld [vmem:[%s6462_s2 + $0x308] sm:$0xff]  ;;  %v5339_v34 = vld [vmem:[#allocation8 + $0x70] sm:$0xff] }
  0x75   : > { %1535 = vmatpush.bf16.msra.mxu1 %v5272_v4  ;;  %v1319_v4 = vor.u32 %v1318_v45, %v1315_v44  ;;  %v5302_v44 = vld [vmem:[%s6462_s2 + $0x348] sm:$0xff] }
  0x76   : > { %1549 = vmatpush.bf16.msra.mxu2 %v5280_v53  ;;  %v1260_v53 = vor.u32 %v1259_v52, %v1256_v50  ;;  %v5310_v45 = vld [vmem:[%s6462_s2 + $0x388] sm:$0xff]  ;;  %v5301_v50 = vld [vmem:[%s6462_s2 + $0x340] sm:$0xff] }
  0x77   : > { %1563 = vmatpush.bf16.msra.mxu3 %v5288_v7  ;;  %v1268_v7 = vor.u32 %v1267_v54, %v1264_v47  ;;  %v1320_v13 = vsel %vm1252_vm2, %v1311_v3, %v1319_v4  ;;  %v5309_v52 = vld [vmem:[%s6462_s2 + $0x380] sm:$0xff]  ;;  %v1640_v54 = vpack.c.b16 %v6189_v63, %v5961_v29 }
  0x78   : > { %1522 = vmatpush.bf16.msra.mxu0 %v5263_v16  ;;  %v5317_v47 = vld [vmem:[%s6462_s2 + $0x3c0] sm:$0xff] }
  0x79   : > { %1536 = vmatpush.bf16.msra.mxu1 %v5271_v17  ;;  %v1269_v16 = vsel %vm1252_vm2, %v1260_v53, %v1268_v7  ;;  %v1286_v17 = vsel %vm1252_vm2, %v1277_v8, %v1285_v9  ;;  %v5340_v37 = vld [vmem:[#allocation8 + $0x78] sm:$0xff]  ;;  %v5335_v7 = vld [vmem:[#allocation8 + $0x50] sm:$0xff] }
  0x7a   : > { %1550 = vmatpush.bf16.msra.mxu2 %v5279_v22  ;;  %v5306_v22 = vld [vmem:[%s6462_s2 + $0x368] sm:$0xff] }
  0x7b   : > { %1564 = vmatpush.bf16.msra.mxu3 %v5287_v23  ;;  %v1905_v23 = vld [vmem:[#allocation4 + $0x8] sm:$0xff]  ;;  %v5332_v3 = vld [vmem:[#allocation8 + $0x38] sm:$0xff] }
  0x7c   : > { %1523 = vmatpush.bf16.msra.mxu0 %v5262_v39  ;;  %1909 = vperm.xlu0 %5543, %v1905_v23   ;;  %v5303_v39 = vld [vmem:[%s6462_s2 + $0x350] sm:$0xff]  ;;  %v5348_v4 = vld [vmem:[#allocation8 + $0xb8] sm:$0xff] }
  0x7d   : > { %1537 = vmatpush.bf16.msra.mxu1 %v5270_v41  ;;  %2828 = vperm.xlu1 %5544, %v1905_v23   ;;  %v5311_v41 = vld [vmem:[%s6462_s2 + $0x390] sm:$0xff] }
  0x7e   : > { %1551 = vmatpush.bf16.msra.mxu2 %v5278_v46  ;;  %v5318_v46 = vld [vmem:[%s6462_s2 + $0x3c8] sm:$0xff] }
  0x7f   : > { %1565 = vmatpush.bf16.msra.mxu3 %v5286_v48  ;;  %v5293_v48 = vld [vmem:[%s6462_s2 + $0x300] sm:$0xff]  ;;  %v5345_v23 = vld [vmem:[#allocation8 + $0xa0] sm:$0xff] }
  0x80   : > { %1524 = vmatpush.bf16.msra.mxu0 %v5261_v49 }
  0x81   : > { %1538 = vmatpush.bf16.msra.mxu1 %v5269_v61 }
  0x82   : > { %1552 = vmatpush.bf16.msra.mxu2 %v5277_v0 }
  0x83   : > { %1566 = vmatpush.bf16.msra.mxu3 %v5285_v2  ;;  %1525 = vmatmul.bf16.vlgmr.msra.gmra.mxu0 %v1269_v16  ;;  %v5354_v16 = vld [vmem:[#allocation8 + $0xe8] sm:$0xff] }
  0x84   : > { %1840 = vmatpush.bf16.msrb.mxu0 %v5300_v5  ;;  %1539 = vmatmul.bf16.vlgmr.msra.gmra.mxu1 %v1286_v17  ;;  %v5356_v5 = vld [vmem:[#allocation8 + $0xf8] sm:$0xff] }
  0x85   : > { %1854 = vmatpush.bf16.msrb.mxu1 %v5308_v6  ;;  %1553 = vmatmul.bf16.vlgmr.msra.gmra.mxu2 %v1303_v12  ;;  %v5355_v12 = vld [vmem:[#allocation8 + $0xf0] sm:$0xff] }
  0x86   : > { %1868 = vmatpush.bf16.msrb.mxu2 %v5316_v10  ;;  %1567 = vmatmul.bf16.vlgmr.msra.gmra.mxu3 %v1320_v13  ;;  %v5331_v10 = vld [vmem:[#allocation8 + $0x30] sm:$0xff]  ;;  %v5334_v13 = vld [vmem:[#allocation8 + $0x48] sm:$0xff] }
  0x87   : > { %1882 = vmatpush.bf16.msrb.mxu3 %v5324_v11  ;;  %1914 = vperm.xlu0 %5543, %v1906_v33   ;;  %v5347_v11 = vld [vmem:[#allocation8 + $0xb0] sm:$0xff] }
  0x88   : > { %1841 = vmatpush.bf16.msrb.mxu0 %v5299_v14  ;;  %2833 = vperm.xlu1 %5544, %v1906_v33   ;;  %v5330_v14 = vld [vmem:[#allocation8 + $0x28] sm:$0xff] }
  0x89   : > { %1855 = vmatpush.bf16.msrb.mxu1 %v5307_v15  ;;  %v5346_v15 = vld [vmem:[#allocation8 + $0xa8] sm:$0xff] }
  0x8a   : > { %1869 = vmatpush.bf16.msrb.mxu2 %v5315_v18 }
  0x8b   : > { %1883 = vmatpush.bf16.msrb.mxu3 %v5323_v19  ;;  %v5333_v19 = vld [vmem:[#allocation8 + $0x40] sm:$0xff] }
  0x8c   : > { %1842 = vmatpush.bf16.msrb.mxu0 %v5298_v21 }
  0x8d   : > { %1856 = vmatpush.bf16.msrb.mxu1 %v5306_v22  ;;  %v5329_v22 = vld [vmem:[#allocation8 + $0x20] sm:$0xff] }
  0x8e   : > { %1870 = vmatpush.bf16.msrb.mxu2 %v5314_v24  ;;  %v5353_v24 = vld [vmem:[#allocation8 + $0xe0] sm:$0xff] }
  0x8f   : > { %1884 = vmatpush.bf16.msrb.mxu3 %v5322_v25 }
  0x90   : > { %1843 = vmatpush.bf16.msrb.mxu0 %v5297_v26  ;;  %v5364_v26 = vld [vmem:[#allocation8 + $0x138] sm:$0xff] }
  0x91   : > { %1857 = vmatpush.bf16.msrb.mxu1 %v5305_v27  ;;  %v5328_v27 = vld [vmem:[#allocation8 + $0x18] sm:$0xff] }
  0x92   : > { %1871 = vmatpush.bf16.msrb.mxu2 %v5313_v28  ;;  %v5344_v28 = vld [vmem:[#allocation8 + $0x98] sm:$0xff] }
  0x93   : > { %1885 = vmatpush.bf16.msrb.mxu3 %v5321_v30  ;;  %v5352_v30 = vld [vmem:[#allocation8 + $0xd8] sm:$0xff] }
  0x94   : > { %1844 = vmatpush.bf16.msrb.mxu0 %v5296_v31 }
  0x95   : > { %1858 = vmatpush.bf16.msrb.mxu1 %v5304_v32  ;;  %v5363_v32 = vld [vmem:[#allocation8 + $0x130] sm:$0xff] }
  0x96   : > { %1872 = vmatpush.bf16.msrb.mxu2 %v5312_v35 }
  0x97   : > { %1886 = vmatpush.bf16.msrb.mxu3 %v5320_v36  ;;  %v5327_v36 = vld [vmem:[#allocation8 + $0x10] sm:$0xff] }
  0x98   : > { %1845 = vmatpush.bf16.msrb.mxu0 %v5295_v38  ;;  %v5343_v38 = vld [vmem:[#allocation8 + $0x90] sm:$0xff] }
  0x99   : > { %1859 = vmatpush.bf16.msrb.mxu1 %v5303_v39  ;;  %v5351_v39 = vld [vmem:[#allocation8 + $0xd0] sm:$0xff] }
  0x9a   : > { %1873 = vmatpush.bf16.msrb.mxu2 %v5311_v41 }
  0x9b   : > { %1887 = vmatpush.bf16.msrb.mxu3 %v5319_v42  ;;  %v5362_v42 = vld [vmem:[#allocation8 + $0x128] sm:$0xff] }
  0x9c   : > { %1846 = vmatpush.bf16.msrb.mxu0 %v5294_v43 }
  0x9d   : > { %1860 = vmatpush.bf16.msrb.mxu1 %v5302_v44 }
  0x9e   : > { %1874 = vmatpush.bf16.msrb.mxu2 %v5310_v45 }
  0x9f   : > { %1888 = vmatpush.bf16.msrb.mxu3 %v5318_v46  ;;  %v5326_v46 = vld [vmem:[#allocation8 + $0x8] sm:$0xff] }
  0xa0   : > { %1847 = vmatpush.bf16.msrb.mxu0 %v5293_v48  ;;  %v5342_v48 = vld [vmem:[#allocation8 + $0x88] sm:$0xff] }
  0xa1   : > { %1861 = vmatpush.bf16.msrb.mxu1 %v5301_v50  ;;  %v5350_v50 = vld [vmem:[#allocation8 + $0xc8] sm:$0xff] }
  0xa2   : > { %1875 = vmatpush.bf16.msrb.mxu2 %v5309_v52 }
  0xa3   : > { %1889 = vmatpush.bf16.msrb.mxu3 %v5317_v47  ;;  %1848 = vmatmul.bf16.vlgmr.msrb.gmra.mxu0 %v1640_v54  ;;  %v5361_v47 = vld [vmem:[#allocation8 + $0x120] sm:$0xff] }
  0xa4   : > { %1862 = vmatmul.bf16.vlgmr.msrb.gmra.mxu1 %v1641_v55  ;;  %2021 = vmatpush.bf16.msra.mxu0 %v5340_v37  ;;  %v5372_v37 = vld [vmem:[#allocation8 + $0x178] sm:$0xff] }
  0xa5   : > { %1876 = vmatmul.bf16.vlgmr.msrb.gmra.mxu2 %v1642_v57  ;;  %2104 = vmatpush.bf16.msra.mxu1 %v5332_v3  ;;  %v5325_v57 = vld [vmem:[#allocation8] sm:$0xff]  ;;  %v5371_v3 = vld [vmem:[#allocation8 + $0x170] sm:$0xff] }
  0xa6   : > { %1890 = vmatmul.bf16.vlgmr.msrb.gmra.mxu3 %v1643_v58  ;;  %2206 = vmatpush.bf16.msra.mxu2 %v5348_v4  ;;  %v5341_v58 = vld [vmem:[#allocation8 + $0x80] sm:$0xff]  ;;  %v5379_v4 = vld [vmem:[#allocation8 + $0x1b0] sm:$0xff] }
  0xa7   : > { %2313 = vmatpush.bf16.msra.mxu3 %v5356_v5 }
  0xa8   : > { %2022 = vmatpush.bf16.msra.mxu0 %v5339_v34  ;;  %v5388_v34 = vld [vmem:[#allocation8 + $0x1f8] sm:$0xff] }
  0xa9   : > { %2105 = vmatpush.bf16.msra.mxu1 %v5331_v10 }
  0xaa   : > { %2207 = vmatpush.bf16.msra.mxu2 %v5347_v11 }
  0xab   : > { %2314 = vmatpush.bf16.msra.mxu3 %v5355_v12 }
  0xac   : > { %2023 = vmatpush.bf16.msra.mxu0 %v5338_v40 }
  0xad   : > { %2106 = vmatpush.bf16.msra.mxu1 %v5330_v14 }
  0xae   : > { %2208 = vmatpush.bf16.msra.mxu2 %v5346_v15  ;;  %v5370_v15 = vld [vmem:[#allocation8 + $0x168] sm:$0xff] }
  0xaf   : > { %2315 = vmatpush.bf16.msra.mxu3 %v5354_v16  ;;  %v5378_v16 = vld [vmem:[#allocation8 + $0x1a8] sm:$0xff] }
  0xb0   : > { %2024 = vmatpush.bf16.msra.mxu0 %v5337_v62 }
  0xb1   : > { %2107 = vmatpush.bf16.msra.mxu1 %v5329_v22 }
  0xb2   : > { %2209 = vmatpush.bf16.msra.mxu2 %v5345_v23 }
  0xb3   : > { %2316 = vmatpush.bf16.msra.mxu3 %v5353_v24  ;;  %v5545_v24 = vld [vmem:[#allocation6] ss:$0 sm:$0xff] }
  0xb4   : > { %2025 = vmatpush.bf16.msra.mxu0 %v5336_v51  ;;  %v5359_v51 = vld [vmem:[#allocation8 + $0x110] sm:$0xff] }
  0xb5   : > { %2108 = vmatpush.bf16.msra.mxu1 %v5328_v27  ;;  %v5357_v27 = vld [vmem:[#allocation8 + $0x100] sm:$0xff] }
  0xb6   : > { %2210 = vmatpush.bf16.msra.mxu2 %v5344_v28 }
  0xb7   : > { %2317 = vmatpush.bf16.msra.mxu3 %v5352_v30 }
  0xb8   : > { %2026 = vmatpush.bf16.msra.mxu0 %v5335_v7 }
  0xb9   : > { %2109 = vmatpush.bf16.msra.mxu1 %v5327_v36 }
  0xba   : > { %2211 = vmatpush.bf16.msra.mxu2 %v5343_v38 }
  0xbb   : > { %2318 = vmatpush.bf16.msra.mxu3 %v5351_v39 }
  0xbc   : > { %2027 = vmatpush.bf16.msra.mxu0 %v5334_v13  ;;  %v5358_v13 = vld [vmem:[#allocation8 + $0x108] sm:$0xff] }
  0xbd   : > { %2110 = vmatpush.bf16.msra.mxu1 %v5326_v46 }
  0xbe   : > { %2212 = vmatpush.bf16.msra.mxu2 %v5342_v48 }
  0xbf   : > { %2319 = vmatpush.bf16.msra.mxu3 %v5350_v50 }
  0xc0   : > { %v785_v59 = vpop.f32.mrf.mxu0  ;;  %2028 = vmatpush.bf16.msra.mxu0 %v5333_v19 }
  0xc1   : > { %v799_v49 = vpop.f32.mrf.mxu1  ;;  %2111 = vmatpush.bf16.msra.mxu1 %v5325_v57  ;;  %v5367_v57 = vld [vmem:[#allocation8 + $0x150] sm:$0xff] }
  0xc2   : > { %v800_v25 = vadd.f32 %v799_v49, %v785_v59  ;;  %v5349_v59 = vld [vmem:[#allocation8 + $0xc0] sm:$0xff]  ;;  %2213 = vmatpush.bf16.msra.mxu2 %v5341_v58  ;;  %v5375_v58 = vld [vmem:[#allocation8 + $0x190] sm:$0xff] }
  0xc3   : > { %2320 = vmatpush.bf16.msra.mxu3 %v5349_v59  ;;  %v5383_v59 = vld [vmem:[#allocation8 + $0x1d0] sm:$0xff] }
  0xc4   : > { %2396 = vmatpush.bf16.msrb.mxu0 %v5364_v26 }
  0xc5   : > { %2502 = vmatpush.bf16.msrb.mxu1 %v5372_v37  ;;  %v5374_v37 = vld [vmem:[#allocation8 + $0x188] sm:$0xff] }
  0xc7   : > { %2698 = vmatpush.bf16.msrb.mxu3 %v5388_v34  ;;  %v5373_v34 = vld [vmem:[#allocation8 + $0x180] sm:$0xff] }
  0xc8   : > { %v813_v29 = vpop.f32.mrf.mxu2  ;;  %v6363_v1 = vpop.f32.mrf.mxu0  ;;  %2397 = vmatpush.bf16.msrb.mxu0 %v5363_v32  ;;  %v5385_v32 = vld [vmem:[#allocation8 + $0x1e0] sm:$0xff] }
  0xc9   : > { %v6361_v63 = vpop.f32.mrf.mxu3  ;;  %v6365_v61 = vpop.f32.mrf.mxu1  ;;  %v814_v31 = vadd.f32 %v813_v29, %v800_v25  ;;  %2503 = vmatpush.bf16.msrb.mxu1 %v5371_v3 }
  0xca   : > { %v802_v45 = vadd.f32 %v6365_v61, %v6363_v1  ;;  %v5380_v1 = vld [vmem:[#allocation8 + $0x1b8] sm:$0xff] }
  0xcb   : > { %v828_v41 = vadd.f32 %v6361_v63, %v814_v31  ;;  %v5360_v63 = vld [vmem:[#allocation8 + $0x118] sm:$0xff]  ;;  %2609 = vmatpush.bf16.msrb.mxu2 %v5380_v1  ;;  %v5377_v31 = vld [vmem:[#allocation8 + $0x1a0] sm:$0xff]  ;;  %v5382_v1 = vld [vmem:[#allocation8 + $0x1c8] sm:$0xff] }
  0xcc   : > { %2398 = vmatpush.bf16.msrb.mxu0 %v5362_v42 }
  0xcd   : > { %2504 = vmatpush.bf16.msrb.mxu1 %v5370_v15 }
  0xcf   : > { %2610 = vmatpush.bf16.msrb.mxu2 %v5379_v4  ;;  %v6400_v4 = vld [vmem:[#allocation2 + $0xc] sm:$0x1] }
  0xd0   : > { %v6367_v56 = vpop.f32.mrf.mxu2  ;;  %2399 = vmatpush.bf16.msrb.mxu0 %v5361_v47  ;;  %v5376_v47 = vld [vmem:[#allocation8 + $0x198] sm:$0xff] }
  0xd1   : > { %v6369_v60 = vpop.f32.mrf.mxu3  ;;  %v816_v54 = vadd.f32 %v6367_v56, %v802_v45 }
  0xd3   : > { %v830_v56 = vadd.f32 %v6369_v60, %v816_v54  ;;  %2611 = vmatpush.bf16.msrb.mxu2 %v5378_v16  ;;  %v5384_v54 = vld [vmem:[#allocation8 + $0x1d8] sm:$0xff]  ;;  %v2437_v16 = vunpack.c.l.b16 %v6400_v4 }
  0xd4   : > { %2400 = vmatpush.bf16.msrb.mxu0 %v5360_v63  ;;  %v5366_v63 = vld [vmem:[#allocation8 + $0x148] sm:$0xff] }
  0xd7   : > { %2612 = vmatpush.bf16.msrb.mxu2 %v5377_v31 }
  0xd8   : > { %2401 = vmatpush.bf16.msrb.mxu0 %v5359_v51 }
  0xdb   : > { %2613 = vmatpush.bf16.msrb.mxu2 %v5376_v47 }
  0xdc   : > { %2402 = vmatpush.bf16.msrb.mxu0 %v5358_v13 }
  0xdf   : > { %2614 = vmatpush.bf16.msrb.mxu2 %v5375_v58 }
  0xe0   : > { %v6371_v0 = vpop.f32.mrf.mxu0  ;;  %2403 = vmatpush.bf16.msrb.mxu0 %v5357_v27  ;;  %v5396_v27 = vld [vmem:[#allocation8 + $0x238] sm:$0xff] }
  0xe1   : > { %v6373_v2 = vpop.f32.mrf.mxu1  ;;  %v1117_v52 = vadd.f32 %v6371_v0, %v828_v41 }
  0xe3   : > { %v1131_v61 = vadd.f32 %v6373_v2, %v1117_v52  ;;  %v5387_v2 = vld [vmem:[#allocation8 + $0x1f0] sm:$0xff]  ;;  %v5368_v52 = vld [vmem:[#allocation8 + $0x158] sm:$0xff]  ;;  %2615 = vmatpush.bf16.msrb.mxu2 %v5374_v37 }
  0xe4   : > { %2699 = vmatpush.bf16.msrb.mxu3 %v5387_v2 }
  0xe7   : > { %2616 = vmatpush.bf16.msrb.mxu2 %v5373_v34 }
  0xe8   : > { %v6375_v6 = vpop.f32.mrf.mxu2  ;;  %v6379_v8 = vpop.f32.mrf.mxu0 }
  0xe9   : > { %v6377_v53 = vpop.f32.mrf.mxu3  ;;  %v6381_v9 = vpop.f32.mrf.mxu1  ;;  %v1145_v5 = vadd.f32 %v6375_v6, %v1131_v61  ;;  %v1119_v10 = vadd.f32 %v6379_v8, %v830_v56  ;;  %v5386_v6 = vld [vmem:[#allocation8 + $0x1e8] sm:$0xff]  ;;  %v5365_v61 = vld [vmem:[#allocation8 + $0x140] sm:$0xff] }
  0xea   : > { %2700 = vmatpush.bf16.msrb.mxu3 %v5386_v6  ;;  %v5381_v56 = vld [vmem:[#allocation8 + $0x1c0] sm:$0xff] }
  0xeb   : > { %v1159_v19 = vadd.f32 %v6377_v53, %v1145_v5  ;;  %v5369_v53 = vld [vmem:[#allocation8 + $0x160] sm:$0xff]  ;;  %v6402_v5 = vld [vmem:[#allocation2 + $0xc] sm:$0x3] }
  0xec   : > { %2505 = vmatpush.bf16.msrb.mxu1 %v5369_v53 }
  0xee   : > { %v1910_v36 = vpop.permute.xlu0 %1909  ;;  %2701 = vmatpush.bf16.msrb.mxu3 %v5385_v32 }
  0xf0   : > { %v6383_v17 = vpop.f32.mrf.mxu2  ;;  %2506 = vmatpush.bf16.msrb.mxu1 %v5368_v52 }
  0xf1   : > { %v6385_v18 = vpop.f32.mrf.mxu3 }
  0xf2   : > { %2702 = vmatpush.bf16.msrb.mxu3 %v5384_v54 }
  0xf4   : > { %2507 = vmatpush.bf16.msrb.mxu1 %v5367_v57 }
  0xf6   : > { %2703 = vmatpush.bf16.msrb.mxu3 %v5383_v59 }
  0xf8   : > { %2508 = vmatpush.bf16.msrb.mxu1 %v5366_v63 }
  0xfa   : > { %2704 = vmatpush.bf16.msrb.mxu3 %v5382_v1  ;;  %v5394_v1 = vld [vmem:[#allocation8 + $0x228] sm:$0xff] }
  0xfc   : > { %2509 = vmatpush.bf16.msrb.mxu1 %v5365_v61 }
  0xfe   : > { %2705 = vmatpush.bf16.msrb.mxu3 %v5381_v56 }
 0x100   : > { %v1526_v20 = vpop.f32.mrf.mxu0 }
 0x101   : > { %v1540_v21 = vpop.f32.mrf.mxu1 }
 0x102   : > { %v1541_v55 = vadd.f32 %v1540_v21, %v1526_v20  ;;  %v1133_v21 = vadd.f32 %v6381_v9, %v1119_v10 }
 0x104   : > { %v1147_v28 = vadd.f32 %v6383_v17, %v1133_v21 }
 0x106   : > { %v1161_v39 = vadd.f32 %v6385_v18, %v1147_v28  ;;  %v1915_v18 = vpop.permute.xlu0 %1914 }
 0x108   : > { %v1554_v33 = vpop.f32.mrf.mxu2  ;;  %v1528_v43 = vpop.f32.mrf.mxu0 }
 0x109   : > { %v1568_v35 = vpop.f32.mrf.mxu3  ;;  %v1542_v44 = vpop.f32.mrf.mxu1  ;;  %v1555_v0 = vadd.f32 %v1554_v33, %v1541_v55 }
 0x10a   : > { %v1543_v12 = vadd.f32 %v1542_v44, %v1528_v43 }
 0x10b   : > { %v1569_v11 = vadd.f32 %v1568_v35, %v1555_v0  ;;  %v2222_v0 = vld [vmem:[#allocation2] sm:$0x8] }
 0x10d   : > { %v1573_v22 = vadd.f32 %v1569_v11, %v1159_v19  ;;  %v2243_v11 = vunpack.c.l.b16 %v2222_v0  ;;  %v2540_v19 = vunpack.c.l.b16 %v6402_v5 }
 0x110   : > { %v1556_v49 = vpop.f32.mrf.mxu2 }
 0x111   : > { %v1570_v29 = vpop.f32.mrf.mxu3  ;;  %v1557_v23 = vadd.f32 %v1556_v49, %v1543_v12 }
 0x113   : > { %v1571_v33 = vadd.f32 %v1570_v29, %v1557_v23 }
 0x115   : > { %v1574_v17 = vadd.f32 %v1571_v33, %v1161_v39 }
 0x120   : > { %v1849_v40 = vpop.f32.mrf.mxu0 }
 0x121   : > { %v1863_v62 = vpop.f32.mrf.mxu1 }
 0x122   : > { %v1864_v7 = vadd.f32 %v1863_v62, %v1849_v40  ;;  %v1943_v40 = vld [vmem:[#allocation2] sm:$0xc] }
 0x123   : > { %v1924_v62 = vld [vmem:[#allocation2] sm:$0xe]  ;;  %v1964_v51 = vunpack.c.l.b16 %v1943_v40  ;;  %v2542_v40 = vpack.c.b16 %v2540_v19, %v2540_v19 }
 0x124   : > { %v2036_v3 = vunpack.c.l.b16 %v1924_v62 }
 0x128   : > { %v1877_v60 = vpop.f32.mrf.mxu2  ;;  %v1851_v25 = vpop.f32.mrf.mxu0 }
 0x129   : > { %v1891_v14 = vpop.f32.mrf.mxu3  ;;  %v1878_v20 = vadd.f32 %v1877_v60, %v1864_v7  ;;  %v1865_v26 = vpop.f32.mrf.mxu1 }
 0x12a   : > { %v1866_v9 = vadd.f32 %v1865_v26, %v1851_v25 }
 0x12b   : > { %v1892_v8 = vadd.f32 %v1891_v14, %v1878_v20 }
 0x12d   : > { %v1896_v30 = vadd.f32 %v1892_v8, %v1573_v22 }
 0x12f   : > { %v1901_v35 = vadd.f32 %v5545_v24, %v1896_v30 }
 0x130   : > { %v1879_v38 = vpop.f32.mrf.mxu2 }
 0x131   : > { %v1903_v41 = vmax.f32 %v1901_v35, 0.0  ;;  %v1880_v42 = vadd.f32 %v1879_v38, %v1866_v9  ;;  %v1893_v43 = vpop.f32.mrf.mxu3 }
 0x133   : > { %v1917_v44 = vmul.f32 %v1910_v36, %v1903_v41  ;;  %v1894_v45 = vadd.f32 %v1893_v43, %v1880_v42 }
 0x135   : > { %v1919_v46 = vpack.c.bf16 %v1917_v44, %v1917_v44  ;;  %v1897_v48 = vadd.f32 %v1894_v45, %v1574_v17 }
 0x137   : > { %1921 = vst [vmem:[#allocation2 + $0x4] sm:$0xf] %v1919_v46  ;;  %v1902_v50 = vadd.f32 %v5545_v24, %v1897_v48  ;;  %v5395_v48 = vld [vmem:[#allocation8 + $0x230] sm:$0xff] }
 0x139   : > { %v1904_v55 = vmax.f32 %v1902_v50, 0.0 }
 0x13b   : > { %v1918_v49 = vmul.f32 %v1915_v18, %v1904_v55 }
 0x13d   : > { %v1920_v29 = vpack.c.bf16 %v1918_v49, %v1918_v49 }
 0x13e   : > { %v2518_v54 = vld [vmem:[#allocation2 + $0x4] sm:$0xe] }
 0x13f   : > { %1922 = vst [vmem:[#allocation2 + $0x8] sm:$0xf] %v1920_v29  ;;  %v2539_v61 = vunpack.c.l.b16 %v2518_v54  ;;  %v5410_v54 = vld [vmem:[#allocation11 + $0x68] sm:$0xff] }
 0x146   : > { %v6404_v7 = vld [vmem:[#allocation2 + $0x4] sm:$0xff]  }
 0x147   : > { %v1926_v2 = vld [vmem:[#allocation2 + $0x8] sm:$0x3]  ;;  %v1965_v12 = vunpack.c.l.b16 %v6404_v7  ;;  %v2244_v14 = vunpack.c.h.b16 %v6404_v7 }
 0x148   : > { %v2118_v10 = vld [vmem:[#allocation2 + $0x8] sm:$0x7]  ;;  %v1966_v13 = vunpack.c.l.b16 %v1926_v2 }
 0x149   : > { %v2137_v60 = vunpack.c.l.b16 %v2118_v10  ;;  %v6408_v15 = vld [vmem:[#allocation2 + $0x4] sm:$0xff]   ;;  %v1967_v20 = vpack.c.b16 %v1965_v12, %v1964_v51  ;;  %v2037_v21 = vpack.c.b16 %v1965_v12, %v2036_v3  ;;  %v2245_v23 = vpack.c.b16 %v1965_v12, %v2243_v11  ;;  %v2714_v51 = vld [vmem:[#allocation2 + $0xc] sm:$0x7] }
 0x14a   : > { %v1968_v6 = vpack.c.b16 %v1966_v13, %v1966_v13  ;;  %v2246_v8 = vpack.c.b16 %v2244_v14, %v2244_v14  ;;  %v2436_v24 = vunpack.c.h.b16 %v6408_v15  ;;  %v2439_v3 = vpack.c.b16 %v2437_v16, %v2437_v16  ;;  %v5393_v2 = vld [vmem:[#allocation8 + $0x220] sm:$0xff] }
 0x14b   : > { %v2138_v22 = vpack.c.b16 %v2137_v60, %v2137_v60  ;;  %v1969_v25 = vrot.slane %v1967_v20, 2  ;;  %v2039_v28 = vshrl.u32 %v2037_v21, 16  ;;  %v2042_v30 = vshll.u32 %v2037_v21, 16  ;;  %v2625_v11 = vld [vmem:[#allocation2 + $0x4] sm:$0xc] }
 0x14c   : > { %v1970_v26 = vrot.slane %v1968_v6, 2  ;;  %v2047_v53 = vshrl.u32 %v1968_v6, 16  ;;  %v2050_v31 = vshll.u32 %v1968_v6, 16  ;;  %v2141_v32 = vshrl.u32 %v1967_v20, 16  ;;  %v5392_v6 = vld [vmem:[#allocation8 + $0x218] sm:$0xff] }
 0x14d   : > { %v2144_v33 = vshll.u32 %v1967_v20, 16  ;;  %v2041_v9 = vrot.slane %v2039_v28, 1  ;;  %v2044_v36 = vrot.slane %v2042_v30, 2  ;;  %v2149_v38 = vshrl.u32 %v2138_v22, 16 }
 0x14e   : > { %v1971_v35 = vsel %vm567_vm0, %v1969_v25, %v1970_v26  ;;  %v2049_v39 = vrot.slane %v2047_v53, 1  ;;  %v2052_v41 = vrot.slane %v2050_v31, 2  ;;  %v2143_v42 = vrot.slane %v2141_v32, 2  ;;  %v5391_v53 = vld [vmem:[#allocation8 + $0x210] sm:$0xff] }
 0x14f   : > { %2029 = vmatmul.bf16.vlgmr.msra.gmra.mxu0 %v1971_v35  ;;  %v2146_v43 = vrot.slane %v2144_v33, 3  ;;  %v2045_v17 = vor.u32 %v2044_v36, %v2041_v9  ;;  %v2151_v44 = vrot.slane %v2149_v38, 2  ;;  %v2152_v45 = vshll.u32 %v2138_v22, 16 }
 0x150   : > { %2801 = vmatpush.bf16.msra.mxu0 %v5396_v27  ;;  %v2248_v46 = vshrl.u32 %v2245_v23, 16  ;;  %v2053_v50 = vor.u32 %v2052_v41, %v2049_v39  ;;  %v2251_v52 = vshll.u32 %v2245_v23, 16  ;;  %v2256_v47 = vshrl.u32 %v2246_v8, 16 }
 0x151   : > { %v2147_v55 = vor.u32 %v2146_v43, %v2143_v42  ;;  %v2154_v57 = vrot.slane %v2152_v45, 3  ;;  %v2259_v18 = vshll.u32 %v2246_v8, 16  ;;  %v2541_v0 = vpack.c.b16 %v2436_v24, %v2539_v61  ;;  %v5389_v45 = vld [vmem:[#allocation8 + $0x200] sm:$0xff] }
 0x152   : > { %v2250_v58 = vrot.slane %v2248_v46, 3  ;;  %v2054_v59 = vsel %vm842_vm1, %v2045_v17, %v2053_v50  ;;  %v2253_v49 = vrot.slane %v2251_v52, 4  ;;  %v2258_v29 = vrot.slane %v2256_v47, 3  ;;  %v5412_v52 = vld [vmem:[#allocation11 + $0x78] sm:$0xff]  ;;  %v5411_v47 = vld [vmem:[#allocation11 + $0x70] sm:$0xff] }
 0x153   : > { %2112 = vmatmul.bf16.vlgmr.msra.gmra.mxu1 %v2054_v59  ;;  %v2155_v63 = vor.u32 %v2154_v57, %v2151_v44  ;;  %v2261_v37 = vrot.slane %v2259_v18, 4  ;;  %v2444_v4 = vshll.u32 %v6408_v15, 16  ;;  %v2552_v10 = vshrl.u32 %v2542_v40, 16  ;;  %v5408_v57 = vld [vmem:[#allocation11 + $0x58] sm:$0xff] }
 0x154   : > { %2802 = vmatpush.bf16.msra.mxu0 %v5395_v48  ;;  %v2254_v34 = vor.u32 %v2253_v49, %v2250_v58  ;;  %v2733_v12 = vunpack.c.l.b16 %v2714_v51  ;;  %v2544_v13 = vshrl.u32 %v2541_v0, 16  ;;  %v2547_v60 = vshll.u32 %v2541_v0, 16  ;;  %2940 = vmatpush.bf16.msra.mxu1 %v5412_v52  ;;  %v5404_v18 = vld [vmem:[#allocation11 + $0x38] sm:$0xff]  ;;  %v5426_v0 = vld [vmem:[#allocation11 + $0xe8] sm:$0xff] }
 0x155   : > { %v2156_v62 = vsel %vm2139_vm3, %v2147_v55, %v2155_v63  ;;  %v2262_v56 = vor.u32 %v2261_v37, %v2258_v29  ;;  %v2555_v14 = vshll.u32 %v2542_v40, 16  ;;  %v2446_v19 = vrot.slane %v2444_v4, 1  ;;  %v5409_v55 = vld [vmem:[#allocation11 + $0x60] sm:$0xff]  ;;  %v5420_v59 = vld [vmem:[#allocation11 + $0xb8] sm:$0xff]  ;;  %v5407_v29 = vld [vmem:[#allocation11 + $0x50] sm:$0xff] }
 0x156   : > { %2214 = vmatmul.bf16.vlgmr.msra.gmra.mxu2 %v2156_v62  ;;  %v2449_v20 = vshll.u32 %v2439_v3, 16  ;;  %v2644_v21 = vunpack.c.l.b16 %v2625_v11  ;;  %v2442_v16 = vshrl.u32 %v6408_v15, 16  ;;  %v2554_v22 = vrot.slane %v2552_v10, 1  ;;  %v5390_v15 = vld [vmem:[#allocation8 + $0x208] sm:$0xff]  ;;  %v5428_v49 = vld [vmem:[#allocation11 + $0xf8] sm:$0xff]  ;;  %v5403_v63 = vld [vmem:[#allocation11 + $0x30] sm:$0xff] }
 0x157   : > { %v2263_v5 = vsel %vm1252_vm2, %v2254_v34, %v2262_v56  ;;  %v2734_v23 = vpack.c.b16 %v2733_v12, %v2733_v12  ;;  %v2546_v8 = vrot.slane %v2544_v13, 1  ;;  %v2549_v25 = vrot.slane %v2547_v60, 2  ;;  %3023 = vmatpush.bf16.msra.mxu2 %v5404_v18  ;;  %v5419_v37 = vld [vmem:[#allocation11 + $0xb0] sm:$0xff]  ;;  %v5402_v62 = vld [vmem:[#allocation11 + $0x28] sm:$0xff]  ;;  %v5405_v3 = vld [vmem:[#allocation11 + $0x40] sm:$0xff] }
 0x158   : > { %2803 = vmatpush.bf16.msra.mxu0 %v5394_v1  ;;  %2321 = vmatmul.bf16.vlgmr.msra.gmra.mxu3 %v2263_v5  ;;  %v2557_v26 = vrot.slane %v2555_v14, 2  ;;  %v2645_v27 = vpack.c.b16 %v2436_v24, %v2644_v21  ;;  %v2447_v28 = vor.u32 %v2446_v19, %v2442_v16  ;;  %v2451_v30 = vrot.slane %v2449_v20, 1  ;;  %v5427_v1 = vld [vmem:[#allocation11 + $0xf0] sm:$0xff]  ;;  %v5418_v56 = vld [vmem:[#allocation11 + $0xa8] sm:$0xff]  ;;  %v5401_v4 = vld [vmem:[#allocation11 + $0x20] sm:$0xff] }
 0x159   : > { %v2744_v31 = vshrl.u32 %v2734_v23, 16  ;;  %v2747_v32 = vshll.u32 %v2734_v23, 16  ;;  %v2550_v33 = vor.u32 %v2549_v25, %v2546_v8  ;;  %v2647_v41 = vrot.slane %v2542_v40, 2  ;;  %2941 = vmatpush.bf16.msra.mxu1 %v5411_v47  ;;  %3124 = vmatpush.bf16.msra.mxu3 %v5420_v59  ;;  %v5406_v40 = vld [vmem:[#allocation11 + $0x48] sm:$0xff]  ;;  %v5417_v5 = vld [vmem:[#allocation11 + $0xa0] sm:$0xff]  ;;  %v5436_v11 = vld [vmem:[#allocation11 + $0x138] sm:$0xff] }
 0x15a   : > { %v2558_v35 = vor.u32 %v2557_v26, %v2554_v22  ;;  %v2736_v9 = vshrl.u32 %v2645_v27, 16  ;;  %v2739_v36 = vshll.u32 %v2645_v27, 16  ;;  %v2452_v38 = vsel %vm2440_vm4, %v2447_v28, %v2451_v30  ;;  %v5425_v10 = vld [vmem:[#allocation11 + $0xe0] sm:$0xff]  ;;  %v5400_v14 = vld [vmem:[#allocation11 + $0x18] sm:$0xff]  ;;  %v5399_v16 = vld [vmem:[#allocation11 + $0x10] sm:$0xff] }
 0x15b   : > { %v2646_v39 = vrot.slane %v2645_v27, 2  ;;  %v2746_v24 = vrot.slane %v2744_v31, 2  ;;  %v2749_v17 = vrot.slane %v2747_v32, 3  ;;  %3024 = vmatpush.bf16.msra.mxu2 %v5403_v63  ;;  %v5416_v19 = vld [vmem:[#allocation11 + $0x98] sm:$0xff]  ;;  %v5415_v22 = vld [vmem:[#allocation11 + $0x90] sm:$0xff]  ;;  %v5434_v25 = vld [vmem:[#allocation11 + $0x128] sm:$0xff]  ;;  %v2829_v63 = vpop.permute.xlu1 %2828 }
 0x15c   : > { %2804 = vmatpush.bf16.msra.mxu0 %v5393_v2  ;;  %v2738_v42 = vrot.slane %v2736_v9, 2  ;;  %v2741_v43 = vrot.slane %v2739_v36, 3  ;;  %v5424_v20 = vld [vmem:[#allocation11 + $0xd8] sm:$0xff]  ;;  %v5423_v8 = vld [vmem:[#allocation11 + $0xd0] sm:$0xff]  ;;  %v5414_v31 = vld [vmem:[#allocation11 + $0x88] sm:$0xff] }
 0x15d   : > { %v2648_v44 = vsel %vm567_vm0, %v2646_v39, %v2647_v41  ;;  %v2750_v48 = vor.u32 %v2749_v17, %v2746_v24  ;;  %2942 = vmatpush.bf16.msra.mxu1 %v5410_v54  ;;  %3125 = vmatpush.bf16.msra.mxu3 %v5419_v37  ;;  %v5422_v32 = vld [vmem:[#allocation11 + $0xc8] sm:$0xff]  ;;  %v5397_v39 = vld [vmem:[#allocation11] sm:$0xff]  ;;  %v5452_v17 = vld [vmem:[#allocation11 + $0x1b8] sm:$0xff] }
 0x15e   : > { %v2742_v46 = vor.u32 %v2741_v43, %v2738_v42  ;;  %v5413_v41 = vld [vmem:[#allocation11 + $0x80] sm:$0xff]  ;;  %v5444_v43 = vld [vmem:[#allocation11 + $0x178] sm:$0xff]  ;;  %v5431_v54 = vld [vmem:[#allocation11 + $0x110] sm:$0xff] }
 0x15f   : > { %2404 = vmatmul.bf16.vlgmr.msrb.gmra.mxu0 %v6404_v7  ;;  %v2559_v7 = vsel %vm842_vm1, %v2550_v33, %v2558_v35  ;;  %3025 = vmatpush.bf16.msra.mxu2 %v5402_v62  ;;  %v5433_v33 = vld [vmem:[#allocation11 + $0x120] sm:$0xff]  ;;  %v5546_v52 = vld [vmem:[#allocation9] ss:$0 sm:$0xff]  ;;  %v5451_v18 = vld [vmem:[#allocation11 + $0x1b0] sm:$0xff] }
 0x160   : > { %2805 = vmatpush.bf16.msra.mxu0 %v5392_v6  ;;  %v2751_v50 = vsel %vm2139_vm3, %v2742_v46, %v2750_v48  ;;  %v5435_v6 = vld [vmem:[#allocation11 + $0x130] sm:$0xff]  ;;  %v5421_v24 = vld [vmem:[#allocation11 + $0xc0] sm:$0xff]  ;;  %v5460_v46 = vld [vmem:[#allocation11 + $0x1f8] sm:$0xff] }
 0x161   : > { %2943 = vmatpush.bf16.msra.mxu1 %v5409_v55  ;;  %3126 = vmatpush.bf16.msra.mxu3 %v5418_v56  ;;  %v5459_v59 = vld [vmem:[#allocation11 + $0x1f0] sm:$0xff]  ;;  %v5450_v62 = vld [vmem:[#allocation11 + $0x1a8] sm:$0xff] }
 0x163   : > { %2510 = vmatmul.bf16.vlgmr.msrb.gmra.mxu1 %v2452_v38  ;;  %3026 = vmatpush.bf16.msra.mxu2 %v5401_v4 }
 0x164   : > { %2806 = vmatpush.bf16.msra.mxu0 %v5391_v53  ;;  %v5398_v53 = vld [vmem:[#allocation11 + $0x8] sm:$0xff] }
 0x165   : > { %2944 = vmatpush.bf16.msra.mxu1 %v5408_v57  ;;  %3127 = vmatpush.bf16.msra.mxu3 %v5417_v5  ;;  %v5429_v5 = vld [vmem:[#allocation11 + $0x100] sm:$0xff] }
 0x166   : > { %2617 = vmatmul.bf16.vlgmr.msrb.gmra.mxu2 %v2559_v7  ;;  %v5432_v7 = vld [vmem:[#allocation11 + $0x118] sm:$0xff] }
 0x167   : > { %3027 = vmatpush.bf16.msra.mxu2 %v5400_v14 }
 0x168   : > { %2807 = vmatpush.bf16.msra.mxu0 %v5390_v15  ;;  %2706 = vmatmul.bf16.vlgmr.msrb.gmra.mxu3 %v2648_v44 }
 0x169   : > { %2945 = vmatpush.bf16.msra.mxu1 %v5407_v29  ;;  %3128 = vmatpush.bf16.msra.mxu3 %v5416_v19  ;;  %v5440_v19 = vld [vmem:[#allocation11 + $0x158] sm:$0xff] }
 0x16b   : > { %3028 = vmatpush.bf16.msra.mxu2 %v5399_v16 }
 0x16c   : > { %2808 = vmatpush.bf16.msra.mxu0 %v5389_v45 }
 0x16d   : > { %2946 = vmatpush.bf16.msra.mxu1 %v5406_v40  ;;  %3129 = vmatpush.bf16.msra.mxu3 %v5415_v22  ;;  %v5442_v40 = vld [vmem:[#allocation11 + $0x168] sm:$0xff] }
 0x16f   : > { %2809 = vmatmul.bf16.vlgmr.msra.gmra.mxu0 %v2751_v50  ;;  %3029 = vmatpush.bf16.msra.mxu2 %v5398_v53  ;;  %v5454_v53 = vld [vmem:[#allocation11 + $0x1c8] sm:$0xff] }
 0x170   : > { %3231 = vmatpush.bf16.msrb.mxu0 %v5428_v49 }
 0x171   : > { %2947 = vmatpush.bf16.msra.mxu1 %v5405_v3  ;;  %3130 = vmatpush.bf16.msra.mxu3 %v5414_v31  ;;  %v3140_v31 = vld [vmem:[#allocation3] sm:$0x8] }
 0x173   : > { %3030 = vmatpush.bf16.msra.mxu2 %v5397_v39 }
 0x174   : > { %3232 = vmatpush.bf16.msrb.mxu0 %v5427_v1  ;;  %v5430_v1 = vld [vmem:[#allocation11 + $0x108] sm:$0xff] }
 0x175   : > { %3314 = vmatpush.bf16.msrb.mxu1 %v5436_v11  ;;  %3131 = vmatpush.bf16.msra.mxu3 %v5413_v41  ;;  %v5441_v11 = vld [vmem:[#allocation11 + $0x160] sm:$0xff] }
 0x177   : > { %3419 = vmatpush.bf16.msrb.mxu2 %v5444_v43 }
 0x178   : > { %3233 = vmatpush.bf16.msrb.mxu0 %v5426_v0 }
 0x179   : > { %3315 = vmatpush.bf16.msrb.mxu1 %v5435_v6  ;;  %3526 = vmatpush.bf16.msrb.mxu3 %v5452_v17  ;;  %v2834_v6 = vpop.permute.xlu1 %2833 }
 0x17c   : > { %3234 = vmatpush.bf16.msrb.mxu0 %v5425_v10 }
 0x17d   : > { %3316 = vmatpush.bf16.msrb.mxu1 %v5434_v25  ;;  %3527 = vmatpush.bf16.msrb.mxu3 %v5451_v18  ;;  %v5455_v25 = vld [vmem:[#allocation11 + $0x1d0] sm:$0xff]  ;;  %v5468_v18 = vld [vmem:[#allocation11 + $0x238] sm:$0xff] }
 0x180   : > { %3235 = vmatpush.bf16.msrb.mxu0 %v5424_v20  ;;  %v5448_v20 = vld [vmem:[#allocation11 + $0x198] sm:$0xff] }
 0x181   : > { %3317 = vmatpush.bf16.msrb.mxu1 %v5433_v33  ;;  %3528 = vmatpush.bf16.msrb.mxu3 %v5450_v62 }
 0x184   : > { %3236 = vmatpush.bf16.msrb.mxu0 %v5423_v8  ;;  %v5447_v8 = vld [vmem:[#allocation11 + $0x190] sm:$0xff] }
 0x185   : > { %3318 = vmatpush.bf16.msrb.mxu1 %v5432_v7 }
 0x188   : > { %3237 = vmatpush.bf16.msrb.mxu0 %v5422_v32  ;;  %v6428_v32 = vld [vmem:[#allocation3 + $0xc] sm:$0x3] }
 0x189   : > { %3319 = vmatpush.bf16.msrb.mxu1 %v5431_v54 }
 0x18c   : > { %3238 = vmatpush.bf16.msrb.mxu0 %v5421_v24  ;;  %v3161_v24 = vunpack.c.l.b16 %v3140_v31 }
 0x18d   : > { %3320 = vmatpush.bf16.msrb.mxu1 %v5430_v1 }
 0x190   : > { %3615 = vmatpush.bf16.msra.mxu0 %v5460_v46 }
 0x191   : > { %3321 = vmatpush.bf16.msrb.mxu1 %v5429_v5 }
 0x194   : > { %3616 = vmatpush.bf16.msra.mxu0 %v5459_v59 }
 0x1cc   : > { %v2030_v58 = vpop.f32.mrf.mxu0 }
 0x1d0   : > { %v2113_v61 = vpop.f32.mrf.mxu1 }
 0x1d1   : > { %v2114_v60 = vadd.f32 %v2113_v61, %v2030_v58  ;;  %v5443_v58 = vld [vmem:[#allocation11 + $0x170] sm:$0xff] }
 0x1d2   : > { %3420 = vmatpush.bf16.msrb.mxu2 %v5443_v58 }
 0x1d4   : > { %v2032_v34 = vpop.f32.mrf.mxu0 }
 0x1d6   : > { %3421 = vmatpush.bf16.msrb.mxu2 %v5442_v40 }
 0x1d8   : > { %v2115_v51 = vpop.f32.mrf.mxu1 }
 0x1d9   : > { %v2215_v2 = vpop.f32.mrf.mxu2  ;;  %v2116_v35 = vadd.f32 %v2115_v51, %v2032_v34  ;;  %v5458_v51 = vld [vmem:[#allocation11 + $0x1e8] sm:$0xff] }
 0x1da   : > { %v2220_v21 = vadd.f32 %v2215_v2, %v2114_v60  ;;  %3617 = vmatpush.bf16.msra.mxu0 %v5458_v51  ;;  %3422 = vmatpush.bf16.msrb.mxu2 %v5441_v11 }
 0x1db   : > { %v2322_v12 = vpop.f32.mrf.mxu3 }
 0x1dc   : > { %v2405_v13 = vpop.f32.mrf.mxu0  ;;  %v2327_v30 = vadd.f32 %v2322_v12, %v2220_v21  ;;  %v5449_v12 = vld [vmem:[#allocation11 + $0x1a0] sm:$0xff]  ;;  %v5456_v21 = vld [vmem:[#allocation11 + $0x1d8] sm:$0xff] }
 0x1dd   : > { %3529 = vmatpush.bf16.msrb.mxu3 %v5449_v12  ;;  %v5467_v12 = vld [vmem:[#allocation11 + $0x230] sm:$0xff] }
 0x1de   : > { %v2410_v9 = vadd.f32 %v2405_v13, %v2327_v30  ;;  %v5457_v13 = vld [vmem:[#allocation11 + $0x1e0] sm:$0xff]  ;;  %3423 = vmatpush.bf16.msrb.mxu2 %v5440_v19  ;;  %v2843_v30 = vld [vmem:[#allocation3] sm:$0xe] }
 0x1df   : > { %3618 = vmatpush.bf16.msra.mxu0 %v5457_v13 }
 0x1e0   : > { %v2511_v26 = vpop.f32.mrf.mxu1 }
 0x1e1   : > { %v2217_v23 = vpop.f32.mrf.mxu2  ;;  %v2516_v38 = vadd.f32 %v2511_v26, %v2410_v9  ;;  %3530 = vmatpush.bf16.msrb.mxu3 %v5448_v20  ;;  %v5438_v26 = vld [vmem:[#allocation11 + $0x148] sm:$0xff]  ;;  %v5437_v9 = vld [vmem:[#allocation11 + $0x140] sm:$0xff] }
 0x1e2   : > { %v2221_v36 = vadd.f32 %v2217_v23, %v2116_v35  ;;  %v5439_v23 = vld [vmem:[#allocation11 + $0x150] sm:$0xff]  ;;  %v2955_v35 = vunpack.c.l.b16 %v2843_v30 }
 0x1e3   : > { %v2324_v27 = vpop.f32.mrf.mxu3  ;;  %3619 = vmatpush.bf16.msra.mxu0 %v5456_v21  ;;  %3424 = vmatpush.bf16.msrb.mxu2 %v5439_v23 }
 0x1e4   : > { %v2407_v28 = vpop.f32.mrf.mxu0  ;;  %v2328_v48 = vadd.f32 %v2324_v27, %v2221_v36  ;;  %v5446_v27 = vld [vmem:[#allocation11 + $0x188] sm:$0xff]  ;;  %v5445_v36 = vld [vmem:[#allocation11 + $0x180] sm:$0xff] }
 0x1e5   : > { %3531 = vmatpush.bf16.msrb.mxu3 %v5447_v8 }
 0x1e6   : > { %v2411_v55 = vadd.f32 %v2407_v28, %v2328_v48  ;;  %v2862_v28 = vld [vmem:[#allocation3] sm:$0xc] }
 0x1e7   : > { %3620 = vmatpush.bf16.msra.mxu0 %v5455_v25  ;;  %v2883_v33 = vunpack.c.l.b16 %v2862_v28  ;;  %3425 = vmatpush.bf16.msrb.mxu2 %v5438_v26  ;;  %v5466_v28 = vld [vmem:[#allocation11 + $0x228] sm:$0xff] }
 0x1e8   : > { %v2513_v47 = vpop.f32.mrf.mxu1 }
 0x1e9   : > { %v2618_v15 = vpop.f32.mrf.mxu2  ;;  %v2517_v49 = vadd.f32 %v2513_v47, %v2411_v55  ;;  %3532 = vmatpush.bf16.msrb.mxu3 %v5446_v27 }
 0x1ea   : > { %v2623_v42 = vadd.f32 %v2618_v15, %v2516_v38  ;;  %v5453_v38 = vld [vmem:[#allocation11 + $0x1c0] sm:$0xff] }
 0x1eb   : > { %v2707_v44 = vpop.f32.mrf.mxu3  ;;  %3621 = vmatpush.bf16.msra.mxu0 %v5454_v53  ;;  %3426 = vmatpush.bf16.msrb.mxu2 %v5437_v9  ;;  %v3631_v9 = vld [vmem:[#allocation3 + $0xc] sm:$0x7] }
 0x1ec   : > { %v2810_v45 = vpop.f32.mrf.mxu0  ;;  %v2712_v50 = vadd.f32 %v2707_v44, %v2623_v42 }
 0x1ed   : > { %3533 = vmatpush.bf16.msrb.mxu3 %v5445_v36 }
 0x1ee   : > { %v2815_v57 = vadd.f32 %v2810_v45, %v2712_v50  ;;  %v3457_v45 = vunpack.c.l.b16 %v6428_v32 }
 0x1ef   : > { %3622 = vmatpush.bf16.msra.mxu0 %v5453_v38 }
 0x1f0   : > { %v2820_v29 = vadd.f32 %v5546_v52, %v2815_v57  ;;  %v3459_v31 = vpack.c.b16 %v3457_v45, %v3457_v45 }
 0x1f1   : > { %v2620_v37 = vpop.f32.mrf.mxu2 }
 0x1f2   : > { %v2822_v61 = vmax.f32 %v2820_v29, 0.0  ;;  %v2624_v34 = vadd.f32 %v2620_v37, %v2517_v49  ;;  %v3472_v45 = vshll.u32 %v3459_v31, 16 }
 0x1f3   : > { %v2709_v56 = vpop.f32.mrf.mxu3 }
 0x1f4   : > { %v2812_v0 = vpop.f32.mrf.mxu0  ;;  %v2836_v3 = vmul.f32 %v2829_v63, %v2822_v61  ;;  %v2713_v4 = vadd.f32 %v2709_v56, %v2624_v34  ;;  %v3332_v56 = vld [vmem:[#allocation3 + $0xc] sm:$0x1] }
 0x1f5   : > { %v3355_v19 = vunpack.c.l.b16 %v3332_v56 }
 0x1f6   : > { %v2838_v2 = vpack.c.bf16 %v2836_v3, %v2836_v3  ;;  %v2816_v10 = vadd.f32 %v2812_v0, %v2713_v4 }
 0x1f7   : > { %v3357_v36 = vpack.c.b16 %v3355_v19, %v3355_v19 }
 0x1f8   : > { %2840 = vst [vmem:[#allocation3 + $0x4] sm:$0xf] %v2838_v2  ;;  %v2821_v60 = vadd.f32 %v5546_v52, %v2816_v10 }
 0x1fa   : > { %v2823_v14 = vmax.f32 %v2821_v60, 0.0 }
 0x1fc   : > { %v2837_v16 = vmul.f32 %v2834_v6, %v2823_v14 }
 0x1fe   : > { %v2839_v22 = vpack.c.bf16 %v2837_v16, %v2837_v16 }
 0x1ff   : > { %v3435_v20 = vld [vmem:[#allocation3 + $0x4] sm:$0xe] }
 0x200   : > { %2841 = vst [vmem:[#allocation3 + $0x8] sm:$0xf] %v2839_v22  ;;  %v3456_v30 = vunpack.c.l.b16 %v3435_v20 }
 0x207   : > { %v6430_v39 = vld [vmem:[#allocation3 + $0x4] sm:$0xff]  }
 0x208   : > { %v2845_v41 = vld [vmem:[#allocation3 + $0x8] sm:$0x3]  ;;  %v2884_v7 = vunpack.c.l.b16 %v6430_v39  ;;  %v3162_v17 = vunpack.c.h.b16 %v6430_v39 }
 0x209   : > { %v3037_v15 = vld [vmem:[#allocation3 + $0x8] sm:$0x7]  ;;  %v2885_v42 = vunpack.c.l.b16 %v2845_v41 }
 0x20a   : > { %v3056_v43 = vunpack.c.l.b16 %v3037_v15  ;;  %v6434_v44 = vld [vmem:[#allocation3 + $0x4] sm:$0xff]   ;;  %v2886_v46 = vpack.c.b16 %v2884_v7, %v2883_v33  ;;  %v2956_v50 = vpack.c.b16 %v2884_v7, %v2955_v35  ;;  %v3163_v47 = vpack.c.b16 %v2884_v7, %v3161_v24  ;;  %v5465_v15 = vld [vmem:[#allocation11 + $0x220] sm:$0xff] }
 0x20b   : > { %v2887_v48 = vpack.c.b16 %v2885_v42, %v2885_v42  ;;  %v3164_v54 = vpack.c.b16 %v3162_v17, %v3162_v17  ;;  %v3354_v55 = vunpack.c.h.b16 %v6434_v44  ;;  %v3361_v38 = vshll.u32 %v6434_v44, 16  ;;  %v3542_v7 = vld [vmem:[#allocation3 + $0x4] sm:$0xc] }
 0x20c   : > { %v3057_v52 = vpack.c.b16 %v3056_v43, %v3056_v43  ;;  %v2888_v57 = vrot.slane %v2886_v46, 2  ;;  %v2958_v59 = vshrl.u32 %v2956_v50, 16  ;;  %v2961_v49 = vshll.u32 %v2956_v50, 16  ;;  %v5464_v50 = vld [vmem:[#allocation11 + $0x218] sm:$0xff] }
 0x20d   : > { %v2889_v58 = vrot.slane %v2887_v48, 2  ;;  %v2966_v29 = vshrl.u32 %v2887_v48, 16  ;;  %v2969_v63 = vshll.u32 %v2887_v48, 16  ;;  %v3059_v37 = vshrl.u32 %v2886_v46, 16 }
 0x20e   : > { %v3062_v1 = vshll.u32 %v2886_v46, 16  ;;  %v2960_v34 = vrot.slane %v2958_v59, 1  ;;  %v2963_v40 = vrot.slane %v2961_v49, 2  ;;  %v3067_v62 = vshrl.u32 %v3057_v52, 16 }
 0x20f   : > { %v2890_v61 = vsel %vm567_vm0, %v2888_v57, %v2889_v58  ;;  %v2968_v0 = vrot.slane %v2966_v29, 1  ;;  %v2971_v51 = vrot.slane %v2969_v63, 2  ;;  %v3061_v3 = vrot.slane %v3059_v37, 2  ;;  %v5463_v37 = vld [vmem:[#allocation11 + $0x210] sm:$0xff] }
 0x210   : > { %2948 = vmatmul.bf16.vlgmr.msra.gmra.mxu1 %v2890_v61  ;;  %v3064_v4 = vrot.slane %v3062_v1, 3  ;;  %v2964_v5 = vor.u32 %v2963_v40, %v2960_v34  ;;  %v3069_v2 = vrot.slane %v3067_v62, 2  ;;  %v3070_v10 = vshll.u32 %v3057_v52, 16 }
 0x211   : > { %3718 = vmatpush.bf16.msra.mxu1 %v5468_v18  ;;  %v3166_v11 = vshrl.u32 %v3163_v47, 16  ;;  %v2972_v13 = vor.u32 %v2971_v51, %v2968_v0  ;;  %v3169_v60 = vshll.u32 %v3163_v47, 16  ;;  %v3174_v14 = vshrl.u32 %v3164_v54, 16 }
 0x212   : > { %v3065_v6 = vor.u32 %v3064_v4, %v3061_v3  ;;  %v3072_v21 = vrot.slane %v3070_v10, 3  ;;  %v3177_v22 = vshll.u32 %v3164_v54, 16  ;;  %v3458_v35 = vpack.c.b16 %v3354_v55, %v3456_v30 }
 0x213   : > { %v3168_v16 = vrot.slane %v3166_v11, 3  ;;  %v2973_v23 = vsel %vm842_vm1, %v2964_v5, %v2972_v13  ;;  %v3171_v8 = vrot.slane %v3169_v60, 4  ;;  %v3176_v25 = vrot.slane %v3174_v14, 3  ;;  %v5461_v11 = vld [vmem:[#allocation11 + $0x200] sm:$0xff] }
 0x214   : > { %3031 = vmatmul.bf16.vlgmr.msra.gmra.mxu2 %v2973_v23  ;;  %v3073_v26 = vor.u32 %v3072_v21, %v3069_v2  ;;  %v3179_v27 = vrot.slane %v3177_v22, 4  ;;  %v3469_v24 = vshrl.u32 %v3459_v31, 16  ;;  %v3650_v42 = vunpack.c.l.b16 %v3631_v9 }
 0x215   : > { %3719 = vmatpush.bf16.msra.mxu1 %v5467_v12  ;;  %v3172_v53 = vor.u32 %v3171_v8, %v3168_v16  ;;  %v3461_v43 = vshrl.u32 %v3458_v35, 16  ;;  %v3464_v17 = vshll.u32 %v3458_v35, 16  ;;  %v3363_v46 = vrot.slane %v3361_v38, 1 }
 0x216   : > { %v3074_v32 = vsel %vm2139_vm3, %v3065_v6, %v3073_v26  ;;  %v3180_v33 = vor.u32 %v3179_v27, %v3176_v25  ;;  %v3366_v48 = vshll.u32 %v3357_v36, 16  ;;  %v3561_v52 = vunpack.c.l.b16 %v3542_v7 }
 0x217   : > { %3132 = vmatmul.bf16.vlgmr.msra.gmra.mxu3 %v3074_v32  ;;  %v3359_v47 = vshrl.u32 %v6434_v44, 16  ;;  %v3471_v54 = vrot.slane %v3469_v24, 1  ;;  %v3651_v57 = vpack.c.b16 %v3650_v42, %v3650_v42  ;;  %v3463_v58 = vrot.slane %v3461_v43, 1  ;;  %v5462_v44 = vld [vmem:[#allocation11 + $0x208] sm:$0xff]  ;;  %v5547_v24 = vld [vmem:[#allocation12] ss:$0 sm:$0xff] }
 0x218   : > { %v3181_v41 = vsel %vm1252_vm2, %v3172_v53, %v3180_v33  ;;  %v3466_v18 = vrot.slane %v3464_v17, 2  ;;  %v3474_v59 = vrot.slane %v3472_v45, 2  ;;  %v3562_v49 = vpack.c.b16 %v3354_v55, %v3561_v52  ;;  %v3739_v42 = vld [vmem:[#allocation2 + $0x4] sm:$0xff]  }
 0x219   : > { %3720 = vmatpush.bf16.msra.mxu1 %v5466_v28  ;;  %3239 = vmatmul.bf16.vlgmr.msrb.gmra.mxu0 %v3181_v41  ;;  %v3364_v29 = vor.u32 %v3363_v46, %v3359_v47  ;;  %v3368_v63 = vrot.slane %v3366_v48, 1  ;;  %v3661_v1 = vshrl.u32 %v3651_v57, 16  ;;  %v3664_v61 = vshll.u32 %v3651_v57, 16 }
 0x21a   : > { %v3467_v34 = vor.u32 %v3466_v18, %v3463_v58  ;;  %v3475_v40 = vor.u32 %v3474_v59, %v3471_v54  ;;  %v3653_v62 = vshrl.u32 %v3562_v49, 16  ;;  %v3656_v56 = vshll.u32 %v3562_v49, 16 }
 0x21b   : > { %v3369_v0 = vsel %vm2440_vm4, %v3364_v29, %v3368_v63  ;;  %v3563_v51 = vrot.slane %v3562_v49, 2  ;;  %v3564_v3 = vrot.slane %v3459_v31, 2  ;;  %v3663_v55 = vrot.slane %v3661_v1, 2 }
 0x21c   : > { %v3655_v4 = vrot.slane %v3653_v62, 2  ;;  %v3658_v5 = vrot.slane %v3656_v56, 3  ;;  %v3666_v2 = vrot.slane %v3664_v61, 3  ;;  %v3741_v48 = vunpack.c.l.bf16 %v3739_v42 }
 0x21d   : > { %3721 = vmatpush.bf16.msra.mxu1 %v5465_v15  ;;  %v3565_v10 = vsel %vm567_vm0, %v3563_v51, %v3564_v3  ;;  %v3742_v63 = vunpack.c.h.bf16 %v3739_v42 }
 0x21e   : > { %v3659_v12 = vor.u32 %v3658_v5, %v3655_v4  ;;  %v3667_v13 = vor.u32 %v3666_v2, %v3663_v55 }
 0x220   : > { %3322 = vmatmul.bf16.vlgmr.msrb.gmra.mxu1 %v6430_v39  ;;  %v3476_v39 = vsel %vm842_vm1, %v3467_v34, %v3475_v40  ;;  %v3668_v60 = vsel %vm2139_vm3, %v3659_v12, %v3667_v13 }
 0x221   : > { %3722 = vmatpush.bf16.msra.mxu1 %v5464_v50 }
 0x224   : > { %3427 = vmatmul.bf16.vlgmr.msrb.gmra.mxu2 %v3369_v0 }
 0x225   : > { %3723 = vmatpush.bf16.msra.mxu1 %v5463_v37 }
 0x227   : > { %3534 = vmatmul.bf16.vlgmr.msrb.gmra.mxu3 %v3476_v39 }
 0x229   : > { %3724 = vmatpush.bf16.msra.mxu1 %v5462_v44  ;;  %3623 = vmatmul.bf16.vlgmr.msra.gmra.mxu0 %v3565_v10 }
 0x22d   : > { %3725 = vmatpush.bf16.msra.mxu1 %v5461_v11 }
 0x230   : > { %3726 = vmatmul.bf16.vlgmr.msra.gmra.mxu1 %v3668_v60 }
 0x28d   : > { %v2949_v14 = vpop.f32.mrf.mxu1 }
 0x295   : > { %v2951_v19 = vpop.f32.mrf.mxu1 }
 0x296   : > { %v3240_v20 = vpop.f32.mrf.mxu0 }
 0x297   : > { %v3032_v6 = vpop.f32.mrf.mxu2 }
 0x298   : > { %v3033_v21 = vadd.f32 %v3032_v6, %v2949_v14 }
 0x29a   : > { %v3133_v16 = vpop.f32.mrf.mxu3 }
 0x29b   : > { %v3138_v23 = vadd.f32 %v3133_v16, %v3033_v21 }
 0x29d   : > { %v3323_v22 = vpop.f32.mrf.mxu1  ;;  %v3245_v26 = vadd.f32 %v3240_v20, %v3138_v23 }
 0x29e   : > { %v3242_v25 = vpop.f32.mrf.mxu0 }
 0x29f   : > { %v3034_v8 = vpop.f32.mrf.mxu2  ;;  %v3328_v53 = vadd.f32 %v3323_v22, %v3245_v26 }
 0x2a0   : > { %v3035_v27 = vadd.f32 %v3034_v8, %v2951_v19 }
 0x2a2   : > { %v3135_v28 = vpop.f32.mrf.mxu3 }
 0x2a3   : > { %v3139_v31 = vadd.f32 %v3135_v28, %v3035_v27 }
 0x2a5   : > { %v3325_v30 = vpop.f32.mrf.mxu1  ;;  %v3246_v9 = vadd.f32 %v3242_v25, %v3139_v31 }
 0x2a6   : > { %v3624_v35 = vpop.f32.mrf.mxu0 }
 0x2a7   : > { %v3428_v32 = vpop.f32.mrf.mxu2  ;;  %v3329_v7 = vadd.f32 %v3325_v30, %v3246_v9 }
 0x2a8   : > { %v3433_v33 = vadd.f32 %v3428_v32, %v3328_v53 }
 0x2aa   : > { %v3535_v36 = vpop.f32.mrf.mxu3 }
 0x2ab   : > { %v3540_v38 = vadd.f32 %v3535_v36, %v3433_v33 }
 0x2ad   : > { %v3727_v41 = vpop.f32.mrf.mxu1  ;;  %v3629_v15 = vadd.f32 %v3624_v35, %v3540_v38 }
 0x2ae   : > { %v3626_v54 = vpop.f32.mrf.mxu0 }
 0x2af   : > { %v3732_v43 = vadd.f32 %v3727_v41, %v3629_v15  ;;  %v3430_v17 = vpop.f32.mrf.mxu2 }
 0x2b0   : > { %v3434_v45 = vadd.f32 %v3430_v17, %v3329_v7 }
 0x2b1   : > { %v3737_v46 = vadd.f32 %v5547_v24, %v3732_v43 }
 0x2b2   : > { %v3537_v50 = vpop.f32.mrf.mxu3 }
 0x2b3   : > { %v3743_v52 = vadd.f32 %v3741_v48, %v3737_v46  ;;  %v3541_v47 = vadd.f32 %v3537_v50, %v3434_v45 }
 0x2b5   : > { %v3729_v57 = vpop.f32.mrf.mxu1  ;;  %v3745_v58 = vmax.f32 %v3743_v52, 0.0  ;;  %v3630_v18 = vadd.f32 %v3626_v54, %v3541_v47 }
 0x2b7   : > { %v3747_v59 = vpack.c.bf16 %v3745_v58, %v3745_v58  ;;  %v3733_v49 = vadd.f32 %v3729_v57, %v3630_v18 }
 0x2b9   : > { %3749 = vst [vmem:[#allocation2 + $0x4] sm:$0xf] %v3747_v59  ;;  %v3738_v29 = vadd.f32 %v5547_v24, %v3733_v49 }
 0x2bb   : > { %v3744_v37 = vadd.f32 %v3742_v63, %v3738_v29 }
 0x2bd   : > { %v3746_v1 = vmax.f32 %v3744_v37, 0.0 }
 0x2bf   : > { %v3748_v61 = vpack.c.bf16 %v3746_v1, %v3746_v1 }
 0x2c0   : > { %v3751_v34 = vld [vmem:[#allocation2 + $0x4] sm:$0xc] }
 0x2c1   : > { %3753 = vst.sshfl [vmem:[#allocation1] sm:$0xff pattern:$0x75643120] %v3751_v34 }
 0x2c2   : > { %3750 = vst [vmem:[#allocation2 + $0x8] sm:$0xf] %v3748_v61 }
 0x2c8   : > { %v3755_v40 = vld [vmem:[#allocation1 + $0x1] ss:$2 sm:$0xff] }
 0x2c9   : > { %v3756_v62 = vshrl.u32 %v3755_v40, 16  ;;  %v3759_v56 = vshll.u32 %v3755_v40, 16  ;;  %v3766_v0 = vld [vmem:[#allocation2 + $0x8] sm:$0x3] }
 0x2ca   : > { %v3768_v51 = vrot.slane %v3766_v0, 2 }
 0x2cb   : > { %v3758_v3 = vrot.slane %v3756_v62, 6  ;;  %v3761_v44 = vrot.slane %v3759_v56, 7 }
 0x2cc   : > { %v3772_v55 = vsel %vm3769_vm5, %v3766_v0, %v3768_v51 }
 0x2cd   : > { %v3762_v39 = vor.u32 %v3761_v44, %v3758_v3  ;;  %v3773_v4 = vshrl.u32 %v3772_v55, 16  ;;  %v3776_v10 = vshll.u32 %v3772_v55, 16 }
 0x2cf   : > { %v3763_v5 = vrot.slane %v3762_v39, 2  ;;  %v3775_v2 = vrot.slane %v3773_v4, 7 }
 0x2d1   : > { %3765 = vst [vmem:[%s397_s30] sm:$0x1] %v3763_v5  ;;  %v3778_v11 = vor.u32 %v3776_v10, %v3775_v2 }
 0x2d3   : > { %3780 = vst [vmem:[%s397_s30] sm:$0x2] %v3778_v11 }
 0x2d4 PF: > { %s22_s27 = sadd.s32 1, %s5750_s27  }
 0x2d5   : > { %p19_p7 = scmp.ge.s32.totalorder %s22_s27, 4  }
 0x2d7   :  { %21 = sbr.rel (!%p19_p7) target bundleno = 4 (0x4), region = 127 }
 0x2dc   :  { %3800 = vsyncpa [#allocation5], 1 }
 0x2dd   :  { %3802 = vsyncpa [#allocation5 + $0x1], 1 }
 0x2de   :  { %3803 = vsyncpa [#allocation7], 1 }
 0x2df   :  { %3804 = vsyncpa [#allocation10], 1 }
 0x2e0   :  { %3805 = vsyncpa [#allocation13], 1 }

</bundles_post_ra>
